<compile_context>
chip_gen: v6e
topology: v6e:2x2x1
jax: 0.10.0
libtpu: 0.0.40
codegen_flags: <defaults>
</compile_context>

<pallas_src>
import math
import functools

import jax
import jax.numpy as jnp
from jax import lax
from jax.experimental import pallas as pl
from jax.experimental.pallas import tpu as pltpu

NEG_INF = -1e30


# ------------------------------ in-kernel helpers ------------------------------

def _ln(x, g, b, eps=1e-5):
    """LayerNorm over the last axis, f32 statistics. x: (M, E); g/b: (1, E)."""
    mean = jnp.mean(x, axis=-1, keepdims=True)
    xc = x - mean
    var = jnp.mean(xc * xc, axis=-1, keepdims=True)
    return xc * lax.rsqrt(var + eps) * g + b


def _mha(qb, kb, vb, nhead, mask):
    """Multi-head attention for ONE batch element; heads are the batch dim of a
    single batched dot_general (no per-head accumulation loop).

    qb: (L, E) bf16 (already scaled), kb/vb: (S, E) bf16,
    mask: additive f32 broadcastable to (L, S).
    Returns concatenated head outputs (L, E) f32 (output projection NOT applied).
    """
    L, E = qb.shape
    S = kb.shape[0]
    Dh = E // nhead
    qh = jnp.stack([qb[:, h * Dh:(h + 1) * Dh] for h in range(nhead)], axis=0)  # (H,L,Dh)
    kh = jnp.stack([kb[:, h * Dh:(h + 1) * Dh] for h in range(nhead)], axis=0)  # (H,S,Dh)
    vh = jnp.stack([vb[:, h * Dh:(h + 1) * Dh] for h in range(nhead)], axis=0)  # (H,S,Dh)
    # q @ k^T with heads batched: contract last dims, batch dim 0.
    s = lax.dot_general(qh, kh, (((2,), (2,)), ((0,), (0,))),
                        preferred_element_type=jnp.float32)                     # (H,L,S)
    s = s + mask                                    # additive mask, broadcast once
    smax = jnp.max(s, axis=-1, keepdims=True)
    p = jnp.exp(s - smax)
    denom = jnp.sum(p, axis=-1, keepdims=True)
    inv = pl.reciprocal(denom, approx=True)         # EUP slot, co-issues for free
    o = lax.dot_general(p.astype(jnp.bfloat16), vh, (((2,), (1,)), ((0,), (0,))),
                        preferred_element_type=jnp.float32) * inv               # (H,L,Dh)
    return jnp.concatenate([o[h] for h in range(nhead)], axis=-1)               # (L,E)


# ------------------------------- Pallas kernels --------------------------------

def _enc_layer_kernel(x_ref, kpm_ref,
                      qkv_w_ref, qkv_b_ref, ow_ref, ob_ref,
                      w1_ref, b1_ref, w2_ref, b2_ref,
                      n1g_ref, n1b_ref, n2g_ref, n2b_ref,
                      o_ref, *, nhead, scale):
    Nb, S, E = x_ref.shape
    xb = x_ref[...].reshape(Nb * S, E)                 # (Nb*S, E) bf16 residual stream
    x32 = xb.astype(jnp.float32)

    # QKV projection on the full (Nb*S) row slab.
    qkv = jnp.dot(xb, qkv_w_ref[...],
                  preferred_element_type=jnp.float32) + qkv_b_ref[...]   # (Nb*S, 3E)
    q = (qkv[:, :E] * scale).astype(jnp.bfloat16)       # scale folded into Q once
    k = qkv[:, E:2 * E].astype(jnp.bfloat16)
    v = qkv[:, 2 * E:].astype(jnp.bfloat16)

    parts = []
    for b in range(Nb):                                 # static, small block count
        sl = slice(b * S, (b + 1) * S)
        parts.append(_mha(q[sl], k[sl], v[sl], nhead, kpm_ref[b]))
    attn = parts[0] if Nb == 1 else jnp.concatenate(parts, axis=0)       # (Nb*S, E)

    # Single output projection over the full row slab.
    attn = jnp.dot(attn.astype(jnp.bfloat16), ow_ref[...],
                   preferred_element_type=jnp.float32) + ob_ref[...]
    y = _ln(x32 + attn, n1g_ref[...], n1b_ref[...])

    h = jnp.dot(y.astype(jnp.bfloat16), w1_ref[...],
                preferred_element_type=jnp.float32) + b1_ref[...]
    h = jnp.maximum(h, 0.0)
    ff = jnp.dot(h.astype(jnp.bfloat16), w2_ref[...],
                 preferred_element_type=jnp.float32) + b2_ref[...]

    out = _ln(y + ff, n2g_ref[...], n2b_ref[...])
    o_ref[...] = out.reshape(Nb, S, E).astype(o_ref.dtype)


def _dec_layer_kernel(t_ref, m_ref, causal_ref, tkpm_ref, mkpm_ref,
                      sa_qkv_w_ref, sa_qkv_b_ref, sa_ow_ref, sa_ob_ref,
                      ca_qw_ref, ca_qb_ref, ca_kvw_ref, ca_kvb_ref, ca_ow_ref, ca_ob_ref,
                      w1_ref, b1_ref, w2_ref, b2_ref,
                      n1g_ref, n1b_ref, n2g_ref, n2b_ref, n3g_ref, n3b_ref,
                      o_ref, *, nhead, scale):
    Nb, T, E = t_ref.shape
    S = m_ref.shape[1]
    tb = t_ref[...].reshape(Nb * T, E)                 # bf16
    mb = m_ref[...].reshape(Nb * S, E)                 # bf16
    t32 = tb.astype(jnp.float32)
    causal = causal_ref[...]                           # (T, T) additive f32

    # --- self-attention (causal + tgt key-padding) ---
    qkv = jnp.dot(tb, sa_qkv_w_ref[...],
                  preferred_element_type=jnp.float32) + sa_qkv_b_ref[...]
    q = (qkv[:, :E] * scale).astype(jnp.bfloat16)
    k = qkv[:, E:2 * E].astype(jnp.bfloat16)
    v = qkv[:, 2 * E:].astype(jnp.bfloat16)
    parts = []
    for b in range(Nb):
        sl = slice(b * T, (b + 1) * T)
        sa_mask = causal + tkpm_ref[b]                 # (T, T), built once per element
        parts.append(_mha(q[sl], k[sl], v[sl], nhead, sa_mask))
    sa = parts[0] if Nb == 1 else jnp.concatenate(parts, axis=0)
    sa = jnp.dot(sa.astype(jnp.bfloat16), sa_ow_ref[...],
                 preferred_element_type=jnp.float32) + sa_ob_ref[...]
    x = _ln(t32 + sa, n1g_ref[...], n1b_ref[...])

    # --- cross-attention (memory key-padding) ---
    qc = jnp.dot(x.astype(jnp.bfloat16), ca_qw_ref[...],
                 preferred_element_type=jnp.float32) + ca_qb_ref[...]
    qc = (qc * scale).astype(jnp.bfloat16)
    kv = jnp.dot(mb, ca_kvw_ref[...],
                 preferred_element_type=jnp.float32) + ca_kvb_ref[...]
    kc = kv[:, :E].astype(jnp.bfloat16)
    vc = kv[:, E:].astype(jnp.bfloat16)
    parts = []
    for b in range(Nb):
        slq = slice(b * T, (b + 1) * T)
        slk = slice(b * S, (b + 1) * S)
        parts.append(_mha(qc[slq], kc[slk], vc[slk], nhead, mkpm_ref[b]))
    ca = parts[0] if Nb == 1 else jnp.concatenate(parts, axis=0)
    ca = jnp.dot(ca.astype(jnp.bfloat16), ca_ow_ref[...],
                 preferred_element_type=jnp.float32) + ca_ob_ref[...]
    y = _ln(x + ca, n2g_ref[...], n2b_ref[...])

    # --- FFN ---
    h = jnp.dot(y.astype(jnp.bfloat16), w1_ref[...],
                preferred_element_type=jnp.float32) + b1_ref[...]
    h = jnp.maximum(h, 0.0)
    ff = jnp.dot(h.astype(jnp.bfloat16), w2_ref[...],
                 preferred_element_type=jnp.float32) + b2_ref[...]

    out = _ln(y + ff, n3g_ref[...], n3b_ref[...])
    o_ref[...] = out.reshape(Nb, T, E).astype(o_ref.dtype)


def _ln_kernel(x_ref, g_ref, b_ref, o_ref):
    o_ref[...] = _ln(x_ref[...].astype(jnp.float32),
                     g_ref[...], b_ref[...]).astype(o_ref.dtype)


def _norm_proj_kernel(x_ref, g_ref, b_ref, w_ref, ob_ref, o_ref):
    y = _ln(x_ref[...].astype(jnp.float32), g_ref[...], b_ref[...])
    o_ref[...] = (jnp.dot(y.astype(jnp.bfloat16), w_ref[...],
                          preferred_element_type=jnp.float32) + ob_ref[...]
                  ).astype(o_ref.dtype)


# ------------------------------ pallas_call wrappers ----------------------------

def _shared_spec(shape):
    """Full-array block, same block for every step of a 1-D grid (weights, masks)."""
    zeros = (0,) * len(shape)
    return pl.BlockSpec(shape, lambda b, _z=zeros: _z)


def _pick_nb(n, rows_per_elem, target_rows=256):
    """Largest divisor of n whose block keeps <= target_rows matmul rows per step."""
    best = 1
    for d in range(1, n + 1):
        if n % d == 0 and (d == 1 or d * rows_per_elem <= target_rows):
            best = d
    return best


def _pick_tile(n, target):
    if n <= target:
        return n
    best = 1
    for d in range(1, target + 1):
        if n % d == 0:
            best = d
    return best


def _vmem_limit(weight_list, act_f32_elems):
    """Explicit scoped-VMEM request: 2x (double-buffered) weights + activation slack,
    clamped to [16 MiB, 64 MiB] so it is valid on v5e/v6e/v7x."""
    w_bytes = sum(int(w.size) * w.dtype.itemsize for w in weight_list)
    est = 2 * w_bytes + 6 * int(act_f32_elems) * 4 + (2 << 20)
    return int(min(64 << 20, max(est, 16 << 20)))


def encoder_layer(x_b, kpm3, p, nhead, nb):
    """x_b: (N, S, E) bf16; kpm3: (N, 1, S) additive f32."""
    N, S, E = x_b.shape
    H = p["w1"].shape[1]
    scale = 1.0 / math.sqrt(E // nhead)
    weights = [p["qkv_w"], p["qkv_b"], p["o_w"], p["o_b"],
               p["w1"], p["b1"], p["w2"], p["b2"],
               p["n1g"], p["n1b"], p["n2g"], p["n2b"]]
    act = nb * S * (3 * E + 4 * E + H) + nb * nhead * S * S * 2
    in_specs = [pl.BlockSpec((nb, S, E), lambda b: (b, 0, 0)),
                pl.BlockSpec((nb, 1, S), lambda b: (b, 0, 0))]
    in_specs += [_shared_spec(w.shape) for w in weights]
    return pl.pallas_call(
        functools.partial(_enc_layer_kernel, nhead=nhead, scale=scale),
        out_shape=jax.ShapeDtypeStruct((N, S, E), jnp.bfloat16),
        grid=(N // nb,),
        in_specs=in_specs,
        out_specs=pl.BlockSpec((nb, S, E), lambda b: (b, 0, 0)),
        compiler_params=pltpu.CompilerParams(
            dimension_semantics=("parallel",),
            vmem_limit_bytes=_vmem_limit(weights, act)),
    )(x_b, kpm3, *weights)


def decoder_layer(t_b, m_b, causal, tkpm3, mkpm3, p, nhead, nb):
    """t_b: (N, T, E) bf16, m_b: (N, S, E) bf16, causal: (T, T),
    tkpm3: (N,1,T), mkpm3: (N,1,S) additive f32."""
    N, T, E = t_b.shape
    S = m_b.shape[1]
    H = p["w1"].shape[1]
    scale = 1.0 / math.sqrt(E // nhead)
    weights = [p["sa_qkv_w"], p["sa_qkv_b"], p["sa_o_w"], p["sa_o_b"],
               p["ca_q_w"], p["ca_q_b"], p["ca_kv_w"], p["ca_kv_b"],
               p["ca_o_w"], p["ca_o_b"],
               p["w1"], p["b1"], p["w2"], p["b2"],
               p["n1g"], p["n1b"], p["n2g"], p["n2b"], p["n3g"], p["n3b"]]
    act = nb * (T * (3 * E + 6 * E + H) + S * 3 * E) + nb * nhead * T * (T + S) * 2
    in_specs = [pl.BlockSpec((nb, T, E), lambda b: (b, 0, 0)),
                pl.BlockSpec((nb, S, E), lambda b: (b, 0, 0)),
                _shared_spec((T, T)),
                pl.BlockSpec((nb, 1, T), lambda b: (b, 0, 0)),
                pl.BlockSpec((nb, 1, S), lambda b: (b, 0, 0))]
    in_specs += [_shared_spec(w.shape) for w in weights]
    return pl.pallas_call(
        functools.partial(_dec_layer_kernel, nhead=nhead, scale=scale),
        out_shape=jax.ShapeDtypeStruct((N, T, E), jnp.bfloat16),
        grid=(N // nb,),
        in_specs=in_specs,
        out_specs=pl.BlockSpec((nb, T, E), lambda b: (b, 0, 0)),
        compiler_params=pltpu.CompilerParams(
            dimension_semantics=("parallel",),
            vmem_limit_bytes=_vmem_limit(weights, act)),
    )(t_b, m_b, causal, tkpm3, mkpm3, *weights)


def layer_norm_2d(x2d, g, b, out_dtype, *, row_tile=512):
    M, E = x2d.shape
    tm = _pick_tile(M, row_tile)
    return pl.pallas_call(
        _ln_kernel,
        out_shape=jax.ShapeDtypeStruct((M, E), out_dtype),
        grid=(M // tm,),
        in_specs=[pl.BlockSpec((tm, E), lambda i: (i, 0)),
                  pl.BlockSpec((1, E), lambda i: (0, 0)),
                  pl.BlockSpec((1, E), lambda i: (0, 0))],
        out_specs=pl.BlockSpec((tm, E), lambda i: (i, 0)),
        compiler_params=pltpu.CompilerParams(dimension_semantics=("parallel",)),
    )(x2d, g, b)


def norm_and_project(x2d, g, b, w, ob, *, row_tile=256, col_tile=1024):
    """Final LayerNorm + vocab projection, tiled over rows and vocab columns."""
    M, E = x2d.shape
    V = w.shape[1]
    tm = _pick_tile(M, row_tile)
    tv = _pick_tile(V, col_tile)
    act = tm * (E + tv)
    return pl.pallas_call(
        _norm_proj_kernel,
        out_shape=jax.ShapeDtypeStruct((M, V), jnp.float32),
        grid=(M // tm, V // tv),
        in_specs=[pl.BlockSpec((tm, E), lambda i, j: (i, 0)),
                  pl.BlockSpec((1, E), lambda i, j: (0, 0)),
                  pl.BlockSpec((1, E), lambda i, j: (0, 0)),
                  pl.BlockSpec((E, tv), lambda i, j: (0, j)),
                  pl.BlockSpec((1, tv), lambda i, j: (0, j))],
        out_specs=pl.BlockSpec((tm, tv), lambda i, j: (i, j)),
        compiler_params=pltpu.CompilerParams(
            dimension_semantics=("parallel", "parallel"),
            vmem_limit_bytes=_vmem_limit([w, ob], act)),
    )(x2d, g, b, w, ob)


# ------------------------------- mask helpers -----------------------------------

def get_padding_mask(tgt_ids):
    """tgt_ids: (T, N) ints -> (N, T) additive float mask (pad token id == 1)."""
    return jnp.where((tgt_ids == 1).T, NEG_INF, 0.0).astype(jnp.float32)


def get_subsequent_mask(seq_len):
    """(T, T) additive causal mask (finite large negative instead of -inf)."""
    tri = jnp.triu(jnp.ones((seq_len, seq_len), jnp.float32), k=1)
    return jnp.where(tri > 0.0, NEG_INF, 0.0).astype(jnp.float32)


# ------------------------------- full forward -----------------------------------

def transformer_forward(params, x, tgt_ids, src_padding_mask, *, nhead):
    d_model = params["embedding"].shape[1]
    S, N, E = x.shape
    T = tgt_ids.shape[0]

    # additive masks, clamped to a finite large negative (avoids NaN on fully-masked rows)
    src_kpm = jnp.maximum(src_padding_mask.astype(jnp.float32), NEG_INF)   # (N, S)
    tgt_kpm = get_padding_mask(tgt_ids)                                    # (N, T)
    causal = get_subsequent_mask(T)                                        # (T, T)
    src_kpm3 = src_kpm[:, None, :]                                         # (N, 1, S)
    tgt_kpm3 = tgt_kpm[:, None, :]                                         # (N, 1, T)

    # src path: scale + positional encoding, batch-major (N, S, E), bf16 residual stream
    xs = x * math.sqrt(d_model) + params["pe"][:S]
    xs = jnp.transpose(xs, (1, 0, 2)).astype(jnp.bfloat16)
    # tgt path: embedding gather + scale + positional encoding, batch-major (N, T, E)
    tg = jnp.take(params["embedding"], tgt_ids, axis=0) * math.sqrt(d_model) + params["pe"][:T]
    tg = jnp.transpose(tg, (1, 0, 2)).astype(jnp.bfloat16)

    nb_e = _pick_nb(N, S)
    nb_d = _pick_nb(N, max(S, T))

    mem = xs
    for lp in params["enc_layers"]:
        mem = encoder_layer(mem, src_kpm3, lp, nhead, nb_e)
    mem = layer_norm_2d(mem.reshape(N * S, E),
                        params["enc_norm_g"], params["enc_norm_b"],
                        jnp.bfloat16).reshape(N, S, E)

    out = tg
    for lp in params["dec_layers"]:
        out = decoder_layer(out, mem, causal, tgt_kpm3, src_kpm3, lp, nhead, nb_d)

    logits = norm_and_project(out.reshape(N * T, E),
                              params["dec_norm_g"], params["dec_norm_b"],
                              params["out_w"], params["out_b"])            # (N*T, V)
    V = logits.shape[-1]
    return jnp.transpose(logits.reshape(N, T, V), (1, 0, 2))               # (T, N, V)


# ------------------------------ parameter init -----------------------------------

def init_params(key, vocab, d_model, nhead, nlayer, nhid, max_len=64):
    scale = 0.05
    keys = iter(jax.random.split(key, 512))

    def w(shape):
        return jax.random.normal(next(keys), shape, jnp.float32) * scale

    def attn_packed(E):
        wq, wk, wv = w((E, E)), w((E, E)), w((E, E))
        return {"qkv_w": jnp.concatenate([wq, wk, wv], axis=1).astype(jnp.bfloat16),
                "qkv_b": jnp.zeros((1, 3 * E), jnp.float32),
                "o_w": w((E, E)).astype(jnp.bfloat16),
                "o_b": jnp.zeros((1, E), jnp.float32)}

    def enc_layer_p(E, H):
        a = attn_packed(E)
        return {"qkv_w": a["qkv_w"], "qkv_b": a["qkv_b"], "o_w": a["o_w"], "o_b": a["o_b"],
                "w1": w((E, H)).astype(jnp.bfloat16), "b1": jnp.zeros((1, H), jnp.float32),
                "w2": w((H, E)).astype(jnp.bfloat16), "b2": jnp.zeros((1, E), jnp.float32),
                "n1g": jnp.ones((1, E), jnp.float32), "n1b": jnp.zeros((1, E), jnp.float32),
                "n2g": jnp.ones((1, E), jnp.float32), "n2b": jnp.zeros((1, E), jnp.float32)}

    def dec_layer_p(E, H):
        sa = attn_packed(E)
        wq, wk, wv = w((E, E)), w((E, E)), w((E, E))
        return {"sa_qkv_w": sa["qkv_w"], "sa_qkv_b": sa["qkv_b"],
                "sa_o_w": sa["o_w"], "sa_o_b": sa["o_b"],
                "ca_q_w": wq.astype(jnp.bfloat16), "ca_q_b": jnp.zeros((1, E), jnp.float32),
                "ca_kv_w": jnp.concatenate([wk, wv], axis=1).astype(jnp.bfloat16),
                "ca_kv_b": jnp.zeros((1, 2 * E), jnp.float32),
                "ca_o_w": w((E, E)).astype(jnp.bfloat16), "ca_o_b": jnp.zeros((1, E), jnp.float32),
                "w1": w((E, H)).astype(jnp.bfloat16), "b1": jnp.zeros((1, H), jnp.float32),
                "w2": w((H, E)).astype(jnp.bfloat16), "b2": jnp.zeros((1, E), jnp.float32),
                "n1g": jnp.ones((1, E), jnp.float32), "n1b": jnp.zeros((1, E), jnp.float32),
                "n2g": jnp.ones((1, E), jnp.float32), "n2b": jnp.zeros((1, E), jnp.float32),
                "n3g": jnp.ones((1, E), jnp.float32), "n3b": jnp.zeros((1, E), jnp.float32)}

    # sinusoidal positional encoding (max_len, 1, d_model)
    pos = jnp.arange(max_len, dtype=jnp.float32)[:, None]
    div = jnp.exp(-jnp.arange(0, d_model, 2, dtype=jnp.float32) * math.log(10000.0) / d_model)
    pe = jnp.zeros((max_len, d_model), jnp.float32)
    pe = pe.at[:, 0::2].set(jnp.sin(pos * div))
    pe = pe.at[:, 1::2].set(jnp.cos(pos * div))
    pe = pe[:, None, :]

    return {
        "embedding": w((vocab, d_model)),
        "pe": pe,
        "enc_layers": [enc_layer_p(d_model, nhid) for _ in range(nlayer)],
        "dec_layers": [dec_layer_p(d_model, nhid) for _ in range(nlayer)],
        "enc_norm_g": jnp.ones((1, d_model), jnp.float32),
        "enc_norm_b": jnp.zeros((1, d_model), jnp.float32),
        "dec_norm_g": jnp.ones((1, d_model), jnp.float32),
        "dec_norm_b": jnp.zeros((1, d_model), jnp.float32),
        "out_w": w((d_model, vocab)).astype(jnp.bfloat16),
        "out_b": jnp.zeros((1, vocab), jnp.float32),
    }


# ----------------------------------- main -----------------------------------------

if __name__ == "__main__":
    # lane-dense small config: d_model / vocab are multiples of 128
    vocab, d_model, nhead, nlayer, nhid = 128, 128, 4, 2, 256
    S, T, N = 8, 8, 2

    key = jax.random.PRNGKey(0)
    kp, kx, kt = jax.random.split(key, 3)

    params = init_params(kp, vocab, d_model, nhead, nlayer, nhid)

    # src features (already embedded, like the PyTorch module's `x` input)
    x = jax.random.normal(kx, (S, N, d_model), jnp.float32)
    # tgt token ids in [2, vocab) so pad-id 1 doesn't fully mask any row; one pad at the end
    tgt_ids = jax.random.randint(kt, (T, N), 2, vocab).astype(jnp.int32)
    tgt_ids = tgt_ids.at[T - 1, 1].set(1)
    # src key-padding mask (N, S): additive 0 / -inf (clamped to finite inside the model)
    src_padding_mask = jnp.zeros((N, S), jnp.float32).at[1, S - 1].set(-jnp.inf)

    fwd = jax.jit(functools.partial(transformer_forward, nhead=nhead))
    logits = fwd(params, x, tgt_ids, src_padding_mask)
    jax.block_until_ready(logits)

    assert logits.shape == (T, N, vocab)
    assert bool(jnp.all(jnp.isfinite(logits)))
    print("KERNEL_OK")
</pallas_src>

<mosaic_0001>
module attributes {stable_mosaic.version = 11 : i64} {
  func.func @_dec_layer_kernel(%arg0: i32, %arg1: memref<2x8x128xbf16, #tpu.memory_space<vmem>>, %arg2: memref<2x8x128xbf16, #tpu.memory_space<vmem>>, %arg3: memref<8x8xf32, #tpu.memory_space<vmem>>, %arg4: memref<2x1x8xf32, #tpu.memory_space<vmem>>, %arg5: memref<2x1x8xf32, #tpu.memory_space<vmem>>, %arg6: memref<128x384xbf16, #tpu.memory_space<vmem>>, %arg7: memref<1x384xf32, #tpu.memory_space<vmem>>, %arg8: memref<128x128xbf16, #tpu.memory_space<vmem>>, %arg9: memref<1x128xf32, #tpu.memory_space<vmem>>, %arg10: memref<128x128xbf16, #tpu.memory_space<vmem>>, %arg11: memref<1x128xf32, #tpu.memory_space<vmem>>, %arg12: memref<128x256xbf16, #tpu.memory_space<vmem>>, %arg13: memref<1x256xf32, #tpu.memory_space<vmem>>, %arg14: memref<128x128xbf16, #tpu.memory_space<vmem>>, %arg15: memref<1x128xf32, #tpu.memory_space<vmem>>, %arg16: memref<128x256xbf16, #tpu.memory_space<vmem>>, %arg17: memref<1x256xf32, #tpu.memory_space<vmem>>, %arg18: memref<256x128xbf16, #tpu.memory_space<vmem>>, %arg19: memref<1x128xf32, #tpu.memory_space<vmem>>, %arg20: memref<1x128xf32, #tpu.memory_space<vmem>>, %arg21: memref<1x128xf32, #tpu.memory_space<vmem>>, %arg22: memref<1x128xf32, #tpu.memory_space<vmem>>, %arg23: memref<1x128xf32, #tpu.memory_space<vmem>>, %arg24: memref<1x128xf32, #tpu.memory_space<vmem>>, %arg25: memref<1x128xf32, #tpu.memory_space<vmem>>, %arg26: memref<2x8x128xbf16, #tpu.memory_space<vmem>>) attributes {dimension_semantics = [#tpu.dimension_semantics<parallel>], iteration_bounds = array<i64: 1>, scalar_prefetch = 0 : i64, scratch_operands = 0 : i64, tpu.core_type = #tpu.core_type<tc>, window_params = [{transform_indices = @transform_0, window_bounds = array<i64: 2, 8, 128>}, {transform_indices = @transform_1, window_bounds = array<i64: 2, 8, 128>}, {pipeline_mode = #tpu.pipeline_mode<synchronous>, transform_indices = @transform_2, window_bounds = array<i64: 8, 8>}, {transform_indices = @transform_3, window_bounds = array<i64: 2, 1, 8>}, {transform_indices = @transform_4, window_bounds = array<i64: 2, 1, 8>}, {pipeline_mode = #tpu.pipeline_mode<synchronous>, transform_indices = @transform_5, window_bounds = array<i64: 128, 384>}, {pipeline_mode = #tpu.pipeline_mode<synchronous>, transform_indices = @transform_6, window_bounds = array<i64: 1, 384>}, {pipeline_mode = #tpu.pipeline_mode<synchronous>, transform_indices = @transform_7, window_bounds = array<i64: 128, 128>}, {pipeline_mode = #tpu.pipeline_mode<synchronous>, transform_indices = @transform_8, window_bounds = array<i64: 1, 128>}, {pipeline_mode = #tpu.pipeline_mode<synchronous>, transform_indices = @transform_9, window_bounds = array<i64: 128, 128>}, {pipeline_mode = #tpu.pipeline_mode<synchronous>, transform_indices = @transform_10, window_bounds = array<i64: 1, 128>}, {pipeline_mode = #tpu.pipeline_mode<synchronous>, transform_indices = @transform_11, window_bounds = array<i64: 128, 256>}, {pipeline_mode = #tpu.pipeline_mode<synchronous>, transform_indices = @transform_12, window_bounds = array<i64: 1, 256>}, {pipeline_mode = #tpu.pipeline_mode<synchronous>, transform_indices = @transform_13, window_bounds = array<i64: 128, 128>}, {pipeline_mode = #tpu.pipeline_mode<synchronous>, transform_indices = @transform_14, window_bounds = array<i64: 1, 128>}, {pipeline_mode = #tpu.pipeline_mode<synchronous>, transform_indices = @transform_15, window_bounds = array<i64: 128, 256>}, {pipeline_mode = #tpu.pipeline_mode<synchronous>, transform_indices = @transform_16, window_bounds = array<i64: 1, 256>}, {pipeline_mode = #tpu.pipeline_mode<synchronous>, transform_indices = @transform_17, window_bounds = array<i64: 256, 128>}, {pipeline_mode = #tpu.pipeline_mode<synchronous>, transform_indices = @transform_18, window_bounds = array<i64: 1, 128>}, {pipeline_mode = #tpu.pipeline_mode<synchronous>, transform_indices = @transform_19, window_bounds = array<i64: 1, 128>}, {pipeline_mode = #tpu.pipeline_mode<synchronous>, transform_indices = @transform_20, window_bounds = array<i64: 1, 128>}, {pipeline_mode = #tpu.pipeline_mode<synchronous>, transform_indices = @transform_21, window_bounds = array<i64: 1, 128>}, {pipeline_mode = #tpu.pipeline_mode<synchronous>, transform_indices = @transform_22, window_bounds = array<i64: 1, 128>}, {pipeline_mode = #tpu.pipeline_mode<synchronous>, transform_indices = @transform_23, window_bounds = array<i64: 1, 128>}, {pipeline_mode = #tpu.pipeline_mode<synchronous>, transform_indices = @transform_24, window_bounds = array<i64: 1, 128>}, {transform_indices = @transform_25, window_bounds = array<i64: 2, 8, 128>}]} {
    %c0 = arith.constant 0 : index
    %c0_0 = arith.constant 0 : index
    %c0_1 = arith.constant 0 : index
    %0 = vector.load %arg1[%c0, %c0_0, %c0_1] : memref<2x8x128xbf16, #tpu.memory_space<vmem>>, vector<2x8x128xbf16>
    %1 = vector.shape_cast %0 : vector<2x8x128xbf16> to vector<16x128xbf16>
    %c0_2 = arith.constant 0 : index
    %c0_3 = arith.constant 0 : index
    %c0_4 = arith.constant 0 : index
    %2 = vector.load %arg2[%c0_2, %c0_3, %c0_4] : memref<2x8x128xbf16, #tpu.memory_space<vmem>>, vector<2x8x128xbf16>
    %3 = vector.shape_cast %2 : vector<2x8x128xbf16> to vector<16x128xbf16>
    %4 = arith.extf %1 : vector<16x128xbf16> to vector<16x128xf32>
    %c0_5 = arith.constant 0 : index
    %c0_6 = arith.constant 0 : index
    %5 = vector.load %arg3[%c0_5, %c0_6] : memref<8x8xf32, #tpu.memory_space<vmem>>, vector<8x8xf32>
    %c0_7 = arith.constant 0 : index
    %c0_8 = arith.constant 0 : index
    %6 = vector.load %arg6[%c0_7, %c0_8] : memref<128x384xbf16, #tpu.memory_space<vmem>>, vector<128x384xbf16>
    %cst = arith.constant dense<0.000000e+00> : vector<16x384xf32>
    %7 = tpu.matmul %1, %6, %cst {dimension_numbers = #tpu.dot_dimension_numbers<[1], [0], [0], [1], [0, 0, 1, 1], [], []>} : vector<16x128xbf16>, vector<128x384xbf16>, vector<16x384xf32> -> vector<16x384xf32>
    %c0_9 = arith.constant 0 : index
    %c0_10 = arith.constant 0 : index
    %8 = vector.load %arg7[%c0_9, %c0_10] : memref<1x384xf32, #tpu.memory_space<vmem>>, vector<1x384xf32>
    %9 = vector.broadcast %8 : vector<1x384xf32> to vector<16x384xf32>
    %10 = arith.addf %7, %9 : vector<16x384xf32>
    %11 = vector.extract_strided_slice %10 {offsets = [0, 0], sizes = [16, 128], strides = [1, 1]} : vector<16x384xf32> to vector<16x128xf32>
    %cst_11 = arith.constant 0.176776692 : f32
    %12 = vector.broadcast %cst_11 : f32 to vector<16x128xf32>
    %13 = arith.mulf %11, %12 : vector<16x128xf32>
    %14 = arith.truncf %13 : vector<16x128xf32> to vector<16x128xbf16>
    %15 = vector.extract_strided_slice %10 {offsets = [0, 128], sizes = [16, 128], strides = [1, 1]} : vector<16x384xf32> to vector<16x128xf32>
    %16 = arith.truncf %15 : vector<16x128xf32> to vector<16x128xbf16>
    %17 = vector.extract_strided_slice %10 {offsets = [0, 256], sizes = [16, 128], strides = [1, 1]} : vector<16x384xf32> to vector<16x128xf32>
    %18 = arith.truncf %17 : vector<16x128xf32> to vector<16x128xbf16>
    %c0_12 = arith.constant 0 : index
    %c0_13 = arith.constant 0 : index
    %c0_14 = arith.constant 0 : index
    %19 = vector.load %arg4[%c0_12, %c0_13, %c0_14] : memref<2x1x8xf32, #tpu.memory_space<vmem>>, vector<1x1x8xf32>
    %20 = vector.shape_cast %19 : vector<1x1x8xf32> to vector<1x8xf32>
    %21 = vector.broadcast %20 : vector<1x8xf32> to vector<8x8xf32>
    %22 = arith.addf %5, %21 : vector<8x8xf32>
    %23 = vector.extract_strided_slice %14 {offsets = [0, 0], sizes = [8, 128], strides = [1, 1]} : vector<16x128xbf16> to vector<8x128xbf16>
    %24 = vector.extract_strided_slice %16 {offsets = [0, 0], sizes = [8, 128], strides = [1, 1]} : vector<16x128xbf16> to vector<8x128xbf16>
    %25 = vector.extract_strided_slice %18 {offsets = [0, 0], sizes = [8, 128], strides = [1, 1]} : vector<16x128xbf16> to vector<8x128xbf16>
    %26 = vector.extract_strided_slice %23 {offsets = [0, 0], sizes = [8, 32], strides = [1, 1]} : vector<8x128xbf16> to vector<8x32xbf16>
    %27 = vector.extract_strided_slice %23 {offsets = [0, 32], sizes = [8, 32], strides = [1, 1]} : vector<8x128xbf16> to vector<8x32xbf16>
    %28 = vector.extract_strided_slice %23 {offsets = [0, 64], sizes = [8, 32], strides = [1, 1]} : vector<8x128xbf16> to vector<8x32xbf16>
    %29 = vector.extract_strided_slice %23 {offsets = [0, 96], sizes = [8, 32], strides = [1, 1]} : vector<8x128xbf16> to vector<8x32xbf16>
    %30 = vector.shape_cast %26 : vector<8x32xbf16> to vector<1x8x32xbf16>
    %31 = vector.shape_cast %27 : vector<8x32xbf16> to vector<1x8x32xbf16>
    %32 = vector.shape_cast %28 : vector<8x32xbf16> to vector<1x8x32xbf16>
    %33 = vector.shape_cast %29 : vector<8x32xbf16> to vector<1x8x32xbf16>
    %34 = tpu.concatenate %30, %31, %32, %33 in 0 : vector<1x8x32xbf16>, vector<1x8x32xbf16>, vector<1x8x32xbf16>, vector<1x8x32xbf16> -> vector<4x8x32xbf16>
    %35 = vector.extract_strided_slice %24 {offsets = [0, 0], sizes = [8, 32], strides = [1, 1]} : vector<8x128xbf16> to vector<8x32xbf16>
    %36 = vector.extract_strided_slice %24 {offsets = [0, 32], sizes = [8, 32], strides = [1, 1]} : vector<8x128xbf16> to vector<8x32xbf16>
    %37 = vector.extract_strided_slice %24 {offsets = [0, 64], sizes = [8, 32], strides = [1, 1]} : vector<8x128xbf16> to vector<8x32xbf16>
    %38 = vector.extract_strided_slice %24 {offsets = [0, 96], sizes = [8, 32], strides = [1, 1]} : vector<8x128xbf16> to vector<8x32xbf16>
    %39 = vector.shape_cast %35 : vector<8x32xbf16> to vector<1x8x32xbf16>
    %40 = vector.shape_cast %36 : vector<8x32xbf16> to vector<1x8x32xbf16>
    %41 = vector.shape_cast %37 : vector<8x32xbf16> to vector<1x8x32xbf16>
    %42 = vector.shape_cast %38 : vector<8x32xbf16> to vector<1x8x32xbf16>
    %43 = tpu.concatenate %39, %40, %41, %42 in 0 : vector<1x8x32xbf16>, vector<1x8x32xbf16>, vector<1x8x32xbf16>, vector<1x8x32xbf16> -> vector<4x8x32xbf16>
    %44 = vector.extract_strided_slice %25 {offsets = [0, 0], sizes = [8, 32], strides = [1, 1]} : vector<8x128xbf16> to vector<8x32xbf16>
    %45 = vector.extract_strided_slice %25 {offsets = [0, 32], sizes = [8, 32], strides = [1, 1]} : vector<8x128xbf16> to vector<8x32xbf16>
    %46 = vector.extract_strided_slice %25 {offsets = [0, 64], sizes = [8, 32], strides = [1, 1]} : vector<8x128xbf16> to vector<8x32xbf16>
    %47 = vector.extract_strided_slice %25 {offsets = [0, 96], sizes = [8, 32], strides = [1, 1]} : vector<8x128xbf16> to vector<8x32xbf16>
    %48 = vector.shape_cast %44 : vector<8x32xbf16> to vector<1x8x32xbf16>
    %49 = vector.shape_cast %45 : vector<8x32xbf16> to vector<1x8x32xbf16>
    %50 = vector.shape_cast %46 : vector<8x32xbf16> to vector<1x8x32xbf16>
    %51 = vector.shape_cast %47 : vector<8x32xbf16> to vector<1x8x32xbf16>
    %52 = tpu.concatenate %48, %49, %50, %51 in 0 : vector<1x8x32xbf16>, vector<1x8x32xbf16>, vector<1x8x32xbf16>, vector<1x8x32xbf16> -> vector<4x8x32xbf16>
    %cst_15 = arith.constant dense<0.000000e+00> : vector<4x8x8xf32>
    %53 = tpu.matmul %34, %43, %cst_15 {dimension_numbers = #tpu.dot_dimension_numbers<[2], [2], [1], [1], [0, 0, 0, 1, 1, 1], [0], [0]>} : vector<4x8x32xbf16>, vector<4x8x32xbf16>, vector<4x8x8xf32> -> vector<4x8x8xf32>
    %54 = vector.shape_cast %22 : vector<8x8xf32> to vector<1x8x8xf32>
    %55 = vector.broadcast %54 : vector<1x8x8xf32> to vector<4x8x8xf32>
    %56 = arith.addf %53, %55 : vector<4x8x8xf32>
    %cst_16 = arith.constant dense<0xFF800000> : vector<4x8xf32>
    %57 = vector.multi_reduction <maximumf>, %56, %cst_16 [2] : vector<4x8x8xf32> to vector<4x8xf32>
    %58 = vector.shape_cast %57 : vector<4x8xf32> to vector<4x8x1xf32>
    %59 = vector.broadcast %58 : vector<4x8x1xf32> to vector<4x8x8xf32>
    %60 = arith.subf %56, %59 : vector<4x8x8xf32>
    %61 = math.exp %60 : vector<4x8x8xf32>
    %cst_17 = arith.constant dense<0.000000e+00> : vector<4x8xf32>
    %62 = vector.multi_reduction <add>, %61, %cst_17 [2] : vector<4x8x8xf32> to vector<4x8xf32>
    %63 = vector.shape_cast %62 : vector<4x8xf32> to vector<4x8x1xf32>
    %64 = tpu.reciprocal %63 {approx = true} : vector<4x8x1xf32> -> vector<4x8x1xf32>
    %65 = arith.truncf %61 : vector<4x8x8xf32> to vector<4x8x8xbf16>
    %cst_18 = arith.constant dense<0.000000e+00> : vector<4x8x32xf32>
    %66 = tpu.matmul %65, %52, %cst_18 {dimension_numbers = #tpu.dot_dimension_numbers<[2], [1], [1], [2], [0, 0, 0, 1, 1, 2], [0], [0]>} : vector<4x8x8xbf16>, vector<4x8x32xbf16>, vector<4x8x32xf32> -> vector<4x8x32xf32>
    %67 = vector.broadcast %64 : vector<4x8x1xf32> to vector<4x8x32xf32>
    %68 = arith.mulf %66, %67 : vector<4x8x32xf32>
    %69 = vector.extract_strided_slice %68 {offsets = [0, 0, 0], sizes = [1, 8, 32], strides = [1, 1, 1]} : vector<4x8x32xf32> to vector<1x8x32xf32>
    %70 = vector.shape_cast %69 : vector<1x8x32xf32> to vector<8x32xf32>
    %71 = vector.extract_strided_slice %68 {offsets = [1, 0, 0], sizes = [1, 8, 32], strides = [1, 1, 1]} : vector<4x8x32xf32> to vector<1x8x32xf32>
    %72 = vector.shape_cast %71 : vector<1x8x32xf32> to vector<8x32xf32>
    %73 = vector.extract_strided_slice %68 {offsets = [2, 0, 0], sizes = [1, 8, 32], strides = [1, 1, 1]} : vector<4x8x32xf32> to vector<1x8x32xf32>
    %74 = vector.shape_cast %73 : vector<1x8x32xf32> to vector<8x32xf32>
    %75 = vector.extract_strided_slice %68 {offsets = [3, 0, 0], sizes = [1, 8, 32], strides = [1, 1, 1]} : vector<4x8x32xf32> to vector<1x8x32xf32>
    %76 = vector.shape_cast %75 : vector<1x8x32xf32> to vector<8x32xf32>
    %77 = tpu.concatenate %70, %72, %74, %76 in 1 : vector<8x32xf32>, vector<8x32xf32>, vector<8x32xf32>, vector<8x32xf32> -> vector<8x128xf32>
    %c1 = arith.constant 1 : index
    %c0_19 = arith.constant 0 : index
    %c0_20 = arith.constant 0 : index
    %78 = vector.load %arg4[%c1, %c0_19, %c0_20] : memref<2x1x8xf32, #tpu.memory_space<vmem>>, vector<1x1x8xf32>
    %79 = vector.shape_cast %78 : vector<1x1x8xf32> to vector<1x8xf32>
    %80 = vector.broadcast %79 : vector<1x8xf32> to vector<8x8xf32>
    %81 = arith.addf %5, %80 : vector<8x8xf32>
    %82 = vector.extract_strided_slice %14 {offsets = [8, 0], sizes = [8, 128], strides = [1, 1]} : vector<16x128xbf16> to vector<8x128xbf16>
    %83 = vector.extract_strided_slice %16 {offsets = [8, 0], sizes = [8, 128], strides = [1, 1]} : vector<16x128xbf16> to vector<8x128xbf16>
    %84 = vector.extract_strided_slice %18 {offsets = [8, 0], sizes = [8, 128], strides = [1, 1]} : vector<16x128xbf16> to vector<8x128xbf16>
    %85 = vector.extract_strided_slice %82 {offsets = [0, 0], sizes = [8, 32], strides = [1, 1]} : vector<8x128xbf16> to vector<8x32xbf16>
    %86 = vector.extract_strided_slice %82 {offsets = [0, 32], sizes = [8, 32], strides = [1, 1]} : vector<8x128xbf16> to vector<8x32xbf16>
    %87 = vector.extract_strided_slice %82 {offsets = [0, 64], sizes = [8, 32], strides = [1, 1]} : vector<8x128xbf16> to vector<8x32xbf16>
    %88 = vector.extract_strided_slice %82 {offsets = [0, 96], sizes = [8, 32], strides = [1, 1]} : vector<8x128xbf16> to vector<8x32xbf16>
    %89 = vector.shape_cast %85 : vector<8x32xbf16> to vector<1x8x32xbf16>
    %90 = vector.shape_cast %86 : vector<8x32xbf16> to vector<1x8x32xbf16>
    %91 = vector.shape_cast %87 : vector<8x32xbf16> to vector<1x8x32xbf16>
    %92 = vector.shape_cast %88 : vector<8x32xbf16> to vector<1x8x32xbf16>
    %93 = tpu.concatenate %89, %90, %91, %92 in 0 : vector<1x8x32xbf16>, vector<1x8x32xbf16>, vector<1x8x32xbf16>, vector<1x8x32xbf16> -> vector<4x8x32xbf16>
    %94 = vector.extract_strided_slice %83 {offsets = [0, 0], sizes = [8, 32], strides = [1, 1]} : vector<8x128xbf16> to vector<8x32xbf16>
    %95 = vector.extract_strided_slice %83 {offsets = [0, 32], sizes = [8, 32], strides = [1, 1]} : vector<8x128xbf16> to vector<8x32xbf16>
    %96 = vector.extract_strided_slice %83 {offsets = [0, 64], sizes = [8, 32], strides = [1, 1]} : vector<8x128xbf16> to vector<8x32xbf16>
    %97 = vector.extract_strided_slice %83 {offsets = [0, 96], sizes = [8, 32], strides = [1, 1]} : vector<8x128xbf16> to vector<8x32xbf16>
    %98 = vector.shape_cast %94 : vector<8x32xbf16> to vector<1x8x32xbf16>
    %99 = vector.shape_cast %95 : vector<8x32xbf16> to vector<1x8x32xbf16>
    %100 = vector.shape_cast %96 : vector<8x32xbf16> to vector<1x8x32xbf16>
    %101 = vector.shape_cast %97 : vector<8x32xbf16> to vector<1x8x32xbf16>
    %102 = tpu.concatenate %98, %99, %100, %101 in 0 : vector<1x8x32xbf16>, vector<1x8x32xbf16>, vector<1x8x32xbf16>, vector<1x8x32xbf16> -> vector<4x8x32xbf16>
    %103 = vector.extract_strided_slice %84 {offsets = [0, 0], sizes = [8, 32], strides = [1, 1]} : vector<8x128xbf16> to vector<8x32xbf16>
    %104 = vector.extract_strided_slice %84 {offsets = [0, 32], sizes = [8, 32], strides = [1, 1]} : vector<8x128xbf16> to vector<8x32xbf16>
    %105 = vector.extract_strided_slice %84 {offsets = [0, 64], sizes = [8, 32], strides = [1, 1]} : vector<8x128xbf16> to vector<8x32xbf16>
    %106 = vector.extract_strided_slice %84 {offsets = [0, 96], sizes = [8, 32], strides = [1, 1]} : vector<8x128xbf16> to vector<8x32xbf16>
    %107 = vector.shape_cast %103 : vector<8x32xbf16> to vector<1x8x32xbf16>
    %108 = vector.shape_cast %104 : vector<8x32xbf16> to vector<1x8x32xbf16>
    %109 = vector.shape_cast %105 : vector<8x32xbf16> to vector<1x8x32xbf16>
    %110 = vector.shape_cast %106 : vector<8x32xbf16> to vector<1x8x32xbf16>
    %111 = tpu.concatenate %107, %108, %109, %110 in 0 : vector<1x8x32xbf16>, vector<1x8x32xbf16>, vector<1x8x32xbf16>, vector<1x8x32xbf16> -> vector<4x8x32xbf16>
    %cst_21 = arith.constant dense<0.000000e+00> : vector<4x8x8xf32>
    %112 = tpu.matmul %93, %102, %cst_21 {dimension_numbers = #tpu.dot_dimension_numbers<[2], [2], [1], [1], [0, 0, 0, 1, 1, 1], [0], [0]>} : vector<4x8x32xbf16>, vector<4x8x32xbf16>, vector<4x8x8xf32> -> vector<4x8x8xf32>
    %113 = vector.shape_cast %81 : vector<8x8xf32> to vector<1x8x8xf32>
    %114 = vector.broadcast %113 : vector<1x8x8xf32> to vector<4x8x8xf32>
    %115 = arith.addf %112, %114 : vector<4x8x8xf32>
    %cst_22 = arith.constant dense<0xFF800000> : vector<4x8xf32>
    %116 = vector.multi_reduction <maximumf>, %115, %cst_22 [2] : vector<4x8x8xf32> to vector<4x8xf32>
    %117 = vector.shape_cast %116 : vector<4x8xf32> to vector<4x8x1xf32>
    %118 = vector.broadcast %117 : vector<4x8x1xf32> to vector<4x8x8xf32>
    %119 = arith.subf %115, %118 : vector<4x8x8xf32>
    %120 = math.exp %119 : vector<4x8x8xf32>
    %cst_23 = arith.constant dense<0.000000e+00> : vector<4x8xf32>
    %121 = vector.multi_reduction <add>, %120, %cst_23 [2] : vector<4x8x8xf32> to vector<4x8xf32>
    %122 = vector.shape_cast %121 : vector<4x8xf32> to vector<4x8x1xf32>
    %123 = tpu.reciprocal %122 {approx = true} : vector<4x8x1xf32> -> vector<4x8x1xf32>
    %124 = arith.truncf %120 : vector<4x8x8xf32> to vector<4x8x8xbf16>
    %cst_24 = arith.constant dense<0.000000e+00> : vector<4x8x32xf32>
    %125 = tpu.matmul %124, %111, %cst_24 {dimension_numbers = #tpu.dot_dimension_numbers<[2], [1], [1], [2], [0, 0, 0, 1, 1, 2], [0], [0]>} : vector<4x8x8xbf16>, vector<4x8x32xbf16>, vector<4x8x32xf32> -> vector<4x8x32xf32>
    %126 = vector.broadcast %123 : vector<4x8x1xf32> to vector<4x8x32xf32>
    %127 = arith.mulf %125, %126 : vector<4x8x32xf32>
    %128 = vector.extract_strided_slice %127 {offsets = [0, 0, 0], sizes = [1, 8, 32], strides = [1, 1, 1]} : vector<4x8x32xf32> to vector<1x8x32xf32>
    %129 = vector.shape_cast %128 : vector<1x8x32xf32> to vector<8x32xf32>
    %130 = vector.extract_strided_slice %127 {offsets = [1, 0, 0], sizes = [1, 8, 32], strides = [1, 1, 1]} : vector<4x8x32xf32> to vector<1x8x32xf32>
    %131 = vector.shape_cast %130 : vector<1x8x32xf32> to vector<8x32xf32>
    %132 = vector.extract_strided_slice %127 {offsets = [2, 0, 0], sizes = [1, 8, 32], strides = [1, 1, 1]} : vector<4x8x32xf32> to vector<1x8x32xf32>
    %133 = vector.shape_cast %132 : vector<1x8x32xf32> to vector<8x32xf32>
    %134 = vector.extract_strided_slice %127 {offsets = [3, 0, 0], sizes = [1, 8, 32], strides = [1, 1, 1]} : vector<4x8x32xf32> to vector<1x8x32xf32>
    %135 = vector.shape_cast %134 : vector<1x8x32xf32> to vector<8x32xf32>
    %136 = tpu.concatenate %129, %131, %133, %135 in 1 : vector<8x32xf32>, vector<8x32xf32>, vector<8x32xf32>, vector<8x32xf32> -> vector<8x128xf32>
    %137 = tpu.concatenate %77, %136 in 0 : vector<8x128xf32>, vector<8x128xf32> -> vector<16x128xf32>
    %138 = arith.truncf %137 : vector<16x128xf32> to vector<16x128xbf16>
    %c0_25 = arith.constant 0 : index
    %c0_26 = arith.constant 0 : index
    %139 = vector.load %arg8[%c0_25, %c0_26] : memref<128x128xbf16, #tpu.memory_space<vmem>>, vector<128x128xbf16>
    %cst_27 = arith.constant dense<0.000000e+00> : vector<16x128xf32>
    %140 = tpu.matmul %138, %139, %cst_27 {dimension_numbers = #tpu.dot_dimension_numbers<[1], [0], [0], [1], [0, 0, 1, 1], [], []>} : vector<16x128xbf16>, vector<128x128xbf16>, vector<16x128xf32> -> vector<16x128xf32>
    %c0_28 = arith.constant 0 : index
    %c0_29 = arith.constant 0 : index
    %141 = vector.load %arg9[%c0_28, %c0_29] : memref<1x128xf32, #tpu.memory_space<vmem>>, vector<1x128xf32>
    %142 = vector.broadcast %141 : vector<1x128xf32> to vector<16x128xf32>
    %143 = arith.addf %140, %142 : vector<16x128xf32>
    %144 = arith.addf %4, %143 : vector<16x128xf32>
    %c0_30 = arith.constant 0 : index
    %c0_31 = arith.constant 0 : index
    %145 = vector.load %arg20[%c0_30, %c0_31] : memref<1x128xf32, #tpu.memory_space<vmem>>, vector<1x128xf32>
    %c0_32 = arith.constant 0 : index
    %c0_33 = arith.constant 0 : index
    %146 = vector.load %arg21[%c0_32, %c0_33] : memref<1x128xf32, #tpu.memory_space<vmem>>, vector<1x128xf32>
    %cst_34 = arith.constant dense<0.000000e+00> : vector<16xf32>
    %147 = vector.multi_reduction <add>, %144, %cst_34 [1] : vector<16x128xf32> to vector<16xf32>
    %148 = vector.shape_cast %147 : vector<16xf32> to vector<16x1xf32>
    %cst_35 = arith.constant 1.280000e+02 : f32
    %149 = vector.broadcast %cst_35 : f32 to vector<16x1xf32>
    %150 = arith.divf %148, %149 : vector<16x1xf32>
    %151 = vector.broadcast %150 : vector<16x1xf32> to vector<16x128xf32>
    %152 = arith.subf %144, %151 : vector<16x128xf32>
    %153 = arith.mulf %152, %152 : vector<16x128xf32>
    %cst_36 = arith.constant dense<0.000000e+00> : vector<16xf32>
    %154 = vector.multi_reduction <add>, %153, %cst_36 [1] : vector<16x128xf32> to vector<16xf32>
    %155 = vector.shape_cast %154 : vector<16xf32> to vector<16x1xf32>
    %cst_37 = arith.constant 1.280000e+02 : f32
    %156 = vector.broadcast %cst_37 : f32 to vector<16x1xf32>
    %157 = arith.divf %155, %156 : vector<16x1xf32>
    %cst_38 = arith.constant 9.99999974E-6 : f32
    %158 = vector.broadcast %cst_38 : f32 to vector<16x1xf32>
    %159 = arith.addf %157, %158 : vector<16x1xf32>
    %160 = math.rsqrt %159 : vector<16x1xf32>
    %161 = vector.broadcast %160 : vector<16x1xf32> to vector<16x128xf32>
    %162 = arith.mulf %152, %161 : vector<16x128xf32>
    %163 = vector.broadcast %145 : vector<1x128xf32> to vector<16x128xf32>
    %164 = arith.mulf %162, %163 : vector<16x128xf32>
    %165 = vector.broadcast %146 : vector<1x128xf32> to vector<16x128xf32>
    %166 = arith.addf %164, %165 : vector<16x128xf32>
    %167 = arith.truncf %166 : vector<16x128xf32> to vector<16x128xbf16>
    %c0_39 = arith.constant 0 : index
    %c0_40 = arith.constant 0 : index
    %168 = vector.load %arg10[%c0_39, %c0_40] : memref<128x128xbf16, #tpu.memory_space<vmem>>, vector<128x128xbf16>
    %cst_41 = arith.constant dense<0.000000e+00> : vector<16x128xf32>
    %169 = tpu.matmul %167, %168, %cst_41 {dimension_numbers = #tpu.dot_dimension_numbers<[1], [0], [0], [1], [0, 0, 1, 1], [], []>} : vector<16x128xbf16>, vector<128x128xbf16>, vector<16x128xf32> -> vector<16x128xf32>
    %c0_42 = arith.constant 0 : index
    %c0_43 = arith.constant 0 : index
    %170 = vector.load %arg11[%c0_42, %c0_43] : memref<1x128xf32, #tpu.memory_space<vmem>>, vector<1x128xf32>
    %171 = vector.broadcast %170 : vector<1x128xf32> to vector<16x128xf32>
    %172 = arith.addf %169, %171 : vector<16x128xf32>
    %cst_44 = arith.constant 0.176776692 : f32
    %173 = vector.broadcast %cst_44 : f32 to vector<16x128xf32>
    %174 = arith.mulf %172, %173 : vector<16x128xf32>
    %175 = arith.truncf %174 : vector<16x128xf32> to vector<16x128xbf16>
    %c0_45 = arith.constant 0 : index
    %c0_46 = arith.constant 0 : index
    %176 = vector.load %arg12[%c0_45, %c0_46] : memref<128x256xbf16, #tpu.memory_space<vmem>>, vector<128x256xbf16>
    %cst_47 = arith.constant dense<0.000000e+00> : vector<16x256xf32>
    %177 = tpu.matmul %3, %176, %cst_47 {dimension_numbers = #tpu.dot_dimension_numbers<[1], [0], [0], [1], [0, 0, 1, 1], [], []>} : vector<16x128xbf16>, vector<128x256xbf16>, vector<16x256xf32> -> vector<16x256xf32>
    %c0_48 = arith.constant 0 : index
    %c0_49 = arith.constant 0 : index
    %178 = vector.load %arg13[%c0_48, %c0_49] : memref<1x256xf32, #tpu.memory_space<vmem>>, vector<1x256xf32>
    %179 = vector.broadcast %178 : vector<1x256xf32> to vector<16x256xf32>
    %180 = arith.addf %177, %179 : vector<16x256xf32>
    %181 = vector.extract_strided_slice %180 {offsets = [0, 0], sizes = [16, 128], strides = [1, 1]} : vector<16x256xf32> to vector<16x128xf32>
    %182 = arith.truncf %181 : vector<16x128xf32> to vector<16x128xbf16>
    %183 = vector.extract_strided_slice %180 {offsets = [0, 128], sizes = [16, 128], strides = [1, 1]} : vector<16x256xf32> to vector<16x128xf32>
    %184 = arith.truncf %183 : vector<16x128xf32> to vector<16x128xbf16>
    %185 = vector.extract_strided_slice %175 {offsets = [0, 0], sizes = [8, 128], strides = [1, 1]} : vector<16x128xbf16> to vector<8x128xbf16>
    %186 = vector.extract_strided_slice %182 {offsets = [0, 0], sizes = [8, 128], strides = [1, 1]} : vector<16x128xbf16> to vector<8x128xbf16>
    %187 = vector.extract_strided_slice %184 {offsets = [0, 0], sizes = [8, 128], strides = [1, 1]} : vector<16x128xbf16> to vector<8x128xbf16>
    %c0_50 = arith.constant 0 : index
    %c0_51 = arith.constant 0 : index
    %c0_52 = arith.constant 0 : index
    %188 = vector.load %arg5[%c0_50, %c0_51, %c0_52] : memref<2x1x8xf32, #tpu.memory_space<vmem>>, vector<1x1x8xf32>
    %189 = vector.shape_cast %188 : vector<1x1x8xf32> to vector<1x8xf32>
    %190 = vector.extract_strided_slice %185 {offsets = [0, 0], sizes = [8, 32], strides = [1, 1]} : vector<8x128xbf16> to vector<8x32xbf16>
    %191 = vector.extract_strided_slice %185 {offsets = [0, 32], sizes = [8, 32], strides = [1, 1]} : vector<8x128xbf16> to vector<8x32xbf16>
    %192 = vector.extract_strided_slice %185 {offsets = [0, 64], sizes = [8, 32], strides = [1, 1]} : vector<8x128xbf16> to vector<8x32xbf16>
    %193 = vector.extract_strided_slice %185 {offsets = [0, 96], sizes = [8, 32], strides = [1, 1]} : vector<8x128xbf16> to vector<8x32xbf16>
    %194 = vector.shape_cast %190 : vector<8x32xbf16> to vector<1x8x32xbf16>
    %195 = vector.shape_cast %191 : vector<8x32xbf16> to vector<1x8x32xbf16>
    %196 = vector.shape_cast %192 : vector<8x32xbf16> to vector<1x8x32xbf16>
    %197 = vector.shape_cast %193 : vector<8x32xbf16> to vector<1x8x32xbf16>
    %198 = tpu.concatenate %194, %195, %196, %197 in 0 : vector<1x8x32xbf16>, vector<1x8x32xbf16>, vector<1x8x32xbf16>, vector<1x8x32xbf16> -> vector<4x8x32xbf16>
    %199 = vector.extract_strided_slice %186 {offsets = [0, 0], sizes = [8, 32], strides = [1, 1]} : vector<8x128xbf16> to vector<8x32xbf16>
    %200 = vector.extract_strided_slice %186 {offsets = [0, 32], sizes = [8, 32], strides = [1, 1]} : vector<8x128xbf16> to vector<8x32xbf16>
    %201 = vector.extract_strided_slice %186 {offsets = [0, 64], sizes = [8, 32], strides = [1, 1]} : vector<8x128xbf16> to vector<8x32xbf16>
    %202 = vector.extract_strided_slice %186 {offsets = [0, 96], sizes = [8, 32], strides = [1, 1]} : vector<8x128xbf16> to vector<8x32xbf16>
    %203 = vector.shape_cast %199 : vector<8x32xbf16> to vector<1x8x32xbf16>
    %204 = vector.shape_cast %200 : vector<8x32xbf16> to vector<1x8x32xbf16>
    %205 = vector.shape_cast %201 : vector<8x32xbf16> to vector<1x8x32xbf16>
    %206 = vector.shape_cast %202 : vector<8x32xbf16> to vector<1x8x32xbf16>
    %207 = tpu.concatenate %203, %204, %205, %206 in 0 : vector<1x8x32xbf16>, vector<1x8x32xbf16>, vector<1x8x32xbf16>, vector<1x8x32xbf16> -> vector<4x8x32xbf16>
    %208 = vector.extract_strided_slice %187 {offsets = [0, 0], sizes = [8, 32], strides = [1, 1]} : vector<8x128xbf16> to vector<8x32xbf16>
    %209 = vector.extract_strided_slice %187 {offsets = [0, 32], sizes = [8, 32], strides = [1, 1]} : vector<8x128xbf16> to vector<8x32xbf16>
    %210 = vector.extract_strided_slice %187 {offsets = [0, 64], sizes = [8, 32], strides = [1, 1]} : vector<8x128xbf16> to vector<8x32xbf16>
    %211 = vector.extract_strided_slice %187 {offsets = [0, 96], sizes = [8, 32], strides = [1, 1]} : vector<8x128xbf16> to vector<8x32xbf16>
    %212 = vector.shape_cast %208 : vector<8x32xbf16> to vector<1x8x32xbf16>
    %213 = vector.shape_cast %209 : vector<8x32xbf16> to vector<1x8x32xbf16>
    %214 = vector.shape_cast %210 : vector<8x32xbf16> to vector<1x8x32xbf16>
    %215 = vector.shape_cast %211 : vector<8x32xbf16> to vector<1x8x32xbf16>
    %216 = tpu.concatenate %212, %213, %214, %215 in 0 : vector<1x8x32xbf16>, vector<1x8x32xbf16>, vector<1x8x32xbf16>, vector<1x8x32xbf16> -> vector<4x8x32xbf16>
    %cst_53 = arith.constant dense<0.000000e+00> : vector<4x8x8xf32>
    %217 = tpu.matmul %198, %207, %cst_53 {dimension_numbers = #tpu.dot_dimension_numbers<[2], [2], [1], [1], [0, 0, 0, 1, 1, 1], [0], [0]>} : vector<4x8x32xbf16>, vector<4x8x32xbf16>, vector<4x8x8xf32> -> vector<4x8x8xf32>
    %218 = vector.shape_cast %189 : vector<1x8xf32> to vector<1x1x8xf32>
    %219 = vector.broadcast %218 : vector<1x1x8xf32> to vector<4x8x8xf32>
    %220 = arith.addf %217, %219 : vector<4x8x8xf32>
    %cst_54 = arith.constant dense<0xFF800000> : vector<4x8xf32>
    %221 = vector.multi_reduction <maximumf>, %220, %cst_54 [2] : vector<4x8x8xf32> to vector<4x8xf32>
    %222 = vector.shape_cast %221 : vector<4x8xf32> to vector<4x8x1xf32>
    %223 = vector.broadcast %222 : vector<4x8x1xf32> to vector<4x8x8xf32>
    %224 = arith.subf %220, %223 : vector<4x8x8xf32>
    %225 = math.exp %224 : vector<4x8x8xf32>
    %cst_55 = arith.constant dense<0.000000e+00> : vector<4x8xf32>
    %226 = vector.multi_reduction <add>, %225, %cst_55 [2] : vector<4x8x8xf32> to vector<4x8xf32>
    %227 = vector.shape_cast %226 : vector<4x8xf32> to vector<4x8x1xf32>
    %228 = tpu.reciprocal %227 {approx = true} : vector<4x8x1xf32> -> vector<4x8x1xf32>
    %229 = arith.truncf %225 : vector<4x8x8xf32> to vector<4x8x8xbf16>
    %cst_56 = arith.constant dense<0.000000e+00> : vector<4x8x32xf32>
    %230 = tpu.matmul %229, %216, %cst_56 {dimension_numbers = #tpu.dot_dimension_numbers<[2], [1], [1], [2], [0, 0, 0, 1, 1, 2], [0], [0]>} : vector<4x8x8xbf16>, vector<4x8x32xbf16>, vector<4x8x32xf32> -> vector<4x8x32xf32>
    %231 = vector.broadcast %228 : vector<4x8x1xf32> to vector<4x8x32xf32>
    %232 = arith.mulf %230, %231 : vector<4x8x32xf32>
    %233 = vector.extract_strided_slice %232 {offsets = [0, 0, 0], sizes = [1, 8, 32], strides = [1, 1, 1]} : vector<4x8x32xf32> to vector<1x8x32xf32>
    %234 = vector.shape_cast %233 : vector<1x8x32xf32> to vector<8x32xf32>
    %235 = vector.extract_strided_slice %232 {offsets = [1, 0, 0], sizes = [1, 8, 32], strides = [1, 1, 1]} : vector<4x8x32xf32> to vector<1x8x32xf32>
    %236 = vector.shape_cast %235 : vector<1x8x32xf32> to vector<8x32xf32>
    %237 = vector.extract_strided_slice %232 {offsets = [2, 0, 0], sizes = [1, 8, 32], strides = [1, 1, 1]} : vector<4x8x32xf32> to vector<1x8x32xf32>
    %238 = vector.shape_cast %237 : vector<1x8x32xf32> to vector<8x32xf32>
    %239 = vector.extract_strided_slice %232 {offsets = [3, 0, 0], sizes = [1, 8, 32], strides = [1, 1, 1]} : vector<4x8x32xf32> to vector<1x8x32xf32>
    %240 = vector.shape_cast %239 : vector<1x8x32xf32> to vector<8x32xf32>
    %241 = tpu.concatenate %234, %236, %238, %240 in 1 : vector<8x32xf32>, vector<8x32xf32>, vector<8x32xf32>, vector<8x32xf32> -> vector<8x128xf32>
    %242 = vector.extract_strided_slice %175 {offsets = [8, 0], sizes = [8, 128], strides = [1, 1]} : vector<16x128xbf16> to vector<8x128xbf16>
    %243 = vector.extract_strided_slice %182 {offsets = [8, 0], sizes = [8, 128], strides = [1, 1]} : vector<16x128xbf16> to vector<8x128xbf16>
    %244 = vector.extract_strided_slice %184 {offsets = [8, 0], sizes = [8, 128], strides = [1, 1]} : vector<16x128xbf16> to vector<8x128xbf16>
    %c1_57 = arith.constant 1 : index
    %c0_58 = arith.constant 0 : index
    %c0_59 = arith.constant 0 : index
    %245 = vector.load %arg5[%c1_57, %c0_58, %c0_59] : memref<2x1x8xf32, #tpu.memory_space<vmem>>, vector<1x1x8xf32>
    %246 = vector.shape_cast %245 : vector<1x1x8xf32> to vector<1x8xf32>
    %247 = vector.extract_strided_slice %242 {offsets = [0, 0], sizes = [8, 32], strides = [1, 1]} : vector<8x128xbf16> to vector<8x32xbf16>
    %248 = vector.extract_strided_slice %242 {offsets = [0, 32], sizes = [8, 32], strides = [1, 1]} : vector<8x128xbf16> to vector<8x32xbf16>
    %249 = vector.extract_strided_slice %242 {offsets = [0, 64], sizes = [8, 32], strides = [1, 1]} : vector<8x128xbf16> to vector<8x32xbf16>
    %250 = vector.extract_strided_slice %242 {offsets = [0, 96], sizes = [8, 32], strides = [1, 1]} : vector<8x128xbf16> to vector<8x32xbf16>
    %251 = vector.shape_cast %247 : vector<8x32xbf16> to vector<1x8x32xbf16>
    %252 = vector.shape_cast %248 : vector<8x32xbf16> to vector<1x8x32xbf16>
    %253 = vector.shape_cast %249 : vector<8x32xbf16> to vector<1x8x32xbf16>
    %254 = vector.shape_cast %250 : vector<8x32xbf16> to vector<1x8x32xbf16>
    %255 = tpu.concatenate %251, %252, %253, %254 in 0 : vector<1x8x32xbf16>, vector<1x8x32xbf16>, vector<1x8x32xbf16>, vector<1x8x32xbf16> -> vector<4x8x32xbf16>
    %256 = vector.extract_strided_slice %243 {offsets = [0, 0], sizes = [8, 32], strides = [1, 1]} : vector<8x128xbf16> to vector<8x32xbf16>
    %257 = vector.extract_strided_slice %243 {offsets = [0, 32], sizes = [8, 32], strides = [1, 1]} : vector<8x128xbf16> to vector<8x32xbf16>
    %258 = vector.extract_strided_slice %243 {offsets = [0, 64], sizes = [8, 32], strides = [1, 1]} : vector<8x128xbf16> to vector<8x32xbf16>
    %259 = vector.extract_strided_slice %243 {offsets = [0, 96], sizes = [8, 32], strides = [1, 1]} : vector<8x128xbf16> to vector<8x32xbf16>
    %260 = vector.shape_cast %256 : vector<8x32xbf16> to vector<1x8x32xbf16>
    %261 = vector.shape_cast %257 : vector<8x32xbf16> to vector<1x8x32xbf16>
    %262 = vector.shape_cast %258 : vector<8x32xbf16> to vector<1x8x32xbf16>
    %263 = vector.shape_cast %259 : vector<8x32xbf16> to vector<1x8x32xbf16>
    %264 = tpu.concatenate %260, %261, %262, %263 in 0 : vector<1x8x32xbf16>, vector<1x8x32xbf16>, vector<1x8x32xbf16>, vector<1x8x32xbf16> -> vector<4x8x32xbf16>
    %265 = vector.extract_strided_slice %244 {offsets = [0, 0], sizes = [8, 32], strides = [1, 1]} : vector<8x128xbf16> to vector<8x32xbf16>
    %266 = vector.extract_strided_slice %244 {offsets = [0, 32], sizes = [8, 32], strides = [1, 1]} : vector<8x128xbf16> to vector<8x32xbf16>
    %267 = vector.extract_strided_slice %244 {offsets = [0, 64], sizes = [8, 32], strides = [1, 1]} : vector<8x128xbf16> to vector<8x32xbf16>
    %268 = vector.extract_strided_slice %244 {offsets = [0, 96], sizes = [8, 32], strides = [1, 1]} : vector<8x128xbf16> to vector<8x32xbf16>
    %269 = vector.shape_cast %265 : vector<8x32xbf16> to vector<1x8x32xbf16>
    %270 = vector.shape_cast %266 : vector<8x32xbf16> to vector<1x8x32xbf16>
    %271 = vector.shape_cast %267 : vector<8x32xbf16> to vector<1x8x32xbf16>
    %272 = vector.shape_cast %268 : vector<8x32xbf16> to vector<1x8x32xbf16>
    %273 = tpu.concatenate %269, %270, %271, %272 in 0 : vector<1x8x32xbf16>, vector<1x8x32xbf16>, vector<1x8x32xbf16>, vector<1x8x32xbf16> -> vector<4x8x32xbf16>
    %cst_60 = arith.constant dense<0.000000e+00> : vector<4x8x8xf32>
    %274 = tpu.matmul %255, %264, %cst_60 {dimension_numbers = #tpu.dot_dimension_numbers<[2], [2], [1], [1], [0, 0, 0, 1, 1, 1], [0], [0]>} : vector<4x8x32xbf16>, vector<4x8x32xbf16>, vector<4x8x8xf32> -> vector<4x8x8xf32>
    %275 = vector.shape_cast %246 : vector<1x8xf32> to vector<1x1x8xf32>
    %276 = vector.broadcast %275 : vector<1x1x8xf32> to vector<4x8x8xf32>
    %277 = arith.addf %274, %276 : vector<4x8x8xf32>
    %cst_61 = arith.constant dense<0xFF800000> : vector<4x8xf32>
    %278 = vector.multi_reduction <maximumf>, %277, %cst_61 [2] : vector<4x8x8xf32> to vector<4x8xf32>
    %279 = vector.shape_cast %278 : vector<4x8xf32> to vector<4x8x1xf32>
    %280 = vector.broadcast %279 : vector<4x8x1xf32> to vector<4x8x8xf32>
    %281 = arith.subf %277, %280 : vector<4x8x8xf32>
    %282 = math.exp %281 : vector<4x8x8xf32>
    %cst_62 = arith.constant dense<0.000000e+00> : vector<4x8xf32>
    %283 = vector.multi_reduction <add>, %282, %cst_62 [2] : vector<4x8x8xf32> to vector<4x8xf32>
    %284 = vector.shape_cast %283 : vector<4x8xf32> to vector<4x8x1xf32>
    %285 = tpu.reciprocal %284 {approx = true} : vector<4x8x1xf32> -> vector<4x8x1xf32>
    %286 = arith.truncf %282 : vector<4x8x8xf32> to vector<4x8x8xbf16>
    %cst_63 = arith.constant dense<0.000000e+00> : vector<4x8x32xf32>
    %287 = tpu.matmul %286, %273, %cst_63 {dimension_numbers = #tpu.dot_dimension_numbers<[2], [1], [1], [2], [0, 0, 0, 1, 1, 2], [0], [0]>} : vector<4x8x8xbf16>, vector<4x8x32xbf16>, vector<4x8x32xf32> -> vector<4x8x32xf32>
    %288 = vector.broadcast %285 : vector<4x8x1xf32> to vector<4x8x32xf32>
    %289 = arith.mulf %287, %288 : vector<4x8x32xf32>
    %290 = vector.extract_strided_slice %289 {offsets = [0, 0, 0], sizes = [1, 8, 32], strides = [1, 1, 1]} : vector<4x8x32xf32> to vector<1x8x32xf32>
    %291 = vector.shape_cast %290 : vector<1x8x32xf32> to vector<8x32xf32>
    %292 = vector.extract_strided_slice %289 {offsets = [1, 0, 0], sizes = [1, 8, 32], strides = [1, 1, 1]} : vector<4x8x32xf32> to vector<1x8x32xf32>
    %293 = vector.shape_cast %292 : vector<1x8x32xf32> to vector<8x32xf32>
    %294 = vector.extract_strided_slice %289 {offsets = [2, 0, 0], sizes = [1, 8, 32], strides = [1, 1, 1]} : vector<4x8x32xf32> to vector<1x8x32xf32>
    %295 = vector.shape_cast %294 : vector<1x8x32xf32> to vector<8x32xf32>
    %296 = vector.extract_strided_slice %289 {offsets = [3, 0, 0], sizes = [1, 8, 32], strides = [1, 1, 1]} : vector<4x8x32xf32> to vector<1x8x32xf32>
    %297 = vector.shape_cast %296 : vector<1x8x32xf32> to vector<8x32xf32>
    %298 = tpu.concatenate %291, %293, %295, %297 in 1 : vector<8x32xf32>, vector<8x32xf32>, vector<8x32xf32>, vector<8x32xf32> -> vector<8x128xf32>
    %299 = tpu.concatenate %241, %298 in 0 : vector<8x128xf32>, vector<8x128xf32> -> vector<16x128xf32>
    %300 = arith.truncf %299 : vector<16x128xf32> to vector<16x128xbf16>
    %c0_64 = arith.constant 0 : index
    %c0_65 = arith.constant 0 : index
    %301 = vector.load %arg14[%c0_64, %c0_65] : memref<128x128xbf16, #tpu.memory_space<vmem>>, vector<128x128xbf16>
    %cst_66 = arith.constant dense<0.000000e+00> : vector<16x128xf32>
    %302 = tpu.matmul %300, %301, %cst_66 {dimension_numbers = #tpu.dot_dimension_numbers<[1], [0], [0], [1], [0, 0, 1, 1], [], []>} : vector<16x128xbf16>, vector<128x128xbf16>, vector<16x128xf32> -> vector<16x128xf32>
    %c0_67 = arith.constant 0 : index
    %c0_68 = arith.constant 0 : index
    %303 = vector.load %arg15[%c0_67, %c0_68] : memref<1x128xf32, #tpu.memory_space<vmem>>, vector<1x128xf32>
    %304 = vector.broadcast %303 : vector<1x128xf32> to vector<16x128xf32>
    %305 = arith.addf %302, %304 : vector<16x128xf32>
    %306 = arith.addf %166, %305 : vector<16x128xf32>
    %c0_69 = arith.constant 0 : index
    %c0_70 = arith.constant 0 : index
    %307 = vector.load %arg22[%c0_69, %c0_70] : memref<1x128xf32, #tpu.memory_space<vmem>>, vector<1x128xf32>
    %c0_71 = arith.constant 0 : index
    %c0_72 = arith.constant 0 : index
    %308 = vector.load %arg23[%c0_71, %c0_72] : memref<1x128xf32, #tpu.memory_space<vmem>>, vector<1x128xf32>
    %cst_73 = arith.constant dense<0.000000e+00> : vector<16xf32>
    %309 = vector.multi_reduction <add>, %306, %cst_73 [1] : vector<16x128xf32> to vector<16xf32>
    %310 = vector.shape_cast %309 : vector<16xf32> to vector<16x1xf32>
    %cst_74 = arith.constant 1.280000e+02 : f32
    %311 = vector.broadcast %cst_74 : f32 to vector<16x1xf32>
    %312 = arith.divf %310, %311 : vector<16x1xf32>
    %313 = vector.broadcast %312 : vector<16x1xf32> to vector<16x128xf32>
    %314 = arith.subf %306, %313 : vector<16x128xf32>
    %315 = arith.mulf %314, %314 : vector<16x128xf32>
    %cst_75 = arith.constant dense<0.000000e+00> : vector<16xf32>
    %316 = vector.multi_reduction <add>, %315, %cst_75 [1] : vector<16x128xf32> to vector<16xf32>
    %317 = vector.shape_cast %316 : vector<16xf32> to vector<16x1xf32>
    %cst_76 = arith.constant 1.280000e+02 : f32
    %318 = vector.broadcast %cst_76 : f32 to vector<16x1xf32>
    %319 = arith.divf %317, %318 : vector<16x1xf32>
    %cst_77 = arith.constant 9.99999974E-6 : f32
    %320 = vector.broadcast %cst_77 : f32 to vector<16x1xf32>
    %321 = arith.addf %319, %320 : vector<16x1xf32>
    %322 = math.rsqrt %321 : vector<16x1xf32>
    %323 = vector.broadcast %322 : vector<16x1xf32> to vector<16x128xf32>
    %324 = arith.mulf %314, %323 : vector<16x128xf32>
    %325 = vector.broadcast %307 : vector<1x128xf32> to vector<16x128xf32>
    %326 = arith.mulf %324, %325 : vector<16x128xf32>
    %327 = vector.broadcast %308 : vector<1x128xf32> to vector<16x128xf32>
    %328 = arith.addf %326, %327 : vector<16x128xf32>
    %329 = arith.truncf %328 : vector<16x128xf32> to vector<16x128xbf16>
    %c0_78 = arith.constant 0 : index
    %c0_79 = arith.constant 0 : index
    %330 = vector.load %arg16[%c0_78, %c0_79] : memref<128x256xbf16, #tpu.memory_space<vmem>>, vector<128x256xbf16>
    %cst_80 = arith.constant dense<0.000000e+00> : vector<16x256xf32>
    %331 = tpu.matmul %329, %330, %cst_80 {dimension_numbers = #tpu.dot_dimension_numbers<[1], [0], [0], [1], [0, 0, 1, 1], [], []>} : vector<16x128xbf16>, vector<128x256xbf16>, vector<16x256xf32> -> vector<16x256xf32>
    %c0_81 = arith.constant 0 : index
    %c0_82 = arith.constant 0 : index
    %332 = vector.load %arg17[%c0_81, %c0_82] : memref<1x256xf32, #tpu.memory_space<vmem>>, vector<1x256xf32>
    %333 = vector.broadcast %332 : vector<1x256xf32> to vector<16x256xf32>
    %334 = arith.addf %331, %333 : vector<16x256xf32>
    %cst_83 = arith.constant 0.000000e+00 : f32
    %335 = vector.broadcast %cst_83 : f32 to vector<16x256xf32>
    %336 = arith.maximumf %334, %335 : vector<16x256xf32>
    %337 = arith.truncf %336 : vector<16x256xf32> to vector<16x256xbf16>
    %c0_84 = arith.constant 0 : index
    %c0_85 = arith.constant 0 : index
    %338 = vector.load %arg18[%c0_84, %c0_85] : memref<256x128xbf16, #tpu.memory_space<vmem>>, vector<256x128xbf16>
    %cst_86 = arith.constant dense<0.000000e+00> : vector<16x128xf32>
    %339 = tpu.matmul %337, %338, %cst_86 {dimension_numbers = #tpu.dot_dimension_numbers<[1], [0], [0], [1], [0, 0, 1, 1], [], []>} : vector<16x256xbf16>, vector<256x128xbf16>, vector<16x128xf32> -> vector<16x128xf32>
    %c0_87 = arith.constant 0 : index
    %c0_88 = arith.constant 0 : index
    %340 = vector.load %arg19[%c0_87, %c0_88] : memref<1x128xf32, #tpu.memory_space<vmem>>, vector<1x128xf32>
    %341 = vector.broadcast %340 : vector<1x128xf32> to vector<16x128xf32>
    %342 = arith.addf %339, %341 : vector<16x128xf32>
    %343 = arith.addf %328, %342 : vector<16x128xf32>
    %c0_89 = arith.constant 0 : index
    %c0_90 = arith.constant 0 : index
    %344 = vector.load %arg24[%c0_89, %c0_90] : memref<1x128xf32, #tpu.memory_space<vmem>>, vector<1x128xf32>
    %c0_91 = arith.constant 0 : index
    %c0_92 = arith.constant 0 : index
    %345 = vector.load %arg25[%c0_91, %c0_92] : memref<1x128xf32, #tpu.memory_space<vmem>>, vector<1x128xf32>
    %cst_93 = arith.constant dense<0.000000e+00> : vector<16xf32>
    %346 = vector.multi_reduction <add>, %343, %cst_93 [1] : vector<16x128xf32> to vector<16xf32>
    %347 = vector.shape_cast %346 : vector<16xf32> to vector<16x1xf32>
    %cst_94 = arith.constant 1.280000e+02 : f32
    %348 = vector.broadcast %cst_94 : f32 to vector<16x1xf32>
    %349 = arith.divf %347, %348 : vector<16x1xf32>
    %350 = vector.broadcast %349 : vector<16x1xf32> to vector<16x128xf32>
    %351 = arith.subf %343, %350 : vector<16x128xf32>
    %352 = arith.mulf %351, %351 : vector<16x128xf32>
    %cst_95 = arith.constant dense<0.000000e+00> : vector<16xf32>
    %353 = vector.multi_reduction <add>, %352, %cst_95 [1] : vector<16x128xf32> to vector<16xf32>
    %354 = vector.shape_cast %353 : vector<16xf32> to vector<16x1xf32>
    %cst_96 = arith.constant 1.280000e+02 : f32
    %355 = vector.broadcast %cst_96 : f32 to vector<16x1xf32>
    %356 = arith.divf %354, %355 : vector<16x1xf32>
    %cst_97 = arith.constant 9.99999974E-6 : f32
    %357 = vector.broadcast %cst_97 : f32 to vector<16x1xf32>
    %358 = arith.addf %356, %357 : vector<16x1xf32>
    %359 = math.rsqrt %358 : vector<16x1xf32>
    %360 = vector.broadcast %359 : vector<16x1xf32> to vector<16x128xf32>
    %361 = arith.mulf %351, %360 : vector<16x128xf32>
    %362 = vector.broadcast %344 : vector<1x128xf32> to vector<16x128xf32>
    %363 = arith.mulf %361, %362 : vector<16x128xf32>
    %364 = vector.broadcast %345 : vector<1x128xf32> to vector<16x128xf32>
    %365 = arith.addf %363, %364 : vector<16x128xf32>
    %366 = vector.shape_cast %365 : vector<16x128xf32> to vector<2x8x128xf32>
    %367 = arith.truncf %366 : vector<2x8x128xf32> to vector<2x8x128xbf16>
    %c0_98 = arith.constant 0 : index
    %c0_99 = arith.constant 0 : index
    %c0_100 = arith.constant 0 : index
    %368 = vector.load %arg26[%c0_98, %c0_99, %c0_100] : memref<2x8x128xbf16, #tpu.memory_space<vmem>>, vector<2x8x128xbf16>
    tpu.vector_store %arg26[%c0_98, %c0_99, %c0_100], %367 {strides = array<i32>} : memref<2x8x128xbf16, #tpu.memory_space<vmem>>, vector<2x8x128xbf16>,
    return
  }
  func.func @transform_0(%arg0: i32) -> (i32, i32, i32) {
    %c0_i32 = arith.constant 0 : i32
    %c0_i32_0 = arith.constant 0 : i32
    %c0_i32_1 = arith.constant 0 : i32
    return %arg0, %c0_i32, %c0_i32_0 : i32, i32, i32
  }
  func.func @transform_1(%arg0: i32) -> (i32, i32, i32) {
    %c0_i32 = arith.constant 0 : i32
    %c0_i32_0 = arith.constant 0 : i32
    %c0_i32_1 = arith.constant 0 : i32
    return %arg0, %c0_i32, %c0_i32_0 : i32, i32, i32
  }
  func.func @transform_2(%arg0: i32) -> (i32, i32) {
    %c0_i32 = arith.constant 0 : i32
    %c0_i32_0 = arith.constant 0 : i32
    %c0_i32_1 = arith.constant 0 : i32
    return %c0_i32, %c0_i32_0 : i32, i32
  }
  func.func @transform_3(%arg0: i32) -> (i32, i32, i32) {
    %c0_i32 = arith.constant 0 : i32
    %c0_i32_0 = arith.constant 0 : i32
    %c0_i32_1 = arith.constant 0 : i32
    return %arg0, %c0_i32, %c0_i32_0 : i32, i32, i32
  }
  func.func @transform_4(%arg0: i32) -> (i32, i32, i32) {
    %c0_i32 = arith.constant 0 : i32
    %c0_i32_0 = arith.constant 0 : i32
    %c0_i32_1 = arith.constant 0 : i32
    return %arg0, %c0_i32, %c0_i32_0 : i32, i32, i32
  }
  func.func @transform_5(%arg0: i32) -> (i32, i32) {
    %c0_i32 = arith.constant 0 : i32
    %c0_i32_0 = arith.constant 0 : i32
    %c0_i32_1 = arith.constant 0 : i32
    return %c0_i32, %c0_i32_0 : i32, i32
  }
  func.func @transform_6(%arg0: i32) -> (i32, i32) {
    %c0_i32 = arith.constant 0 : i32
    %c0_i32_0 = arith.constant 0 : i32
    %c0_i32_1 = arith.constant 0 : i32
    return %c0_i32, %c0_i32_0 : i32, i32
  }
  func.func @transform_7(%arg0: i32) -> (i32, i32) {
    %c0_i32 = arith.constant 0 : i32
    %c0_i32_0 = arith.constant 0 : i32
    %c0_i32_1 = arith.constant 0 : i32
    return %c0_i32, %c0_i32_0 : i32, i32
  }
  func.func @transform_8(%arg0: i32) -> (i32, i32) {
    %c0_i32 = arith.constant 0 : i32
    %c0_i32_0 = arith.constant 0 : i32
    %c0_i32_1 = arith.constant 0 : i32
    return %c0_i32, %c0_i32_0 : i32, i32
  }
  func.func @transform_9(%arg0: i32) -> (i32, i32) {
    %c0_i32 = arith.constant 0 : i32
    %c0_i32_0 = arith.constant 0 : i32
    %c0_i32_1 = arith.constant 0 : i32
    return %c0_i32, %c0_i32_0 : i32, i32
  }
  func.func @transform_10(%arg0: i32) -> (i32, i32) {
    %c0_i32 = arith.constant 0 : i32
    %c0_i32_0 = arith.constant 0 : i32
    %c0_i32_1 = arith.constant 0 : i32
    return %c0_i32, %c0_i32_0 : i32, i32
  }
  func.func @transform_11(%arg0: i32) -> (i32, i32) {
    %c0_i32 = arith.constant 0 : i32
    %c0_i32_0 = arith.constant 0 : i32
    %c0_i32_1 = arith.constant 0 : i32
    return %c0_i32, %c0_i32_0 : i32, i32
  }
  func.func @transform_12(%arg0: i32) -> (i32, i32) {
    %c0_i32 = arith.constant 0 : i32
    %c0_i32_0 = arith.constant 0 : i32
    %c0_i32_1 = arith.constant 0 : i32
    return %c0_i32, %c0_i32_0 : i32, i32
  }
  func.func @transform_13(%arg0: i32) -> (i32, i32) {
    %c0_i32 = arith.constant 0 : i32
    %c0_i32_0 = arith.constant 0 : i32
    %c0_i32_1 = arith.constant 0 : i32
    return %c0_i32, %c0_i32_0 : i32, i32
  }
  func.func @transform_14(%arg0: i32) -> (i32, i32) {
    %c0_i32 = arith.constant 0 : i32
    %c0_i32_0 = arith.constant 0 : i32
    %c0_i32_1 = arith.constant 0 : i32
    return %c0_i32, %c0_i32_0 : i32, i32
  }
  func.func @transform_15(%arg0: i32) -> (i32, i32) {
    %c0_i32 = arith.constant 0 : i32
    %c0_i32_0 = arith.constant 0 : i32
    %c0_i32_1 = arith.constant 0 : i32
    return %c0_i32, %c0_i32_0 : i32, i32
  }
  func.func @transform_16(%arg0: i32) -> (i32, i32) {
    %c0_i32 = arith.constant 0 : i32
    %c0_i32_0 = arith.constant 0 : i32
    %c0_i32_1 = arith.constant 0 : i32
    return %c0_i32, %c0_i32_0 : i32, i32
  }
  func.func @transform_17(%arg0: i32) -> (i32, i32) {
    %c0_i32 = arith.constant 0 : i32
    %c0_i32_0 = arith.constant 0 : i32
    %c0_i32_1 = arith.constant 0 : i32
    return %c0_i32, %c0_i32_0 : i32, i32
  }
  func.func @transform_18(%arg0: i32) -> (i32, i32) {
    %c0_i32 = arith.constant 0 : i32
    %c0_i32_0 = arith.constant 0 : i32
    %c0_i32_1 = arith.constant 0 : i32
    return %c0_i32, %c0_i32_0 : i32, i32
  }
  func.func @transform_19(%arg0: i32) -> (i32, i32) {
    %c0_i32 = arith.constant 0 : i32
    %c0_i32_0 = arith.constant 0 : i32
    %c0_i32_1 = arith.constant 0 : i32
    return %c0_i32, %c0_i32_0 : i32, i32
  }
  func.func @transform_20(%arg0: i32) -> (i32, i32) {
    %c0_i32 = arith.constant 0 : i32
    %c0_i32_0 = arith.constant 0 : i32
    %c0_i32_1 = arith.constant 0 : i32
    return %c0_i32, %c0_i32_0 : i32, i32
  }
  func.func @transform_21(%arg0: i32) -> (i32, i32) {
    %c0_i32 = arith.constant 0 : i32
    %c0_i32_0 = arith.constant 0 : i32
    %c0_i32_1 = arith.constant 0 : i32
    return %c0_i32, %c0_i32_0 : i32, i32
  }
  func.func @transform_22(%arg0: i32) -> (i32, i32) {
    %c0_i32 = arith.constant 0 : i32
    %c0_i32_0 = arith.constant 0 : i32
    %c0_i32_1 = arith.constant 0 : i32
    return %c0_i32, %c0_i32_0 : i32, i32
  }
  func.func @transform_23(%arg0: i32) -> (i32, i32) {
    %c0_i32 = arith.constant 0 : i32
    %c0_i32_0 = arith.constant 0 : i32
    %c0_i32_1 = arith.constant 0 : i32
    return %c0_i32, %c0_i32_0 : i32, i32
  }
  func.func @transform_24(%arg0: i32) -> (i32, i32) {
    %c0_i32 = arith.constant 0 : i32
    %c0_i32_0 = arith.constant 0 : i32
    %c0_i32_1 = arith.constant 0 : i32
    return %c0_i32, %c0_i32_0 : i32, i32
  }
  func.func @transform_25(%arg0: i32) -> (i32, i32, i32) {
    %c0_i32 = arith.constant 0 : i32
    %c0_i32_0 = arith.constant 0 : i32
    %c0_i32_1 = arith.constant 0 : i32
    return %arg0, %c0_i32, %c0_i32_0 : i32, i32, i32
  }
}

module attributes {stable_mosaic.version = 11 : i64} {
  func.func @_ln_kernel(%arg0: i32, %arg1: memref<16x128xbf16, #tpu.memory_space<vmem>>, %arg2: memref<1x128xf32, #tpu.memory_space<vmem>>, %arg3: memref<1x128xf32, #tpu.memory_space<vmem>>, %arg4: memref<16x128xbf16, #tpu.memory_space<vmem>>) attributes {dimension_semantics = [#tpu.dimension_semantics<parallel>], iteration_bounds = array<i64: 1>, scalar_prefetch = 0 : i64, scratch_operands = 0 : i64, tpu.core_type = #tpu.core_type<tc>, window_params = [{transform_indices = @transform_0, window_bounds = array<i64: 16, 128>}, {pipeline_mode = #tpu.pipeline_mode<synchronous>, transform_indices = @transform_1, window_bounds = array<i64: 1, 128>}, {pipeline_mode = #tpu.pipeline_mode<synchronous>, transform_indices = @transform_2, window_bounds = array<i64: 1, 128>}, {transform_indices = @transform_3, window_bounds = array<i64: 16, 128>}]} {
    %c0 = arith.constant 0 : index
    %c0_0 = arith.constant 0 : index
    %0 = vector.load %arg1[%c0, %c0_0] : memref<16x128xbf16, #tpu.memory_space<vmem>>, vector<16x128xbf16>
    %1 = arith.extf %0 : vector<16x128xbf16> to vector<16x128xf32>
    %c0_1 = arith.constant 0 : index
    %c0_2 = arith.constant 0 : index
    %2 = vector.load %arg2[%c0_1, %c0_2] : memref<1x128xf32, #tpu.memory_space<vmem>>, vector<1x128xf32>
    %c0_3 = arith.constant 0 : index
    %c0_4 = arith.constant 0 : index
    %3 = vector.load %arg3[%c0_3, %c0_4] : memref<1x128xf32, #tpu.memory_space<vmem>>, vector<1x128xf32>
    %cst = arith.constant dense<0.000000e+00> : vector<16xf32>
    %4 = vector.multi_reduction <add>, %1, %cst [1] : vector<16x128xf32> to vector<16xf32>
    %5 = vector.shape_cast %4 : vector<16xf32> to vector<16x1xf32>
    %cst_5 = arith.constant 1.280000e+02 : f32
    %6 = vector.broadcast %cst_5 : f32 to vector<16x1xf32>
    %7 = arith.divf %5, %6 : vector<16x1xf32>
    %8 = vector.broadcast %7 : vector<16x1xf32> to vector<16x128xf32>
    %9 = arith.subf %1, %8 : vector<16x128xf32>
    %10 = arith.mulf %9, %9 : vector<16x128xf32>
    %cst_6 = arith.constant dense<0.000000e+00> : vector<16xf32>
    %11 = vector.multi_reduction <add>, %10, %cst_6 [1] : vector<16x128xf32> to vector<16xf32>
    %12 = vector.shape_cast %11 : vector<16xf32> to vector<16x1xf32>
    %cst_7 = arith.constant 1.280000e+02 : f32
    %13 = vector.broadcast %cst_7 : f32 to vector<16x1xf32>
    %14 = arith.divf %12, %13 : vector<16x1xf32>
    %cst_8 = arith.constant 9.99999974E-6 : f32
    %15 = vector.broadcast %cst_8 : f32 to vector<16x1xf32>
    %16 = arith.addf %14, %15 : vector<16x1xf32>
    %17 = math.rsqrt %16 : vector<16x1xf32>
    %18 = vector.broadcast %17 : vector<16x1xf32> to vector<16x128xf32>
    %19 = arith.mulf %9, %18 : vector<16x128xf32>
    %20 = vector.broadcast %2 : vector<1x128xf32> to vector<16x128xf32>
    %21 = arith.mulf %19, %20 : vector<16x128xf32>
    %22 = vector.broadcast %3 : vector<1x128xf32> to vector<16x128xf32>
    %23 = arith.addf %21, %22 : vector<16x128xf32>
    %24 = arith.truncf %23 : vector<16x128xf32> to vector<16x128xbf16>
    %c0_9 = arith.constant 0 : index
    %c0_10 = arith.constant 0 : index
    %25 = vector.load %arg4[%c0_9, %c0_10] : memref<16x128xbf16, #tpu.memory_space<vmem>>, vector<16x128xbf16>
    tpu.vector_store %arg4[%c0_9, %c0_10], %24 {strides = array<i32>} : memref<16x128xbf16, #tpu.memory_space<vmem>>, vector<16x128xbf16>,
    return
  }
  func.func @transform_0(%arg0: i32) -> (i32, i32) {
    %c0_i32 = arith.constant 0 : i32
    %c0_i32_0 = arith.constant 0 : i32
    return %arg0, %c0_i32 : i32, i32
  }
  func.func @transform_1(%arg0: i32) -> (i32, i32) {
    %c0_i32 = arith.constant 0 : i32
    %c0_i32_0 = arith.constant 0 : i32
    %c0_i32_1 = arith.constant 0 : i32
    return %c0_i32, %c0_i32_0 : i32, i32
  }
  func.func @transform_2(%arg0: i32) -> (i32, i32) {
    %c0_i32 = arith.constant 0 : i32
    %c0_i32_0 = arith.constant 0 : i32
    %c0_i32_1 = arith.constant 0 : i32
    return %c0_i32, %c0_i32_0 : i32, i32
  }
  func.func @transform_3(%arg0: i32) -> (i32, i32) {
    %c0_i32 = arith.constant 0 : i32
    %c0_i32_0 = arith.constant 0 : i32
    return %arg0, %c0_i32 : i32, i32
  }
}

module attributes {stable_mosaic.version = 11 : i64} {
  func.func @_enc_layer_kernel(%arg0: i32, %arg1: memref<2x8x128xbf16, #tpu.memory_space<vmem>>, %arg2: memref<2x1x8xf32, #tpu.memory_space<vmem>>, %arg3: memref<128x384xbf16, #tpu.memory_space<vmem>>, %arg4: memref<1x384xf32, #tpu.memory_space<vmem>>, %arg5: memref<128x128xbf16, #tpu.memory_space<vmem>>, %arg6: memref<1x128xf32, #tpu.memory_space<vmem>>, %arg7: memref<128x256xbf16, #tpu.memory_space<vmem>>, %arg8: memref<1x256xf32, #tpu.memory_space<vmem>>, %arg9: memref<256x128xbf16, #tpu.memory_space<vmem>>, %arg10: memref<1x128xf32, #tpu.memory_space<vmem>>, %arg11: memref<1x128xf32, #tpu.memory_space<vmem>>, %arg12: memref<1x128xf32, #tpu.memory_space<vmem>>, %arg13: memref<1x128xf32, #tpu.memory_space<vmem>>, %arg14: memref<1x128xf32, #tpu.memory_space<vmem>>, %arg15: memref<2x8x128xbf16, #tpu.memory_space<vmem>>) attributes {dimension_semantics = [#tpu.dimension_semantics<parallel>], iteration_bounds = array<i64: 1>, scalar_prefetch = 0 : i64, scratch_operands = 0 : i64, tpu.core_type = #tpu.core_type<tc>, window_params = [{transform_indices = @transform_0, window_bounds = array<i64: 2, 8, 128>}, {transform_indices = @transform_1, window_bounds = array<i64: 2, 1, 8>}, {pipeline_mode = #tpu.pipeline_mode<synchronous>, transform_indices = @transform_2, window_bounds = array<i64: 128, 384>}, {pipeline_mode = #tpu.pipeline_mode<synchronous>, transform_indices = @transform_3, window_bounds = array<i64: 1, 384>}, {pipeline_mode = #tpu.pipeline_mode<synchronous>, transform_indices = @transform_4, window_bounds = array<i64: 128, 128>}, {pipeline_mode = #tpu.pipeline_mode<synchronous>, transform_indices = @transform_5, window_bounds = array<i64: 1, 128>}, {pipeline_mode = #tpu.pipeline_mode<synchronous>, transform_indices = @transform_6, window_bounds = array<i64: 128, 256>}, {pipeline_mode = #tpu.pipeline_mode<synchronous>, transform_indices = @transform_7, window_bounds = array<i64: 1, 256>}, {pipeline_mode = #tpu.pipeline_mode<synchronous>, transform_indices = @transform_8, window_bounds = array<i64: 256, 128>}, {pipeline_mode = #tpu.pipeline_mode<synchronous>, transform_indices = @transform_9, window_bounds = array<i64: 1, 128>}, {pipeline_mode = #tpu.pipeline_mode<synchronous>, transform_indices = @transform_10, window_bounds = array<i64: 1, 128>}, {pipeline_mode = #tpu.pipeline_mode<synchronous>, transform_indices = @transform_11, window_bounds = array<i64: 1, 128>}, {pipeline_mode = #tpu.pipeline_mode<synchronous>, transform_indices = @transform_12, window_bounds = array<i64: 1, 128>}, {pipeline_mode = #tpu.pipeline_mode<synchronous>, transform_indices = @transform_13, window_bounds = array<i64: 1, 128>}, {transform_indices = @transform_14, window_bounds = array<i64: 2, 8, 128>}]} {
    %c0 = arith.constant 0 : index
    %c0_0 = arith.constant 0 : index
    %c0_1 = arith.constant 0 : index
    %0 = vector.load %arg1[%c0, %c0_0, %c0_1] : memref<2x8x128xbf16, #tpu.memory_space<vmem>>, vector<2x8x128xbf16>
    %1 = vector.shape_cast %0 : vector<2x8x128xbf16> to vector<16x128xbf16>
    %2 = arith.extf %1 : vector<16x128xbf16> to vector<16x128xf32>
    %c0_2 = arith.constant 0 : index
    %c0_3 = arith.constant 0 : index
    %3 = vector.load %arg3[%c0_2, %c0_3] : memref<128x384xbf16, #tpu.memory_space<vmem>>, vector<128x384xbf16>
    %cst = arith.constant dense<0.000000e+00> : vector<16x384xf32>
    %4 = tpu.matmul %1, %3, %cst {dimension_numbers = #tpu.dot_dimension_numbers<[1], [0], [0], [1], [0, 0, 1, 1], [], []>} : vector<16x128xbf16>, vector<128x384xbf16>, vector<16x384xf32> -> vector<16x384xf32>
    %c0_4 = arith.constant 0 : index
    %c0_5 = arith.constant 0 : index
    %5 = vector.load %arg4[%c0_4, %c0_5] : memref<1x384xf32, #tpu.memory_space<vmem>>, vector<1x384xf32>
    %6 = vector.broadcast %5 : vector<1x384xf32> to vector<16x384xf32>
    %7 = arith.addf %4, %6 : vector<16x384xf32>
    %8 = vector.extract_strided_slice %7 {offsets = [0, 0], sizes = [16, 128], strides = [1, 1]} : vector<16x384xf32> to vector<16x128xf32>
    %cst_6 = arith.constant 0.176776692 : f32
    %9 = vector.broadcast %cst_6 : f32 to vector<16x128xf32>
    %10 = arith.mulf %8, %9 : vector<16x128xf32>
    %11 = arith.truncf %10 : vector<16x128xf32> to vector<16x128xbf16>
    %12 = vector.extract_strided_slice %7 {offsets = [0, 128], sizes = [16, 128], strides = [1, 1]} : vector<16x384xf32> to vector<16x128xf32>
    %13 = arith.truncf %12 : vector<16x128xf32> to vector<16x128xbf16>
    %14 = vector.extract_strided_slice %7 {offsets = [0, 256], sizes = [16, 128], strides = [1, 1]} : vector<16x384xf32> to vector<16x128xf32>
    %15 = arith.truncf %14 : vector<16x128xf32> to vector<16x128xbf16>
    %16 = vector.extract_strided_slice %11 {offsets = [0, 0], sizes = [8, 128], strides = [1, 1]} : vector<16x128xbf16> to vector<8x128xbf16>
    %17 = vector.extract_strided_slice %13 {offsets = [0, 0], sizes = [8, 128], strides = [1, 1]} : vector<16x128xbf16> to vector<8x128xbf16>
    %18 = vector.extract_strided_slice %15 {offsets = [0, 0], sizes = [8, 128], strides = [1, 1]} : vector<16x128xbf16> to vector<8x128xbf16>
    %c0_7 = arith.constant 0 : index
    %c0_8 = arith.constant 0 : index
    %c0_9 = arith.constant 0 : index
    %19 = vector.load %arg2[%c0_7, %c0_8, %c0_9] : memref<2x1x8xf32, #tpu.memory_space<vmem>>, vector<1x1x8xf32>
    %20 = vector.shape_cast %19 : vector<1x1x8xf32> to vector<1x8xf32>
    %21 = vector.extract_strided_slice %16 {offsets = [0, 0], sizes = [8, 32], strides = [1, 1]} : vector<8x128xbf16> to vector<8x32xbf16>
    %22 = vector.extract_strided_slice %16 {offsets = [0, 32], sizes = [8, 32], strides = [1, 1]} : vector<8x128xbf16> to vector<8x32xbf16>
    %23 = vector.extract_strided_slice %16 {offsets = [0, 64], sizes = [8, 32], strides = [1, 1]} : vector<8x128xbf16> to vector<8x32xbf16>
    %24 = vector.extract_strided_slice %16 {offsets = [0, 96], sizes = [8, 32], strides = [1, 1]} : vector<8x128xbf16> to vector<8x32xbf16>
    %25 = vector.shape_cast %21 : vector<8x32xbf16> to vector<1x8x32xbf16>
    %26 = vector.shape_cast %22 : vector<8x32xbf16> to vector<1x8x32xbf16>
    %27 = vector.shape_cast %23 : vector<8x32xbf16> to vector<1x8x32xbf16>
    %28 = vector.shape_cast %24 : vector<8x32xbf16> to vector<1x8x32xbf16>
    %29 = tpu.concatenate %25, %26, %27, %28 in 0 : vector<1x8x32xbf16>, vector<1x8x32xbf16>, vector<1x8x32xbf16>, vector<1x8x32xbf16> -> vector<4x8x32xbf16>
    %30 = vector.extract_strided_slice %17 {offsets = [0, 0], sizes = [8, 32], strides = [1, 1]} : vector<8x128xbf16> to vector<8x32xbf16>
    %31 = vector.extract_strided_slice %17 {offsets = [0, 32], sizes = [8, 32], strides = [1, 1]} : vector<8x128xbf16> to vector<8x32xbf16>
    %32 = vector.extract_strided_slice %17 {offsets = [0, 64], sizes = [8, 32], strides = [1, 1]} : vector<8x128xbf16> to vector<8x32xbf16>
    %33 = vector.extract_strided_slice %17 {offsets = [0, 96], sizes = [8, 32], strides = [1, 1]} : vector<8x128xbf16> to vector<8x32xbf16>
    %34 = vector.shape_cast %30 : vector<8x32xbf16> to vector<1x8x32xbf16>
    %35 = vector.shape_cast %31 : vector<8x32xbf16> to vector<1x8x32xbf16>
    %36 = vector.shape_cast %32 : vector<8x32xbf16> to vector<1x8x32xbf16>
    %37 = vector.shape_cast %33 : vector<8x32xbf16> to vector<1x8x32xbf16>
    %38 = tpu.concatenate %34, %35, %36, %37 in 0 : vector<1x8x32xbf16>, vector<1x8x32xbf16>, vector<1x8x32xbf16>, vector<1x8x32xbf16> -> vector<4x8x32xbf16>
    %39 = vector.extract_strided_slice %18 {offsets = [0, 0], sizes = [8, 32], strides = [1, 1]} : vector<8x128xbf16> to vector<8x32xbf16>
    %40 = vector.extract_strided_slice %18 {offsets = [0, 32], sizes = [8, 32], strides = [1, 1]} : vector<8x128xbf16> to vector<8x32xbf16>
    %41 = vector.extract_strided_slice %18 {offsets = [0, 64], sizes = [8, 32], strides = [1, 1]} : vector<8x128xbf16> to vector<8x32xbf16>
    %42 = vector.extract_strided_slice %18 {offsets = [0, 96], sizes = [8, 32], strides = [1, 1]} : vector<8x128xbf16> to vector<8x32xbf16>
    %43 = vector.shape_cast %39 : vector<8x32xbf16> to vector<1x8x32xbf16>
    %44 = vector.shape_cast %40 : vector<8x32xbf16> to vector<1x8x32xbf16>
    %45 = vector.shape_cast %41 : vector<8x32xbf16> to vector<1x8x32xbf16>
    %46 = vector.shape_cast %42 : vector<8x32xbf16> to vector<1x8x32xbf16>
    %47 = tpu.concatenate %43, %44, %45, %46 in 0 : vector<1x8x32xbf16>, vector<1x8x32xbf16>, vector<1x8x32xbf16>, vector<1x8x32xbf16> -> vector<4x8x32xbf16>
    %cst_10 = arith.constant dense<0.000000e+00> : vector<4x8x8xf32>
    %48 = tpu.matmul %29, %38, %cst_10 {dimension_numbers = #tpu.dot_dimension_numbers<[2], [2], [1], [1], [0, 0, 0, 1, 1, 1], [0], [0]>} : vector<4x8x32xbf16>, vector<4x8x32xbf16>, vector<4x8x8xf32> -> vector<4x8x8xf32>
    %49 = vector.shape_cast %20 : vector<1x8xf32> to vector<1x1x8xf32>
    %50 = vector.broadcast %49 : vector<1x1x8xf32> to vector<4x8x8xf32>
    %51 = arith.addf %48, %50 : vector<4x8x8xf32>
    %cst_11 = arith.constant dense<0xFF800000> : vector<4x8xf32>
    %52 = vector.multi_reduction <maximumf>, %51, %cst_11 [2] : vector<4x8x8xf32> to vector<4x8xf32>
    %53 = vector.shape_cast %52 : vector<4x8xf32> to vector<4x8x1xf32>
    %54 = vector.broadcast %53 : vector<4x8x1xf32> to vector<4x8x8xf32>
    %55 = arith.subf %51, %54 : vector<4x8x8xf32>
    %56 = math.exp %55 : vector<4x8x8xf32>
    %cst_12 = arith.constant dense<0.000000e+00> : vector<4x8xf32>
    %57 = vector.multi_reduction <add>, %56, %cst_12 [2] : vector<4x8x8xf32> to vector<4x8xf32>
    %58 = vector.shape_cast %57 : vector<4x8xf32> to vector<4x8x1xf32>
    %59 = tpu.reciprocal %58 {approx = true} : vector<4x8x1xf32> -> vector<4x8x1xf32>
    %60 = arith.truncf %56 : vector<4x8x8xf32> to vector<4x8x8xbf16>
    %cst_13 = arith.constant dense<0.000000e+00> : vector<4x8x32xf32>
    %61 = tpu.matmul %60, %47, %cst_13 {dimension_numbers = #tpu.dot_dimension_numbers<[2], [1], [1], [2], [0, 0, 0, 1, 1, 2], [0], [0]>} : vector<4x8x8xbf16>, vector<4x8x32xbf16>, vector<4x8x32xf32> -> vector<4x8x32xf32>
    %62 = vector.broadcast %59 : vector<4x8x1xf32> to vector<4x8x32xf32>
    %63 = arith.mulf %61, %62 : vector<4x8x32xf32>
    %64 = vector.extract_strided_slice %63 {offsets = [0, 0, 0], sizes = [1, 8, 32], strides = [1, 1, 1]} : vector<4x8x32xf32> to vector<1x8x32xf32>
    %65 = vector.shape_cast %64 : vector<1x8x32xf32> to vector<8x32xf32>
    %66 = vector.extract_strided_slice %63 {offsets = [1, 0, 0], sizes = [1, 8, 32], strides = [1, 1, 1]} : vector<4x8x32xf32> to vector<1x8x32xf32>
    %67 = vector.shape_cast %66 : vector<1x8x32xf32> to vector<8x32xf32>
    %68 = vector.extract_strided_slice %63 {offsets = [2, 0, 0], sizes = [1, 8, 32], strides = [1, 1, 1]} : vector<4x8x32xf32> to vector<1x8x32xf32>
    %69 = vector.shape_cast %68 : vector<1x8x32xf32> to vector<8x32xf32>
    %70 = vector.extract_strided_slice %63 {offsets = [3, 0, 0], sizes = [1, 8, 32], strides = [1, 1, 1]} : vector<4x8x32xf32> to vector<1x8x32xf32>
    %71 = vector.shape_cast %70 : vector<1x8x32xf32> to vector<8x32xf32>
    %72 = tpu.concatenate %65, %67, %69, %71 in 1 : vector<8x32xf32>, vector<8x32xf32>, vector<8x32xf32>, vector<8x32xf32> -> vector<8x128xf32>
    %73 = vector.extract_strided_slice %11 {offsets = [8, 0], sizes = [8, 128], strides = [1, 1]} : vector<16x128xbf16> to vector<8x128xbf16>
    %74 = vector.extract_strided_slice %13 {offsets = [8, 0], sizes = [8, 128], strides = [1, 1]} : vector<16x128xbf16> to vector<8x128xbf16>
    %75 = vector.extract_strided_slice %15 {offsets = [8, 0], sizes = [8, 128], strides = [1, 1]} : vector<16x128xbf16> to vector<8x128xbf16>
    %c1 = arith.constant 1 : index
    %c0_14 = arith.constant 0 : index
    %c0_15 = arith.constant 0 : index
    %76 = vector.load %arg2[%c1, %c0_14, %c0_15] : memref<2x1x8xf32, #tpu.memory_space<vmem>>, vector<1x1x8xf32>
    %77 = vector.shape_cast %76 : vector<1x1x8xf32> to vector<1x8xf32>
    %78 = vector.extract_strided_slice %73 {offsets = [0, 0], sizes = [8, 32], strides = [1, 1]} : vector<8x128xbf16> to vector<8x32xbf16>
    %79 = vector.extract_strided_slice %73 {offsets = [0, 32], sizes = [8, 32], strides = [1, 1]} : vector<8x128xbf16> to vector<8x32xbf16>
    %80 = vector.extract_strided_slice %73 {offsets = [0, 64], sizes = [8, 32], strides = [1, 1]} : vector<8x128xbf16> to vector<8x32xbf16>
    %81 = vector.extract_strided_slice %73 {offsets = [0, 96], sizes = [8, 32], strides = [1, 1]} : vector<8x128xbf16> to vector<8x32xbf16>
    %82 = vector.shape_cast %78 : vector<8x32xbf16> to vector<1x8x32xbf16>
    %83 = vector.shape_cast %79 : vector<8x32xbf16> to vector<1x8x32xbf16>
    %84 = vector.shape_cast %80 : vector<8x32xbf16> to vector<1x8x32xbf16>
    %85 = vector.shape_cast %81 : vector<8x32xbf16> to vector<1x8x32xbf16>
    %86 = tpu.concatenate %82, %83, %84, %85 in 0 : vector<1x8x32xbf16>, vector<1x8x32xbf16>, vector<1x8x32xbf16>, vector<1x8x32xbf16> -> vector<4x8x32xbf16>
    %87 = vector.extract_strided_slice %74 {offsets = [0, 0], sizes = [8, 32], strides = [1, 1]} : vector<8x128xbf16> to vector<8x32xbf16>
    %88 = vector.extract_strided_slice %74 {offsets = [0, 32], sizes = [8, 32], strides = [1, 1]} : vector<8x128xbf16> to vector<8x32xbf16>
    %89 = vector.extract_strided_slice %74 {offsets = [0, 64], sizes = [8, 32], strides = [1, 1]} : vector<8x128xbf16> to vector<8x32xbf16>
    %90 = vector.extract_strided_slice %74 {offsets = [0, 96], sizes = [8, 32], strides = [1, 1]} : vector<8x128xbf16> to vector<8x32xbf16>
    %91 = vector.shape_cast %87 : vector<8x32xbf16> to vector<1x8x32xbf16>
    %92 = vector.shape_cast %88 : vector<8x32xbf16> to vector<1x8x32xbf16>
    %93 = vector.shape_cast %89 : vector<8x32xbf16> to vector<1x8x32xbf16>
    %94 = vector.shape_cast %90 : vector<8x32xbf16> to vector<1x8x32xbf16>
    %95 = tpu.concatenate %91, %92, %93, %94 in 0 : vector<1x8x32xbf16>, vector<1x8x32xbf16>, vector<1x8x32xbf16>, vector<1x8x32xbf16> -> vector<4x8x32xbf16>
    %96 = vector.extract_strided_slice %75 {offsets = [0, 0], sizes = [8, 32], strides = [1, 1]} : vector<8x128xbf16> to vector<8x32xbf16>
    %97 = vector.extract_strided_slice %75 {offsets = [0, 32], sizes = [8, 32], strides = [1, 1]} : vector<8x128xbf16> to vector<8x32xbf16>
    %98 = vector.extract_strided_slice %75 {offsets = [0, 64], sizes = [8, 32], strides = [1, 1]} : vector<8x128xbf16> to vector<8x32xbf16>
    %99 = vector.extract_strided_slice %75 {offsets = [0, 96], sizes = [8, 32], strides = [1, 1]} : vector<8x128xbf16> to vector<8x32xbf16>
    %100 = vector.shape_cast %96 : vector<8x32xbf16> to vector<1x8x32xbf16>
    %101 = vector.shape_cast %97 : vector<8x32xbf16> to vector<1x8x32xbf16>
    %102 = vector.shape_cast %98 : vector<8x32xbf16> to vector<1x8x32xbf16>
    %103 = vector.shape_cast %99 : vector<8x32xbf16> to vector<1x8x32xbf16>
    %104 = tpu.concatenate %100, %101, %102, %103 in 0 : vector<1x8x32xbf16>, vector<1x8x32xbf16>, vector<1x8x32xbf16>, vector<1x8x32xbf16> -> vector<4x8x32xbf16>
    %cst_16 = arith.constant dense<0.000000e+00> : vector<4x8x8xf32>
    %105 = tpu.matmul %86, %95, %cst_16 {dimension_numbers = #tpu.dot_dimension_numbers<[2], [2], [1], [1], [0, 0, 0, 1, 1, 1], [0], [0]>} : vector<4x8x32xbf16>, vector<4x8x32xbf16>, vector<4x8x8xf32> -> vector<4x8x8xf32>
    %106 = vector.shape_cast %77 : vector<1x8xf32> to vector<1x1x8xf32>
    %107 = vector.broadcast %106 : vector<1x1x8xf32> to vector<4x8x8xf32>
    %108 = arith.addf %105, %107 : vector<4x8x8xf32>
    %cst_17 = arith.constant dense<0xFF800000> : vector<4x8xf32>
    %109 = vector.multi_reduction <maximumf>, %108, %cst_17 [2] : vector<4x8x8xf32> to vector<4x8xf32>
    %110 = vector.shape_cast %109 : vector<4x8xf32> to vector<4x8x1xf32>
    %111 = vector.broadcast %110 : vector<4x8x1xf32> to vector<4x8x8xf32>
    %112 = arith.subf %108, %111 : vector<4x8x8xf32>
    %113 = math.exp %112 : vector<4x8x8xf32>
    %cst_18 = arith.constant dense<0.000000e+00> : vector<4x8xf32>
    %114 = vector.multi_reduction <add>, %113, %cst_18 [2] : vector<4x8x8xf32> to vector<4x8xf32>
    %115 = vector.shape_cast %114 : vector<4x8xf32> to vector<4x8x1xf32>
    %116 = tpu.reciprocal %115 {approx = true} : vector<4x8x1xf32> -> vector<4x8x1xf32>
    %117 = arith.truncf %113 : vector<4x8x8xf32> to vector<4x8x8xbf16>
    %cst_19 = arith.constant dense<0.000000e+00> : vector<4x8x32xf32>
    %118 = tpu.matmul %117, %104, %cst_19 {dimension_numbers = #tpu.dot_dimension_numbers<[2], [1], [1], [2], [0, 0, 0, 1, 1, 2], [0], [0]>} : vector<4x8x8xbf16>, vector<4x8x32xbf16>, vector<4x8x32xf32> -> vector<4x8x32xf32>
    %119 = vector.broadcast %116 : vector<4x8x1xf32> to vector<4x8x32xf32>
    %120 = arith.mulf %118, %119 : vector<4x8x32xf32>
    %121 = vector.extract_strided_slice %120 {offsets = [0, 0, 0], sizes = [1, 8, 32], strides = [1, 1, 1]} : vector<4x8x32xf32> to vector<1x8x32xf32>
    %122 = vector.shape_cast %121 : vector<1x8x32xf32> to vector<8x32xf32>
    %123 = vector.extract_strided_slice %120 {offsets = [1, 0, 0], sizes = [1, 8, 32], strides = [1, 1, 1]} : vector<4x8x32xf32> to vector<1x8x32xf32>
    %124 = vector.shape_cast %123 : vector<1x8x32xf32> to vector<8x32xf32>
    %125 = vector.extract_strided_slice %120 {offsets = [2, 0, 0], sizes = [1, 8, 32], strides = [1, 1, 1]} : vector<4x8x32xf32> to vector<1x8x32xf32>
    %126 = vector.shape_cast %125 : vector<1x8x32xf32> to vector<8x32xf32>
    %127 = vector.extract_strided_slice %120 {offsets = [3, 0, 0], sizes = [1, 8, 32], strides = [1, 1, 1]} : vector<4x8x32xf32> to vector<1x8x32xf32>
    %128 = vector.shape_cast %127 : vector<1x8x32xf32> to vector<8x32xf32>
    %129 = tpu.concatenate %122, %124, %126, %128 in 1 : vector<8x32xf32>, vector<8x32xf32>, vector<8x32xf32>, vector<8x32xf32> -> vector<8x128xf32>
    %130 = tpu.concatenate %72, %129 in 0 : vector<8x128xf32>, vector<8x128xf32> -> vector<16x128xf32>
    %131 = arith.truncf %130 : vector<16x128xf32> to vector<16x128xbf16>
    %c0_20 = arith.constant 0 : index
    %c0_21 = arith.constant 0 : index
    %132 = vector.load %arg5[%c0_20, %c0_21] : memref<128x128xbf16, #tpu.memory_space<vmem>>, vector<128x128xbf16>
    %cst_22 = arith.constant dense<0.000000e+00> : vector<16x128xf32>
    %133 = tpu.matmul %131, %132, %cst_22 {dimension_numbers = #tpu.dot_dimension_numbers<[1], [0], [0], [1], [0, 0, 1, 1], [], []>} : vector<16x128xbf16>, vector<128x128xbf16>, vector<16x128xf32> -> vector<16x128xf32>
    %c0_23 = arith.constant 0 : index
    %c0_24 = arith.constant 0 : index
    %134 = vector.load %arg6[%c0_23, %c0_24] : memref<1x128xf32, #tpu.memory_space<vmem>>, vector<1x128xf32>
    %135 = vector.broadcast %134 : vector<1x128xf32> to vector<16x128xf32>
    %136 = arith.addf %133, %135 : vector<16x128xf32>
    %137 = arith.addf %2, %136 : vector<16x128xf32>
    %c0_25 = arith.constant 0 : index
    %c0_26 = arith.constant 0 : index
    %138 = vector.load %arg11[%c0_25, %c0_26] : memref<1x128xf32, #tpu.memory_space<vmem>>, vector<1x128xf32>
    %c0_27 = arith.constant 0 : index
    %c0_28 = arith.constant 0 : index
    %139 = vector.load %arg12[%c0_27, %c0_28] : memref<1x128xf32, #tpu.memory_space<vmem>>, vector<1x128xf32>
    %cst_29 = arith.constant dense<0.000000e+00> : vector<16xf32>
    %140 = vector.multi_reduction <add>, %137, %cst_29 [1] : vector<16x128xf32> to vector<16xf32>
    %141 = vector.shape_cast %140 : vector<16xf32> to vector<16x1xf32>
    %cst_30 = arith.constant 1.280000e+02 : f32
    %142 = vector.broadcast %cst_30 : f32 to vector<16x1xf32>
    %143 = arith.divf %141, %142 : vector<16x1xf32>
    %144 = vector.broadcast %143 : vector<16x1xf32> to vector<16x128xf32>
    %145 = arith.subf %137, %144 : vector<16x128xf32>
    %146 = arith.mulf %145, %145 : vector<16x128xf32>
    %cst_31 = arith.constant dense<0.000000e+00> : vector<16xf32>
    %147 = vector.multi_reduction <add>, %146, %cst_31 [1] : vector<16x128xf32> to vector<16xf32>
    %148 = vector.shape_cast %147 : vector<16xf32> to vector<16x1xf32>
    %cst_32 = arith.constant 1.280000e+02 : f32
    %149 = vector.broadcast %cst_32 : f32 to vector<16x1xf32>
    %150 = arith.divf %148, %149 : vector<16x1xf32>
    %cst_33 = arith.constant 9.99999974E-6 : f32
    %151 = vector.broadcast %cst_33 : f32 to vector<16x1xf32>
    %152 = arith.addf %150, %151 : vector<16x1xf32>
    %153 = math.rsqrt %152 : vector<16x1xf32>
    %154 = vector.broadcast %153 : vector<16x1xf32> to vector<16x128xf32>
    %155 = arith.mulf %145, %154 : vector<16x128xf32>
    %156 = vector.broadcast %138 : vector<1x128xf32> to vector<16x128xf32>
    %157 = arith.mulf %155, %156 : vector<16x128xf32>
    %158 = vector.broadcast %139 : vector<1x128xf32> to vector<16x128xf32>
    %159 = arith.addf %157, %158 : vector<16x128xf32>
    %160 = arith.truncf %159 : vector<16x128xf32> to vector<16x128xbf16>
    %c0_34 = arith.constant 0 : index
    %c0_35 = arith.constant 0 : index
    %161 = vector.load %arg7[%c0_34, %c0_35] : memref<128x256xbf16, #tpu.memory_space<vmem>>, vector<128x256xbf16>
    %cst_36 = arith.constant dense<0.000000e+00> : vector<16x256xf32>
    %162 = tpu.matmul %160, %161, %cst_36 {dimension_numbers = #tpu.dot_dimension_numbers<[1], [0], [0], [1], [0, 0, 1, 1], [], []>} : vector<16x128xbf16>, vector<128x256xbf16>, vector<16x256xf32> -> vector<16x256xf32>
    %c0_37 = arith.constant 0 : index
    %c0_38 = arith.constant 0 : index
    %163 = vector.load %arg8[%c0_37, %c0_38] : memref<1x256xf32, #tpu.memory_space<vmem>>, vector<1x256xf32>
    %164 = vector.broadcast %163 : vector<1x256xf32> to vector<16x256xf32>
    %165 = arith.addf %162, %164 : vector<16x256xf32>
    %cst_39 = arith.constant 0.000000e+00 : f32
    %166 = vector.broadcast %cst_39 : f32 to vector<16x256xf32>
    %167 = arith.maximumf %165, %166 : vector<16x256xf32>
    %168 = arith.truncf %167 : vector<16x256xf32> to vector<16x256xbf16>
    %c0_40 = arith.constant 0 : index
    %c0_41 = arith.constant 0 : index
    %169 = vector.load %arg9[%c0_40, %c0_41] : memref<256x128xbf16, #tpu.memory_space<vmem>>, vector<256x128xbf16>
    %cst_42 = arith.constant dense<0.000000e+00> : vector<16x128xf32>
    %170 = tpu.matmul %168, %169, %cst_42 {dimension_numbers = #tpu.dot_dimension_numbers<[1], [0], [0], [1], [0, 0, 1, 1], [], []>} : vector<16x256xbf16>, vector<256x128xbf16>, vector<16x128xf32> -> vector<16x128xf32>
    %c0_43 = arith.constant 0 : index
    %c0_44 = arith.constant 0 : index
    %171 = vector.load %arg10[%c0_43, %c0_44] : memref<1x128xf32, #tpu.memory_space<vmem>>, vector<1x128xf32>
    %172 = vector.broadcast %171 : vector<1x128xf32> to vector<16x128xf32>
    %173 = arith.addf %170, %172 : vector<16x128xf32>
    %174 = arith.addf %159, %173 : vector<16x128xf32>
    %c0_45 = arith.constant 0 : index
    %c0_46 = arith.constant 0 : index
    %175 = vector.load %arg13[%c0_45, %c0_46] : memref<1x128xf32, #tpu.memory_space<vmem>>, vector<1x128xf32>
    %c0_47 = arith.constant 0 : index
    %c0_48 = arith.constant 0 : index
    %176 = vector.load %arg14[%c0_47, %c0_48] : memref<1x128xf32, #tpu.memory_space<vmem>>, vector<1x128xf32>
    %cst_49 = arith.constant dense<0.000000e+00> : vector<16xf32>
    %177 = vector.multi_reduction <add>, %174, %cst_49 [1] : vector<16x128xf32> to vector<16xf32>
    %178 = vector.shape_cast %177 : vector<16xf32> to vector<16x1xf32>
    %cst_50 = arith.constant 1.280000e+02 : f32
    %179 = vector.broadcast %cst_50 : f32 to vector<16x1xf32>
    %180 = arith.divf %178, %179 : vector<16x1xf32>
    %181 = vector.broadcast %180 : vector<16x1xf32> to vector<16x128xf32>
    %182 = arith.subf %174, %181 : vector<16x128xf32>
    %183 = arith.mulf %182, %182 : vector<16x128xf32>
    %cst_51 = arith.constant dense<0.000000e+00> : vector<16xf32>
    %184 = vector.multi_reduction <add>, %183, %cst_51 [1] : vector<16x128xf32> to vector<16xf32>
    %185 = vector.shape_cast %184 : vector<16xf32> to vector<16x1xf32>
    %cst_52 = arith.constant 1.280000e+02 : f32
    %186 = vector.broadcast %cst_52 : f32 to vector<16x1xf32>
    %187 = arith.divf %185, %186 : vector<16x1xf32>
    %cst_53 = arith.constant 9.99999974E-6 : f32
    %188 = vector.broadcast %cst_53 : f32 to vector<16x1xf32>
    %189 = arith.addf %187, %188 : vector<16x1xf32>
    %190 = math.rsqrt %189 : vector<16x1xf32>
    %191 = vector.broadcast %190 : vector<16x1xf32> to vector<16x128xf32>
    %192 = arith.mulf %182, %191 : vector<16x128xf32>
    %193 = vector.broadcast %175 : vector<1x128xf32> to vector<16x128xf32>
    %194 = arith.mulf %192, %193 : vector<16x128xf32>
    %195 = vector.broadcast %176 : vector<1x128xf32> to vector<16x128xf32>
    %196 = arith.addf %194, %195 : vector<16x128xf32>
    %197 = vector.shape_cast %196 : vector<16x128xf32> to vector<2x8x128xf32>
    %198 = arith.truncf %197 : vector<2x8x128xf32> to vector<2x8x128xbf16>
    %c0_54 = arith.constant 0 : index
    %c0_55 = arith.constant 0 : index
    %c0_56 = arith.constant 0 : index
    %199 = vector.load %arg15[%c0_54, %c0_55, %c0_56] : memref<2x8x128xbf16, #tpu.memory_space<vmem>>, vector<2x8x128xbf16>
    tpu.vector_store %arg15[%c0_54, %c0_55, %c0_56], %198 {strides = array<i32>} : memref<2x8x128xbf16, #tpu.memory_space<vmem>>, vector<2x8x128xbf16>,
    return
  }
  func.func @transform_0(%arg0: i32) -> (i32, i32, i32) {
    %c0_i32 = arith.constant 0 : i32
    %c0_i32_0 = arith.constant 0 : i32
    %c0_i32_1 = arith.constant 0 : i32
    return %arg0, %c0_i32, %c0_i32_0 : i32, i32, i32
  }
  func.func @transform_1(%arg0: i32) -> (i32, i32, i32) {
    %c0_i32 = arith.constant 0 : i32
    %c0_i32_0 = arith.constant 0 : i32
    %c0_i32_1 = arith.constant 0 : i32
    return %arg0, %c0_i32, %c0_i32_0 : i32, i32, i32
  }
  func.func @transform_2(%arg0: i32) -> (i32, i32) {
    %c0_i32 = arith.constant 0 : i32
    %c0_i32_0 = arith.constant 0 : i32
    %c0_i32_1 = arith.constant 0 : i32
    return %c0_i32, %c0_i32_0 : i32, i32
  }
  func.func @transform_3(%arg0: i32) -> (i32, i32) {
    %c0_i32 = arith.constant 0 : i32
    %c0_i32_0 = arith.constant 0 : i32
    %c0_i32_1 = arith.constant 0 : i32
    return %c0_i32, %c0_i32_0 : i32, i32
  }
  func.func @transform_4(%arg0: i32) -> (i32, i32) {
    %c0_i32 = arith.constant 0 : i32
    %c0_i32_0 = arith.constant 0 : i32
    %c0_i32_1 = arith.constant 0 : i32
    return %c0_i32, %c0_i32_0 : i32, i32
  }
  func.func @transform_5(%arg0: i32) -> (i32, i32) {
    %c0_i32 = arith.constant 0 : i32
    %c0_i32_0 = arith.constant 0 : i32
    %c0_i32_1 = arith.constant 0 : i32
    return %c0_i32, %c0_i32_0 : i32, i32
  }
  func.func @transform_6(%arg0: i32) -> (i32, i32) {
    %c0_i32 = arith.constant 0 : i32
    %c0_i32_0 = arith.constant 0 : i32
    %c0_i32_1 = arith.constant 0 : i32
    return %c0_i32, %c0_i32_0 : i32, i32
  }
  func.func @transform_7(%arg0: i32) -> (i32, i32) {
    %c0_i32 = arith.constant 0 : i32
    %c0_i32_0 = arith.constant 0 : i32
    %c0_i32_1 = arith.constant 0 : i32
    return %c0_i32, %c0_i32_0 : i32, i32
  }
  func.func @transform_8(%arg0: i32) -> (i32, i32) {
    %c0_i32 = arith.constant 0 : i32
    %c0_i32_0 = arith.constant 0 : i32
    %c0_i32_1 = arith.constant 0 : i32
    return %c0_i32, %c0_i32_0 : i32, i32
  }
  func.func @transform_9(%arg0: i32) -> (i32, i32) {
    %c0_i32 = arith.constant 0 : i32
    %c0_i32_0 = arith.constant 0 : i32
    %c0_i32_1 = arith.constant 0 : i32
    return %c0_i32, %c0_i32_0 : i32, i32
  }
  func.func @transform_10(%arg0: i32) -> (i32, i32) {
    %c0_i32 = arith.constant 0 : i32
    %c0_i32_0 = arith.constant 0 : i32
    %c0_i32_1 = arith.constant 0 : i32
    return %c0_i32, %c0_i32_0 : i32, i32
  }
  func.func @transform_11(%arg0: i32) -> (i32, i32) {
    %c0_i32 = arith.constant 0 : i32
    %c0_i32_0 = arith.constant 0 : i32
    %c0_i32_1 = arith.constant 0 : i32
    return %c0_i32, %c0_i32_0 : i32, i32
  }
  func.func @transform_12(%arg0: i32) -> (i32, i32) {
    %c0_i32 = arith.constant 0 : i32
    %c0_i32_0 = arith.constant 0 : i32
    %c0_i32_1 = arith.constant 0 : i32
    return %c0_i32, %c0_i32_0 : i32, i32
  }
  func.func @transform_13(%arg0: i32) -> (i32, i32) {
    %c0_i32 = arith.constant 0 : i32
    %c0_i32_0 = arith.constant 0 : i32
    %c0_i32_1 = arith.constant 0 : i32
    return %c0_i32, %c0_i32_0 : i32, i32
  }
  func.func @transform_14(%arg0: i32) -> (i32, i32, i32) {
    %c0_i32 = arith.constant 0 : i32
    %c0_i32_0 = arith.constant 0 : i32
    %c0_i32_1 = arith.constant 0 : i32
    return %arg0, %c0_i32, %c0_i32_0 : i32, i32, i32
  }
}

module attributes {stable_mosaic.version = 11 : i64} {
  func.func @_enc_layer_kernel(%arg0: i32, %arg1: memref<2x8x128xbf16, #tpu.memory_space<vmem>>, %arg2: memref<2x1x8xf32, #tpu.memory_space<vmem>>, %arg3: memref<128x384xbf16, #tpu.memory_space<vmem>>, %arg4: memref<1x384xf32, #tpu.memory_space<vmem>>, %arg5: memref<128x128xbf16, #tpu.memory_space<vmem>>, %arg6: memref<1x128xf32, #tpu.memory_space<vmem>>, %arg7: memref<128x256xbf16, #tpu.memory_space<vmem>>, %arg8: memref<1x256xf32, #tpu.memory_space<vmem>>, %arg9: memref<256x128xbf16, #tpu.memory_space<vmem>>, %arg10: memref<1x128xf32, #tpu.memory_space<vmem>>, %arg11: memref<1x128xf32, #tpu.memory_space<vmem>>, %arg12: memref<1x128xf32, #tpu.memory_space<vmem>>, %arg13: memref<1x128xf32, #tpu.memory_space<vmem>>, %arg14: memref<1x128xf32, #tpu.memory_space<vmem>>, %arg15: memref<2x8x128xbf16, #tpu.memory_space<vmem>>) attributes {dimension_semantics = [#tpu.dimension_semantics<parallel>], iteration_bounds = array<i64: 1>, scalar_prefetch = 0 : i64, scratch_operands = 0 : i64, tpu.core_type = #tpu.core_type<tc>, window_params = [{transform_indices = @transform_0, window_bounds = array<i64: 2, 8, 128>}, {transform_indices = @transform_1, window_bounds = array<i64: 2, 1, 8>}, {pipeline_mode = #tpu.pipeline_mode<synchronous>, transform_indices = @transform_2, window_bounds = array<i64: 128, 384>}, {pipeline_mode = #tpu.pipeline_mode<synchronous>, transform_indices = @transform_3, window_bounds = array<i64: 1, 384>}, {pipeline_mode = #tpu.pipeline_mode<synchronous>, transform_indices = @transform_4, window_bounds = array<i64: 128, 128>}, {pipeline_mode = #tpu.pipeline_mode<synchronous>, transform_indices = @transform_5, window_bounds = array<i64: 1, 128>}, {pipeline_mode = #tpu.pipeline_mode<synchronous>, transform_indices = @transform_6, window_bounds = array<i64: 128, 256>}, {pipeline_mode = #tpu.pipeline_mode<synchronous>, transform_indices = @transform_7, window_bounds = array<i64: 1, 256>}, {pipeline_mode = #tpu.pipeline_mode<synchronous>, transform_indices = @transform_8, window_bounds = array<i64: 256, 128>}, {pipeline_mode = #tpu.pipeline_mode<synchronous>, transform_indices = @transform_9, window_bounds = array<i64: 1, 128>}, {pipeline_mode = #tpu.pipeline_mode<synchronous>, transform_indices = @transform_10, window_bounds = array<i64: 1, 128>}, {pipeline_mode = #tpu.pipeline_mode<synchronous>, transform_indices = @transform_11, window_bounds = array<i64: 1, 128>}, {pipeline_mode = #tpu.pipeline_mode<synchronous>, transform_indices = @transform_12, window_bounds = array<i64: 1, 128>}, {pipeline_mode = #tpu.pipeline_mode<synchronous>, transform_indices = @transform_13, window_bounds = array<i64: 1, 128>}, {transform_indices = @transform_14, window_bounds = array<i64: 2, 8, 128>}]} {
    %c0 = arith.constant 0 : index
    %c0_0 = arith.constant 0 : index
    %c0_1 = arith.constant 0 : index
    %0 = vector.load %arg1[%c0, %c0_0, %c0_1] : memref<2x8x128xbf16, #tpu.memory_space<vmem>>, vector<2x8x128xbf16>
    %1 = vector.shape_cast %0 : vector<2x8x128xbf16> to vector<16x128xbf16>
    %2 = arith.extf %1 : vector<16x128xbf16> to vector<16x128xf32>
    %c0_2 = arith.constant 0 : index
    %c0_3 = arith.constant 0 : index
    %3 = vector.load %arg3[%c0_2, %c0_3] : memref<128x384xbf16, #tpu.memory_space<vmem>>, vector<128x384xbf16>
    %cst = arith.constant dense<0.000000e+00> : vector<16x384xf32>
    %4 = tpu.matmul %1, %3, %cst {dimension_numbers = #tpu.dot_dimension_numbers<[1], [0], [0], [1], [0, 0, 1, 1], [], []>} : vector<16x128xbf16>, vector<128x384xbf16>, vector<16x384xf32> -> vector<16x384xf32>
    %c0_4 = arith.constant 0 : index
    %c0_5 = arith.constant 0 : index
    %5 = vector.load %arg4[%c0_4, %c0_5] : memref<1x384xf32, #tpu.memory_space<vmem>>, vector<1x384xf32>
    %6 = vector.broadcast %5 : vector<1x384xf32> to vector<16x384xf32>
    %7 = arith.addf %4, %6 : vector<16x384xf32>
    %8 = vector.extract_strided_slice %7 {offsets = [0, 0], sizes = [16, 128], strides = [1, 1]} : vector<16x384xf32> to vector<16x128xf32>
    %cst_6 = arith.constant 0.176776692 : f32
    %9 = vector.broadcast %cst_6 : f32 to vector<16x128xf32>
    %10 = arith.mulf %8, %9 : vector<16x128xf32>
    %11 = arith.truncf %10 : vector<16x128xf32> to vector<16x128xbf16>
    %12 = vector.extract_strided_slice %7 {offsets = [0, 128], sizes = [16, 128], strides = [1, 1]} : vector<16x384xf32> to vector<16x128xf32>
    %13 = arith.truncf %12 : vector<16x128xf32> to vector<16x128xbf16>
    %14 = vector.extract_strided_slice %7 {offsets = [0, 256], sizes = [16, 128], strides = [1, 1]} : vector<16x384xf32> to vector<16x128xf32>
    %15 = arith.truncf %14 : vector<16x128xf32> to vector<16x128xbf16>
    %16 = vector.extract_strided_slice %11 {offsets = [0, 0], sizes = [8, 128], strides = [1, 1]} : vector<16x128xbf16> to vector<8x128xbf16>
    %17 = vector.extract_strided_slice %13 {offsets = [0, 0], sizes = [8, 128], strides = [1, 1]} : vector<16x128xbf16> to vector<8x128xbf16>
    %18 = vector.extract_strided_slice %15 {offsets = [0, 0], sizes = [8, 128], strides = [1, 1]} : vector<16x128xbf16> to vector<8x128xbf16>
    %c0_7 = arith.constant 0 : index
    %c0_8 = arith.constant 0 : index
    %c0_9 = arith.constant 0 : index
    %19 = vector.load %arg2[%c0_7, %c0_8, %c0_9] : memref<2x1x8xf32, #tpu.memory_space<vmem>>, vector<1x1x8xf32>
    %20 = vector.shape_cast %19 : vector<1x1x8xf32> to vector<1x8xf32>
    %21 = vector.extract_strided_slice %16 {offsets = [0, 0], sizes = [8, 32], strides = [1, 1]} : vector<8x128xbf16> to vector<8x32xbf16>
    %22 = vector.extract_strided_slice %16 {offsets = [0, 32], sizes = [8, 32], strides = [1, 1]} : vector<8x128xbf16> to vector<8x32xbf16>
    %23 = vector.extract_strided_slice %16 {offsets = [0, 64], sizes = [8, 32], strides = [1, 1]} : vector<8x128xbf16> to vector<8x32xbf16>
    %24 = vector.extract_strided_slice %16 {offsets = [0, 96], sizes = [8, 32], strides = [1, 1]} : vector<8x128xbf16> to vector<8x32xbf16>
    %25 = vector.shape_cast %21 : vector<8x32xbf16> to vector<1x8x32xbf16>
    %26 = vector.shape_cast %22 : vector<8x32xbf16> to vector<1x8x32xbf16>
    %27 = vector.shape_cast %23 : vector<8x32xbf16> to vector<1x8x32xbf16>
    %28 = vector.shape_cast %24 : vector<8x32xbf16> to vector<1x8x32xbf16>
    %29 = tpu.concatenate %25, %26, %27, %28 in 0 : vector<1x8x32xbf16>, vector<1x8x32xbf16>, vector<1x8x32xbf16>, vector<1x8x32xbf16> -> vector<4x8x32xbf16>
    %30 = vector.extract_strided_slice %17 {offsets = [0, 0], sizes = [8, 32], strides = [1, 1]} : vector<8x128xbf16> to vector<8x32xbf16>
    %31 = vector.extract_strided_slice %17 {offsets = [0, 32], sizes = [8, 32], strides = [1, 1]} : vector<8x128xbf16> to vector<8x32xbf16>
    %32 = vector.extract_strided_slice %17 {offsets = [0, 64], sizes = [8, 32], strides = [1, 1]} : vector<8x128xbf16> to vector<8x32xbf16>
    %33 = vector.extract_strided_slice %17 {offsets = [0, 96], sizes = [8, 32], strides = [1, 1]} : vector<8x128xbf16> to vector<8x32xbf16>
    %34 = vector.shape_cast %30 : vector<8x32xbf16> to vector<1x8x32xbf16>
    %35 = vector.shape_cast %31 : vector<8x32xbf16> to vector<1x8x32xbf16>
    %36 = vector.shape_cast %32 : vector<8x32xbf16> to vector<1x8x32xbf16>
    %37 = vector.shape_cast %33 : vector<8x32xbf16> to vector<1x8x32xbf16>
    %38 = tpu.concatenate %34, %35, %36, %37 in 0 : vector<1x8x32xbf16>, vector<1x8x32xbf16>, vector<1x8x32xbf16>, vector<1x8x32xbf16> -> vector<4x8x32xbf16>
    %39 = vector.extract_strided_slice %18 {offsets = [0, 0], sizes = [8, 32], strides = [1, 1]} : vector<8x128xbf16> to vector<8x32xbf16>
    %40 = vector.extract_strided_slice %18 {offsets = [0, 32], sizes = [8, 32], strides = [1, 1]} : vector<8x128xbf16> to vector<8x32xbf16>
    %41 = vector.extract_strided_slice %18 {offsets = [0, 64], sizes = [8, 32], strides = [1, 1]} : vector<8x128xbf16> to vector<8x32xbf16>
    %42 = vector.extract_strided_slice %18 {offsets = [0, 96], sizes = [8, 32], strides = [1, 1]} : vector<8x128xbf16> to vector<8x32xbf16>
    %43 = vector.shape_cast %39 : vector<8x32xbf16> to vector<1x8x32xbf16>
    %44 = vector.shape_cast %40 : vector<8x32xbf16> to vector<1x8x32xbf16>
    %45 = vector.shape_cast %41 : vector<8x32xbf16> to vector<1x8x32xbf16>
    %46 = vector.shape_cast %42 : vector<8x32xbf16> to vector<1x8x32xbf16>
    %47 = tpu.concatenate %43, %44, %45, %46 in 0 : vector<1x8x32xbf16>, vector<1x8x32xbf16>, vector<1x8x32xbf16>, vector<1x8x32xbf16> -> vector<4x8x32xbf16>
    %cst_10 = arith.constant dense<0.000000e+00> : vector<4x8x8xf32>
    %48 = tpu.matmul %29, %38, %cst_10 {dimension_numbers = #tpu.dot_dimension_numbers<[2], [2], [1], [1], [0, 0, 0, 1, 1, 1], [0], [0]>} : vector<4x8x32xbf16>, vector<4x8x32xbf16>, vector<4x8x8xf32> -> vector<4x8x8xf32>
    %49 = vector.shape_cast %20 : vector<1x8xf32> to vector<1x1x8xf32>
    %50 = vector.broadcast %49 : vector<1x1x8xf32> to vector<4x8x8xf32>
    %51 = arith.addf %48, %50 : vector<4x8x8xf32>
    %cst_11 = arith.constant dense<0xFF800000> : vector<4x8xf32>
    %52 = vector.multi_reduction <maximumf>, %51, %cst_11 [2] : vector<4x8x8xf32> to vector<4x8xf32>
    %53 = vector.shape_cast %52 : vector<4x8xf32> to vector<4x8x1xf32>
    %54 = vector.broadcast %53 : vector<4x8x1xf32> to vector<4x8x8xf32>
    %55 = arith.subf %51, %54 : vector<4x8x8xf32>
    %56 = math.exp %55 : vector<4x8x8xf32>
    %cst_12 = arith.constant dense<0.000000e+00> : vector<4x8xf32>
    %57 = vector.multi_reduction <add>, %56, %cst_12 [2] : vector<4x8x8xf32> to vector<4x8xf32>
    %58 = vector.shape_cast %57 : vector<4x8xf32> to vector<4x8x1xf32>
    %59 = tpu.reciprocal %58 {approx = true} : vector<4x8x1xf32> -> vector<4x8x1xf32>
    %60 = arith.truncf %56 : vector<4x8x8xf32> to vector<4x8x8xbf16>
    %cst_13 = arith.constant dense<0.000000e+00> : vector<4x8x32xf32>
    %61 = tpu.matmul %60, %47, %cst_13 {dimension_numbers = #tpu.dot_dimension_numbers<[2], [1], [1], [2], [0, 0, 0, 1, 1, 2], [0], [0]>} : vector<4x8x8xbf16>, vector<4x8x32xbf16>, vector<4x8x32xf32> -> vector<4x8x32xf32>
    %62 = vector.broadcast %59 : vector<4x8x1xf32> to vector<4x8x32xf32>
    %63 = arith.mulf %61, %62 : vector<4x8x32xf32>
    %64 = vector.extract_strided_slice %63 {offsets = [0, 0, 0], sizes = [1, 8, 32], strides = [1, 1, 1]} : vector<4x8x32xf32> to vector<1x8x32xf32>
    %65 = vector.shape_cast %64 : vector<1x8x32xf32> to vector<8x32xf32>
    %66 = vector.extract_strided_slice %63 {offsets = [1, 0, 0], sizes = [1, 8, 32], strides = [1, 1, 1]} : vector<4x8x32xf32> to vector<1x8x32xf32>
    %67 = vector.shape_cast %66 : vector<1x8x32xf32> to vector<8x32xf32>
    %68 = vector.extract_strided_slice %63 {offsets = [2, 0, 0], sizes = [1, 8, 32], strides = [1, 1, 1]} : vector<4x8x32xf32> to vector<1x8x32xf32>
    %69 = vector.shape_cast %68 : vector<1x8x32xf32> to vector<8x32xf32>
    %70 = vector.extract_strided_slice %63 {offsets = [3, 0, 0], sizes = [1, 8, 32], strides = [1, 1, 1]} : vector<4x8x32xf32> to vector<1x8x32xf32>
    %71 = vector.shape_cast %70 : vector<1x8x32xf32> to vector<8x32xf32>
    %72 = tpu.concatenate %65, %67, %69, %71 in 1 : vector<8x32xf32>, vector<8x32xf32>, vector<8x32xf32>, vector<8x32xf32> -> vector<8x128xf32>
    %73 = vector.extract_strided_slice %11 {offsets = [8, 0], sizes = [8, 128], strides = [1, 1]} : vector<16x128xbf16> to vector<8x128xbf16>
    %74 = vector.extract_strided_slice %13 {offsets = [8, 0], sizes = [8, 128], strides = [1, 1]} : vector<16x128xbf16> to vector<8x128xbf16>
    %75 = vector.extract_strided_slice %15 {offsets = [8, 0], sizes = [8, 128], strides = [1, 1]} : vector<16x128xbf16> to vector<8x128xbf16>
    %c1 = arith.constant 1 : index
    %c0_14 = arith.constant 0 : index
    %c0_15 = arith.constant 0 : index
    %76 = vector.load %arg2[%c1, %c0_14, %c0_15] : memref<2x1x8xf32, #tpu.memory_space<vmem>>, vector<1x1x8xf32>
    %77 = vector.shape_cast %76 : vector<1x1x8xf32> to vector<1x8xf32>
    %78 = vector.extract_strided_slice %73 {offsets = [0, 0], sizes = [8, 32], strides = [1, 1]} : vector<8x128xbf16> to vector<8x32xbf16>
    %79 = vector.extract_strided_slice %73 {offsets = [0, 32], sizes = [8, 32], strides = [1, 1]} : vector<8x128xbf16> to vector<8x32xbf16>
    %80 = vector.extract_strided_slice %73 {offsets = [0, 64], sizes = [8, 32], strides = [1, 1]} : vector<8x128xbf16> to vector<8x32xbf16>
    %81 = vector.extract_strided_slice %73 {offsets = [0, 96], sizes = [8, 32], strides = [1, 1]} : vector<8x128xbf16> to vector<8x32xbf16>
    %82 = vector.shape_cast %78 : vector<8x32xbf16> to vector<1x8x32xbf16>
    %83 = vector.shape_cast %79 : vector<8x32xbf16> to vector<1x8x32xbf16>
    %84 = vector.shape_cast %80 : vector<8x32xbf16> to vector<1x8x32xbf16>
    %85 = vector.shape_cast %81 : vector<8x32xbf16> to vector<1x8x32xbf16>
    %86 = tpu.concatenate %82, %83, %84, %85 in 0 : vector<1x8x32xbf16>, vector<1x8x32xbf16>, vector<1x8x32xbf16>, vector<1x8x32xbf16> -> vector<4x8x32xbf16>
    %87 = vector.extract_strided_slice %74 {offsets = [0, 0], sizes = [8, 32], strides = [1, 1]} : vector<8x128xbf16> to vector<8x32xbf16>
    %88 = vector.extract_strided_slice %74 {offsets = [0, 32], sizes = [8, 32], strides = [1, 1]} : vector<8x128xbf16> to vector<8x32xbf16>
    %89 = vector.extract_strided_slice %74 {offsets = [0, 64], sizes = [8, 32], strides = [1, 1]} : vector<8x128xbf16> to vector<8x32xbf16>
    %90 = vector.extract_strided_slice %74 {offsets = [0, 96], sizes = [8, 32], strides = [1, 1]} : vector<8x128xbf16> to vector<8x32xbf16>
    %91 = vector.shape_cast %87 : vector<8x32xbf16> to vector<1x8x32xbf16>
    %92 = vector.shape_cast %88 : vector<8x32xbf16> to vector<1x8x32xbf16>
    %93 = vector.shape_cast %89 : vector<8x32xbf16> to vector<1x8x32xbf16>
    %94 = vector.shape_cast %90 : vector<8x32xbf16> to vector<1x8x32xbf16>
    %95 = tpu.concatenate %91, %92, %93, %94 in 0 : vector<1x8x32xbf16>, vector<1x8x32xbf16>, vector<1x8x32xbf16>, vector<1x8x32xbf16> -> vector<4x8x32xbf16>
    %96 = vector.extract_strided_slice %75 {offsets = [0, 0], sizes = [8, 32], strides = [1, 1]} : vector<8x128xbf16> to vector<8x32xbf16>
    %97 = vector.extract_strided_slice %75 {offsets = [0, 32], sizes = [8, 32], strides = [1, 1]} : vector<8x128xbf16> to vector<8x32xbf16>
    %98 = vector.extract_strided_slice %75 {offsets = [0, 64], sizes = [8, 32], strides = [1, 1]} : vector<8x128xbf16> to vector<8x32xbf16>
    %99 = vector.extract_strided_slice %75 {offsets = [0, 96], sizes = [8, 32], strides = [1, 1]} : vector<8x128xbf16> to vector<8x32xbf16>
    %100 = vector.shape_cast %96 : vector<8x32xbf16> to vector<1x8x32xbf16>
    %101 = vector.shape_cast %97 : vector<8x32xbf16> to vector<1x8x32xbf16>
    %102 = vector.shape_cast %98 : vector<8x32xbf16> to vector<1x8x32xbf16>
    %103 = vector.shape_cast %99 : vector<8x32xbf16> to vector<1x8x32xbf16>
    %104 = tpu.concatenate %100, %101, %102, %103 in 0 : vector<1x8x32xbf16>, vector<1x8x32xbf16>, vector<1x8x32xbf16>, vector<1x8x32xbf16> -> vector<4x8x32xbf16>
    %cst_16 = arith.constant dense<0.000000e+00> : vector<4x8x8xf32>
    %105 = tpu.matmul %86, %95, %cst_16 {dimension_numbers = #tpu.dot_dimension_numbers<[2], [2], [1], [1], [0, 0, 0, 1, 1, 1], [0], [0]>} : vector<4x8x32xbf16>, vector<4x8x32xbf16>, vector<4x8x8xf32> -> vector<4x8x8xf32>
    %106 = vector.shape_cast %77 : vector<1x8xf32> to vector<1x1x8xf32>
    %107 = vector.broadcast %106 : vector<1x1x8xf32> to vector<4x8x8xf32>
    %108 = arith.addf %105, %107 : vector<4x8x8xf32>
    %cst_17 = arith.constant dense<0xFF800000> : vector<4x8xf32>
    %109 = vector.multi_reduction <maximumf>, %108, %cst_17 [2] : vector<4x8x8xf32> to vector<4x8xf32>
    %110 = vector.shape_cast %109 : vector<4x8xf32> to vector<4x8x1xf32>
    %111 = vector.broadcast %110 : vector<4x8x1xf32> to vector<4x8x8xf32>
    %112 = arith.subf %108, %111 : vector<4x8x8xf32>
    %113 = math.exp %112 : vector<4x8x8xf32>
    %cst_18 = arith.constant dense<0.000000e+00> : vector<4x8xf32>
    %114 = vector.multi_reduction <add>, %113, %cst_18 [2] : vector<4x8x8xf32> to vector<4x8xf32>
    %115 = vector.shape_cast %114 : vector<4x8xf32> to vector<4x8x1xf32>
    %116 = tpu.reciprocal %115 {approx = true} : vector<4x8x1xf32> -> vector<4x8x1xf32>
    %117 = arith.truncf %113 : vector<4x8x8xf32> to vector<4x8x8xbf16>
    %cst_19 = arith.constant dense<0.000000e+00> : vector<4x8x32xf32>
    %118 = tpu.matmul %117, %104, %cst_19 {dimension_numbers = #tpu.dot_dimension_numbers<[2], [1], [1], [2], [0, 0, 0, 1, 1, 2], [0], [0]>} : vector<4x8x8xbf16>, vector<4x8x32xbf16>, vector<4x8x32xf32> -> vector<4x8x32xf32>
    %119 = vector.broadcast %116 : vector<4x8x1xf32> to vector<4x8x32xf32>
    %120 = arith.mulf %118, %119 : vector<4x8x32xf32>
    %121 = vector.extract_strided_slice %120 {offsets = [0, 0, 0], sizes = [1, 8, 32], strides = [1, 1, 1]} : vector<4x8x32xf32> to vector<1x8x32xf32>
    %122 = vector.shape_cast %121 : vector<1x8x32xf32> to vector<8x32xf32>
    %123 = vector.extract_strided_slice %120 {offsets = [1, 0, 0], sizes = [1, 8, 32], strides = [1, 1, 1]} : vector<4x8x32xf32> to vector<1x8x32xf32>
    %124 = vector.shape_cast %123 : vector<1x8x32xf32> to vector<8x32xf32>
    %125 = vector.extract_strided_slice %120 {offsets = [2, 0, 0], sizes = [1, 8, 32], strides = [1, 1, 1]} : vector<4x8x32xf32> to vector<1x8x32xf32>
    %126 = vector.shape_cast %125 : vector<1x8x32xf32> to vector<8x32xf32>
    %127 = vector.extract_strided_slice %120 {offsets = [3, 0, 0], sizes = [1, 8, 32], strides = [1, 1, 1]} : vector<4x8x32xf32> to vector<1x8x32xf32>
    %128 = vector.shape_cast %127 : vector<1x8x32xf32> to vector<8x32xf32>
    %129 = tpu.concatenate %122, %124, %126, %128 in 1 : vector<8x32xf32>, vector<8x32xf32>, vector<8x32xf32>, vector<8x32xf32> -> vector<8x128xf32>
    %130 = tpu.concatenate %72, %129 in 0 : vector<8x128xf32>, vector<8x128xf32> -> vector<16x128xf32>
    %131 = arith.truncf %130 : vector<16x128xf32> to vector<16x128xbf16>
    %c0_20 = arith.constant 0 : index
    %c0_21 = arith.constant 0 : index
    %132 = vector.load %arg5[%c0_20, %c0_21] : memref<128x128xbf16, #tpu.memory_space<vmem>>, vector<128x128xbf16>
    %cst_22 = arith.constant dense<0.000000e+00> : vector<16x128xf32>
    %133 = tpu.matmul %131, %132, %cst_22 {dimension_numbers = #tpu.dot_dimension_numbers<[1], [0], [0], [1], [0, 0, 1, 1], [], []>} : vector<16x128xbf16>, vector<128x128xbf16>, vector<16x128xf32> -> vector<16x128xf32>
    %c0_23 = arith.constant 0 : index
    %c0_24 = arith.constant 0 : index
    %134 = vector.load %arg6[%c0_23, %c0_24] : memref<1x128xf32, #tpu.memory_space<vmem>>, vector<1x128xf32>
    %135 = vector.broadcast %134 : vector<1x128xf32> to vector<16x128xf32>
    %136 = arith.addf %133, %135 : vector<16x128xf32>
    %137 = arith.addf %2, %136 : vector<16x128xf32>
    %c0_25 = arith.constant 0 : index
    %c0_26 = arith.constant 0 : index
    %138 = vector.load %arg11[%c0_25, %c0_26] : memref<1x128xf32, #tpu.memory_space<vmem>>, vector<1x128xf32>
    %c0_27 = arith.constant 0 : index
    %c0_28 = arith.constant 0 : index
    %139 = vector.load %arg12[%c0_27, %c0_28] : memref<1x128xf32, #tpu.memory_space<vmem>>, vector<1x128xf32>
    %cst_29 = arith.constant dense<0.000000e+00> : vector<16xf32>
    %140 = vector.multi_reduction <add>, %137, %cst_29 [1] : vector<16x128xf32> to vector<16xf32>
    %141 = vector.shape_cast %140 : vector<16xf32> to vector<16x1xf32>
    %cst_30 = arith.constant 1.280000e+02 : f32
    %142 = vector.broadcast %cst_30 : f32 to vector<16x1xf32>
    %143 = arith.divf %141, %142 : vector<16x1xf32>
    %144 = vector.broadcast %143 : vector<16x1xf32> to vector<16x128xf32>
    %145 = arith.subf %137, %144 : vector<16x128xf32>
    %146 = arith.mulf %145, %145 : vector<16x128xf32>
    %cst_31 = arith.constant dense<0.000000e+00> : vector<16xf32>
    %147 = vector.multi_reduction <add>, %146, %cst_31 [1] : vector<16x128xf32> to vector<16xf32>
    %148 = vector.shape_cast %147 : vector<16xf32> to vector<16x1xf32>
    %cst_32 = arith.constant 1.280000e+02 : f32
    %149 = vector.broadcast %cst_32 : f32 to vector<16x1xf32>
    %150 = arith.divf %148, %149 : vector<16x1xf32>
    %cst_33 = arith.constant 9.99999974E-6 : f32
    %151 = vector.broadcast %cst_33 : f32 to vector<16x1xf32>
    %152 = arith.addf %150, %151 : vector<16x1xf32>
    %153 = math.rsqrt %152 : vector<16x1xf32>
    %154 = vector.broadcast %153 : vector<16x1xf32> to vector<16x128xf32>
    %155 = arith.mulf %145, %154 : vector<16x128xf32>
    %156 = vector.broadcast %138 : vector<1x128xf32> to vector<16x128xf32>
    %157 = arith.mulf %155, %156 : vector<16x128xf32>
    %158 = vector.broadcast %139 : vector<1x128xf32> to vector<16x128xf32>
    %159 = arith.addf %157, %158 : vector<16x128xf32>
    %160 = arith.truncf %159 : vector<16x128xf32> to vector<16x128xbf16>
    %c0_34 = arith.constant 0 : index
    %c0_35 = arith.constant 0 : index
    %161 = vector.load %arg7[%c0_34, %c0_35] : memref<128x256xbf16, #tpu.memory_space<vmem>>, vector<128x256xbf16>
    %cst_36 = arith.constant dense<0.000000e+00> : vector<16x256xf32>
    %162 = tpu.matmul %160, %161, %cst_36 {dimension_numbers = #tpu.dot_dimension_numbers<[1], [0], [0], [1], [0, 0, 1, 1], [], []>} : vector<16x128xbf16>, vector<128x256xbf16>, vector<16x256xf32> -> vector<16x256xf32>
    %c0_37 = arith.constant 0 : index
    %c0_38 = arith.constant 0 : index
    %163 = vector.load %arg8[%c0_37, %c0_38] : memref<1x256xf32, #tpu.memory_space<vmem>>, vector<1x256xf32>
    %164 = vector.broadcast %163 : vector<1x256xf32> to vector<16x256xf32>
    %165 = arith.addf %162, %164 : vector<16x256xf32>
    %cst_39 = arith.constant 0.000000e+00 : f32
    %166 = vector.broadcast %cst_39 : f32 to vector<16x256xf32>
    %167 = arith.maximumf %165, %166 : vector<16x256xf32>
    %168 = arith.truncf %167 : vector<16x256xf32> to vector<16x256xbf16>
    %c0_40 = arith.constant 0 : index
    %c0_41 = arith.constant 0 : index
    %169 = vector.load %arg9[%c0_40, %c0_41] : memref<256x128xbf16, #tpu.memory_space<vmem>>, vector<256x128xbf16>
    %cst_42 = arith.constant dense<0.000000e+00> : vector<16x128xf32>
    %170 = tpu.matmul %168, %169, %cst_42 {dimension_numbers = #tpu.dot_dimension_numbers<[1], [0], [0], [1], [0, 0, 1, 1], [], []>} : vector<16x256xbf16>, vector<256x128xbf16>, vector<16x128xf32> -> vector<16x128xf32>
    %c0_43 = arith.constant 0 : index
    %c0_44 = arith.constant 0 : index
    %171 = vector.load %arg10[%c0_43, %c0_44] : memref<1x128xf32, #tpu.memory_space<vmem>>, vector<1x128xf32>
    %172 = vector.broadcast %171 : vector<1x128xf32> to vector<16x128xf32>
    %173 = arith.addf %170, %172 : vector<16x128xf32>
    %174 = arith.addf %159, %173 : vector<16x128xf32>
    %c0_45 = arith.constant 0 : index
    %c0_46 = arith.constant 0 : index
    %175 = vector.load %arg13[%c0_45, %c0_46] : memref<1x128xf32, #tpu.memory_space<vmem>>, vector<1x128xf32>
    %c0_47 = arith.constant 0 : index
    %c0_48 = arith.constant 0 : index
    %176 = vector.load %arg14[%c0_47, %c0_48] : memref<1x128xf32, #tpu.memory_space<vmem>>, vector<1x128xf32>
    %cst_49 = arith.constant dense<0.000000e+00> : vector<16xf32>
    %177 = vector.multi_reduction <add>, %174, %cst_49 [1] : vector<16x128xf32> to vector<16xf32>
    %178 = vector.shape_cast %177 : vector<16xf32> to vector<16x1xf32>
    %cst_50 = arith.constant 1.280000e+02 : f32
    %179 = vector.broadcast %cst_50 : f32 to vector<16x1xf32>
    %180 = arith.divf %178, %179 : vector<16x1xf32>
    %181 = vector.broadcast %180 : vector<16x1xf32> to vector<16x128xf32>
    %182 = arith.subf %174, %181 : vector<16x128xf32>
    %183 = arith.mulf %182, %182 : vector<16x128xf32>
    %cst_51 = arith.constant dense<0.000000e+00> : vector<16xf32>
    %184 = vector.multi_reduction <add>, %183, %cst_51 [1] : vector<16x128xf32> to vector<16xf32>
    %185 = vector.shape_cast %184 : vector<16xf32> to vector<16x1xf32>
    %cst_52 = arith.constant 1.280000e+02 : f32
    %186 = vector.broadcast %cst_52 : f32 to vector<16x1xf32>
    %187 = arith.divf %185, %186 : vector<16x1xf32>
    %cst_53 = arith.constant 9.99999974E-6 : f32
    %188 = vector.broadcast %cst_53 : f32 to vector<16x1xf32>
    %189 = arith.addf %187, %188 : vector<16x1xf32>
    %190 = math.rsqrt %189 : vector<16x1xf32>
    %191 = vector.broadcast %190 : vector<16x1xf32> to vector<16x128xf32>
    %192 = arith.mulf %182, %191 : vector<16x128xf32>
    %193 = vector.broadcast %175 : vector<1x128xf32> to vector<16x128xf32>
    %194 = arith.mulf %192, %193 : vector<16x128xf32>
    %195 = vector.broadcast %176 : vector<1x128xf32> to vector<16x128xf32>
    %196 = arith.addf %194, %195 : vector<16x128xf32>
    %197 = vector.shape_cast %196 : vector<16x128xf32> to vector<2x8x128xf32>
    %198 = arith.truncf %197 : vector<2x8x128xf32> to vector<2x8x128xbf16>
    %c0_54 = arith.constant 0 : index
    %c0_55 = arith.constant 0 : index
    %c0_56 = arith.constant 0 : index
    %199 = vector.load %arg15[%c0_54, %c0_55, %c0_56] : memref<2x8x128xbf16, #tpu.memory_space<vmem>>, vector<2x8x128xbf16>
    tpu.vector_store %arg15[%c0_54, %c0_55, %c0_56], %198 {strides = array<i32>} : memref<2x8x128xbf16, #tpu.memory_space<vmem>>, vector<2x8x128xbf16>,
    return
  }
  func.func @transform_0(%arg0: i32) -> (i32, i32, i32) {
    %c0_i32 = arith.constant 0 : i32
    %c0_i32_0 = arith.constant 0 : i32
    %c0_i32_1 = arith.constant 0 : i32
    return %arg0, %c0_i32, %c0_i32_0 : i32, i32, i32
  }
  func.func @transform_1(%arg0: i32) -> (i32, i32, i32) {
    %c0_i32 = arith.constant 0 : i32
    %c0_i32_0 = arith.constant 0 : i32
    %c0_i32_1 = arith.constant 0 : i32
    return %arg0, %c0_i32, %c0_i32_0 : i32, i32, i32
  }
  func.func @transform_2(%arg0: i32) -> (i32, i32) {
    %c0_i32 = arith.constant 0 : i32
    %c0_i32_0 = arith.constant 0 : i32
    %c0_i32_1 = arith.constant 0 : i32
    return %c0_i32, %c0_i32_0 : i32, i32
  }
  func.func @transform_3(%arg0: i32) -> (i32, i32) {
    %c0_i32 = arith.constant 0 : i32
    %c0_i32_0 = arith.constant 0 : i32
    %c0_i32_1 = arith.constant 0 : i32
    return %c0_i32, %c0_i32_0 : i32, i32
  }
  func.func @transform_4(%arg0: i32) -> (i32, i32) {
    %c0_i32 = arith.constant 0 : i32
    %c0_i32_0 = arith.constant 0 : i32
    %c0_i32_1 = arith.constant 0 : i32
    return %c0_i32, %c0_i32_0 : i32, i32
  }
  func.func @transform_5(%arg0: i32) -> (i32, i32) {
    %c0_i32 = arith.constant 0 : i32
    %c0_i32_0 = arith.constant 0 : i32
    %c0_i32_1 = arith.constant 0 : i32
    return %c0_i32, %c0_i32_0 : i32, i32
  }
  func.func @transform_6(%arg0: i32) -> (i32, i32) {
    %c0_i32 = arith.constant 0 : i32
    %c0_i32_0 = arith.constant 0 : i32
    %c0_i32_1 = arith.constant 0 : i32
    return %c0_i32, %c0_i32_0 : i32, i32
  }
  func.func @transform_7(%arg0: i32) -> (i32, i32) {
    %c0_i32 = arith.constant 0 : i32
    %c0_i32_0 = arith.constant 0 : i32
    %c0_i32_1 = arith.constant 0 : i32
    return %c0_i32, %c0_i32_0 : i32, i32
  }
  func.func @transform_8(%arg0: i32) -> (i32, i32) {
    %c0_i32 = arith.constant 0 : i32
    %c0_i32_0 = arith.constant 0 : i32
    %c0_i32_1 = arith.constant 0 : i32
    return %c0_i32, %c0_i32_0 : i32, i32
  }
  func.func @transform_9(%arg0: i32) -> (i32, i32) {
    %c0_i32 = arith.constant 0 : i32
    %c0_i32_0 = arith.constant 0 : i32
    %c0_i32_1 = arith.constant 0 : i32
    return %c0_i32, %c0_i32_0 : i32, i32
  }
  func.func @transform_10(%arg0: i32) -> (i32, i32) {
    %c0_i32 = arith.constant 0 : i32
    %c0_i32_0 = arith.constant 0 : i32
    %c0_i32_1 = arith.constant 0 : i32
    return %c0_i32, %c0_i32_0 : i32, i32
  }
  func.func @transform_11(%arg0: i32) -> (i32, i32) {
    %c0_i32 = arith.constant 0 : i32
    %c0_i32_0 = arith.constant 0 : i32
    %c0_i32_1 = arith.constant 0 : i32
    return %c0_i32, %c0_i32_0 : i32, i32
  }
  func.func @transform_12(%arg0: i32) -> (i32, i32) {
    %c0_i32 = arith.constant 0 : i32
    %c0_i32_0 = arith.constant 0 : i32
    %c0_i32_1 = arith.constant 0 : i32
    return %c0_i32, %c0_i32_0 : i32, i32
  }
  func.func @transform_13(%arg0: i32) -> (i32, i32) {
    %c0_i32 = arith.constant 0 : i32
    %c0_i32_0 = arith.constant 0 : i32
    %c0_i32_1 = arith.constant 0 : i32
    return %c0_i32, %c0_i32_0 : i32, i32
  }
  func.func @transform_14(%arg0: i32) -> (i32, i32, i32) {
    %c0_i32 = arith.constant 0 : i32
    %c0_i32_0 = arith.constant 0 : i32
    %c0_i32_1 = arith.constant 0 : i32
    return %arg0, %c0_i32, %c0_i32_0 : i32, i32, i32
  }
}

module attributes {stable_mosaic.version = 11 : i64} {
  func.func @_dec_layer_kernel(%arg0: i32, %arg1: memref<2x8x128xbf16, #tpu.memory_space<vmem>>, %arg2: memref<2x8x128xbf16, #tpu.memory_space<vmem>>, %arg3: memref<8x8xf32, #tpu.memory_space<vmem>>, %arg4: memref<2x1x8xf32, #tpu.memory_space<vmem>>, %arg5: memref<2x1x8xf32, #tpu.memory_space<vmem>>, %arg6: memref<128x384xbf16, #tpu.memory_space<vmem>>, %arg7: memref<1x384xf32, #tpu.memory_space<vmem>>, %arg8: memref<128x128xbf16, #tpu.memory_space<vmem>>, %arg9: memref<1x128xf32, #tpu.memory_space<vmem>>, %arg10: memref<128x128xbf16, #tpu.memory_space<vmem>>, %arg11: memref<1x128xf32, #tpu.memory_space<vmem>>, %arg12: memref<128x256xbf16, #tpu.memory_space<vmem>>, %arg13: memref<1x256xf32, #tpu.memory_space<vmem>>, %arg14: memref<128x128xbf16, #tpu.memory_space<vmem>>, %arg15: memref<1x128xf32, #tpu.memory_space<vmem>>, %arg16: memref<128x256xbf16, #tpu.memory_space<vmem>>, %arg17: memref<1x256xf32, #tpu.memory_space<vmem>>, %arg18: memref<256x128xbf16, #tpu.memory_space<vmem>>, %arg19: memref<1x128xf32, #tpu.memory_space<vmem>>, %arg20: memref<1x128xf32, #tpu.memory_space<vmem>>, %arg21: memref<1x128xf32, #tpu.memory_space<vmem>>, %arg22: memref<1x128xf32, #tpu.memory_space<vmem>>, %arg23: memref<1x128xf32, #tpu.memory_space<vmem>>, %arg24: memref<1x128xf32, #tpu.memory_space<vmem>>, %arg25: memref<1x128xf32, #tpu.memory_space<vmem>>, %arg26: memref<2x8x128xbf16, #tpu.memory_space<vmem>>) attributes {dimension_semantics = [#tpu.dimension_semantics<parallel>], iteration_bounds = array<i64: 1>, scalar_prefetch = 0 : i64, scratch_operands = 0 : i64, tpu.core_type = #tpu.core_type<tc>, window_params = [{transform_indices = @transform_0, window_bounds = array<i64: 2, 8, 128>}, {transform_indices = @transform_1, window_bounds = array<i64: 2, 8, 128>}, {pipeline_mode = #tpu.pipeline_mode<synchronous>, transform_indices = @transform_2, window_bounds = array<i64: 8, 8>}, {transform_indices = @transform_3, window_bounds = array<i64: 2, 1, 8>}, {transform_indices = @transform_4, window_bounds = array<i64: 2, 1, 8>}, {pipeline_mode = #tpu.pipeline_mode<synchronous>, transform_indices = @transform_5, window_bounds = array<i64: 128, 384>}, {pipeline_mode = #tpu.pipeline_mode<synchronous>, transform_indices = @transform_6, window_bounds = array<i64: 1, 384>}, {pipeline_mode = #tpu.pipeline_mode<synchronous>, transform_indices = @transform_7, window_bounds = array<i64: 128, 128>}, {pipeline_mode = #tpu.pipeline_mode<synchronous>, transform_indices = @transform_8, window_bounds = array<i64: 1, 128>}, {pipeline_mode = #tpu.pipeline_mode<synchronous>, transform_indices = @transform_9, window_bounds = array<i64: 128, 128>}, {pipeline_mode = #tpu.pipeline_mode<synchronous>, transform_indices = @transform_10, window_bounds = array<i64: 1, 128>}, {pipeline_mode = #tpu.pipeline_mode<synchronous>, transform_indices = @transform_11, window_bounds = array<i64: 128, 256>}, {pipeline_mode = #tpu.pipeline_mode<synchronous>, transform_indices = @transform_12, window_bounds = array<i64: 1, 256>}, {pipeline_mode = #tpu.pipeline_mode<synchronous>, transform_indices = @transform_13, window_bounds = array<i64: 128, 128>}, {pipeline_mode = #tpu.pipeline_mode<synchronous>, transform_indices = @transform_14, window_bounds = array<i64: 1, 128>}, {pipeline_mode = #tpu.pipeline_mode<synchronous>, transform_indices = @transform_15, window_bounds = array<i64: 128, 256>}, {pipeline_mode = #tpu.pipeline_mode<synchronous>, transform_indices = @transform_16, window_bounds = array<i64: 1, 256>}, {pipeline_mode = #tpu.pipeline_mode<synchronous>, transform_indices = @transform_17, window_bounds = array<i64: 256, 128>}, {pipeline_mode = #tpu.pipeline_mode<synchronous>, transform_indices = @transform_18, window_bounds = array<i64: 1, 128>}, {pipeline_mode = #tpu.pipeline_mode<synchronous>, transform_indices = @transform_19, window_bounds = array<i64: 1, 128>}, {pipeline_mode = #tpu.pipeline_mode<synchronous>, transform_indices = @transform_20, window_bounds = array<i64: 1, 128>}, {pipeline_mode = #tpu.pipeline_mode<synchronous>, transform_indices = @transform_21, window_bounds = array<i64: 1, 128>}, {pipeline_mode = #tpu.pipeline_mode<synchronous>, transform_indices = @transform_22, window_bounds = array<i64: 1, 128>}, {pipeline_mode = #tpu.pipeline_mode<synchronous>, transform_indices = @transform_23, window_bounds = array<i64: 1, 128>}, {pipeline_mode = #tpu.pipeline_mode<synchronous>, transform_indices = @transform_24, window_bounds = array<i64: 1, 128>}, {transform_indices = @transform_25, window_bounds = array<i64: 2, 8, 128>}]} {
    %c0 = arith.constant 0 : index
    %c0_0 = arith.constant 0 : index
    %c0_1 = arith.constant 0 : index
    %0 = vector.load %arg1[%c0, %c0_0, %c0_1] : memref<2x8x128xbf16, #tpu.memory_space<vmem>>, vector<2x8x128xbf16>
    %1 = vector.shape_cast %0 : vector<2x8x128xbf16> to vector<16x128xbf16>
    %c0_2 = arith.constant 0 : index
    %c0_3 = arith.constant 0 : index
    %c0_4 = arith.constant 0 : index
    %2 = vector.load %arg2[%c0_2, %c0_3, %c0_4] : memref<2x8x128xbf16, #tpu.memory_space<vmem>>, vector<2x8x128xbf16>
    %3 = vector.shape_cast %2 : vector<2x8x128xbf16> to vector<16x128xbf16>
    %4 = arith.extf %1 : vector<16x128xbf16> to vector<16x128xf32>
    %c0_5 = arith.constant 0 : index
    %c0_6 = arith.constant 0 : index
    %5 = vector.load %arg3[%c0_5, %c0_6] : memref<8x8xf32, #tpu.memory_space<vmem>>, vector<8x8xf32>
    %c0_7 = arith.constant 0 : index
    %c0_8 = arith.constant 0 : index
    %6 = vector.load %arg6[%c0_7, %c0_8] : memref<128x384xbf16, #tpu.memory_space<vmem>>, vector<128x384xbf16>
    %cst = arith.constant dense<0.000000e+00> : vector<16x384xf32>
    %7 = tpu.matmul %1, %6, %cst {dimension_numbers = #tpu.dot_dimension_numbers<[1], [0], [0], [1], [0, 0, 1, 1], [], []>} : vector<16x128xbf16>, vector<128x384xbf16>, vector<16x384xf32> -> vector<16x384xf32>
    %c0_9 = arith.constant 0 : index
    %c0_10 = arith.constant 0 : index
    %8 = vector.load %arg7[%c0_9, %c0_10] : memref<1x384xf32, #tpu.memory_space<vmem>>, vector<1x384xf32>
    %9 = vector.broadcast %8 : vector<1x384xf32> to vector<16x384xf32>
    %10 = arith.addf %7, %9 : vector<16x384xf32>
    %11 = vector.extract_strided_slice %10 {offsets = [0, 0], sizes = [16, 128], strides = [1, 1]} : vector<16x384xf32> to vector<16x128xf32>
    %cst_11 = arith.constant 0.176776692 : f32
    %12 = vector.broadcast %cst_11 : f32 to vector<16x128xf32>
    %13 = arith.mulf %11, %12 : vector<16x128xf32>
    %14 = arith.truncf %13 : vector<16x128xf32> to vector<16x128xbf16>
    %15 = vector.extract_strided_slice %10 {offsets = [0, 128], sizes = [16, 128], strides = [1, 1]} : vector<16x384xf32> to vector<16x128xf32>
    %16 = arith.truncf %15 : vector<16x128xf32> to vector<16x128xbf16>
    %17 = vector.extract_strided_slice %10 {offsets = [0, 256], sizes = [16, 128], strides = [1, 1]} : vector<16x384xf32> to vector<16x128xf32>
    %18 = arith.truncf %17 : vector<16x128xf32> to vector<16x128xbf16>
    %c0_12 = arith.constant 0 : index
    %c0_13 = arith.constant 0 : index
    %c0_14 = arith.constant 0 : index
    %19 = vector.load %arg4[%c0_12, %c0_13, %c0_14] : memref<2x1x8xf32, #tpu.memory_space<vmem>>, vector<1x1x8xf32>
    %20 = vector.shape_cast %19 : vector<1x1x8xf32> to vector<1x8xf32>
    %21 = vector.broadcast %20 : vector<1x8xf32> to vector<8x8xf32>
    %22 = arith.addf %5, %21 : vector<8x8xf32>
    %23 = vector.extract_strided_slice %14 {offsets = [0, 0], sizes = [8, 128], strides = [1, 1]} : vector<16x128xbf16> to vector<8x128xbf16>
    %24 = vector.extract_strided_slice %16 {offsets = [0, 0], sizes = [8, 128], strides = [1, 1]} : vector<16x128xbf16> to vector<8x128xbf16>
    %25 = vector.extract_strided_slice %18 {offsets = [0, 0], sizes = [8, 128], strides = [1, 1]} : vector<16x128xbf16> to vector<8x128xbf16>
    %26 = vector.extract_strided_slice %23 {offsets = [0, 0], sizes = [8, 32], strides = [1, 1]} : vector<8x128xbf16> to vector<8x32xbf16>
    %27 = vector.extract_strided_slice %23 {offsets = [0, 32], sizes = [8, 32], strides = [1, 1]} : vector<8x128xbf16> to vector<8x32xbf16>
    %28 = vector.extract_strided_slice %23 {offsets = [0, 64], sizes = [8, 32], strides = [1, 1]} : vector<8x128xbf16> to vector<8x32xbf16>
    %29 = vector.extract_strided_slice %23 {offsets = [0, 96], sizes = [8, 32], strides = [1, 1]} : vector<8x128xbf16> to vector<8x32xbf16>
    %30 = vector.shape_cast %26 : vector<8x32xbf16> to vector<1x8x32xbf16>
    %31 = vector.shape_cast %27 : vector<8x32xbf16> to vector<1x8x32xbf16>
    %32 = vector.shape_cast %28 : vector<8x32xbf16> to vector<1x8x32xbf16>
    %33 = vector.shape_cast %29 : vector<8x32xbf16> to vector<1x8x32xbf16>
    %34 = tpu.concatenate %30, %31, %32, %33 in 0 : vector<1x8x32xbf16>, vector<1x8x32xbf16>, vector<1x8x32xbf16>, vector<1x8x32xbf16> -> vector<4x8x32xbf16>
    %35 = vector.extract_strided_slice %24 {offsets = [0, 0], sizes = [8, 32], strides = [1, 1]} : vector<8x128xbf16> to vector<8x32xbf16>
    %36 = vector.extract_strided_slice %24 {offsets = [0, 32], sizes = [8, 32], strides = [1, 1]} : vector<8x128xbf16> to vector<8x32xbf16>
    %37 = vector.extract_strided_slice %24 {offsets = [0, 64], sizes = [8, 32], strides = [1, 1]} : vector<8x128xbf16> to vector<8x32xbf16>
    %38 = vector.extract_strided_slice %24 {offsets = [0, 96], sizes = [8, 32], strides = [1, 1]} : vector<8x128xbf16> to vector<8x32xbf16>
    %39 = vector.shape_cast %35 : vector<8x32xbf16> to vector<1x8x32xbf16>
    %40 = vector.shape_cast %36 : vector<8x32xbf16> to vector<1x8x32xbf16>
    %41 = vector.shape_cast %37 : vector<8x32xbf16> to vector<1x8x32xbf16>
    %42 = vector.shape_cast %38 : vector<8x32xbf16> to vector<1x8x32xbf16>
    %43 = tpu.concatenate %39, %40, %41, %42 in 0 : vector<1x8x32xbf16>, vector<1x8x32xbf16>, vector<1x8x32xbf16>, vector<1x8x32xbf16> -> vector<4x8x32xbf16>
    %44 = vector.extract_strided_slice %25 {offsets = [0, 0], sizes = [8, 32], strides = [1, 1]} : vector<8x128xbf16> to vector<8x32xbf16>
    %45 = vector.extract_strided_slice %25 {offsets = [0, 32], sizes = [8, 32], strides = [1, 1]} : vector<8x128xbf16> to vector<8x32xbf16>
    %46 = vector.extract_strided_slice %25 {offsets = [0, 64], sizes = [8, 32], strides = [1, 1]} : vector<8x128xbf16> to vector<8x32xbf16>
    %47 = vector.extract_strided_slice %25 {offsets = [0, 96], sizes = [8, 32], strides = [1, 1]} : vector<8x128xbf16> to vector<8x32xbf16>
    %48 = vector.shape_cast %44 : vector<8x32xbf16> to vector<1x8x32xbf16>
    %49 = vector.shape_cast %45 : vector<8x32xbf16> to vector<1x8x32xbf16>
    %50 = vector.shape_cast %46 : vector<8x32xbf16> to vector<1x8x32xbf16>
    %51 = vector.shape_cast %47 : vector<8x32xbf16> to vector<1x8x32xbf16>
    %52 = tpu.concatenate %48, %49, %50, %51 in 0 : vector<1x8x32xbf16>, vector<1x8x32xbf16>, vector<1x8x32xbf16>, vector<1x8x32xbf16> -> vector<4x8x32xbf16>
    %cst_15 = arith.constant dense<0.000000e+00> : vector<4x8x8xf32>
    %53 = tpu.matmul %34, %43, %cst_15 {dimension_numbers = #tpu.dot_dimension_numbers<[2], [2], [1], [1], [0, 0, 0, 1, 1, 1], [0], [0]>} : vector<4x8x32xbf16>, vector<4x8x32xbf16>, vector<4x8x8xf32> -> vector<4x8x8xf32>
    %54 = vector.shape_cast %22 : vector<8x8xf32> to vector<1x8x8xf32>
    %55 = vector.broadcast %54 : vector<1x8x8xf32> to vector<4x8x8xf32>
    %56 = arith.addf %53, %55 : vector<4x8x8xf32>
    %cst_16 = arith.constant dense<0xFF800000> : vector<4x8xf32>
    %57 = vector.multi_reduction <maximumf>, %56, %cst_16 [2] : vector<4x8x8xf32> to vector<4x8xf32>
    %58 = vector.shape_cast %57 : vector<4x8xf32> to vector<4x8x1xf32>
    %59 = vector.broadcast %58 : vector<4x8x1xf32> to vector<4x8x8xf32>
    %60 = arith.subf %56, %59 : vector<4x8x8xf32>
    %61 = math.exp %60 : vector<4x8x8xf32>
    %cst_17 = arith.constant dense<0.000000e+00> : vector<4x8xf32>
    %62 = vector.multi_reduction <add>, %61, %cst_17 [2] : vector<4x8x8xf32> to vector<4x8xf32>
    %63 = vector.shape_cast %62 : vector<4x8xf32> to vector<4x8x1xf32>
    %64 = tpu.reciprocal %63 {approx = true} : vector<4x8x1xf32> -> vector<4x8x1xf32>
    %65 = arith.truncf %61 : vector<4x8x8xf32> to vector<4x8x8xbf16>
    %cst_18 = arith.constant dense<0.000000e+00> : vector<4x8x32xf32>
    %66 = tpu.matmul %65, %52, %cst_18 {dimension_numbers = #tpu.dot_dimension_numbers<[2], [1], [1], [2], [0, 0, 0, 1, 1, 2], [0], [0]>} : vector<4x8x8xbf16>, vector<4x8x32xbf16>, vector<4x8x32xf32> -> vector<4x8x32xf32>
    %67 = vector.broadcast %64 : vector<4x8x1xf32> to vector<4x8x32xf32>
    %68 = arith.mulf %66, %67 : vector<4x8x32xf32>
    %69 = vector.extract_strided_slice %68 {offsets = [0, 0, 0], sizes = [1, 8, 32], strides = [1, 1, 1]} : vector<4x8x32xf32> to vector<1x8x32xf32>
    %70 = vector.shape_cast %69 : vector<1x8x32xf32> to vector<8x32xf32>
    %71 = vector.extract_strided_slice %68 {offsets = [1, 0, 0], sizes = [1, 8, 32], strides = [1, 1, 1]} : vector<4x8x32xf32> to vector<1x8x32xf32>
    %72 = vector.shape_cast %71 : vector<1x8x32xf32> to vector<8x32xf32>
    %73 = vector.extract_strided_slice %68 {offsets = [2, 0, 0], sizes = [1, 8, 32], strides = [1, 1, 1]} : vector<4x8x32xf32> to vector<1x8x32xf32>
    %74 = vector.shape_cast %73 : vector<1x8x32xf32> to vector<8x32xf32>
    %75 = vector.extract_strided_slice %68 {offsets = [3, 0, 0], sizes = [1, 8, 32], strides = [1, 1, 1]} : vector<4x8x32xf32> to vector<1x8x32xf32>
    %76 = vector.shape_cast %75 : vector<1x8x32xf32> to vector<8x32xf32>
    %77 = tpu.concatenate %70, %72, %74, %76 in 1 : vector<8x32xf32>, vector<8x32xf32>, vector<8x32xf32>, vector<8x32xf32> -> vector<8x128xf32>
    %c1 = arith.constant 1 : index
    %c0_19 = arith.constant 0 : index
    %c0_20 = arith.constant 0 : index
    %78 = vector.load %arg4[%c1, %c0_19, %c0_20] : memref<2x1x8xf32, #tpu.memory_space<vmem>>, vector<1x1x8xf32>
    %79 = vector.shape_cast %78 : vector<1x1x8xf32> to vector<1x8xf32>
    %80 = vector.broadcast %79 : vector<1x8xf32> to vector<8x8xf32>
    %81 = arith.addf %5, %80 : vector<8x8xf32>
    %82 = vector.extract_strided_slice %14 {offsets = [8, 0], sizes = [8, 128], strides = [1, 1]} : vector<16x128xbf16> to vector<8x128xbf16>
    %83 = vector.extract_strided_slice %16 {offsets = [8, 0], sizes = [8, 128], strides = [1, 1]} : vector<16x128xbf16> to vector<8x128xbf16>
    %84 = vector.extract_strided_slice %18 {offsets = [8, 0], sizes = [8, 128], strides = [1, 1]} : vector<16x128xbf16> to vector<8x128xbf16>
    %85 = vector.extract_strided_slice %82 {offsets = [0, 0], sizes = [8, 32], strides = [1, 1]} : vector<8x128xbf16> to vector<8x32xbf16>
    %86 = vector.extract_strided_slice %82 {offsets = [0, 32], sizes = [8, 32], strides = [1, 1]} : vector<8x128xbf16> to vector<8x32xbf16>
    %87 = vector.extract_strided_slice %82 {offsets = [0, 64], sizes = [8, 32], strides = [1, 1]} : vector<8x128xbf16> to vector<8x32xbf16>
    %88 = vector.extract_strided_slice %82 {offsets = [0, 96], sizes = [8, 32], strides = [1, 1]} : vector<8x128xbf16> to vector<8x32xbf16>
    %89 = vector.shape_cast %85 : vector<8x32xbf16> to vector<1x8x32xbf16>
    %90 = vector.shape_cast %86 : vector<8x32xbf16> to vector<1x8x32xbf16>
    %91 = vector.shape_cast %87 : vector<8x32xbf16> to vector<1x8x32xbf16>
    %92 = vector.shape_cast %88 : vector<8x32xbf16> to vector<1x8x32xbf16>
    %93 = tpu.concatenate %89, %90, %91, %92 in 0 : vector<1x8x32xbf16>, vector<1x8x32xbf16>, vector<1x8x32xbf16>, vector<1x8x32xbf16> -> vector<4x8x32xbf16>
    %94 = vector.extract_strided_slice %83 {offsets = [0, 0], sizes = [8, 32], strides = [1, 1]} : vector<8x128xbf16> to vector<8x32xbf16>
    %95 = vector.extract_strided_slice %83 {offsets = [0, 32], sizes = [8, 32], strides = [1, 1]} : vector<8x128xbf16> to vector<8x32xbf16>
    %96 = vector.extract_strided_slice %83 {offsets = [0, 64], sizes = [8, 32], strides = [1, 1]} : vector<8x128xbf16> to vector<8x32xbf16>
    %97 = vector.extract_strided_slice %83 {offsets = [0, 96], sizes = [8, 32], strides = [1, 1]} : vector<8x128xbf16> to vector<8x32xbf16>
    %98 = vector.shape_cast %94 : vector<8x32xbf16> to vector<1x8x32xbf16>
    %99 = vector.shape_cast %95 : vector<8x32xbf16> to vector<1x8x32xbf16>
    %100 = vector.shape_cast %96 : vector<8x32xbf16> to vector<1x8x32xbf16>
    %101 = vector.shape_cast %97 : vector<8x32xbf16> to vector<1x8x32xbf16>
    %102 = tpu.concatenate %98, %99, %100, %101 in 0 : vector<1x8x32xbf16>, vector<1x8x32xbf16>, vector<1x8x32xbf16>, vector<1x8x32xbf16> -> vector<4x8x32xbf16>
    %103 = vector.extract_strided_slice %84 {offsets = [0, 0], sizes = [8, 32], strides = [1, 1]} : vector<8x128xbf16> to vector<8x32xbf16>
    %104 = vector.extract_strided_slice %84 {offsets = [0, 32], sizes = [8, 32], strides = [1, 1]} : vector<8x128xbf16> to vector<8x32xbf16>
    %105 = vector.extract_strided_slice %84 {offsets = [0, 64], sizes = [8, 32], strides = [1, 1]} : vector<8x128xbf16> to vector<8x32xbf16>
    %106 = vector.extract_strided_slice %84 {offsets = [0, 96], sizes = [8, 32], strides = [1, 1]} : vector<8x128xbf16> to vector<8x32xbf16>
    %107 = vector.shape_cast %103 : vector<8x32xbf16> to vector<1x8x32xbf16>
    %108 = vector.shape_cast %104 : vector<8x32xbf16> to vector<1x8x32xbf16>
    %109 = vector.shape_cast %105 : vector<8x32xbf16> to vector<1x8x32xbf16>
    %110 = vector.shape_cast %106 : vector<8x32xbf16> to vector<1x8x32xbf16>
    %111 = tpu.concatenate %107, %108, %109, %110 in 0 : vector<1x8x32xbf16>, vector<1x8x32xbf16>, vector<1x8x32xbf16>, vector<1x8x32xbf16> -> vector<4x8x32xbf16>
    %cst_21 = arith.constant dense<0.000000e+00> : vector<4x8x8xf32>
    %112 = tpu.matmul %93, %102, %cst_21 {dimension_numbers = #tpu.dot_dimension_numbers<[2], [2], [1], [1], [0, 0, 0, 1, 1, 1], [0], [0]>} : vector<4x8x32xbf16>, vector<4x8x32xbf16>, vector<4x8x8xf32> -> vector<4x8x8xf32>
    %113 = vector.shape_cast %81 : vector<8x8xf32> to vector<1x8x8xf32>
    %114 = vector.broadcast %113 : vector<1x8x8xf32> to vector<4x8x8xf32>
    %115 = arith.addf %112, %114 : vector<4x8x8xf32>
    %cst_22 = arith.constant dense<0xFF800000> : vector<4x8xf32>
    %116 = vector.multi_reduction <maximumf>, %115, %cst_22 [2] : vector<4x8x8xf32> to vector<4x8xf32>
    %117 = vector.shape_cast %116 : vector<4x8xf32> to vector<4x8x1xf32>
    %118 = vector.broadcast %117 : vector<4x8x1xf32> to vector<4x8x8xf32>
    %119 = arith.subf %115, %118 : vector<4x8x8xf32>
    %120 = math.exp %119 : vector<4x8x8xf32>
    %cst_23 = arith.constant dense<0.000000e+00> : vector<4x8xf32>
    %121 = vector.multi_reduction <add>, %120, %cst_23 [2] : vector<4x8x8xf32> to vector<4x8xf32>
    %122 = vector.shape_cast %121 : vector<4x8xf32> to vector<4x8x1xf32>
    %123 = tpu.reciprocal %122 {approx = true} : vector<4x8x1xf32> -> vector<4x8x1xf32>
    %124 = arith.truncf %120 : vector<4x8x8xf32> to vector<4x8x8xbf16>
    %cst_24 = arith.constant dense<0.000000e+00> : vector<4x8x32xf32>
    %125 = tpu.matmul %124, %111, %cst_24 {dimension_numbers = #tpu.dot_dimension_numbers<[2], [1], [1], [2], [0, 0, 0, 1, 1, 2], [0], [0]>} : vector<4x8x8xbf16>, vector<4x8x32xbf16>, vector<4x8x32xf32> -> vector<4x8x32xf32>
    %126 = vector.broadcast %123 : vector<4x8x1xf32> to vector<4x8x32xf32>
    %127 = arith.mulf %125, %126 : vector<4x8x32xf32>
    %128 = vector.extract_strided_slice %127 {offsets = [0, 0, 0], sizes = [1, 8, 32], strides = [1, 1, 1]} : vector<4x8x32xf32> to vector<1x8x32xf32>
    %129 = vector.shape_cast %128 : vector<1x8x32xf32> to vector<8x32xf32>
    %130 = vector.extract_strided_slice %127 {offsets = [1, 0, 0], sizes = [1, 8, 32], strides = [1, 1, 1]} : vector<4x8x32xf32> to vector<1x8x32xf32>
    %131 = vector.shape_cast %130 : vector<1x8x32xf32> to vector<8x32xf32>
    %132 = vector.extract_strided_slice %127 {offsets = [2, 0, 0], sizes = [1, 8, 32], strides = [1, 1, 1]} : vector<4x8x32xf32> to vector<1x8x32xf32>
    %133 = vector.shape_cast %132 : vector<1x8x32xf32> to vector<8x32xf32>
    %134 = vector.extract_strided_slice %127 {offsets = [3, 0, 0], sizes = [1, 8, 32], strides = [1, 1, 1]} : vector<4x8x32xf32> to vector<1x8x32xf32>
    %135 = vector.shape_cast %134 : vector<1x8x32xf32> to vector<8x32xf32>
    %136 = tpu.concatenate %129, %131, %133, %135 in 1 : vector<8x32xf32>, vector<8x32xf32>, vector<8x32xf32>, vector<8x32xf32> -> vector<8x128xf32>
    %137 = tpu.concatenate %77, %136 in 0 : vector<8x128xf32>, vector<8x128xf32> -> vector<16x128xf32>
    %138 = arith.truncf %137 : vector<16x128xf32> to vector<16x128xbf16>
    %c0_25 = arith.constant 0 : index
    %c0_26 = arith.constant 0 : index
    %139 = vector.load %arg8[%c0_25, %c0_26] : memref<128x128xbf16, #tpu.memory_space<vmem>>, vector<128x128xbf16>
    %cst_27 = arith.constant dense<0.000000e+00> : vector<16x128xf32>
    %140 = tpu.matmul %138, %139, %cst_27 {dimension_numbers = #tpu.dot_dimension_numbers<[1], [0], [0], [1], [0, 0, 1, 1], [], []>} : vector<16x128xbf16>, vector<128x128xbf16>, vector<16x128xf32> -> vector<16x128xf32>
    %c0_28 = arith.constant 0 : index
    %c0_29 = arith.constant 0 : index
    %141 = vector.load %arg9[%c0_28, %c0_29] : memref<1x128xf32, #tpu.memory_space<vmem>>, vector<1x128xf32>
    %142 = vector.broadcast %141 : vector<1x128xf32> to vector<16x128xf32>
    %143 = arith.addf %140, %142 : vector<16x128xf32>
    %144 = arith.addf %4, %143 : vector<16x128xf32>
    %c0_30 = arith.constant 0 : index
    %c0_31 = arith.constant 0 : index
    %145 = vector.load %arg20[%c0_30, %c0_31] : memref<1x128xf32, #tpu.memory_space<vmem>>, vector<1x128xf32>
    %c0_32 = arith.constant 0 : index
    %c0_33 = arith.constant 0 : index
    %146 = vector.load %arg21[%c0_32, %c0_33] : memref<1x128xf32, #tpu.memory_space<vmem>>, vector<1x128xf32>
    %cst_34 = arith.constant dense<0.000000e+00> : vector<16xf32>
    %147 = vector.multi_reduction <add>, %144, %cst_34 [1] : vector<16x128xf32> to vector<16xf32>
    %148 = vector.shape_cast %147 : vector<16xf32> to vector<16x1xf32>
    %cst_35 = arith.constant 1.280000e+02 : f32
    %149 = vector.broadcast %cst_35 : f32 to vector<16x1xf32>
    %150 = arith.divf %148, %149 : vector<16x1xf32>
    %151 = vector.broadcast %150 : vector<16x1xf32> to vector<16x128xf32>
    %152 = arith.subf %144, %151 : vector<16x128xf32>
    %153 = arith.mulf %152, %152 : vector<16x128xf32>
    %cst_36 = arith.constant dense<0.000000e+00> : vector<16xf32>
    %154 = vector.multi_reduction <add>, %153, %cst_36 [1] : vector<16x128xf32> to vector<16xf32>
    %155 = vector.shape_cast %154 : vector<16xf32> to vector<16x1xf32>
    %cst_37 = arith.constant 1.280000e+02 : f32
    %156 = vector.broadcast %cst_37 : f32 to vector<16x1xf32>
    %157 = arith.divf %155, %156 : vector<16x1xf32>
    %cst_38 = arith.constant 9.99999974E-6 : f32
    %158 = vector.broadcast %cst_38 : f32 to vector<16x1xf32>
    %159 = arith.addf %157, %158 : vector<16x1xf32>
    %160 = math.rsqrt %159 : vector<16x1xf32>
    %161 = vector.broadcast %160 : vector<16x1xf32> to vector<16x128xf32>
    %162 = arith.mulf %152, %161 : vector<16x128xf32>
    %163 = vector.broadcast %145 : vector<1x128xf32> to vector<16x128xf32>
    %164 = arith.mulf %162, %163 : vector<16x128xf32>
    %165 = vector.broadcast %146 : vector<1x128xf32> to vector<16x128xf32>
    %166 = arith.addf %164, %165 : vector<16x128xf32>
    %167 = arith.truncf %166 : vector<16x128xf32> to vector<16x128xbf16>
    %c0_39 = arith.constant 0 : index
    %c0_40 = arith.constant 0 : index
    %168 = vector.load %arg10[%c0_39, %c0_40] : memref<128x128xbf16, #tpu.memory_space<vmem>>, vector<128x128xbf16>
    %cst_41 = arith.constant dense<0.000000e+00> : vector<16x128xf32>
    %169 = tpu.matmul %167, %168, %cst_41 {dimension_numbers = #tpu.dot_dimension_numbers<[1], [0], [0], [1], [0, 0, 1, 1], [], []>} : vector<16x128xbf16>, vector<128x128xbf16>, vector<16x128xf32> -> vector<16x128xf32>
    %c0_42 = arith.constant 0 : index
    %c0_43 = arith.constant 0 : index
    %170 = vector.load %arg11[%c0_42, %c0_43] : memref<1x128xf32, #tpu.memory_space<vmem>>, vector<1x128xf32>
    %171 = vector.broadcast %170 : vector<1x128xf32> to vector<16x128xf32>
    %172 = arith.addf %169, %171 : vector<16x128xf32>
    %cst_44 = arith.constant 0.176776692 : f32
    %173 = vector.broadcast %cst_44 : f32 to vector<16x128xf32>
    %174 = arith.mulf %172, %173 : vector<16x128xf32>
    %175 = arith.truncf %174 : vector<16x128xf32> to vector<16x128xbf16>
    %c0_45 = arith.constant 0 : index
    %c0_46 = arith.constant 0 : index
    %176 = vector.load %arg12[%c0_45, %c0_46] : memref<128x256xbf16, #tpu.memory_space<vmem>>, vector<128x256xbf16>
    %cst_47 = arith.constant dense<0.000000e+00> : vector<16x256xf32>
    %177 = tpu.matmul %3, %176, %cst_47 {dimension_numbers = #tpu.dot_dimension_numbers<[1], [0], [0], [1], [0, 0, 1, 1], [], []>} : vector<16x128xbf16>, vector<128x256xbf16>, vector<16x256xf32> -> vector<16x256xf32>
    %c0_48 = arith.constant 0 : index
    %c0_49 = arith.constant 0 : index
    %178 = vector.load %arg13[%c0_48, %c0_49] : memref<1x256xf32, #tpu.memory_space<vmem>>, vector<1x256xf32>
    %179 = vector.broadcast %178 : vector<1x256xf32> to vector<16x256xf32>
    %180 = arith.addf %177, %179 : vector<16x256xf32>
    %181 = vector.extract_strided_slice %180 {offsets = [0, 0], sizes = [16, 128], strides = [1, 1]} : vector<16x256xf32> to vector<16x128xf32>
    %182 = arith.truncf %181 : vector<16x128xf32> to vector<16x128xbf16>
    %183 = vector.extract_strided_slice %180 {offsets = [0, 128], sizes = [16, 128], strides = [1, 1]} : vector<16x256xf32> to vector<16x128xf32>
    %184 = arith.truncf %183 : vector<16x128xf32> to vector<16x128xbf16>
    %185 = vector.extract_strided_slice %175 {offsets = [0, 0], sizes = [8, 128], strides = [1, 1]} : vector<16x128xbf16> to vector<8x128xbf16>
    %186 = vector.extract_strided_slice %182 {offsets = [0, 0], sizes = [8, 128], strides = [1, 1]} : vector<16x128xbf16> to vector<8x128xbf16>
    %187 = vector.extract_strided_slice %184 {offsets = [0, 0], sizes = [8, 128], strides = [1, 1]} : vector<16x128xbf16> to vector<8x128xbf16>
    %c0_50 = arith.constant 0 : index
    %c0_51 = arith.constant 0 : index
    %c0_52 = arith.constant 0 : index
    %188 = vector.load %arg5[%c0_50, %c0_51, %c0_52] : memref<2x1x8xf32, #tpu.memory_space<vmem>>, vector<1x1x8xf32>
    %189 = vector.shape_cast %188 : vector<1x1x8xf32> to vector<1x8xf32>
    %190 = vector.extract_strided_slice %185 {offsets = [0, 0], sizes = [8, 32], strides = [1, 1]} : vector<8x128xbf16> to vector<8x32xbf16>
    %191 = vector.extract_strided_slice %185 {offsets = [0, 32], sizes = [8, 32], strides = [1, 1]} : vector<8x128xbf16> to vector<8x32xbf16>
    %192 = vector.extract_strided_slice %185 {offsets = [0, 64], sizes = [8, 32], strides = [1, 1]} : vector<8x128xbf16> to vector<8x32xbf16>
    %193 = vector.extract_strided_slice %185 {offsets = [0, 96], sizes = [8, 32], strides = [1, 1]} : vector<8x128xbf16> to vector<8x32xbf16>
    %194 = vector.shape_cast %190 : vector<8x32xbf16> to vector<1x8x32xbf16>
    %195 = vector.shape_cast %191 : vector<8x32xbf16> to vector<1x8x32xbf16>
    %196 = vector.shape_cast %192 : vector<8x32xbf16> to vector<1x8x32xbf16>
    %197 = vector.shape_cast %193 : vector<8x32xbf16> to vector<1x8x32xbf16>
    %198 = tpu.concatenate %194, %195, %196, %197 in 0 : vector<1x8x32xbf16>, vector<1x8x32xbf16>, vector<1x8x32xbf16>, vector<1x8x32xbf16> -> vector<4x8x32xbf16>
    %199 = vector.extract_strided_slice %186 {offsets = [0, 0], sizes = [8, 32], strides = [1, 1]} : vector<8x128xbf16> to vector<8x32xbf16>
    %200 = vector.extract_strided_slice %186 {offsets = [0, 32], sizes = [8, 32], strides = [1, 1]} : vector<8x128xbf16> to vector<8x32xbf16>
    %201 = vector.extract_strided_slice %186 {offsets = [0, 64], sizes = [8, 32], strides = [1, 1]} : vector<8x128xbf16> to vector<8x32xbf16>
    %202 = vector.extract_strided_slice %186 {offsets = [0, 96], sizes = [8, 32], strides = [1, 1]} : vector<8x128xbf16> to vector<8x32xbf16>
    %203 = vector.shape_cast %199 : vector<8x32xbf16> to vector<1x8x32xbf16>
    %204 = vector.shape_cast %200 : vector<8x32xbf16> to vector<1x8x32xbf16>
    %205 = vector.shape_cast %201 : vector<8x32xbf16> to vector<1x8x32xbf16>
    %206 = vector.shape_cast %202 : vector<8x32xbf16> to vector<1x8x32xbf16>
    %207 = tpu.concatenate %203, %204, %205, %206 in 0 : vector<1x8x32xbf16>, vector<1x8x32xbf16>, vector<1x8x32xbf16>, vector<1x8x32xbf16> -> vector<4x8x32xbf16>
    %208 = vector.extract_strided_slice %187 {offsets = [0, 0], sizes = [8, 32], strides = [1, 1]} : vector<8x128xbf16> to vector<8x32xbf16>
    %209 = vector.extract_strided_slice %187 {offsets = [0, 32], sizes = [8, 32], strides = [1, 1]} : vector<8x128xbf16> to vector<8x32xbf16>
    %210 = vector.extract_strided_slice %187 {offsets = [0, 64], sizes = [8, 32], strides = [1, 1]} : vector<8x128xbf16> to vector<8x32xbf16>
    %211 = vector.extract_strided_slice %187 {offsets = [0, 96], sizes = [8, 32], strides = [1, 1]} : vector<8x128xbf16> to vector<8x32xbf16>
    %212 = vector.shape_cast %208 : vector<8x32xbf16> to vector<1x8x32xbf16>
    %213 = vector.shape_cast %209 : vector<8x32xbf16> to vector<1x8x32xbf16>
    %214 = vector.shape_cast %210 : vector<8x32xbf16> to vector<1x8x32xbf16>
    %215 = vector.shape_cast %211 : vector<8x32xbf16> to vector<1x8x32xbf16>
    %216 = tpu.concatenate %212, %213, %214, %215 in 0 : vector<1x8x32xbf16>, vector<1x8x32xbf16>, vector<1x8x32xbf16>, vector<1x8x32xbf16> -> vector<4x8x32xbf16>
    %cst_53 = arith.constant dense<0.000000e+00> : vector<4x8x8xf32>
    %217 = tpu.matmul %198, %207, %cst_53 {dimension_numbers = #tpu.dot_dimension_numbers<[2], [2], [1], [1], [0, 0, 0, 1, 1, 1], [0], [0]>} : vector<4x8x32xbf16>, vector<4x8x32xbf16>, vector<4x8x8xf32> -> vector<4x8x8xf32>
    %218 = vector.shape_cast %189 : vector<1x8xf32> to vector<1x1x8xf32>
    %219 = vector.broadcast %218 : vector<1x1x8xf32> to vector<4x8x8xf32>
    %220 = arith.addf %217, %219 : vector<4x8x8xf32>
    %cst_54 = arith.constant dense<0xFF800000> : vector<4x8xf32>
    %221 = vector.multi_reduction <maximumf>, %220, %cst_54 [2] : vector<4x8x8xf32> to vector<4x8xf32>
    %222 = vector.shape_cast %221 : vector<4x8xf32> to vector<4x8x1xf32>
    %223 = vector.broadcast %222 : vector<4x8x1xf32> to vector<4x8x8xf32>
    %224 = arith.subf %220, %223 : vector<4x8x8xf32>
    %225 = math.exp %224 : vector<4x8x8xf32>
    %cst_55 = arith.constant dense<0.000000e+00> : vector<4x8xf32>
    %226 = vector.multi_reduction <add>, %225, %cst_55 [2] : vector<4x8x8xf32> to vector<4x8xf32>
    %227 = vector.shape_cast %226 : vector<4x8xf32> to vector<4x8x1xf32>
    %228 = tpu.reciprocal %227 {approx = true} : vector<4x8x1xf32> -> vector<4x8x1xf32>
    %229 = arith.truncf %225 : vector<4x8x8xf32> to vector<4x8x8xbf16>
    %cst_56 = arith.constant dense<0.000000e+00> : vector<4x8x32xf32>
    %230 = tpu.matmul %229, %216, %cst_56 {dimension_numbers = #tpu.dot_dimension_numbers<[2], [1], [1], [2], [0, 0, 0, 1, 1, 2], [0], [0]>} : vector<4x8x8xbf16>, vector<4x8x32xbf16>, vector<4x8x32xf32> -> vector<4x8x32xf32>
    %231 = vector.broadcast %228 : vector<4x8x1xf32> to vector<4x8x32xf32>
    %232 = arith.mulf %230, %231 : vector<4x8x32xf32>
    %233 = vector.extract_strided_slice %232 {offsets = [0, 0, 0], sizes = [1, 8, 32], strides = [1, 1, 1]} : vector<4x8x32xf32> to vector<1x8x32xf32>
    %234 = vector.shape_cast %233 : vector<1x8x32xf32> to vector<8x32xf32>
    %235 = vector.extract_strided_slice %232 {offsets = [1, 0, 0], sizes = [1, 8, 32], strides = [1, 1, 1]} : vector<4x8x32xf32> to vector<1x8x32xf32>
    %236 = vector.shape_cast %235 : vector<1x8x32xf32> to vector<8x32xf32>
    %237 = vector.extract_strided_slice %232 {offsets = [2, 0, 0], sizes = [1, 8, 32], strides = [1, 1, 1]} : vector<4x8x32xf32> to vector<1x8x32xf32>
    %238 = vector.shape_cast %237 : vector<1x8x32xf32> to vector<8x32xf32>
    %239 = vector.extract_strided_slice %232 {offsets = [3, 0, 0], sizes = [1, 8, 32], strides = [1, 1, 1]} : vector<4x8x32xf32> to vector<1x8x32xf32>
    %240 = vector.shape_cast %239 : vector<1x8x32xf32> to vector<8x32xf32>
    %241 = tpu.concatenate %234, %236, %238, %240 in 1 : vector<8x32xf32>, vector<8x32xf32>, vector<8x32xf32>, vector<8x32xf32> -> vector<8x128xf32>
    %242 = vector.extract_strided_slice %175 {offsets = [8, 0], sizes = [8, 128], strides = [1, 1]} : vector<16x128xbf16> to vector<8x128xbf16>
    %243 = vector.extract_strided_slice %182 {offsets = [8, 0], sizes = [8, 128], strides = [1, 1]} : vector<16x128xbf16> to vector<8x128xbf16>
    %244 = vector.extract_strided_slice %184 {offsets = [8, 0], sizes = [8, 128], strides = [1, 1]} : vector<16x128xbf16> to vector<8x128xbf16>
    %c1_57 = arith.constant 1 : index
    %c0_58 = arith.constant 0 : index
    %c0_59 = arith.constant 0 : index
    %245 = vector.load %arg5[%c1_57, %c0_58, %c0_59] : memref<2x1x8xf32, #tpu.memory_space<vmem>>, vector<1x1x8xf32>
    %246 = vector.shape_cast %245 : vector<1x1x8xf32> to vector<1x8xf32>
    %247 = vector.extract_strided_slice %242 {offsets = [0, 0], sizes = [8, 32], strides = [1, 1]} : vector<8x128xbf16> to vector<8x32xbf16>
    %248 = vector.extract_strided_slice %242 {offsets = [0, 32], sizes = [8, 32], strides = [1, 1]} : vector<8x128xbf16> to vector<8x32xbf16>
    %249 = vector.extract_strided_slice %242 {offsets = [0, 64], sizes = [8, 32], strides = [1, 1]} : vector<8x128xbf16> to vector<8x32xbf16>
    %250 = vector.extract_strided_slice %242 {offsets = [0, 96], sizes = [8, 32], strides = [1, 1]} : vector<8x128xbf16> to vector<8x32xbf16>
    %251 = vector.shape_cast %247 : vector<8x32xbf16> to vector<1x8x32xbf16>
    %252 = vector.shape_cast %248 : vector<8x32xbf16> to vector<1x8x32xbf16>
    %253 = vector.shape_cast %249 : vector<8x32xbf16> to vector<1x8x32xbf16>
    %254 = vector.shape_cast %250 : vector<8x32xbf16> to vector<1x8x32xbf16>
    %255 = tpu.concatenate %251, %252, %253, %254 in 0 : vector<1x8x32xbf16>, vector<1x8x32xbf16>, vector<1x8x32xbf16>, vector<1x8x32xbf16> -> vector<4x8x32xbf16>
    %256 = vector.extract_strided_slice %243 {offsets = [0, 0], sizes = [8, 32], strides = [1, 1]} : vector<8x128xbf16> to vector<8x32xbf16>
    %257 = vector.extract_strided_slice %243 {offsets = [0, 32], sizes = [8, 32], strides = [1, 1]} : vector<8x128xbf16> to vector<8x32xbf16>
    %258 = vector.extract_strided_slice %243 {offsets = [0, 64], sizes = [8, 32], strides = [1, 1]} : vector<8x128xbf16> to vector<8x32xbf16>
    %259 = vector.extract_strided_slice %243 {offsets = [0, 96], sizes = [8, 32], strides = [1, 1]} : vector<8x128xbf16> to vector<8x32xbf16>
    %260 = vector.shape_cast %256 : vector<8x32xbf16> to vector<1x8x32xbf16>
    %261 = vector.shape_cast %257 : vector<8x32xbf16> to vector<1x8x32xbf16>
    %262 = vector.shape_cast %258 : vector<8x32xbf16> to vector<1x8x32xbf16>
    %263 = vector.shape_cast %259 : vector<8x32xbf16> to vector<1x8x32xbf16>
    %264 = tpu.concatenate %260, %261, %262, %263 in 0 : vector<1x8x32xbf16>, vector<1x8x32xbf16>, vector<1x8x32xbf16>, vector<1x8x32xbf16> -> vector<4x8x32xbf16>
    %265 = vector.extract_strided_slice %244 {offsets = [0, 0], sizes = [8, 32], strides = [1, 1]} : vector<8x128xbf16> to vector<8x32xbf16>
    %266 = vector.extract_strided_slice %244 {offsets = [0, 32], sizes = [8, 32], strides = [1, 1]} : vector<8x128xbf16> to vector<8x32xbf16>
    %267 = vector.extract_strided_slice %244 {offsets = [0, 64], sizes = [8, 32], strides = [1, 1]} : vector<8x128xbf16> to vector<8x32xbf16>
    %268 = vector.extract_strided_slice %244 {offsets = [0, 96], sizes = [8, 32], strides = [1, 1]} : vector<8x128xbf16> to vector<8x32xbf16>
    %269 = vector.shape_cast %265 : vector<8x32xbf16> to vector<1x8x32xbf16>
    %270 = vector.shape_cast %266 : vector<8x32xbf16> to vector<1x8x32xbf16>
    %271 = vector.shape_cast %267 : vector<8x32xbf16> to vector<1x8x32xbf16>
    %272 = vector.shape_cast %268 : vector<8x32xbf16> to vector<1x8x32xbf16>
    %273 = tpu.concatenate %269, %270, %271, %272 in 0 : vector<1x8x32xbf16>, vector<1x8x32xbf16>, vector<1x8x32xbf16>, vector<1x8x32xbf16> -> vector<4x8x32xbf16>
    %cst_60 = arith.constant dense<0.000000e+00> : vector<4x8x8xf32>
    %274 = tpu.matmul %255, %264, %cst_60 {dimension_numbers = #tpu.dot_dimension_numbers<[2], [2], [1], [1], [0, 0, 0, 1, 1, 1], [0], [0]>} : vector<4x8x32xbf16>, vector<4x8x32xbf16>, vector<4x8x8xf32> -> vector<4x8x8xf32>
    %275 = vector.shape_cast %246 : vector<1x8xf32> to vector<1x1x8xf32>
    %276 = vector.broadcast %275 : vector<1x1x8xf32> to vector<4x8x8xf32>
    %277 = arith.addf %274, %276 : vector<4x8x8xf32>
    %cst_61 = arith.constant dense<0xFF800000> : vector<4x8xf32>
    %278 = vector.multi_reduction <maximumf>, %277, %cst_61 [2] : vector<4x8x8xf32> to vector<4x8xf32>
    %279 = vector.shape_cast %278 : vector<4x8xf32> to vector<4x8x1xf32>
    %280 = vector.broadcast %279 : vector<4x8x1xf32> to vector<4x8x8xf32>
    %281 = arith.subf %277, %280 : vector<4x8x8xf32>
    %282 = math.exp %281 : vector<4x8x8xf32>
    %cst_62 = arith.constant dense<0.000000e+00> : vector<4x8xf32>
    %283 = vector.multi_reduction <add>, %282, %cst_62 [2] : vector<4x8x8xf32> to vector<4x8xf32>
    %284 = vector.shape_cast %283 : vector<4x8xf32> to vector<4x8x1xf32>
    %285 = tpu.reciprocal %284 {approx = true} : vector<4x8x1xf32> -> vector<4x8x1xf32>
    %286 = arith.truncf %282 : vector<4x8x8xf32> to vector<4x8x8xbf16>
    %cst_63 = arith.constant dense<0.000000e+00> : vector<4x8x32xf32>
    %287 = tpu.matmul %286, %273, %cst_63 {dimension_numbers = #tpu.dot_dimension_numbers<[2], [1], [1], [2], [0, 0, 0, 1, 1, 2], [0], [0]>} : vector<4x8x8xbf16>, vector<4x8x32xbf16>, vector<4x8x32xf32> -> vector<4x8x32xf32>
    %288 = vector.broadcast %285 : vector<4x8x1xf32> to vector<4x8x32xf32>
    %289 = arith.mulf %287, %288 : vector<4x8x32xf32>
    %290 = vector.extract_strided_slice %289 {offsets = [0, 0, 0], sizes = [1, 8, 32], strides = [1, 1, 1]} : vector<4x8x32xf32> to vector<1x8x32xf32>
    %291 = vector.shape_cast %290 : vector<1x8x32xf32> to vector<8x32xf32>
    %292 = vector.extract_strided_slice %289 {offsets = [1, 0, 0], sizes = [1, 8, 32], strides = [1, 1, 1]} : vector<4x8x32xf32> to vector<1x8x32xf32>
    %293 = vector.shape_cast %292 : vector<1x8x32xf32> to vector<8x32xf32>
    %294 = vector.extract_strided_slice %289 {offsets = [2, 0, 0], sizes = [1, 8, 32], strides = [1, 1, 1]} : vector<4x8x32xf32> to vector<1x8x32xf32>
    %295 = vector.shape_cast %294 : vector<1x8x32xf32> to vector<8x32xf32>
    %296 = vector.extract_strided_slice %289 {offsets = [3, 0, 0], sizes = [1, 8, 32], strides = [1, 1, 1]} : vector<4x8x32xf32> to vector<1x8x32xf32>
    %297 = vector.shape_cast %296 : vector<1x8x32xf32> to vector<8x32xf32>
    %298 = tpu.concatenate %291, %293, %295, %297 in 1 : vector<8x32xf32>, vector<8x32xf32>, vector<8x32xf32>, vector<8x32xf32> -> vector<8x128xf32>
    %299 = tpu.concatenate %241, %298 in 0 : vector<8x128xf32>, vector<8x128xf32> -> vector<16x128xf32>
    %300 = arith.truncf %299 : vector<16x128xf32> to vector<16x128xbf16>
    %c0_64 = arith.constant 0 : index
    %c0_65 = arith.constant 0 : index
    %301 = vector.load %arg14[%c0_64, %c0_65] : memref<128x128xbf16, #tpu.memory_space<vmem>>, vector<128x128xbf16>
    %cst_66 = arith.constant dense<0.000000e+00> : vector<16x128xf32>
    %302 = tpu.matmul %300, %301, %cst_66 {dimension_numbers = #tpu.dot_dimension_numbers<[1], [0], [0], [1], [0, 0, 1, 1], [], []>} : vector<16x128xbf16>, vector<128x128xbf16>, vector<16x128xf32> -> vector<16x128xf32>
    %c0_67 = arith.constant 0 : index
    %c0_68 = arith.constant 0 : index
    %303 = vector.load %arg15[%c0_67, %c0_68] : memref<1x128xf32, #tpu.memory_space<vmem>>, vector<1x128xf32>
    %304 = vector.broadcast %303 : vector<1x128xf32> to vector<16x128xf32>
    %305 = arith.addf %302, %304 : vector<16x128xf32>
    %306 = arith.addf %166, %305 : vector<16x128xf32>
    %c0_69 = arith.constant 0 : index
    %c0_70 = arith.constant 0 : index
    %307 = vector.load %arg22[%c0_69, %c0_70] : memref<1x128xf32, #tpu.memory_space<vmem>>, vector<1x128xf32>
    %c0_71 = arith.constant 0 : index
    %c0_72 = arith.constant 0 : index
    %308 = vector.load %arg23[%c0_71, %c0_72] : memref<1x128xf32, #tpu.memory_space<vmem>>, vector<1x128xf32>
    %cst_73 = arith.constant dense<0.000000e+00> : vector<16xf32>
    %309 = vector.multi_reduction <add>, %306, %cst_73 [1] : vector<16x128xf32> to vector<16xf32>
    %310 = vector.shape_cast %309 : vector<16xf32> to vector<16x1xf32>
    %cst_74 = arith.constant 1.280000e+02 : f32
    %311 = vector.broadcast %cst_74 : f32 to vector<16x1xf32>
    %312 = arith.divf %310, %311 : vector<16x1xf32>
    %313 = vector.broadcast %312 : vector<16x1xf32> to vector<16x128xf32>
    %314 = arith.subf %306, %313 : vector<16x128xf32>
    %315 = arith.mulf %314, %314 : vector<16x128xf32>
    %cst_75 = arith.constant dense<0.000000e+00> : vector<16xf32>
    %316 = vector.multi_reduction <add>, %315, %cst_75 [1] : vector<16x128xf32> to vector<16xf32>
    %317 = vector.shape_cast %316 : vector<16xf32> to vector<16x1xf32>
    %cst_76 = arith.constant 1.280000e+02 : f32
    %318 = vector.broadcast %cst_76 : f32 to vector<16x1xf32>
    %319 = arith.divf %317, %318 : vector<16x1xf32>
    %cst_77 = arith.constant 9.99999974E-6 : f32
    %320 = vector.broadcast %cst_77 : f32 to vector<16x1xf32>
    %321 = arith.addf %319, %320 : vector<16x1xf32>
    %322 = math.rsqrt %321 : vector<16x1xf32>
    %323 = vector.broadcast %322 : vector<16x1xf32> to vector<16x128xf32>
    %324 = arith.mulf %314, %323 : vector<16x128xf32>
    %325 = vector.broadcast %307 : vector<1x128xf32> to vector<16x128xf32>
    %326 = arith.mulf %324, %325 : vector<16x128xf32>
    %327 = vector.broadcast %308 : vector<1x128xf32> to vector<16x128xf32>
    %328 = arith.addf %326, %327 : vector<16x128xf32>
    %329 = arith.truncf %328 : vector<16x128xf32> to vector<16x128xbf16>
    %c0_78 = arith.constant 0 : index
    %c0_79 = arith.constant 0 : index
    %330 = vector.load %arg16[%c0_78, %c0_79] : memref<128x256xbf16, #tpu.memory_space<vmem>>, vector<128x256xbf16>
    %cst_80 = arith.constant dense<0.000000e+00> : vector<16x256xf32>
    %331 = tpu.matmul %329, %330, %cst_80 {dimension_numbers = #tpu.dot_dimension_numbers<[1], [0], [0], [1], [0, 0, 1, 1], [], []>} : vector<16x128xbf16>, vector<128x256xbf16>, vector<16x256xf32> -> vector<16x256xf32>
    %c0_81 = arith.constant 0 : index
    %c0_82 = arith.constant 0 : index
    %332 = vector.load %arg17[%c0_81, %c0_82] : memref<1x256xf32, #tpu.memory_space<vmem>>, vector<1x256xf32>
    %333 = vector.broadcast %332 : vector<1x256xf32> to vector<16x256xf32>
    %334 = arith.addf %331, %333 : vector<16x256xf32>
    %cst_83 = arith.constant 0.000000e+00 : f32
    %335 = vector.broadcast %cst_83 : f32 to vector<16x256xf32>
    %336 = arith.maximumf %334, %335 : vector<16x256xf32>
    %337 = arith.truncf %336 : vector<16x256xf32> to vector<16x256xbf16>
    %c0_84 = arith.constant 0 : index
    %c0_85 = arith.constant 0 : index
    %338 = vector.load %arg18[%c0_84, %c0_85] : memref<256x128xbf16, #tpu.memory_space<vmem>>, vector<256x128xbf16>
    %cst_86 = arith.constant dense<0.000000e+00> : vector<16x128xf32>
    %339 = tpu.matmul %337, %338, %cst_86 {dimension_numbers = #tpu.dot_dimension_numbers<[1], [0], [0], [1], [0, 0, 1, 1], [], []>} : vector<16x256xbf16>, vector<256x128xbf16>, vector<16x128xf32> -> vector<16x128xf32>
    %c0_87 = arith.constant 0 : index
    %c0_88 = arith.constant 0 : index
    %340 = vector.load %arg19[%c0_87, %c0_88] : memref<1x128xf32, #tpu.memory_space<vmem>>, vector<1x128xf32>
    %341 = vector.broadcast %340 : vector<1x128xf32> to vector<16x128xf32>
    %342 = arith.addf %339, %341 : vector<16x128xf32>
    %343 = arith.addf %328, %342 : vector<16x128xf32>
    %c0_89 = arith.constant 0 : index
    %c0_90 = arith.constant 0 : index
    %344 = vector.load %arg24[%c0_89, %c0_90] : memref<1x128xf32, #tpu.memory_space<vmem>>, vector<1x128xf32>
    %c0_91 = arith.constant 0 : index
    %c0_92 = arith.constant 0 : index
    %345 = vector.load %arg25[%c0_91, %c0_92] : memref<1x128xf32, #tpu.memory_space<vmem>>, vector<1x128xf32>
    %cst_93 = arith.constant dense<0.000000e+00> : vector<16xf32>
    %346 = vector.multi_reduction <add>, %343, %cst_93 [1] : vector<16x128xf32> to vector<16xf32>
    %347 = vector.shape_cast %346 : vector<16xf32> to vector<16x1xf32>
    %cst_94 = arith.constant 1.280000e+02 : f32
    %348 = vector.broadcast %cst_94 : f32 to vector<16x1xf32>
    %349 = arith.divf %347, %348 : vector<16x1xf32>
    %350 = vector.broadcast %349 : vector<16x1xf32> to vector<16x128xf32>
    %351 = arith.subf %343, %350 : vector<16x128xf32>
    %352 = arith.mulf %351, %351 : vector<16x128xf32>
    %cst_95 = arith.constant dense<0.000000e+00> : vector<16xf32>
    %353 = vector.multi_reduction <add>, %352, %cst_95 [1] : vector<16x128xf32> to vector<16xf32>
    %354 = vector.shape_cast %353 : vector<16xf32> to vector<16x1xf32>
    %cst_96 = arith.constant 1.280000e+02 : f32
    %355 = vector.broadcast %cst_96 : f32 to vector<16x1xf32>
    %356 = arith.divf %354, %355 : vector<16x1xf32>
    %cst_97 = arith.constant 9.99999974E-6 : f32
    %357 = vector.broadcast %cst_97 : f32 to vector<16x1xf32>
    %358 = arith.addf %356, %357 : vector<16x1xf32>
    %359 = math.rsqrt %358 : vector<16x1xf32>
    %360 = vector.broadcast %359 : vector<16x1xf32> to vector<16x128xf32>
    %361 = arith.mulf %351, %360 : vector<16x128xf32>
    %362 = vector.broadcast %344 : vector<1x128xf32> to vector<16x128xf32>
    %363 = arith.mulf %361, %362 : vector<16x128xf32>
    %364 = vector.broadcast %345 : vector<1x128xf32> to vector<16x128xf32>
    %365 = arith.addf %363, %364 : vector<16x128xf32>
    %366 = vector.shape_cast %365 : vector<16x128xf32> to vector<2x8x128xf32>
    %367 = arith.truncf %366 : vector<2x8x128xf32> to vector<2x8x128xbf16>
    %c0_98 = arith.constant 0 : index
    %c0_99 = arith.constant 0 : index
    %c0_100 = arith.constant 0 : index
    %368 = vector.load %arg26[%c0_98, %c0_99, %c0_100] : memref<2x8x128xbf16, #tpu.memory_space<vmem>>, vector<2x8x128xbf16>
    tpu.vector_store %arg26[%c0_98, %c0_99, %c0_100], %367 {strides = array<i32>} : memref<2x8x128xbf16, #tpu.memory_space<vmem>>, vector<2x8x128xbf16>,
    return
  }
  func.func @transform_0(%arg0: i32) -> (i32, i32, i32) {
    %c0_i32 = arith.constant 0 : i32
    %c0_i32_0 = arith.constant 0 : i32
    %c0_i32_1 = arith.constant 0 : i32
    return %arg0, %c0_i32, %c0_i32_0 : i32, i32, i32
  }
  func.func @transform_1(%arg0: i32) -> (i32, i32, i32) {
    %c0_i32 = arith.constant 0 : i32
    %c0_i32_0 = arith.constant 0 : i32
    %c0_i32_1 = arith.constant 0 : i32
    return %arg0, %c0_i32, %c0_i32_0 : i32, i32, i32
  }
  func.func @transform_2(%arg0: i32) -> (i32, i32) {
    %c0_i32 = arith.constant 0 : i32
    %c0_i32_0 = arith.constant 0 : i32
    %c0_i32_1 = arith.constant 0 : i32
    return %c0_i32, %c0_i32_0 : i32, i32
  }
  func.func @transform_3(%arg0: i32) -> (i32, i32, i32) {
    %c0_i32 = arith.constant 0 : i32
    %c0_i32_0 = arith.constant 0 : i32
    %c0_i32_1 = arith.constant 0 : i32
    return %arg0, %c0_i32, %c0_i32_0 : i32, i32, i32
  }
  func.func @transform_4(%arg0: i32) -> (i32, i32, i32) {
    %c0_i32 = arith.constant 0 : i32
    %c0_i32_0 = arith.constant 0 : i32
    %c0_i32_1 = arith.constant 0 : i32
    return %arg0, %c0_i32, %c0_i32_0 : i32, i32, i32
  }
  func.func @transform_5(%arg0: i32) -> (i32, i32) {
    %c0_i32 = arith.constant 0 : i32
    %c0_i32_0 = arith.constant 0 : i32
    %c0_i32_1 = arith.constant 0 : i32
    return %c0_i32, %c0_i32_0 : i32, i32
  }
  func.func @transform_6(%arg0: i32) -> (i32, i32) {
    %c0_i32 = arith.constant 0 : i32
    %c0_i32_0 = arith.constant 0 : i32
    %c0_i32_1 = arith.constant 0 : i32
    return %c0_i32, %c0_i32_0 : i32, i32
  }
  func.func @transform_7(%arg0: i32) -> (i32, i32) {
    %c0_i32 = arith.constant 0 : i32
    %c0_i32_0 = arith.constant 0 : i32
    %c0_i32_1 = arith.constant 0 : i32
    return %c0_i32, %c0_i32_0 : i32, i32
  }
  func.func @transform_8(%arg0: i32) -> (i32, i32) {
    %c0_i32 = arith.constant 0 : i32
    %c0_i32_0 = arith.constant 0 : i32
    %c0_i32_1 = arith.constant 0 : i32
    return %c0_i32, %c0_i32_0 : i32, i32
  }
  func.func @transform_9(%arg0: i32) -> (i32, i32) {
    %c0_i32 = arith.constant 0 : i32
    %c0_i32_0 = arith.constant 0 : i32
    %c0_i32_1 = arith.constant 0 : i32
    return %c0_i32, %c0_i32_0 : i32, i32
  }
  func.func @transform_10(%arg0: i32) -> (i32, i32) {
    %c0_i32 = arith.constant 0 : i32
    %c0_i32_0 = arith.constant 0 : i32
    %c0_i32_1 = arith.constant 0 : i32
    return %c0_i32, %c0_i32_0 : i32, i32
  }
  func.func @transform_11(%arg0: i32) -> (i32, i32) {
    %c0_i32 = arith.constant 0 : i32
    %c0_i32_0 = arith.constant 0 : i32
    %c0_i32_1 = arith.constant 0 : i32
    return %c0_i32, %c0_i32_0 : i32, i32
  }
  func.func @transform_12(%arg0: i32) -> (i32, i32) {
    %c0_i32 = arith.constant 0 : i32
    %c0_i32_0 = arith.constant 0 : i32
    %c0_i32_1 = arith.constant 0 : i32
    return %c0_i32, %c0_i32_0 : i32, i32
  }
  func.func @transform_13(%arg0: i32) -> (i32, i32) {
    %c0_i32 = arith.constant 0 : i32
    %c0_i32_0 = arith.constant 0 : i32
    %c0_i32_1 = arith.constant 0 : i32
    return %c0_i32, %c0_i32_0 : i32, i32
  }
  func.func @transform_14(%arg0: i32) -> (i32, i32) {
    %c0_i32 = arith.constant 0 : i32
    %c0_i32_0 = arith.constant 0 : i32
    %c0_i32_1 = arith.constant 0 : i32
    return %c0_i32, %c0_i32_0 : i32, i32
  }
  func.func @transform_15(%arg0: i32) -> (i32, i32) {
    %c0_i32 = arith.constant 0 : i32
    %c0_i32_0 = arith.constant 0 : i32
    %c0_i32_1 = arith.constant 0 : i32
    return %c0_i32, %c0_i32_0 : i32, i32
  }
  func.func @transform_16(%arg0: i32) -> (i32, i32) {
    %c0_i32 = arith.constant 0 : i32
    %c0_i32_0 = arith.constant 0 : i32
    %c0_i32_1 = arith.constant 0 : i32
    return %c0_i32, %c0_i32_0 : i32, i32
  }
  func.func @transform_17(%arg0: i32) -> (i32, i32) {
    %c0_i32 = arith.constant 0 : i32
    %c0_i32_0 = arith.constant 0 : i32
    %c0_i32_1 = arith.constant 0 : i32
    return %c0_i32, %c0_i32_0 : i32, i32
  }
  func.func @transform_18(%arg0: i32) -> (i32, i32) {
    %c0_i32 = arith.constant 0 : i32
    %c0_i32_0 = arith.constant 0 : i32
    %c0_i32_1 = arith.constant 0 : i32
    return %c0_i32, %c0_i32_0 : i32, i32
  }
  func.func @transform_19(%arg0: i32) -> (i32, i32) {
    %c0_i32 = arith.constant 0 : i32
    %c0_i32_0 = arith.constant 0 : i32
    %c0_i32_1 = arith.constant 0 : i32
    return %c0_i32, %c0_i32_0 : i32, i32
  }
  func.func @transform_20(%arg0: i32) -> (i32, i32) {
    %c0_i32 = arith.constant 0 : i32
    %c0_i32_0 = arith.constant 0 : i32
    %c0_i32_1 = arith.constant 0 : i32
    return %c0_i32, %c0_i32_0 : i32, i32
  }
  func.func @transform_21(%arg0: i32) -> (i32, i32) {
    %c0_i32 = arith.constant 0 : i32
    %c0_i32_0 = arith.constant 0 : i32
    %c0_i32_1 = arith.constant 0 : i32
    return %c0_i32, %c0_i32_0 : i32, i32
  }
  func.func @transform_22(%arg0: i32) -> (i32, i32) {
    %c0_i32 = arith.constant 0 : i32
    %c0_i32_0 = arith.constant 0 : i32
    %c0_i32_1 = arith.constant 0 : i32
    return %c0_i32, %c0_i32_0 : i32, i32
  }
  func.func @transform_23(%arg0: i32) -> (i32, i32) {
    %c0_i32 = arith.constant 0 : i32
    %c0_i32_0 = arith.constant 0 : i32
    %c0_i32_1 = arith.constant 0 : i32
    return %c0_i32, %c0_i32_0 : i32, i32
  }
  func.func @transform_24(%arg0: i32) -> (i32, i32) {
    %c0_i32 = arith.constant 0 : i32
    %c0_i32_0 = arith.constant 0 : i32
    %c0_i32_1 = arith.constant 0 : i32
    return %c0_i32, %c0_i32_0 : i32, i32
  }
  func.func @transform_25(%arg0: i32) -> (i32, i32, i32) {
    %c0_i32 = arith.constant 0 : i32
    %c0_i32_0 = arith.constant 0 : i32
    %c0_i32_1 = arith.constant 0 : i32
    return %arg0, %c0_i32, %c0_i32_0 : i32, i32, i32
  }
}

module attributes {stable_mosaic.version = 11 : i64} {
  func.func @_norm_proj_kernel(%arg0: i32, %arg1: i32, %arg2: memref<16x128xbf16, #tpu.memory_space<vmem>>, %arg3: memref<1x128xf32, #tpu.memory_space<vmem>>, %arg4: memref<1x128xf32, #tpu.memory_space<vmem>>, %arg5: memref<128x128xbf16, #tpu.memory_space<vmem>>, %arg6: memref<1x128xf32, #tpu.memory_space<vmem>>, %arg7: memref<16x128xf32, #tpu.memory_space<vmem>>) attributes {dimension_semantics = [#tpu.dimension_semantics<parallel>, #tpu.dimension_semantics<parallel>], iteration_bounds = array<i64: 1, 1>, scalar_prefetch = 0 : i64, scratch_operands = 0 : i64, tpu.core_type = #tpu.core_type<tc>, window_params = [{transform_indices = @transform_0, window_bounds = array<i64: 16, 128>}, {pipeline_mode = #tpu.pipeline_mode<synchronous>, transform_indices = @transform_1, window_bounds = array<i64: 1, 128>}, {pipeline_mode = #tpu.pipeline_mode<synchronous>, transform_indices = @transform_2, window_bounds = array<i64: 1, 128>}, {transform_indices = @transform_3, window_bounds = array<i64: 128, 128>}, {transform_indices = @transform_4, window_bounds = array<i64: 1, 128>}, {transform_indices = @transform_5, window_bounds = array<i64: 16, 128>}]} {
    %c0 = arith.constant 0 : index
    %c0_0 = arith.constant 0 : index
    %0 = vector.load %arg2[%c0, %c0_0] : memref<16x128xbf16, #tpu.memory_space<vmem>>, vector<16x128xbf16>
    %1 = arith.extf %0 : vector<16x128xbf16> to vector<16x128xf32>
    %c0_1 = arith.constant 0 : index
    %c0_2 = arith.constant 0 : index
    %2 = vector.load %arg3[%c0_1, %c0_2] : memref<1x128xf32, #tpu.memory_space<vmem>>, vector<1x128xf32>
    %c0_3 = arith.constant 0 : index
    %c0_4 = arith.constant 0 : index
    %3 = vector.load %arg4[%c0_3, %c0_4] : memref<1x128xf32, #tpu.memory_space<vmem>>, vector<1x128xf32>
    %cst = arith.constant dense<0.000000e+00> : vector<16xf32>
    %4 = vector.multi_reduction <add>, %1, %cst [1] : vector<16x128xf32> to vector<16xf32>
    %5 = vector.shape_cast %4 : vector<16xf32> to vector<16x1xf32>
    %cst_5 = arith.constant 1.280000e+02 : f32
    %6 = vector.broadcast %cst_5 : f32 to vector<16x1xf32>
    %7 = arith.divf %5, %6 : vector<16x1xf32>
    %8 = vector.broadcast %7 : vector<16x1xf32> to vector<16x128xf32>
    %9 = arith.subf %1, %8 : vector<16x128xf32>
    %10 = arith.mulf %9, %9 : vector<16x128xf32>
    %cst_6 = arith.constant dense<0.000000e+00> : vector<16xf32>
    %11 = vector.multi_reduction <add>, %10, %cst_6 [1] : vector<16x128xf32> to vector<16xf32>
    %12 = vector.shape_cast %11 : vector<16xf32> to vector<16x1xf32>
    %cst_7 = arith.constant 1.280000e+02 : f32
    %13 = vector.broadcast %cst_7 : f32 to vector<16x1xf32>
    %14 = arith.divf %12, %13 : vector<16x1xf32>
    %cst_8 = arith.constant 9.99999974E-6 : f32
    %15 = vector.broadcast %cst_8 : f32 to vector<16x1xf32>
    %16 = arith.addf %14, %15 : vector<16x1xf32>
    %17 = math.rsqrt %16 : vector<16x1xf32>
    %18 = vector.broadcast %17 : vector<16x1xf32> to vector<16x128xf32>
    %19 = arith.mulf %9, %18 : vector<16x128xf32>
    %20 = vector.broadcast %2 : vector<1x128xf32> to vector<16x128xf32>
    %21 = arith.mulf %19, %20 : vector<16x128xf32>
    %22 = vector.broadcast %3 : vector<1x128xf32> to vector<16x128xf32>
    %23 = arith.addf %21, %22 : vector<16x128xf32>
    %24 = arith.truncf %23 : vector<16x128xf32> to vector<16x128xbf16>
    %c0_9 = arith.constant 0 : index
    %c0_10 = arith.constant 0 : index
    %25 = vector.load %arg5[%c0_9, %c0_10] : memref<128x128xbf16, #tpu.memory_space<vmem>>, vector<128x128xbf16>
    %cst_11 = arith.constant dense<0.000000e+00> : vector<16x128xf32>
    %26 = tpu.matmul %24, %25, %cst_11 {dimension_numbers = #tpu.dot_dimension_numbers<[1], [0], [0], [1], [0, 0, 1, 1], [], []>} : vector<16x128xbf16>, vector<128x128xbf16>, vector<16x128xf32> -> vector<16x128xf32>
    %c0_12 = arith.constant 0 : index
    %c0_13 = arith.constant 0 : index
    %27 = vector.load %arg6[%c0_12, %c0_13] : memref<1x128xf32, #tpu.memory_space<vmem>>, vector<1x128xf32>
    %28 = vector.broadcast %27 : vector<1x128xf32> to vector<16x128xf32>
    %29 = arith.addf %26, %28 : vector<16x128xf32>
    %c0_14 = arith.constant 0 : index
    %c0_15 = arith.constant 0 : index
    %30 = vector.load %arg7[%c0_14, %c0_15] : memref<16x128xf32, #tpu.memory_space<vmem>>, vector<16x128xf32>
    tpu.vector_store %arg7[%c0_14, %c0_15], %29 {strides = array<i32>} : memref<16x128xf32, #tpu.memory_space<vmem>>, vector<16x128xf32>,
    return
  }
  func.func @transform_0(%arg0: i32, %arg1: i32) -> (i32, i32) {
    %c0_i32 = arith.constant 0 : i32
    %c0_i32_0 = arith.constant 0 : i32
    return %arg0, %c0_i32 : i32, i32
  }
  func.func @transform_1(%arg0: i32, %arg1: i32) -> (i32, i32) {
    %c0_i32 = arith.constant 0 : i32
    %c0_i32_0 = arith.constant 0 : i32
    %c0_i32_1 = arith.constant 0 : i32
    return %c0_i32, %c0_i32_0 : i32, i32
  }
  func.func @transform_2(%arg0: i32, %arg1: i32) -> (i32, i32) {
    %c0_i32 = arith.constant 0 : i32
    %c0_i32_0 = arith.constant 0 : i32
    %c0_i32_1 = arith.constant 0 : i32
    return %c0_i32, %c0_i32_0 : i32, i32
  }
  func.func @transform_3(%arg0: i32, %arg1: i32) -> (i32, i32) {
    %c0_i32 = arith.constant 0 : i32
    %c0_i32_0 = arith.constant 0 : i32
    return %c0_i32, %arg1 : i32, i32
  }
  func.func @transform_4(%arg0: i32, %arg1: i32) -> (i32, i32) {
    %c0_i32 = arith.constant 0 : i32
    %c0_i32_0 = arith.constant 0 : i32
    return %c0_i32, %arg1 : i32, i32
  }
  func.func @transform_5(%arg0: i32, %arg1: i32) -> (i32, i32) {
    %c0_i32 = arith.constant 0 : i32
    return %arg0, %arg1 : i32, i32
  }
}

</mosaic_0001>

<bundles_post_ra>
// kernel: transformer_forward.8
= control target key start
LH: loop header
LB: loop body
LE: loop exit
PB: predicated region body
PF: predicated region fallthrough
CT: control target
= control target key end

     0   :  { %s124_s0 = inlined_call_operand.vmem [shape: bf16[16,128], index: 0, kind: input, shape index: {}]   ;;  %s125_s1 = inlined_call_operand.vmem [shape: f32[1,128], index: 1, kind: input, shape index: {}]   ;;  %s126_s2 = inlined_call_operand.vmem [shape: f32[1,128], index: 2, kind: input, shape index: {}]   ;;  %s127_s3 = inlined_call_operand.vmem [shape: bf16[16,128], index: 3, kind: output, shape index: {}]  }
   0x1   :  { %v80_v0 = vld [vmem:[%s124_s0] sm:$0xff]  }
   0x2   :  { %v81_v1 = vunpack.c.l.bf16 %v80_v0  ;;  %v82_v2 = vunpack.c.h.bf16 %v80_v0  ;;  %v73_v19 = vld [vmem:[%s125_s1] ss:$0 sm:$0xff] }
   0x3   :  { %v74_v23 = vld [vmem:[%s126_s2] ss:$0 sm:$0xff] }
   0x4   :  { %20 = vadd.xlane.f32.xlu0 %v81_v1 }
   0x8   :  { %22 = vadd.xlane.f32.xlu0 %v82_v2 }
  0x8d   :  { %v21_v3 = vpop.xlane.xlu0 %20 }
  0x8e   :  { %v25_v4 = vmul.f32 0.0078125, %v21_v3 }
  0x90   :  { %v27_v5 = vsub.f32 %v81_v1, %v25_v4 }
  0x91   :  { %v23_v6 = vpop.xlane.xlu0 %22 }
  0x92   :  { %v26_v7 = vmul.f32 0.0078125, %v23_v6  ;;  %v29_v8 = vmul.f32 %v27_v5, %v27_v5 }
  0x94   :  { %v28_v9 = vsub.f32 %v82_v2, %v26_v7  ;;  %31 = vadd.xlane.f32.xlu1 %v29_v8 }
  0x96   :  { %v30_v10 = vmul.f32 %v28_v9, %v28_v9 }
  0x98   :  { %33 = vadd.xlane.f32.xlu1 %v30_v10 }
 0x11d   :  { %v32_v11 = vpop.xlane.xlu1 %31 }
 0x11e   :  { %v35_v12 = vmul.f32 0.0078125, %v32_v11 }
 0x120   :  { %v37_v13 = vadd.f32 1e-05, %v35_v12 }
 0x121   :  { %v34_v14 = vpop.xlane.xlu1 %33 }
 0x122   :  { %88 = vrsqrt.f32 %v37_v13  ;;  %v36_v15 = vmul.f32 0.0078125, %v34_v14 }
 0x124   :  { %v38_v16 = vadd.f32 1e-05, %v36_v15 }
 0x126   :  { %90 = vrsqrt.f32 %v38_v16 }
 0x12f   :  { %v89_v17 = vpop.eup %88 }
 0x130   :  { %v41_v18 = vmul.f32 %v89_v17, %v27_v5 }
 0x132   :  { %v49_v21 = vmul.f32 %v73_v19, %v41_v18 }
 0x133   :  { %v91_v20 = vpop.eup %90 }
 0x134   :  { %v42_v22 = vmul.f32 %v91_v20, %v28_v9  ;;  %v57_v25 = vadd.f32 %v74_v23, %v49_v21 }
 0x136   :  { %v50_v24 = vmul.f32 %v73_v19, %v42_v22 }
 0x138   :  { %v58_v26 = vadd.f32 %v74_v23, %v50_v24 }
 0x13a   :  { %v86_v27 = vpack.c.bf16 %v58_v26, %v57_v25 }
 0x13c   :  { %87 = vst [vmem:[%s127_s3] sm:$0xff] %v86_v27  }

// kernel: transformer_forward.6
= control target key start
LH: loop header
LB: loop body
LE: loop exit
PB: predicated region body
PF: predicated region fallthrough
CT: control target
= control target key end

     0   :  { %19 = vsyncpa [#allocation3], 0  ;;  %s3029_s0 = inlined_call_operand.vmem [shape: bf16[2,8,128], index: 0, kind: input, shape index: {}]   ;;  %s3030_s1 = inlined_call_operand.vmem [shape: f32[2,1,8], index: 1, kind: input, shape index: {}]   ;;  %s3031_s2 = inlined_call_operand.vmem [shape: bf16[128,384], index: 2, kind: input, shape index: {}]   ;;  %s3032_s3 = inlined_call_operand.hbm [shape: f32[1,384], index: 3, kind: input, shape index: {}]   ;;  %s3033_s4 = inlined_call_operand.vmem [shape: bf16[128,128], index: 4, kind: input, shape index: {}]   ;;  %s3034_s5 = inlined_call_operand.vmem [shape: f32[1,128], index: 5, kind: input, shape index: {}]   ;;  %s3035_s6 = inlined_call_operand.vmem [shape: bf16[128,256], index: 6, kind: input, shape index: {}]   ;;  %s3036_s7 = inlined_call_operand.hbm [shape: f32[1,256], index: 7, kind: input, shape index: {}]   ;;  %s3037_s8 = inlined_call_operand.hbm [shape: bf16[256,128], index: 8, kind: input, shape index: {}]   ;;  %s3038_s9 = inlined_call_operand.hbm [shape: f32[1,128], index: 9, kind: input, shape index: {}]   ;;  %s3039_s10 = inlined_call_operand.hbm [shape: f32[1,128], index: 10, kind: input, shape index: {}]   ;;  %s3040_s11 = inlined_call_operand.hbm [shape: f32[1,128], index: 11, kind: input, shape index: {}]   ;;  %s3041_s12 = inlined_call_operand.hbm [shape: f32[1,128], index: 12, kind: input, shape index: {}]   ;;  %s3042_s13 = inlined_call_operand.hbm [shape: f32[1,128], index: 13, kind: input, shape index: {}]   ;;  %s3043_s14 = inlined_call_operand.vmem [shape: bf16[2,8,128], index: 14, kind: output, shape index: {}]  }
   0x1   :  { %20 = vsyncpa [#allocation5], 0 }
   0x2   :  { %21 = vsyncpa [#allocation8], 0 }
   0x3   :  { %22 = vsyncpa [#allocation11], 0 }
   0x4   :  { %23 = vsyncpa [#allocation14], 0  ;;  %s2504_s29 = smov [#allocation4]   ;;  %s2505_s15 = smov [#allocation7]  }
   0x5   :  { %s52_s30 = sshll.u32 %s2504_s29, 4  ;;  %s74_s16 = sshll.u32 %s2505_s15, 4  ;;  %s53_s30 = int_to_ptr.vmem [resolvable:$true] %s52_s30  ;;  %s75_s16 = int_to_ptr.vmem [resolvable:$true] %s74_s16 }
   0x6   :  { %s2342_s17 = scalar_lea.vmem %s53_s30, 32  ;;  %p2347_p1 = scmp.lt.s32.totalorder %s53_s30, %s53_s30 }
   0x7   :  { %p2343_p0 = scmp.ne.s32.totalorder %s53_s30, %s2342_s17  ;;  %p2348_p2 = scmp.lt.s32.totalorder %s2342_s17, %s2342_s17 }
   0x9   :  { %p2349_p3 = por %p2348_p2, %p2347_p1 }
   0xb   :  { %p2350_p4 = pnand %p2349_p3, %p2343_p0 }
   0xd   :  { %2353 = shalt.err (!%p2350_p4)
}
   0xe   :  { %55 = dma.hbm_to_vmem [thread:$0]  %s3036_s7, 32, %s53_s30, [#allocation5]  }
   0xf   :  { %s2362_s20 = scalar_lea.vmem %s75_s16, 16  ;;  %s2366_s21 = scalar_lea.vmem %s75_s16, 32 }
  0x10   :  { %p2363_p5 = scmp.ne.s32.totalorder %s75_s16, %s2362_s20  ;;  %p2367_p6 = scmp.lt.s32.totalorder %s75_s16, %s75_s16 }
  0x11   :  { %p2368_p7 = scmp.lt.s32.totalorder %s2366_s21, %s2362_s20 }
  0x13   :  { %p2369_p8 = por %p2368_p7, %p2367_p6 }
  0x15   :  { %p2370_p9 = pnand %p2369_p8, %p2363_p5 }
  0x17   :  { %2373 = shalt.err (!%p2370_p9)
}
  0x18   :  { %77 = dma.hbm_to_vmem [thread:$0]  %s3038_s9, 16, %s75_s16, [#allocation8]  }
  0x19   :  { %s2506_s24 = smov [#allocation10]   ;;  %s2507_s26 = smov [#allocation2]  }
  0x1a   :  { %s94_s25 = sshll.u32 %s2506_s24, 4  ;;  %s36_s27 = sshll.u32 %s2507_s26, 4  ;;  %s95_s25 = int_to_ptr.vmem [resolvable:$true] %s94_s25  ;;  %s37_s27 = int_to_ptr.vmem [resolvable:$true] %s36_s27 }
  0x1b   :  { %s2382_s28 = scalar_lea.vmem %s95_s25, 16  ;;  %s2386_s7 = scalar_lea.vmem %s95_s25, 32 }
  0x1c   :  { %p2383_p10 = scmp.ne.s32.totalorder %s95_s25, %s2382_s28  ;;  %p2387_p11 = scmp.lt.s32.totalorder %s95_s25, %s95_s25 }
  0x1d   :  { %p2388_p12 = scmp.lt.s32.totalorder %s2386_s7, %s2382_s28 }
  0x1f   :  { %p2389_p13 = por %p2388_p12, %p2387_p11 }
  0x21   :  { %p2390_p0 = pnand %p2389_p13, %p2383_p10 }
  0x23   :  { %2393 = shalt.err (!%p2390_p0)
}
  0x24   :  { %97 = dma.hbm_to_vmem [thread:$0]  %s3040_s11, 16, %s95_s25, [#allocation11]  }
  0x25   :  { %s2402_s15 = scalar_lea.vmem %s37_s27, 48  ;;  %s2406_s9 = scalar_lea.vmem %s37_s27, 64 }
  0x26   :  { %p2403_p1 = scmp.ne.s32.totalorder %s37_s27, %s2402_s15  ;;  %p2407_p2 = scmp.lt.s32.totalorder %s37_s27, %s37_s27 }
  0x27   :  { %p2408_p3 = scmp.lt.s32.totalorder %s2406_s9, %s2402_s15 }
  0x29   :  { %p2409_p4 = por %p2408_p3, %p2407_p2 }
  0x2b   :  { %p2410_p5 = pnand %p2409_p4, %p2403_p1 }
  0x2d   :  { %2413 = shalt.err (!%p2410_p5)
}
  0x2e   :  { %39 = dma.hbm_to_vmem [thread:$0]  %s3032_s3, 48, %s37_s27, [#allocation3]  }
  0x2f   :  { %s2508_s18 = smov [#allocation6]  }
  0x30   :  { %s61_s19 = sshll.u32 %s2508_s18, 4  ;;  %s62_s19 = int_to_ptr.vmem [resolvable:$true] %s61_s19 }
  0x31   :  { %s2422_s20 = scalar_lea.vmem %s62_s19, 2048  ;;  %p2427_p7 = scmp.lt.s32.totalorder %s62_s19, %s62_s19 }
  0x32   :  { %p2423_p6 = scmp.ne.s32.totalorder %s62_s19, %s2422_s20  ;;  %p2428_p8 = scmp.lt.s32.totalorder %s2422_s20, %s2422_s20 }
  0x34   :  { %p2429_p9 = por %p2428_p8, %p2427_p7 }
  0x36   :  { %p2430_p10 = pnand %p2429_p9, %p2423_p6 }
  0x38   :  { %2433 = shalt.err (!%p2430_p10)
}
  0x39   :  { %s2509_s11 = smov 64   ;;  %s2510_s21 = smov 4  }
  0x3a   :  { %67 = dma.hbm_to_vmem [thread:$0]  %s3037_s8, 2048, %s62_s19, [#allocation5], %s2509_s11, %s2509_s11, %s2510_s21  }
  0x3b   :  { %s2511_s24 = smov [#allocation9]   ;;  %s2512_s25 = smov [#allocation12]  }
  0x3c   :  { %s84_s3 = sshll.u32 %s2511_s24, 4  ;;  %s104_s26 = sshll.u32 %s2512_s25, 4  ;;  %s85_s3 = int_to_ptr.vmem [resolvable:$true] %s84_s3  ;;  %s105_s26 = int_to_ptr.vmem [resolvable:$true] %s104_s26 }
  0x3d   :  { %s2442_s27 = scalar_lea.vmem %s85_s3, 16  ;;  %s2446_s28 = scalar_lea.vmem %s85_s3, 32 }
  0x3e   :  { %p2443_p11 = scmp.ne.s32.totalorder %s85_s3, %s2442_s27  ;;  %p2447_p12 = scmp.lt.s32.totalorder %s85_s3, %s85_s3 }
  0x3f   :  { %p2448_p13 = scmp.lt.s32.totalorder %s2446_s28, %s2442_s27 }
  0x41   :  { %p2449_p0 = por %p2448_p13, %p2447_p12 }
  0x43   :  { %p2450_p1 = pnand %p2449_p0, %p2443_p11 }
  0x45   :  { %2453 = shalt.err (!%p2450_p1)
}
  0x46   :  { %87 = dma.hbm_to_vmem [thread:$0]  %s3039_s10, 16, %s85_s3, [#allocation8]  }
  0x47   :  { %s2462_s30 = scalar_lea.vmem %s105_s26, 16  ;;  %s2466_s8 = scalar_lea.vmem %s105_s26, 32 }
  0x48   :  { %p2463_p2 = scmp.ne.s32.totalorder %s105_s26, %s2462_s30  ;;  %p2467_p3 = scmp.lt.s32.totalorder %s105_s26, %s105_s26 }
  0x49   :  { %p2468_p4 = scmp.lt.s32.totalorder %s2466_s8, %s2462_s30 }
  0x4b   :  { %p2469_p5 = por %p2468_p4, %p2467_p3 }
  0x4d   :  { %p2470_p6 = pnand %p2469_p5, %p2463_p2 }
  0x4f   :  { %2473 = shalt.err (!%p2470_p6)
}
  0x50   :  { %107 = dma.hbm_to_vmem [thread:$0]  %s3041_s12, 16, %s105_s26, [#allocation11]  }
  0x51   :  { %s2513_s16 = smov [#allocation13]  }
  0x52   :  { %s114_s17 = sshll.u32 %s2513_s16, 4  ;;  %s115_s17 = int_to_ptr.vmem [resolvable:$true] %s114_s17 }
  0x53   :  { %s2482_s18 = scalar_lea.vmem %s115_s17, 16  ;;  %s2486_s19 = scalar_lea.vmem %s115_s17, 32 }
  0x54   :  { %p2483_p7 = scmp.ne.s32.totalorder %s115_s17, %s2482_s18  ;;  %p2487_p8 = scmp.lt.s32.totalorder %s115_s17, %s115_s17 }
  0x55   :  { %p2488_p9 = scmp.lt.s32.totalorder %s2486_s19, %s2482_s18 }
  0x57   :  { %p2489_p10 = por %p2488_p9, %p2487_p8 }
  0x59   :  { %p2490_p11 = pnand %p2489_p10, %p2483_p7 }
  0x5b   :  { %2493 = shalt.err (!%p2490_p11)
}
  0x5c   :  { %117 = dma.hbm_to_vmem [thread:$0]  %s3042_s13, 16, %s115_s17, [#allocation14]  }
  0x5d   :  { %2494 = dma.done.wait [#allocation3], 48  }
  0x5e   :  { %2495 = vsyncadd [#allocation3], 4294967248 }
  0x5f   :  { %2496 = dma.done.wait [#allocation5], 2080  }
  0x60   :  { %2497 = vsyncadd [#allocation5], 4294965216 }
  0x61   :  { %2498 = dma.done.wait [#allocation8], 32  }
  0x62   :  { %2499 = vsyncadd [#allocation8], 4294967264 }
  0x63   :  { %2500 = dma.done.wait [#allocation11], 32  }
  0x64   :  { %2501 = vsyncadd [#allocation11], 4294967264 }
  0x65   :  { %2502 = dma.done.wait [#allocation14], 16  }
  0x66   :  { %2503 = vsyncadd [#allocation14], 4294967280  ;;  %v2514_v0 = vmov 0   ;;  %v2515_v1 = vmov 0.0   ;;  %v2212_v2 = vld [vmem:[%s3031_s2 + $0xac] ss:$12 sps:$4 sm:$0xff]   ;;  %v181_v27 = vlaneseq }
  0x67   :  { %362 = vmatprep.mubr.bf16.mxu0 %v2514_v0  ;;  %2046 = vmatprep.subr.bf16.mxu1 %v2515_v1  ;;  %v2214_v3 = vld [vmem:[%s3031_s2 + $0xa8] ss:$12 sps:$4 sm:$0xff]   ;;  %v2217_v5 = vld [vmem:[%s3031_s2 + $0x90] ss:$12 sps:$4 sm:$0xff]   ;;  %v2220_v7 = vld [vmem:[%s3031_s2 + $0x78] ss:$12 sps:$4 sm:$0xff]  }
  0x68   :  { %330 = vmatprep.subr.bf16.mxu0 %v2212_v2  ;;  %v2215_v4 = vld [vmem:[%s3031_s2 + $0x94] ss:$12 sps:$4 sm:$0xff]   ;;  %v2218_v6 = vld [vmem:[%s3031_s2 + $0x7c] ss:$12 sps:$4 sm:$0xff]   ;;  %v2221_v8 = vld [vmem:[%s3031_s2 + $0x64] ss:$12 sps:$4 sm:$0xff]  }
  0x69   :  { %331 = vmatpush1.bf16.msra.mxu0 %v2214_v3  ;;  %v2223_v9 = vld [vmem:[%s3031_s2 + $0x60] ss:$12 sps:$4 sm:$0xff]   ;;  %v2237_v10 = vld [vmem:[%s3031_s2 + $0xb0] ss:$12 sps:$4 sm:$0xff]   ;;  %v2238_v12 = vld [vmem:[%s3031_s2 + $0x98] ss:$12 sps:$4 sm:$0xff]  }
  0x6a   :  { %332 = vmatprep.subr.bf16.mxu0 %v2215_v4  ;;  %v2224_v11 = vld [vmem:[%s3031_s2 + $0x4c] ss:$12 sps:$4 sm:$0xff]   ;;  %2047 = vmatpush3.bf16.msra.mxu1 %v2237_v10  ;;  %v2226_v13 = vld [vmem:[%s3031_s2 + $0x48] ss:$12 sps:$4 sm:$0xff]   ;;  %v2229_v16 = vld [vmem:[%s3031_s2 + $0x30] ss:$12 sps:$4 sm:$0xff]  }
  0x6b   :  { %2048 = vmatprep.subr.bf16.mxu1 %v2515_v1  ;;  %v2227_v14 = vld [vmem:[%s3031_s2 + $0x34] ss:$12 sps:$4 sm:$0xff]   ;;  %v2230_v17 = vld [vmem:[%s3031_s2 + $0x1c] ss:$12 sps:$4 sm:$0xff]   ;;  %v2232_v19 = vld [vmem:[%s3031_s2 + $0x18] ss:$12 sps:$4 sm:$0xff]  }
  0x6c   :  { %v2239_v15 = vld [vmem:[%s3031_s2 + $0x80] ss:$12 sps:$4 sm:$0xff]   ;;  %v2240_v18 = vld [vmem:[%s3031_s2 + $0x68] ss:$12 sps:$4 sm:$0xff]   ;;  %v2233_v20 = vld [vmem:[%s3031_s2 + $0x4] ss:$12 sps:$4 sm:$0xff]  }
  0x6d   :  { %333 = vmatpush1.bf16.msra.mxu0 %v2217_v5  ;;  %v2241_v21 = vld [vmem:[%s3031_s2 + $0x50] ss:$12 sps:$4 sm:$0xff]   ;;  %v2235_v22 = vld [vmem:[%s3031_s2] ss:$12 sps:$4 sm:$0xff]   ;;  %v2242_v24 = vld [vmem:[%s3031_s2 + $0x38] ss:$12 sps:$4 sm:$0xff]  }
  0x6e   :  { %334 = vmatprep.subr.bf16.mxu0 %v2218_v6  ;;  %2049 = vmatpush3.bf16.msra.mxu1 %v2238_v12  ;;  %v2691_v23 = vld [vmem:[%s3029_s0] sm:$0xff]   ;;  %v2244_v26 = vld [vmem:[%s3031_s2 + $0x8] ss:$12 sps:$4 sm:$0xff]   ;;  %vm2516_vm0 = vmmov 0   ;;  %v2716_v28 = vshrl.u32 %v181_v27, 7  ;;  %vm447_vm1 = vcmask 261120  }
  0x6f   :  { %2050 = vmatprep.subr.bf16.mxu1 %v2515_v1  ;;  %v2243_v25 = vld [vmem:[%s3031_s2 + $0x20] ss:$12 sps:$4 sm:$0xff]   ;;  %2062 = vmatprep.mubr.msk.bf16.mxu1 %vm2516_vm0, %v2515_v1  ;;  %s2517_s2 = smov 96   ;;  %s2518_s22 = smov 32   ;;  %vm680_vm2 = vcmask 1043456   ;;  %vm632_vm3 = vcmask 64512  }
  0x70   :  { %v183_v29 = vsub.s32 0, %v2716_v28  ;;  %v187_v30 = vsub.s32 1, %v2716_v28  ;;  %v179_v31 = vld [vmem:[#allocation2] sm:$0x7]  ;;  %v191_v47 = vsub.s32 2, %v2716_v28  ;;  %vm879_vm4 = vcmask 523264  }
  0x71   :  { %335 = vmatpush1.bf16.msra.mxu0 %v2220_v7  ;;  %v1904_v4 = vld [vmem:[%s3030_s1] ss:$0 sm:$0xff]  ;;  %vm881_vm5 = vcmask 785408  }
  0x72   :  { %336 = vmatprep.subr.bf16.mxu0 %v2221_v8  ;;  %2051 = vmatpush3.bf16.msra.mxu1 %v2239_v15  ;;  %v184_v34 = vrot.slane %v179_v31, %v183_v29  ;;  %v188_v35 = vrot.slane %v179_v31, %v187_v30  ;;  %v192_v48 = vrot.slane %v179_v31, %v191_v47 }
  0x73   :  { %2052 = vmatprep.subr.bf16.mxu1 %v2515_v1 }
  0x75   :  { %337 = vmatpush1.bf16.msra.mxu0 %v2223_v9 }
  0x76   :  { %338 = vmatprep.subr.bf16.mxu0 %v2224_v11  ;;  %2053 = vmatpush3.bf16.msra.mxu1 %v2240_v18 }
  0x77   :  { %2054 = vmatprep.subr.bf16.mxu1 %v2515_v1 }
  0x79   :  { %339 = vmatpush1.bf16.msra.mxu0 %v2226_v13 }
  0x7a   :  { %340 = vmatprep.subr.bf16.mxu0 %v2227_v14  ;;  %2055 = vmatpush3.bf16.msra.mxu1 %v2241_v21 }
  0x7b   :  { %2056 = vmatprep.subr.bf16.mxu1 %v2515_v1 }
  0x7d   :  { %341 = vmatpush1.bf16.msra.mxu0 %v2229_v16 }
  0x7e   :  { %342 = vmatprep.subr.bf16.mxu0 %v2230_v17  ;;  %2057 = vmatpush3.bf16.msra.mxu1 %v2242_v24 }
  0x7f   :  { %2058 = vmatprep.subr.bf16.mxu1 %v2515_v1 }
  0x81   :  { %343 = vmatpush1.bf16.msra.mxu0 %v2232_v19 }
  0x82   :  { %344 = vmatprep.subr.bf16.mxu0 %v2233_v20  ;;  %2059 = vmatpush3.bf16.msra.mxu1 %v2243_v25 }
  0x83   :  { %2060 = vmatprep.subr.bf16.mxu1 %v2515_v1 }
  0x85   :  { %345 = vmatpush1.bf16.msra.mxu0 %v2235_v22 }
  0x86   :  { %2090 = vmatprep.subr.bf16.mxu0 %v2515_v1  ;;  %2061 = vmatpush3.bf16.msra.mxu1 %v2244_v26 }
  0x87   :  { %2066 = vmatprep.subr.bf16.mxu1 %v2515_v1 }
  0x88   :  { %363 = vmatmul.mubr.bf16.vlgmr.msra.gmra.mxu0 %v2691_v23 }
  0x89   :  { %2092 = vmatprep.mubr.msk.bf16.mxu0 %vm2516_vm0, %v2515_v1  ;;  %2063 = vmatmul.mubr.bf16.vlgmr.msra.gmra.mxu1 %v2691_v23 }
  0x8a   :  { %2068 = vmatprep.mubr.msk.bf16.mxu1 %vm2516_vm0, %v2515_v1 }
 0x148   :  { %v364_v32 = vpop.f32.mrf.mxu0 }
 0x149   :  { %v365_v39 = vadd.f32 %v364_v32, %v184_v34  ;;  %v407_v49 = vpop.f32.mrf.mxu1 }
 0x14a   :  { %v366_v33 = vpop.f32.mrf.mxu0  ;;  %v408_v51 = vadd.f32 %v407_v49, %v192_v48 }
 0x14b   :  { %v367_v40 = vadd.f32 %v366_v33, %v188_v35  ;;  %v414_v44 = vmul.f32 0.17677669, %v365_v39  ;;  %v2064_v50 = vpop.f32.mrf.mxu1 }
 0x14c   :  { %v368_v36 = vpop.f32.mrf.mxu0 }
 0x14d   :  { %v369_v37 = vadd.f32 %v368_v36, %v184_v34  ;;  %v410_v52 = vpop.f32.mrf.mxu1 }
 0x14e   :  { %v370_v38 = vpop.f32.mrf.mxu0  ;;  %v411_v53 = vadd.f32 %v410_v52, %v192_v48 }
 0x14f   :  { %v371_v41 = vadd.f32 %v370_v38, %v188_v35  ;;  %v415_v42 = vmul.f32 0.17677669, %v369_v37  ;;  %v2065_v54 = vpop.f32.mrf.mxu1 }
 0x150   :  { %v2748_v55 = vpack.c.bf16 %v411_v53, %v408_v51 }
 0x151   :  { %v2724_v43 = vpack.c.bf16 %v371_v41, %v367_v40  ;;  %v2732_v46 = vpack.c.bf16 %v415_v42, %v414_v44 }
 0x152   :  { %v682_v56 = vsel %vm680_vm2, %v2748_v55, 0 }
 0x153   :  { %430 = vrot.lane.b32.xlu1 %v2724_v43, %s2509_s11  ;;  %428 = vrot.lane.b32.xlu0 %v2724_v43, %s2517_s2  ;;  %v452_v45 = vsel %vm447_vm1, %v2724_v43, 0 }
 0x154   :  { %2067 = vmatpush3.bf16.xpose.msra.mxu1 %v452_v45  ;;  %2091 = vmatpush3.bf16.msra.mxu0 %v682_v56 }
 0x155   :  { %2072 = vmatprep.subr.bf16.mxu1 %v2515_v1  ;;  %2102 = vmatprep.subr.bf16.mxu0 %v2515_v1 }
 0x157   :  { %423 = vrot.lane.b32.xlu1 %v2732_v46, %s2509_s11  ;;  %421 = vrot.lane.b32.xlu0 %v2732_v46, %s2517_s2 }
 0x15b   :  { %425 = vrot.lane.b32.xlu1 %v2732_v46, %s2518_s22  ;;  %432 = vrot.lane.b32.xlu0 %v2724_v43, %s2518_s22 }
 0x15c   :  { %2069 = vmatmul.mubr.msk.bf16.vlgmr.msra.gmra.mxu1 %vm447_vm1, %v2732_v46 }
 0x15d   :  { %2074 = vmatprep.mubr.msk.bf16.mxu1 %vm2516_vm0, %v2515_v1 }
 0x15f   :  { %435 = vrot.lane.b32.xlu1 %v2748_v55, %s2517_s2 }
 0x1c5   :  { %v2755_v57 = vpop.permute.xlu0 %428  ;;  %v2760_v59 = vpop.permute.xlu1 %430 }
 0x1c6   :  { %v498_v58 = vsel %vm447_vm1, %v2755_v57, 0  ;;  %v544_v61 = vsel %vm447_vm1, %v2760_v59, 0 }
 0x1c7   :  { %2073 = vmatpush3.bf16.xpose.msra.mxu1 %v498_v58 }
 0x1c8   :  { %2078 = vmatprep.subr.bf16.mxu1 %v2515_v1 }
 0x1c9   :  { %v2762_v60 = vpop.permute.xlu0 %421  ;;  %v2773_v63 = vpop.permute.xlu1 %423 }
 0x1cd   :  { %v2771_v62 = vpop.permute.xlu0 %432  ;;  %v2782_v3 = vpop.permute.xlu1 %425 }
 0x1ce   :  { %2075 = vmatmul.mubr.msk.bf16.vlgmr.msra.gmra.mxu1 %vm447_vm1, %v2762_v60  ;;  %v590_v2 = vsel %vm447_vm1, %v2771_v62, 0 }
 0x1cf   :  { %2079 = vmatpush3.bf16.xpose.msra.mxu1 %v544_v61  ;;  %2080 = vmatprep.mubr.msk.bf16.mxu1 %vm2516_vm0, %v2515_v1  ;;  %v892_v61 = vrot.slane %v2724_v43, 4 }
 0x1d0   :  { %2084 = vmatprep.subr.bf16.mxu1 %v2515_v1 }
 0x1d1   :  { %v2792_v11 = vpop.permute.xlu1 %435 }
 0x1d2   :  { %v728_v12 = vsel %vm680_vm2, %v2792_v11, 0 }
 0x1d6   :  { %2081 = vmatmul.mubr.msk.bf16.vlgmr.msra.gmra.mxu1 %vm447_vm1, %v2773_v63 }
 0x1d7   :  { %2085 = vmatpush3.bf16.xpose.msra.mxu1 %v590_v2  ;;  %2086 = vmatprep.mubr.msk.bf16.mxu1 %vm2516_vm0, %v2515_v1 }
 0x1d8   :  { %2096 = vmatprep.subr.bf16.mxu1 %v2515_v1 }
 0x1de   :  { %2087 = vmatmul.mubr.msk.bf16.vlgmr.msra.gmra.mxu1 %vm447_vm1, %v2782_v3 }
 0x1df   :  { %2098 = vmatprep.mubr.msk.bf16.mxu1 %vm2516_vm0, %v2515_v1  ;;  %2097 = vmatpush3.bf16.msra.mxu1 %v728_v12 }
 0x1e0   :  { %2108 = vmatprep.subr.bf16.mxu1 %v2515_v1 }
 0x21c   :  { %v488_v5 = vpop.f32.mrf.mxu1 }
 0x21d   :  { %v489_v6 = vadd.f32 %v1904_v4, %v488_v5  ;;  %v897_v5 = vsel %vm447_vm1, %v892_v61, 0 }
 0x21e   :  { %v2070_v7 = vpop.f32.mrf.mxu1 }
 0x21f   :  { %v633_v8 = vsel %vm632_vm3, %v489_v6, -inf  ;;  %v940_v7 = vrot.slane %v2755_v57, 4  ;;  %v1127_v57 = vrot.slane %v2748_v55, 4 }
 0x220   :  { %634 = vmax.xlane.f32.xlu0 %v633_v8  ;;  %v491_v9 = vpop.f32.mrf.mxu1 }
 0x221   :  { %v891_v9 = vrot.slane %v2732_v46, 4  ;;  %v1036_v46 = vrot.slane %v2771_v62, 4 }
 0x222   :  { %v2071_v10 = vpop.f32.mrf.mxu1 }
 0x223   :  { %v945_v10 = vsel %vm447_vm1, %v940_v7, 0 }
 0x28e   :  { %v534_v13 = vpop.f32.mrf.mxu1 }
 0x28f   :  { %v535_v14 = vadd.f32 %v1904_v4, %v534_v13  ;;  %v939_v13 = vrot.slane %v2762_v60, 4  ;;  %v1035_v60 = vrot.slane %v2782_v3, 4 }
 0x290   :  { %v2076_v15 = vpop.f32.mrf.mxu1 }
 0x291   :  { %v636_v16 = vsel %vm632_vm3, %v535_v14, -inf  ;;  %v1132_v15 = vsel %vm680_vm2, %v1127_v57, 0 }
 0x292   :  { %637 = vmax.xlane.f32.xlu1 %v636_v16  ;;  %v537_v17 = vpop.f32.mrf.mxu1 }
 0x294   :  { %v2077_v18 = vpop.f32.mrf.mxu1 }
 0x296   :  { %v580_v19 = vpop.f32.mrf.mxu1 }
 0x297   :  { %v581_v20 = vadd.f32 %v1904_v4, %v580_v19 }
 0x298   :  { %v2082_v21 = vpop.f32.mrf.mxu1 }
 0x299   :  { %v639_v22 = vsel %vm632_vm3, %v581_v20, -inf }
 0x29a   :  { %640 = vmax.xlane.f32.xlu0 %v639_v22  ;;  %v583_v24 = vpop.f32.mrf.mxu1 }
 0x29c   :  { %v2083_v25 = vpop.f32.mrf.mxu1 }
 0x29e   :  { %v626_v26 = vpop.f32.mrf.mxu1 }
 0x29f   :  { %v627_v27 = vadd.f32 %v1904_v4, %v626_v26  ;;  %v1914_v26 = vld [vmem:[%s3030_s1 + $0x1] ss:$0 sm:$0xff] }
 0x2a0   :  { %v2088_v31 = vpop.f32.mrf.mxu1 }
 0x2a1   :  { %v642_v32 = vsel %vm632_vm3, %v627_v27, -inf }
 0x2a2   :  { %643 = vmax.xlane.f32.xlu0 %v642_v32  ;;  %v629_v33 = vpop.f32.mrf.mxu1 }
 0x2a3   :  { %439 = vrot.lane.b32.xlu1 %v2748_v55, %s2518_s22 }
 0x2a4   :  { %v2089_v34 = vpop.f32.mrf.mxu1 }
 0x2a9   :  { %v635_v35 = vpop.xlane.xlu0 %634 }
 0x2aa   :  { %v645_v36 = vsub.f32 %v489_v6, %v635_v35  ;;  %v988_v6 = vrot.slane %v2760_v59, 4  ;;  %v987_v59 = vrot.slane %v2773_v63, 4 }
 0x2ac   :  { %v649_v37 = vmul.f32 1.442695, %v645_v36  ;;  %v993_v12 = vsel %vm447_vm1, %v988_v6, 0 }
 0x2ae   :  { %2294 = vpow2.f32 %v649_v37 }
 0x2b8   :  { %437 = vrot.lane.b32.xlu0 %v2748_v55, %s2509_s11  ;;  %v1174_v55 = vrot.slane %v2792_v11, 4 }
 0x2ba   :  { %v1179_v62 = vsel %vm680_vm2, %v1174_v55, 0 }
 0x2bb   :  { %v2804_v38 = vpop.eup %2294 }
 0x2bc   :  { %v673_v39 = vpack.c.bf16 %v2804_v38, %v2804_v38  ;;  %v657_v57 = vsel %vm632_vm3, %v2804_v38, 0.0 }
 0x2be   :  { %2093 = vmatmul.mubr.msk.bf16.vlgmr.msra.gmra.mxu0 %vm632_vm3, %v673_v39 }
 0x2bf   :  { %2104 = vmatprep.mubr.msk.bf16.mxu0 %vm2516_vm0, %v2515_v1 }
 0x31b   :  { %v638_v40 = vpop.xlane.xlu1 %637 }
 0x31c   :  { %v646_v41 = vsub.f32 %v535_v14, %v638_v40  ;;  %v1041_v14 = vsel %vm447_vm1, %v1036_v46, 0 }
 0x31e   :  { %v651_v42 = vmul.f32 1.442695, %v646_v41 }
 0x31f   :  { %v2813_v51 = vpop.permute.xlu1 %439 }
 0x320   :  { %2296 = vpow2.f32 %v651_v42  ;;  %v820_v56 = vsel %vm680_vm2, %v2813_v51, 0 }
 0x323   :  { %v641_v44 = vpop.xlane.xlu0 %640 }
 0x324   :  { %v647_v45 = vsub.f32 %v581_v20, %v641_v44 }
 0x326   :  { %v653_v47 = vmul.f32 1.442695, %v647_v45 }
 0x328   :  { %2298 = vpow2.f32 %v653_v47 }
 0x32b   :  { %v644_v48 = vpop.xlane.xlu0 %643 }
 0x32c   :  { %v648_v49 = vsub.f32 %v627_v27, %v644_v48 }
 0x32d   :  { %v2811_v50 = vpop.eup %2296 }
 0x32e   :  { %v655_v52 = vmul.f32 1.442695, %v648_v49  ;;  %v674_v53 = vpack.c.bf16 %v2811_v50, %v2811_v50  ;;  %v660_v7 = vsel %vm632_vm3, %v2811_v50, 0.0 }
 0x32f   :  { %v2817_v54 = vpop.permute.xlu0 %437 }
 0x330   :  { %2300 = vpow2.f32 %v655_v52  ;;  %v774_v58 = vsel %vm680_vm2, %v2817_v54, 0  ;;  %2099 = vmatmul.mubr.msk.bf16.vlgmr.msra.gmra.mxu1 %vm632_vm3, %v674_v53 }
 0x331   :  { %2109 = vmatpush3.bf16.msra.mxu1 %v820_v56  ;;  %2103 = vmatpush3.bf16.msra.mxu0 %v774_v58 }
 0x332   :  { %2114 = vmatprep.subr.bf16.mxu0 %v2515_v1  ;;  %2110 = vmatprep.mubr.msk.bf16.mxu1 %vm2516_vm0, %v2515_v1 }
 0x333   :  { %2120 = vmatprep.subr.bf16.mxu1 %v2515_v1 }
 0x335   :  { %v2829_v2 = vpop.eup %2298 }
 0x336   :  { %v675_v4 = vpack.c.bf16 %v2829_v2, %v2829_v2 }
 0x338   :  { %2105 = vmatmul.mubr.msk.bf16.vlgmr.msra.gmra.mxu0 %vm632_vm3, %v675_v4 }
 0x339   :  { %2115 = vmatpush3.bf16.xpose.msra.mxu0 %v897_v5  ;;  %2116 = vmatprep.mubr.msk.bf16.mxu0 %vm2516_vm0, %v2515_v1 }
 0x33a   :  { %2126 = vmatprep.subr.bf16.mxu0 %v2515_v1 }
 0x33d   :  { %v2840_v43 = vpop.eup %2300 }
 0x33e   :  { %v676_v8 = vpack.c.bf16 %v2840_v43, %v2840_v43  ;;  %v666_v46 = vsel %vm632_vm3, %v2840_v43, 0.0 }
 0x340   :  { %2111 = vmatmul.mubr.msk.bf16.vlgmr.msra.gmra.mxu1 %vm632_vm3, %v676_v8  ;;  %2117 = vmatmul.mubr.msk.bf16.vlgmr.msra.gmra.mxu0 %vm447_vm1, %v891_v9 }
 0x341   :  { %2121 = vmatpush3.bf16.xpose.msra.mxu1 %v945_v10  ;;  %2127 = vmatpush3.bf16.xpose.msra.mxu0 %v993_v12  ;;  %v663_v12 = vsel %vm632_vm3, %v2829_v2, 0.0 }
 0x342   :  { %2122 = vmatprep.mubr.msk.bf16.mxu1 %vm2516_vm0, %v2515_v1  ;;  %2128 = vmatprep.mubr.msk.bf16.mxu0 %vm2516_vm0, %v2515_v1 }
 0x343   :  { %2132 = vmatprep.subr.bf16.mxu1 %v2515_v1  ;;  %2138 = vmatprep.subr.bf16.mxu0 %v2515_v1 }
 0x348   :  { %2123 = vmatmul.mubr.msk.bf16.vlgmr.msra.gmra.mxu1 %vm447_vm1, %v939_v13  ;;  %2129 = vmatmul.mubr.msk.bf16.vlgmr.msra.gmra.mxu0 %vm447_vm1, %v987_v59 }
 0x349   :  { %2133 = vmatpush3.bf16.xpose.msra.mxu1 %v1041_v14  ;;  %2139 = vmatpush3.bf16.msra.mxu0 %v1132_v15 }
 0x34a   :  { %2134 = vmatprep.mubr.msk.bf16.mxu1 %vm2516_vm0, %v2515_v1  ;;  %2144 = vmatprep.subr.bf16.mxu1 %v2515_v1 }
 0x34b   :  { %2140 = vmatprep.mubr.msk.bf16.mxu0 %vm2516_vm0, %v2515_v1  ;;  %2150 = vmatprep.subr.bf16.mxu0 %v2515_v1 }
 0x350   :  { %2135 = vmatmul.mubr.msk.bf16.vlgmr.msra.gmra.mxu1 %vm447_vm1, %v1035_v60 }
 0x351   :  { %2145 = vmatpush3.bf16.msra.mxu1 %v1179_v62  ;;  %2146 = vmatprep.mubr.msk.bf16.mxu1 %vm2516_vm0, %v2515_v1 }
 0x352   :  { %2156 = vmatprep.subr.bf16.mxu1 %v2515_v1 }
 0x37e   :  { %v2876_v63 = vpop.f32.mrf.mxu0 }
 0x380   :  { %v2094_v16 = vpop.f32.mrf.mxu0 }
 0x382   :  { %v721_v17 = vpop.f32.mrf.mxu0 }
 0x383   :  { %v1221_v17 = vrot.slane %v2817_v54, 4 }
 0x384   :  { %v2095_v18 = vpop.f32.mrf.mxu0 }
 0x3f0   :  { %v2878_v19 = vpop.f32.mrf.mxu1 }
 0x3f2   :  { %v2100_v11 = vpop.f32.mrf.mxu1 }
 0x3f4   :  { %v767_v20 = vpop.f32.mrf.mxu1 }
 0x3f5   :  { %v1226_v20 = vsel %vm680_vm2, %v1221_v17, 0 }
 0x3f6   :  { %v2101_v3 = vpop.f32.mrf.mxu1 }
 0x3f7   :  { %v1268_v3 = vrot.slane %v2813_v51, 4 }
 0x3f8   :  { %v2880_v21 = vpop.f32.mrf.mxu0 }
 0x3fa   :  { %v2106_v22 = vpop.f32.mrf.mxu0 }
 0x3fc   :  { %v813_v24 = vpop.f32.mrf.mxu0 }
 0x3fe   :  { %v2107_v25 = vpop.f32.mrf.mxu0 }
 0x3ff   :  { %v1273_v25 = vsel %vm680_vm2, %v1268_v3, 0 }
 0x400   :  { %v2885_v27 = vpop.f32.mrf.mxu1  ;;  %v933_v31 = vpop.f32.mrf.mxu0 }
 0x401   :  { %v934_v32 = vadd.f32 %v1914_v26, %v933_v31 }
 0x402   :  { %v2112_v33 = vpop.f32.mrf.mxu1  ;;  %v2118_v34 = vpop.f32.mrf.mxu0 }
 0x403   :  { %v1083_v35 = vsel %vm632_vm3, %v934_v32, -inf }
 0x404   :  { %1084 = vmax.xlane.f32.xlu1 %v1083_v35  ;;  %v859_v36 = vpop.f32.mrf.mxu1  ;;  %v936_v37 = vpop.f32.mrf.mxu0 }
 0x405   :  { %v2245_v36 = vld [vmem:[%s3033_s4 + $0x38] sm:$0xff]   ;;  %v2246_v37 = vld [vmem:[%s3033_s4 + $0x30] sm:$0xff]  }
 0x406   :  { %v2113_v39 = vpop.f32.mrf.mxu1  ;;  %v2119_v40 = vpop.f32.mrf.mxu0 }
 0x407   :  { %v2247_v39 = vld [vmem:[%s3033_s4 + $0x28] sm:$0xff]   ;;  %v2249_v40 = vld [vmem:[%s3033_s4 + $0x18] sm:$0xff]  }
 0x408   :  { %v981_v41 = vpop.f32.mrf.mxu1  ;;  %v1029_v42 = vpop.f32.mrf.mxu0 }
 0x409   :  { %v982_v44 = vadd.f32 %v1914_v26, %v981_v41  ;;  %v1030_v48 = vadd.f32 %v1914_v26, %v1029_v42 }
 0x40a   :  { %v2124_v45 = vpop.f32.mrf.mxu1  ;;  %v2130_v47 = vpop.f32.mrf.mxu0 }
 0x40b   :  { %v1086_v49 = vsel %vm632_vm3, %v982_v44, -inf  ;;  %v1089_v61 = vsel %vm632_vm3, %v1030_v48, -inf }
 0x40c   :  { %v1032_v52 = vpop.f32.mrf.mxu0  ;;  %1087 = vmax.xlane.f32.xlu0 %v1086_v49  ;;  %v984_v53 = vpop.f32.mrf.mxu1 }
 0x40d   :  { %v2250_v52 = vld [vmem:[%s3033_s4 + $0x10] sm:$0xff]  }
 0x40e   :  { %v2125_v56 = vpop.f32.mrf.mxu1  ;;  %v2131_v58 = vpop.f32.mrf.mxu0 }
 0x40f   :  { %v2251_v58 = vld [vmem:[%s3033_s4 + $0x8] sm:$0xff]  }
 0x410   :  { %1090 = vmax.xlane.f32.xlu0 %v1089_v61  ;;  %v1077_v4 = vpop.f32.mrf.mxu1 }
 0x411   :  { %v1078_v5 = vadd.f32 %v1914_v26, %v1077_v4 }
 0x412   :  { %v2136_v6 = vpop.f32.mrf.mxu1 }
 0x413   :  { %v1092_v8 = vsel %vm632_vm3, %v1078_v5, -inf }
 0x414   :  { %661 = vadd.xlane.f32.xlu0 %v660_v7  ;;  %1093 = vmax.xlane.f32.xlu1 %v1092_v8  ;;  %v1080_v9 = vpop.f32.mrf.mxu1 }
 0x415   :  { %v2252_v9 = vld [vmem:[%s3033_s4] sm:$0xff]  }
 0x416   :  { %v2137_v10 = vpop.f32.mrf.mxu1 }
 0x418   :  { %664 = vadd.xlane.f32.xlu0 %v663_v12 }
 0x41c   :  { %667 = vadd.xlane.f32.xlu0 %v666_v46 }
 0x420   :  { %658 = vadd.xlane.f32.xlu0 %v657_v57 }
 0x48d   :  { %v1085_v59 = vpop.xlane.xlu1 %1084 }
 0x48e   :  { %v1095_v50 = vsub.f32 %v934_v32, %v1085_v59 }
 0x490   :  { %v1099_v13 = vmul.f32 1.442695, %v1095_v50 }
 0x492   :  { %2302 = vpow2.f32 %v1099_v13 }
 0x495   :  { %v1088_v14 = vpop.xlane.xlu0 %1087 }
 0x496   :  { %v1096_v15 = vsub.f32 %v982_v44, %v1088_v14 }
 0x498   :  { %v1101_v55 = vmul.f32 1.442695, %v1096_v15 }
 0x499   :  { %v1091_v60 = vpop.xlane.xlu0 %1090 }
 0x49a   :  { %2304 = vpow2.f32 %v1101_v55  ;;  %v1097_v62 = vsub.f32 %v1030_v48, %v1091_v60 }
 0x49c   :  { %v1103_v2 = vmul.f32 1.442695, %v1097_v62 }
 0x49d   :  { %v1094_v16 = vpop.xlane.xlu1 %1093  ;;  %v662_v41 = vpop.xlane.xlu0 %661 }
 0x49e   :  { %2306 = vpow2.f32 %v1103_v2  ;;  %v1098_v43 = vsub.f32 %v1078_v5, %v1094_v16 }
 0x49f   :  { %v2303_v18 = vpop.eup %2302 }
 0x4a0   :  { %v1105_v11 = vmul.f32 1.442695, %v1098_v43  ;;  %v1123_v38 = vpack.c.bf16 %v2303_v18, %v2303_v18  ;;  %v1107_v35 = vsel %vm632_vm3, %v2303_v18, 0.0 }
 0x4a1   :  { %v665_v44 = vpop.xlane.xlu0 %664 }
 0x4a2   :  { %2308 = vpow2.f32 %v1105_v11  ;;  %2141 = vmatmul.mubr.msk.bf16.vlgmr.msra.gmra.mxu0 %vm632_vm3, %v1123_v38 }
 0x4a3   :  { %2151 = vmatpush3.bf16.msra.mxu0 %v1226_v20  ;;  %2152 = vmatprep.mubr.msk.bf16.mxu0 %vm2516_vm0, %v2515_v1  ;;  %2310 = vrcp.f32 %v662_v41 }
 0x4a4   :  { %2162 = vmatprep.subr.bf16.mxu0 %v2515_v1 }
 0x4a5   :  { %v668_v47 = vpop.xlane.xlu0 %667 }
 0x4a7   :  { %v2305_v22 = vpop.eup %2304 }
 0x4a8   :  { %v1110_v54 = vsel %vm632_vm3, %v2305_v22, 0.0  ;;  %v1124_v24 = vpack.c.bf16 %v2305_v22, %v2305_v22 }
 0x4a9   :  { %1111 = vadd.xlane.f32.xlu1 %v1110_v54 }
 0x4aa   :  { %2147 = vmatmul.mubr.msk.bf16.vlgmr.msra.gmra.mxu1 %vm632_vm3, %v1124_v24 }
 0x4ab   :  { %v2307_v26 = vpop.eup %2306  ;;  %2157 = vmatpush3.bf16.msra.mxu1 %v1273_v25  ;;  %2158 = vmatprep.mubr.msk.bf16.mxu1 %vm2516_vm0, %v2515_v1 }
 0x4ac   :  { %v1113_v31 = vsel %vm632_vm3, %v2307_v26, 0.0  ;;  %v1125_v32 = vpack.c.bf16 %v2307_v26, %v2307_v26 }
 0x4ad   :  { %1114 = vadd.xlane.f32.xlu1 %v1113_v31 }
 0x4ae   :  { %2153 = vmatmul.mubr.msk.bf16.vlgmr.msra.gmra.mxu0 %vm632_vm3, %v1125_v32 }
 0x4af   :  { %v2309_v51 = vpop.eup %2308  ;;  %2178 = vmatprep.mubr.msk.bf16.mxu0 %vm2516_vm0, %v2515_v1  ;;  %2163 = vmatpush3.bf16.msra.mxu0 %v2245_v36 }
 0x4b0   :  { %v1116_v33 = vsel %vm632_vm3, %v2309_v51, 0.0  ;;  %v1126_v34 = vpack.c.bf16 %v2309_v51, %v2309_v51  ;;  %2164 = vmatprep.subr.bf16.mxu0 %v2515_v1  ;;  %v2311_v61 = vpop.eup %2310 }
 0x4b1   :  { %1117 = vadd.xlane.f32.xlu1 %v1116_v33  ;;  %v863_v7 = vmul.f32 %v2311_v61, %v2878_v19 }
 0x4b2   :  { %2159 = vmatmul.mubr.msk.bf16.vlgmr.msra.gmra.mxu1 %vm632_vm3, %v1126_v34 }
 0x4b3   :  { %1631 = vmatprep.mubr.bf16.mxu1 %v2514_v0  ;;  %2165 = vmatpush3.bf16.msra.mxu0 %v2246_v37  ;;  %v2248_v0 = vld [vmem:[%s3033_s4 + $0x20] sm:$0xff]  }
 0x4b4   :  { %2166 = vmatprep.subr.bf16.mxu0 %v2515_v1 }
 0x4b5   :  { %1108 = vadd.xlane.f32.xlu1 %v1107_v35 }
 0x4b7   :  { %2167 = vmatpush3.bf16.msra.mxu0 %v2247_v39 }
 0x4b8   :  { %2168 = vmatprep.subr.bf16.mxu0 %v2515_v1 }
 0x4bb   :  { %2169 = vmatpush3.bf16.msra.mxu0 %v2248_v0 }
 0x4bc   :  { %2170 = vmatprep.subr.bf16.mxu0 %v2515_v1 }
 0x4bf   :  { %2171 = vmatpush3.bf16.msra.mxu0 %v2249_v40 }
 0x4c0   :  { %2172 = vmatprep.subr.bf16.mxu0 %v2515_v1 }
 0x4c3   :  { %2173 = vmatpush3.bf16.msra.mxu0 %v2250_v52 }
 0x4c4   :  { %2174 = vmatprep.subr.bf16.mxu0 %v2515_v1 }
 0x4c7   :  { %2175 = vmatpush3.bf16.msra.mxu0 %v2251_v58 }
 0x4c8   :  { %2176 = vmatprep.subr.bf16.mxu0 %v2515_v1 }
 0x4cb   :  { %2177 = vmatpush3.bf16.msra.mxu0 %v2252_v9 }
 0x532   :  { %v1112_v42 = vpop.xlane.xlu1 %1111 }
 0x533   :  { %2312 = vrcp.f32 %v1112_v42 }
 0x534   :  { %2314 = vrcp.f32 %v665_v44 }
 0x536   :  { %v1115_v45 = vpop.xlane.xlu1 %1114 }
 0x537   :  { %2316 = vrcp.f32 %v1115_v45  ;;  %v1923_v45 = vld [vmem:[%s3034_s5] ss:$0 sm:$0xff] }
 0x538   :  { %2318 = vrcp.f32 %v668_v47 }
 0x53a   :  { %v1118_v48 = vpop.xlane.xlu1 %1117 }
 0x53b   :  { %2320 = vrcp.f32 %v1118_v48 }
 0x53e   :  { %v1109_v3 = vpop.xlane.xlu1 %1108 }
 0x540   :  { %v2313_v5 = vpop.eup %2312 }
 0x541   :  { %v2315_v10 = vpop.eup %2314 }
 0x542   :  { %v864_v14 = vmul.f32 %v2315_v10, %v2880_v21  ;;  %v659_v21 = vpop.xlane.xlu0 %658 }
 0x543   :  { %2322 = vrcp.f32 %v659_v21  ;;  %v2281_v21 = vld [vmem:[#allocation6 + $0x68] sm:$0xff]  }
 0x544   :  { %v2317_v57 = vpop.eup %2316  ;;  %2324 = vrcp.f32 %v1109_v3  ;;  %v2282_v3 = vld [vmem:[#allocation6 + $0x28] sm:$0xff]  }
 0x545   :  { %v2319_v1 = vpop.eup %2318 }
 0x546   :  { %v865_v16 = vmul.f32 %v2319_v1, %v2885_v27  ;;  %v2262_v1 = vld [vmem:[%s3035_s6 + $0x40] ss:$8 sps:$4 sm:$0xff]  }
 0x548   :  { %v2321_v60 = vpop.eup %2320 }
 0x550   :  { %v2323_v54 = vpop.eup %2322 }
 0x551   :  { %v2325_v27 = vpop.eup %2324  ;;  %v862_v33 = vmul.f32 %v2323_v54, %v2876_v63  ;;  %v145_v63 = vunpack.c.l.bf16 %v2691_v23  ;;  %v2284_v54 = vld [vmem:[#allocation6 + $0x20] sm:$0xff]  }
 0x562   :  { %v1168_v49 = vpop.f32.mrf.mxu0 }
 0x563   :  { %v1315_v51 = vmul.f32 %v2325_v27, %v1168_v49 }
 0x564   :  { %v2142_v53 = vpop.f32.mrf.mxu0 }
 0x565   :  { %v146_v53 = vunpack.c.h.bf16 %v2691_v23 }
 0x566   :  { %v1171_v56 = vpop.f32.mrf.mxu0 }
 0x568   :  { %v2143_v4 = vpop.f32.mrf.mxu0 }
 0x56a   :  { %v1215_v6 = vpop.f32.mrf.mxu1 }
 0x56b   :  { %v1316_v8 = vmul.f32 %v2313_v5, %v1215_v6  ;;  %v2253_v5 = vld [vmem:[%s3035_s6 + $0x70] ss:$8 sps:$4 sm:$0xff]   ;;  %v2255_v6 = vld [vmem:[%s3035_s6 + $0x74] ss:$8 sps:$4 sm:$0xff]  }
 0x56c   :  { %v2148_v12 = vpop.f32.mrf.mxu1  ;;  %1599 = vmatprep.subr.bf16.mxu1 %v2255_v6 }
 0x56d   :  { %v2197_v46 = vpack.i.bf16 %v1316_v8, %v863_v7  ;;  %1600 = vmatpush1.bf16.msra.mxu1 %v2253_v5 }
 0x56e   :  { %v1218_v59 = vpop.f32.mrf.mxu1  ;;  %v1262_v50 = vpop.f32.mrf.mxu0 }
 0x56f   :  { %v1317_v13 = vmul.f32 %v2317_v57, %v1262_v50  ;;  %2198 = vrot.lane.b32.xlu0 %v2197_v46, %s2518_s22  ;;  %v2258_v59 = vld [vmem:[%s3035_s6 + $0x64] ss:$8 sps:$4 sm:$0xff]   ;;  %v2256_v50 = vld [vmem:[%s3035_s6 + $0x60] ss:$8 sps:$4 sm:$0xff]  }
 0x570   :  { %v2149_v15 = vpop.f32.mrf.mxu1  ;;  %v2154_v19 = vpop.f32.mrf.mxu0  ;;  %1601 = vmatprep.subr.bf16.mxu1 %v2258_v59 }
 0x571   :  { %v2202_v55 = vpack.i.bf16 %v1317_v13, %v864_v14  ;;  %1602 = vmatpush1.bf16.msra.mxu1 %v2256_v50  ;;  %v2261_v13 = vld [vmem:[%s3035_s6 + $0x54] ss:$8 sps:$4 sm:$0xff]   ;;  %v2259_v14 = vld [vmem:[%s3035_s6 + $0x50] ss:$8 sps:$4 sm:$0xff]   ;;  %v2264_v15 = vld [vmem:[%s3035_s6 + $0x44] ss:$8 sps:$4 sm:$0xff]  }
 0x572   :  { %v1265_v62 = vpop.f32.mrf.mxu0  ;;  %v1309_v2 = vpop.f32.mrf.mxu1  ;;  %1603 = vmatprep.subr.bf16.mxu1 %v2261_v13  ;;  %v2267_v19 = vld [vmem:[%s3035_s6 + $0x34] ss:$8 sps:$4 sm:$0xff]  }
 0x573   :  { %v1318_v17 = vmul.f32 %v2321_v60, %v1309_v2  ;;  %2203 = vrot.lane.b32.xlu1 %v2202_v55, %s2509_s11  ;;  %v2265_v55 = vld [vmem:[%s3035_s6 + $0x30] ss:$8 sps:$4 sm:$0xff]   ;;  %v2270_v60 = vld [vmem:[%s3035_s6 + $0x24] ss:$8 sps:$4 sm:$0xff]   ;;  %v2268_v62 = vld [vmem:[%s3035_s6 + $0x20] ss:$8 sps:$4 sm:$0xff]  }
 0x574   :  { %v2155_v43 = vpop.f32.mrf.mxu0  ;;  %v2160_v18 = vpop.f32.mrf.mxu1  ;;  %v2273_v2 = vld [vmem:[%s3035_s6 + $0x14] ss:$8 sps:$4 sm:$0xff]  }
 0x575   :  { %v2207_v11 = vpack.i.bf16 %v1318_v17, %v865_v16  ;;  %1604 = vmatpush1.bf16.msra.mxu1 %v2259_v14  ;;  %v2271_v16 = vld [vmem:[%s3035_s6 + $0x10] ss:$8 sps:$4 sm:$0xff]   ;;  %v2276_v17 = vld [vmem:[%s3035_s6 + $0x4] ss:$8 sps:$4 sm:$0xff]   ;;  %v2274_v43 = vld [vmem:[%s3035_s6] ss:$8 sps:$4 sm:$0xff]  }
 0x576   :  { %v1312_v38 = vpop.f32.mrf.mxu1  ;;  %1605 = vmatprep.subr.bf16.mxu1 %v2264_v15  ;;  %v2277_v18 = vld [vmem:[#allocation6 + $0x78] sm:$0xff]  }
 0x577   :  { %2208 = vrot.lane.b32.xlu1 %v2207_v11, %s2517_s2  ;;  %v2278_v11 = vld [vmem:[#allocation6 + $0x38] sm:$0xff]   ;;  %v2279_v38 = vld [vmem:[#allocation6 + $0x70] sm:$0xff]   ;;  %2024 = vmatprep.subr.bf16.mxu0 %v2277_v18 }
 0x578   :  { %v2161_v20 = vpop.f32.mrf.mxu1 }
 0x579   :  { %1606 = vmatpush1.bf16.msra.mxu1 %v2262_v1  ;;  %v2280_v20 = vld [vmem:[#allocation6 + $0x30] sm:$0xff]  }
 0x57a   :  { %1607 = vmatprep.subr.bf16.mxu1 %v2267_v19 }
 0x57d   :  { %1608 = vmatpush1.bf16.msra.mxu1 %v2265_v55 }
 0x57e   :  { %1609 = vmatprep.subr.bf16.mxu1 %v2270_v60 }
 0x581   :  { %1610 = vmatpush1.bf16.msra.mxu1 %v2268_v62 }
 0x582   :  { %1611 = vmatprep.subr.bf16.mxu1 %v2273_v2 }
 0x585   :  { %1612 = vmatpush1.bf16.msra.mxu1 %v2271_v16 }
 0x586   :  { %1613 = vmatprep.subr.bf16.mxu1 %v2276_v17 }
 0x589   :  { %1614 = vmatpush1.bf16.msra.mxu1 %v2274_v43 }
 0x5e1   :  { %v2199_v22 = vpop.permute.xlu0 %2198 }
 0x5e2   :  { %v2201_v25 = vunpack.i.h.bf16 %v2199_v22  ;;  %v2200_v26 = vunpack.i.l.bf16 %v2199_v22  ;;  %v2283_v22 = vld [vmem:[#allocation6 + $0x60] sm:$0xff]  }
 0x5e4   :  { %v1331_v35 = vsel %vm447_vm1, %v1315_v51, %v2201_v25  ;;  %v878_v36 = vsel %vm447_vm1, %v862_v33, %v2200_v26  ;;  %v2286_v25 = vld [vmem:[#allocation6 + $0x18] sm:$0xff]  }
 0x5e5   :  { %v2204_v24 = vpop.permute.xlu1 %2203 }
 0x5e6   :  { %v2206_v31 = vunpack.i.h.bf16 %v2204_v24  ;;  %v2205_v32 = vunpack.i.l.bf16 %v2204_v24  ;;  %v2285_v24 = vld [vmem:[#allocation6 + $0x58] sm:$0xff]  }
 0x5e8   :  { %v880_v0 = vsel %vm879_vm4, %v878_v36, %v2205_v32  ;;  %v1332_v40 = vsel %vm879_vm4, %v1331_v35, %v2206_v31  ;;  %v1932_v36 = vld [vmem:[#allocation9] ss:$0 sm:$0xff] }
 0x5e9   :  { %v2209_v34 = vpop.permute.xlu1 %2208 }
 0x5ea   :  { %v2211_v37 = vunpack.i.h.bf16 %v2209_v34  ;;  %v2210_v39 = vunpack.i.l.bf16 %v2209_v34 }
 0x5ec   :  { %v1333_v41 = vsel %vm881_vm5, %v1332_v40, %v2211_v37  ;;  %v882_v42 = vsel %vm881_vm5, %v880_v0, %v2210_v39  ;;  %v1933_v40 = vld [vmem:[#allocation10] ss:$0 sm:$0xff] }
 0x5ed   :  { %v1334_v44 = vpack.c.bf16 %v1333_v41, %v882_v42 }
 0x5ef   :  { %2179 = vmatmul.mubr.bf16.vlgmr.msra.gmra.mxu0 %v1334_v44 }
 0x5f0   :  { %2025 = vmatpush3.bf16.msra.mxu0 %v2278_v11 }
 0x5f1   :  { %2026 = vmatprep.subr.bf16.mxu0 %v2279_v38 }
 0x5f4   :  { %2027 = vmatpush3.bf16.msra.mxu0 %v2280_v20 }
 0x5f5   :  { %2028 = vmatprep.subr.bf16.mxu0 %v2281_v21 }
 0x5f8   :  { %2029 = vmatpush3.bf16.msra.mxu0 %v2282_v3 }
 0x5f9   :  { %2030 = vmatprep.subr.bf16.mxu0 %v2283_v22 }
 0x5fc   :  { %2031 = vmatpush3.bf16.msra.mxu0 %v2284_v54 }
 0x5fd   :  { %2032 = vmatprep.subr.bf16.mxu0 %v2285_v24 }
 0x600   :  { %2033 = vmatpush3.bf16.msra.mxu0 %v2286_v25 }
 0x6af   :  { %v1440_v47 = vpop.f32.mrf.mxu0 }
 0x6b0   :  { %v1441_v48 = vadd.f32 %v1923_v45, %v1440_v47  ;;  %v2288_v47 = vld [vmem:[#allocation6 + $0x10] sm:$0xff]  }
 0x6b1   :  { %v2180_v49 = vpop.f32.mrf.mxu0 }
 0x6b2   :  { %v1447_v52 = vadd.f32 %v1441_v48, %v145_v63  ;;  %v2287_v63 = vld [vmem:[#allocation6 + $0x50] sm:$0xff]   ;;  %v2289_v48 = vld [vmem:[#allocation6 + $0x48] sm:$0xff]  }
 0x6b3   :  { %v1443_v56 = vpop.f32.mrf.mxu0  ;;  %2034 = vmatprep.subr.bf16.mxu0 %v2287_v63  ;;  %v2290_v49 = vld [vmem:[#allocation6 + $0x8] sm:$0xff]  }
 0x6b4   :  { %v1444_v58 = vadd.f32 %v1923_v45, %v1443_v56  ;;  %1451 = vadd.xlane.f32.xlu0 %v1447_v52  ;;  %2035 = vmatpush3.bf16.msra.mxu0 %v2288_v47  ;;  %v1507_v56 = vld [vmem:[#allocation4] sm:$0x3] }
 0x6b5   :  { %v2181_v61 = vpop.f32.mrf.mxu0  ;;  %2036 = vmatprep.subr.bf16.mxu0 %v2289_v48 }
 0x6b6   :  { %v1448_v4 = vadd.f32 %v1444_v58, %v146_v53  ;;  %v2292_v53 = vld [vmem:[#allocation6] sm:$0xff]   ;;  %v1516_v61 = vrot.slane %v1507_v56, %v187_v30 }
 0x6b7   :  { %v1950_v30 = vld [vmem:[#allocation7] ss:$0 sm:$0xff] }
 0x6b8   :  { %1453 = vadd.xlane.f32.xlu1 %v1448_v4  ;;  %2037 = vmatpush3.bf16.msra.mxu0 %v2290_v49 }
 0x73d   :  { %v1452_v7 = vpop.xlane.xlu0 %1451 }
 0x73e   :  { %v1456_v8 = vmul.f32 0.0078125, %v1452_v7 }
 0x740   :  { %v2970_v9 = vsub.f32 %v1447_v52, %v1456_v8  ;;  %v2291_v52 = vld [vmem:[#allocation6 + $0x40] sm:$0xff]  }
 0x741   :  { %v1454_v23 = vpop.xlane.xlu1 %1453  ;;  %2038 = vmatprep.subr.bf16.mxu0 %v2291_v52 }
 0x742   :  { %v1457_v10 = vmul.f32 0.0078125, %v1454_v23  ;;  %v1460_v12 = vmul.f32 %v2970_v9, %v2970_v9  ;;  %2039 = vmatpush3.bf16.msra.mxu0 %v2292_v53 }
 0x744   :  { %v2974_v46 = vsub.f32 %v1448_v4, %v1457_v10  ;;  %1462 = vadd.xlane.f32.xlu0 %v1460_v12  ;;  %v1512_v4 = vrot.slane %v1507_v56, %v183_v29 }
 0x746   :  { %v1461_v57 = vmul.f32 %v2974_v46, %v2974_v46 }
 0x748   :  { %1464 = vadd.xlane.f32.xlu0 %v1461_v57 }
 0x7cd   :  { %v1463_v26 = vpop.xlane.xlu0 %1462 }
 0x7ce   :  { %v1466_v27 = vmul.f32 0.0078125, %v1463_v26 }
 0x7d0   :  { %v1468_v31 = vadd.f32 1e-05, %v1466_v27 }
 0x7d1   :  { %v1465_v32 = vpop.xlane.xlu0 %1464 }
 0x7d2   :  { %2326 = vrsqrt.f32 %v1468_v31  ;;  %v1467_v51 = vmul.f32 0.0078125, %v1465_v32  ;;  %v1967_v32 = vld [vmem:[#allocation12] ss:$0 sm:$0xff] }
 0x7d4   :  { %v1469_v33 = vadd.f32 1e-05, %v1467_v51 }
 0x7d6   :  { %2328 = vrsqrt.f32 %v1469_v33 }
 0x7df   :  { %v2327_v34 = vpop.eup %2326 }
 0x7e0   :  { %v1472_v35 = vmul.f32 %v2327_v34, %v2970_v9 }
 0x7e2   :  { %v1480_v0 = vmul.f32 %v1932_v36, %v1472_v35  ;;  %v1968_v35 = vld [vmem:[#allocation13] ss:$0 sm:$0xff] }
 0x7e3   :  { %v2329_v37 = vpop.eup %2328 }
 0x7e4   :  { %v1473_v39 = vmul.f32 %v2329_v37, %v2974_v46  ;;  %v1488_v42 = vadd.f32 %v1933_v40, %v1480_v0 }
 0x7e6   :  { %v1481_v41 = vmul.f32 %v1932_v36, %v1473_v39 }
 0x7e8   :  { %v1489_v44 = vadd.f32 %v1933_v40, %v1481_v41 }
 0x7ea   :  { %v1490_v45 = vpack.c.bf16 %v1489_v44, %v1488_v42 }
 0x7ec   :  { %1632 = vmatmul.mubr.bf16.vlgmr.msra.gmra.mxu1 %v1490_v45 }
 0x8ac   :  { %v1633_v58 = vpop.f32.mrf.mxu1 }
 0x8ad   :  { %v1634_v9 = vadd.f32 %v1633_v58, %v1512_v4 }
 0x8ae   :  { %v1635_v5 = vpop.f32.mrf.mxu1 }
 0x8af   :  { %v1636_v7 = vadd.f32 %v1635_v5, %v1516_v61  ;;  %v1642_v59 = vmax.f32 %v1634_v9, 0.0 }
 0x8b0   :  { %v1637_v6 = vpop.f32.mrf.mxu1 }
 0x8b1   :  { %v1638_v8 = vadd.f32 %v1637_v6, %v1512_v4  ;;  %v1643_v46 = vmax.f32 %v1636_v7, 0.0 }
 0x8b2   :  { %v1639_v23 = vpop.f32.mrf.mxu1 }
 0x8b3   :  { %v1640_v10 = vadd.f32 %v1639_v23, %v1516_v61  ;;  %v1644_v12 = vmax.f32 %v1638_v8, 0.0 }
 0x8b5   :  { %v1645_v57 = vmax.f32 %v1640_v10, 0.0  ;;  %v1646_v13 = vpack.c.bf16 %v1644_v12, %v1642_v59 }
 0x8b7   :  { %v1647_v50 = vpack.c.bf16 %v1645_v57, %v1643_v46 }
 0x8b9   :  { %1815 = vmatprep.mubr.bf16.mxu0 %v1647_v50 }
 0x8ba   :  { %1816 = vmatmul.mubr.bf16.vlgmr.msra.gmra.mxu0 %v1646_v13 }
 0x97a   :  { %v2040_v14 = vpop.f32.mrf.mxu0 }
 0x97c   :  { %v2041_v1 = vpop.f32.mrf.mxu0 }
 0x97d   :  { %v2042_v28 = vadd.f32 %v2041_v1, %v2040_v14 }
 0x97e   :  { %v2043_v29 = vpop.f32.mrf.mxu0 }
 0x97f   :  { %v1818_v15 = vadd.f32 %v2042_v28, %v1950_v30 }
 0x980   :  { %v2044_v19 = vpop.f32.mrf.mxu0 }
 0x981   :  { %v2045_v55 = vadd.f32 %v2044_v19, %v2043_v29  ;;  %v1824_v60 = vadd.f32 %v1818_v15, %v1488_v42 }
 0x983   :  { %v1821_v62 = vadd.f32 %v2045_v55, %v1950_v30  ;;  %1828 = vadd.xlane.f32.xlu1 %v1824_v60 }
 0x985   :  { %v1825_v2 = vadd.f32 %v1821_v62, %v1489_v44 }
 0x987   :  { %1830 = vadd.xlane.f32.xlu0 %v1825_v2 }
 0xa0c   :  { %v1829_v16 = vpop.xlane.xlu1 %1828 }
 0xa0d   :  { %v1832_v17 = vmul.f32 0.0078125, %v1829_v16 }
 0xa0f   :  { %v1834_v43 = vsub.f32 %v1824_v60, %v1832_v17 }
 0xa10   :  { %v1831_v18 = vpop.xlane.xlu0 %1830 }
 0xa11   :  { %v1833_v11 = vmul.f32 0.0078125, %v1831_v18  ;;  %v1836_v38 = vmul.f32 %v1834_v43, %v1834_v43 }
 0xa13   :  { %v1835_v20 = vsub.f32 %v1825_v2, %v1833_v11  ;;  %1838 = vadd.xlane.f32.xlu1 %v1836_v38 }
 0xa15   :  { %v1837_v21 = vmul.f32 %v1835_v20, %v1835_v20 }
 0xa17   :  { %1840 = vadd.xlane.f32.xlu0 %v1837_v21 }
 0xa9c   :  { %v1839_v3 = vpop.xlane.xlu1 %1838 }
 0xa9d   :  { %v1842_v22 = vmul.f32 0.0078125, %v1839_v3 }
 0xa9f   :  { %v1844_v54 = vadd.f32 1e-05, %v1842_v22 }
 0xaa0   :  { %v1841_v24 = vpop.xlane.xlu0 %1840 }
 0xaa1   :  { %2330 = vrsqrt.f32 %v1844_v54  ;;  %v1843_v25 = vmul.f32 0.0078125, %v1841_v24 }
 0xaa3   :  { %v1845_v26 = vadd.f32 1e-05, %v1843_v25 }
 0xaa5   :  { %2332 = vrsqrt.f32 %v1845_v26 }
 0xaae   :  { %v2331_v27 = vpop.eup %2330 }
 0xaaf   :  { %v1848_v31 = vmul.f32 %v2331_v27, %v1834_v43 }
 0xab1   :  { %v1856_v33 = vmul.f32 %v1967_v32, %v1848_v31 }
 0xab2   :  { %v2333_v51 = vpop.eup %2332 }
 0xab3   :  { %v1849_v34 = vmul.f32 %v2333_v51, %v1835_v20  ;;  %v1864_v37 = vadd.f32 %v1968_v35, %v1856_v33 }
 0xab5   :  { %v1857_v36 = vmul.f32 %v1967_v32, %v1849_v34 }
 0xab7   :  { %v1865_v39 = vadd.f32 %v1968_v35, %v1857_v36 }
 0xab9   :  { %v1972_v0 = vpack.c.bf16 %v1865_v39, %v1864_v37 }
 0xabb   :  { %1973 = vst [vmem:[%s3043_s14] sm:$0xff] %v1972_v0  }
 0xabc   :  { %1874 = vsyncpa [#allocation3], 1 }
 0xabd   :  { %1875 = vsyncpa [#allocation5], 1 }
 0xabe   :  { %1876 = vsyncpa [#allocation8], 1 }
 0xabf   :  { %1877 = vsyncpa [#allocation11], 1 }
 0xac0   :  { %1878 = vsyncpa [#allocation14], 1 }

// kernel: transformer_forward.7
= control target key start
LH: loop header
LB: loop body
LE: loop exit
PB: predicated region body
PF: predicated region fallthrough
CT: control target
= control target key end

     0   :  { %v2225_v1 = vmov 0   ;;  %v2226_v2 = vmov 0.0   ;;  %vm2227_vm0 = vmmov 0   ;;  %v86_v27 = vlaneseq  ;;  %s2229_s15 = smov 96   ;;  %s2230_s16 = smov 32   ;;  %s2784_s2 = inlined_call_operand.vmem [shape: bf16[128,384], index: 2, kind: input, shape index: {}]   ;;  %s2785_s0 = inlined_call_operand.vmem [shape: bf16[2,8,128], index: 0, kind: input, shape index: {}]   ;;  %s2786_s3 = inlined_call_operand.vmem [shape: f32[1,384], index: 3, kind: input, shape index: {}]   ;;  %s2787_s1 = inlined_call_operand.vmem [shape: f32[2,1,8], index: 1, kind: input, shape index: {}]   ;;  %s2788_s4 = inlined_call_operand.vmem [shape: bf16[128,128], index: 4, kind: input, shape index: {}]   ;;  %s2789_s5 = inlined_call_operand.vmem [shape: f32[1,128], index: 5, kind: input, shape index: {}]   ;;  %s2790_s6 = inlined_call_operand.vmem [shape: bf16[128,256], index: 6, kind: input, shape index: {}]   ;;  %s2791_s8 = inlined_call_operand.vmem [shape: bf16[256,128], index: 8, kind: input, shape index: {}]   ;;  %s2792_s10 = inlined_call_operand.vmem [shape: f32[1,128], index: 10, kind: input, shape index: {}]   ;;  %s2793_s11 = inlined_call_operand.vmem [shape: f32[1,128], index: 11, kind: input, shape index: {}]   ;;  %s2794_s7 = inlined_call_operand.vmem [shape: f32[1,256], index: 7, kind: input, shape index: {}]   ;;  %s2795_s9 = inlined_call_operand.vmem [shape: f32[1,128], index: 9, kind: input, shape index: {}]   ;;  %s2796_s12 = inlined_call_operand.vmem [shape: f32[1,128], index: 12, kind: input, shape index: {}]   ;;  %s2797_s13 = inlined_call_operand.vmem [shape: f32[1,128], index: 13, kind: input, shape index: {}]   ;;  %s2798_s14 = inlined_call_operand.vmem [shape: bf16[2,8,128], index: 14, kind: output, shape index: {}]  }
   0x1   :  { %v2103_v0 = vld [vmem:[%s2784_s2 + $0xac] ss:$12 sps:$4 sm:$0xff]   ;;  %267 = vmatprep.mubr.bf16.mxu0 %v2225_v1  ;;  %1946 = vmatprep.subr.bf16.mxu1 %v2226_v2  ;;  %v2105_v3 = vld [vmem:[%s2784_s2 + $0xa8] ss:$12 sps:$4 sm:$0xff]   ;;  %v2108_v5 = vld [vmem:[%s2784_s2 + $0x90] ss:$12 sps:$4 sm:$0xff]  }
   0x2   :  { %235 = vmatprep.subr.bf16.mxu0 %v2103_v0  ;;  %v2106_v4 = vld [vmem:[%s2784_s2 + $0x94] ss:$12 sps:$4 sm:$0xff]   ;;  %v2109_v6 = vld [vmem:[%s2784_s2 + $0x7c] ss:$12 sps:$4 sm:$0xff]   ;;  %v2111_v7 = vld [vmem:[%s2784_s2 + $0x78] ss:$12 sps:$4 sm:$0xff]   ;;  %1962 = vmatprep.mubr.msk.bf16.mxu1 %vm2227_vm0, %v2226_v2 }
   0x3   :  { %236 = vmatpush1.bf16.msra.mxu0 %v2105_v3  ;;  %v2112_v8 = vld [vmem:[%s2784_s2 + $0x64] ss:$12 sps:$4 sm:$0xff]   ;;  %v2114_v9 = vld [vmem:[%s2784_s2 + $0x60] ss:$12 sps:$4 sm:$0xff]   ;;  %v2117_v13 = vld [vmem:[%s2784_s2 + $0x48] ss:$12 sps:$4 sm:$0xff]  }
   0x4   :  { %237 = vmatprep.subr.bf16.mxu0 %v2106_v4  ;;  %v2128_v10 = vld [vmem:[%s2784_s2 + $0xb0] ss:$12 sps:$4 sm:$0xff]   ;;  %v2115_v11 = vld [vmem:[%s2784_s2 + $0x4c] ss:$12 sps:$4 sm:$0xff]   ;;  %v2118_v14 = vld [vmem:[%s2784_s2 + $0x34] ss:$12 sps:$4 sm:$0xff]  }
   0x5   :  { %1947 = vmatpush3.bf16.msra.mxu1 %v2128_v10  ;;  %v2129_v12 = vld [vmem:[%s2784_s2 + $0x98] ss:$12 sps:$4 sm:$0xff]   ;;  %v2130_v15 = vld [vmem:[%s2784_s2 + $0x80] ss:$12 sps:$4 sm:$0xff]   ;;  %v2120_v16 = vld [vmem:[%s2784_s2 + $0x30] ss:$12 sps:$4 sm:$0xff]  }
   0x6   :  { %1948 = vmatprep.subr.bf16.mxu1 %v2226_v2  ;;  %v2121_v17 = vld [vmem:[%s2784_s2 + $0x1c] ss:$12 sps:$4 sm:$0xff]   ;;  %v2123_v19 = vld [vmem:[%s2784_s2 + $0x18] ss:$12 sps:$4 sm:$0xff]   ;;  %v2126_v22 = vld [vmem:[%s2784_s2] ss:$12 sps:$4 sm:$0xff]  }
   0x7   :  { %238 = vmatpush1.bf16.msra.mxu0 %v2108_v5  ;;  %v2131_v18 = vld [vmem:[%s2784_s2 + $0x68] ss:$12 sps:$4 sm:$0xff]   ;;  %v2124_v20 = vld [vmem:[%s2784_s2 + $0x4] ss:$12 sps:$4 sm:$0xff]   ;;  %v2134_v25 = vld [vmem:[%s2784_s2 + $0x20] ss:$12 sps:$4 sm:$0xff]  }
   0x8   :  { %239 = vmatprep.subr.bf16.mxu0 %v2109_v6  ;;  %v2132_v21 = vld [vmem:[%s2784_s2 + $0x50] ss:$12 sps:$4 sm:$0xff]   ;;  %v2378_v23 = vld [vmem:[%s2785_s0] sm:$0xff]   ;;  %v2135_v26 = vld [vmem:[%s2784_s2 + $0x8] ss:$12 sps:$4 sm:$0xff]   ;;  %v2402_v28 = vshrl.u32 %v86_v27, 7 }
   0x9   :  { %1949 = vmatpush3.bf16.msra.mxu1 %v2129_v12  ;;  %v2133_v24 = vld [vmem:[%s2784_s2 + $0x38] ss:$12 sps:$4 sm:$0xff]   ;;  %v84_v31 = vld [vmem:[%s2786_s3] sm:$0x7]  ;;  %vm352_vm1 = vcmask 261120   ;;  %s2228_s3 = smov 64  }
   0xa   :  { %1950 = vmatprep.subr.bf16.mxu1 %v2226_v2  ;;  %v88_v29 = vsub.s32 0, %v2402_v28  ;;  %v92_v30 = vsub.s32 1, %v2402_v28  ;;  %v96_v47 = vsub.s32 2, %v2402_v28  ;;  %vm585_vm2 = vcmask 1043456   ;;  %v1804_v4 = vld [vmem:[%s2787_s1] ss:$0 sm:$0xff] }
   0xb   :  { %240 = vmatpush1.bf16.msra.mxu0 %v2111_v7  ;;  %vm537_vm3 = vcmask 64512   ;;  %vm784_vm4 = vcmask 523264   ;;  %vm786_vm5 = vcmask 785408   ;;  %v1850_v28 = vld [vmem:[%s2795_s9] ss:$0 sm:$0xff] }
   0xc   :  { %241 = vmatprep.subr.bf16.mxu0 %v2112_v8  ;;  %v89_v34 = vrot.slane %v84_v31, %v88_v29  ;;  %v93_v35 = vrot.slane %v84_v31, %v92_v30  ;;  %v97_v48 = vrot.slane %v84_v31, %v96_v47 }
   0xd   :  { %1951 = vmatpush3.bf16.msra.mxu1 %v2130_v15 }
   0xe   :  { %1952 = vmatprep.subr.bf16.mxu1 %v2226_v2 }
   0xf   :  { %242 = vmatpush1.bf16.msra.mxu0 %v2114_v9 }
  0x10   :  { %243 = vmatprep.subr.bf16.mxu0 %v2115_v11 }
  0x11   :  { %1953 = vmatpush3.bf16.msra.mxu1 %v2131_v18 }
  0x12   :  { %1954 = vmatprep.subr.bf16.mxu1 %v2226_v2 }
  0x13   :  { %244 = vmatpush1.bf16.msra.mxu0 %v2117_v13 }
  0x14   :  { %245 = vmatprep.subr.bf16.mxu0 %v2118_v14 }
  0x15   :  { %1955 = vmatpush3.bf16.msra.mxu1 %v2132_v21 }
  0x16   :  { %1956 = vmatprep.subr.bf16.mxu1 %v2226_v2 }
  0x17   :  { %246 = vmatpush1.bf16.msra.mxu0 %v2120_v16 }
  0x18   :  { %247 = vmatprep.subr.bf16.mxu0 %v2121_v17 }
  0x19   :  { %1957 = vmatpush3.bf16.msra.mxu1 %v2133_v24 }
  0x1a   :  { %1958 = vmatprep.subr.bf16.mxu1 %v2226_v2 }
  0x1b   :  { %248 = vmatpush1.bf16.msra.mxu0 %v2123_v19 }
  0x1c   :  { %249 = vmatprep.subr.bf16.mxu0 %v2124_v20 }
  0x1d   :  { %1959 = vmatpush3.bf16.msra.mxu1 %v2134_v25 }
  0x1e   :  { %1960 = vmatprep.subr.bf16.mxu1 %v2226_v2 }
  0x1f   :  { %250 = vmatpush1.bf16.msra.mxu0 %v2126_v22 }
  0x20   :  { %1990 = vmatprep.subr.bf16.mxu0 %v2226_v2 }
  0x21   :  { %1961 = vmatpush3.bf16.msra.mxu1 %v2135_v26 }
  0x22   :  { %268 = vmatmul.mubr.bf16.vlgmr.msra.gmra.mxu0 %v2378_v23  ;;  %1966 = vmatprep.subr.bf16.mxu1 %v2226_v2 }
  0x23   :  { %1992 = vmatprep.mubr.msk.bf16.mxu0 %vm2227_vm0, %v2226_v2 }
  0x24   :  { %1963 = vmatmul.mubr.bf16.vlgmr.msra.gmra.mxu1 %v2378_v23 }
  0x25   :  { %1968 = vmatprep.mubr.msk.bf16.mxu1 %vm2227_vm0, %v2226_v2 }
  0xe2   :  { %v269_v32 = vpop.f32.mrf.mxu0 }
  0xe3   :  { %v270_v39 = vadd.f32 %v269_v32, %v89_v34 }
  0xe4   :  { %v271_v33 = vpop.f32.mrf.mxu0  ;;  %v312_v49 = vpop.f32.mrf.mxu1 }
  0xe5   :  { %v272_v40 = vadd.f32 %v271_v33, %v93_v35  ;;  %v319_v44 = vmul.f32 0.17677669, %v270_v39  ;;  %v313_v51 = vadd.f32 %v312_v49, %v97_v48 }
  0xe6   :  { %v273_v36 = vpop.f32.mrf.mxu0  ;;  %v1964_v50 = vpop.f32.mrf.mxu1 }
  0xe7   :  { %v274_v37 = vadd.f32 %v273_v36, %v89_v34 }
  0xe8   :  { %v275_v38 = vpop.f32.mrf.mxu0  ;;  %v315_v52 = vpop.f32.mrf.mxu1 }
  0xe9   :  { %v276_v41 = vadd.f32 %v275_v38, %v93_v35  ;;  %v320_v42 = vmul.f32 0.17677669, %v274_v37  ;;  %v316_v53 = vadd.f32 %v315_v52, %v97_v48 }
  0xea   :  { %v1965_v54 = vpop.f32.mrf.mxu1 }
  0xeb   :  { %v2413_v43 = vpack.c.bf16 %v276_v41, %v272_v40  ;;  %v2421_v46 = vpack.c.bf16 %v320_v42, %v319_v44  ;;  %v2437_v55 = vpack.c.bf16 %v316_v53, %v313_v51 }
  0xed   :  { %335 = vrot.lane.b32.xlu1 %v2413_v43, %s2228_s3  ;;  %333 = vrot.lane.b32.xlu0 %v2413_v43, %s2229_s15  ;;  %v357_v45 = vsel %vm352_vm1, %v2413_v43, 0  ;;  %v587_v56 = vsel %vm585_vm2, %v2437_v55, 0 }
  0xee   :  { %1967 = vmatpush3.bf16.xpose.msra.mxu1 %v357_v45  ;;  %1991 = vmatpush3.bf16.msra.mxu0 %v587_v56 }
  0xef   :  { %1972 = vmatprep.subr.bf16.mxu1 %v2226_v2  ;;  %2002 = vmatprep.subr.bf16.mxu0 %v2226_v2 }
  0xf1   :  { %328 = vrot.lane.b32.xlu1 %v2421_v46, %s2228_s3  ;;  %326 = vrot.lane.b32.xlu0 %v2421_v46, %s2229_s15 }
  0xf5   :  { %330 = vrot.lane.b32.xlu1 %v2421_v46, %s2230_s16  ;;  %337 = vrot.lane.b32.xlu0 %v2413_v43, %s2230_s16 }
  0xf6   :  { %1969 = vmatmul.mubr.msk.bf16.vlgmr.msra.gmra.mxu1 %vm352_vm1, %v2421_v46 }
  0xf7   :  { %1974 = vmatprep.mubr.msk.bf16.mxu1 %vm2227_vm0, %v2226_v2 }
  0xf9   :  { %340 = vrot.lane.b32.xlu1 %v2437_v55, %s2229_s15 }
 0x15f   :  { %v2444_v57 = vpop.permute.xlu0 %333  ;;  %v2449_v59 = vpop.permute.xlu1 %335 }
 0x160   :  { %v403_v58 = vsel %vm352_vm1, %v2444_v57, 0  ;;  %v449_v61 = vsel %vm352_vm1, %v2449_v59, 0 }
 0x161   :  { %1973 = vmatpush3.bf16.xpose.msra.mxu1 %v403_v58 }
 0x162   :  { %1978 = vmatprep.subr.bf16.mxu1 %v2226_v2 }
 0x163   :  { %v2451_v60 = vpop.permute.xlu0 %326  ;;  %v2462_v63 = vpop.permute.xlu1 %328 }
 0x167   :  { %v2460_v62 = vpop.permute.xlu0 %337  ;;  %v2471_v3 = vpop.permute.xlu1 %330 }
 0x168   :  { %1975 = vmatmul.mubr.msk.bf16.vlgmr.msra.gmra.mxu1 %vm352_vm1, %v2451_v60  ;;  %v495_v0 = vsel %vm352_vm1, %v2460_v62, 0 }
 0x169   :  { %1979 = vmatpush3.bf16.xpose.msra.mxu1 %v449_v61  ;;  %1980 = vmatprep.mubr.msk.bf16.mxu1 %vm2227_vm0, %v2226_v2  ;;  %v797_v61 = vrot.slane %v2413_v43, 4 }
 0x16a   :  { %1984 = vmatprep.subr.bf16.mxu1 %v2226_v2 }
 0x16b   :  { %v2481_v11 = vpop.permute.xlu1 %340 }
 0x16c   :  { %v633_v12 = vsel %vm585_vm2, %v2481_v11, 0 }
 0x170   :  { %1981 = vmatmul.mubr.msk.bf16.vlgmr.msra.gmra.mxu1 %vm352_vm1, %v2462_v63 }
 0x171   :  { %1985 = vmatpush3.bf16.xpose.msra.mxu1 %v495_v0  ;;  %1986 = vmatprep.mubr.msk.bf16.mxu1 %vm2227_vm0, %v2226_v2 }
 0x172   :  { %1996 = vmatprep.subr.bf16.mxu1 %v2226_v2 }
 0x178   :  { %1987 = vmatmul.mubr.msk.bf16.vlgmr.msra.gmra.mxu1 %vm352_vm1, %v2471_v3 }
 0x179   :  { %1998 = vmatprep.mubr.msk.bf16.mxu1 %vm2227_vm0, %v2226_v2  ;;  %1997 = vmatpush3.bf16.msra.mxu1 %v633_v12 }
 0x17a   :  { %2008 = vmatprep.subr.bf16.mxu1 %v2226_v2 }
 0x1b6   :  { %v393_v5 = vpop.f32.mrf.mxu1 }
 0x1b7   :  { %v394_v6 = vadd.f32 %v1804_v4, %v393_v5  ;;  %v802_v5 = vsel %vm352_vm1, %v797_v61, 0 }
 0x1b8   :  { %v1970_v7 = vpop.f32.mrf.mxu1 }
 0x1b9   :  { %v538_v8 = vsel %vm537_vm3, %v394_v6, -inf  ;;  %v845_v7 = vrot.slane %v2444_v57, 4  ;;  %v1032_v57 = vrot.slane %v2437_v55, 4 }
 0x1ba   :  { %539 = vmax.xlane.f32.xlu0 %v538_v8  ;;  %v396_v9 = vpop.f32.mrf.mxu1 }
 0x1bb   :  { %v796_v9 = vrot.slane %v2421_v46, 4  ;;  %v941_v46 = vrot.slane %v2460_v62, 4 }
 0x1bc   :  { %v1971_v10 = vpop.f32.mrf.mxu1 }
 0x1bd   :  { %v850_v10 = vsel %vm352_vm1, %v845_v7, 0 }
 0x228   :  { %v439_v13 = vpop.f32.mrf.mxu1 }
 0x229   :  { %v440_v14 = vadd.f32 %v1804_v4, %v439_v13  ;;  %v844_v13 = vrot.slane %v2451_v60, 4  ;;  %v940_v60 = vrot.slane %v2471_v3, 4 }
 0x22a   :  { %v1976_v15 = vpop.f32.mrf.mxu1 }
 0x22b   :  { %v541_v16 = vsel %vm537_vm3, %v440_v14, -inf  ;;  %v1037_v15 = vsel %vm585_vm2, %v1032_v57, 0 }
 0x22c   :  { %542 = vmax.xlane.f32.xlu1 %v541_v16  ;;  %v442_v17 = vpop.f32.mrf.mxu1 }
 0x22e   :  { %v1977_v18 = vpop.f32.mrf.mxu1 }
 0x230   :  { %v485_v19 = vpop.f32.mrf.mxu1 }
 0x231   :  { %v486_v20 = vadd.f32 %v1804_v4, %v485_v19 }
 0x232   :  { %v1982_v21 = vpop.f32.mrf.mxu1 }
 0x233   :  { %v544_v22 = vsel %vm537_vm3, %v486_v20, -inf }
 0x234   :  { %545 = vmax.xlane.f32.xlu0 %v544_v22  ;;  %v488_v24 = vpop.f32.mrf.mxu1 }
 0x236   :  { %v1983_v25 = vpop.f32.mrf.mxu1 }
 0x238   :  { %v531_v26 = vpop.f32.mrf.mxu1 }
 0x239   :  { %v532_v27 = vadd.f32 %v1804_v4, %v531_v26  ;;  %v1814_v26 = vld [vmem:[%s2787_s1 + $0x1] ss:$0 sm:$0xff] }
 0x23a   :  { %v1988_v31 = vpop.f32.mrf.mxu1 }
 0x23b   :  { %v547_v32 = vsel %vm537_vm3, %v532_v27, -inf }
 0x23c   :  { %548 = vmax.xlane.f32.xlu0 %v547_v32  ;;  %v534_v33 = vpop.f32.mrf.mxu1 }
 0x23d   :  { %344 = vrot.lane.b32.xlu1 %v2437_v55, %s2230_s16 }
 0x23e   :  { %v1989_v34 = vpop.f32.mrf.mxu1 }
 0x243   :  { %v540_v35 = vpop.xlane.xlu0 %539 }
 0x244   :  { %v550_v36 = vsub.f32 %v394_v6, %v540_v35  ;;  %v893_v6 = vrot.slane %v2449_v59, 4  ;;  %v892_v59 = vrot.slane %v2462_v63, 4 }
 0x246   :  { %v554_v37 = vmul.f32 1.442695, %v550_v36  ;;  %v898_v12 = vsel %vm352_vm1, %v893_v6, 0 }
 0x248   :  { %2185 = vpow2.f32 %v554_v37 }
 0x252   :  { %342 = vrot.lane.b32.xlu0 %v2437_v55, %s2228_s3  ;;  %v1079_v55 = vrot.slane %v2481_v11, 4 }
 0x254   :  { %v1084_v62 = vsel %vm585_vm2, %v1079_v55, 0 }
 0x255   :  { %v2493_v38 = vpop.eup %2185 }
 0x256   :  { %v578_v39 = vpack.c.bf16 %v2493_v38, %v2493_v38  ;;  %v562_v57 = vsel %vm537_vm3, %v2493_v38, 0.0 }
 0x258   :  { %1993 = vmatmul.mubr.msk.bf16.vlgmr.msra.gmra.mxu0 %vm537_vm3, %v578_v39 }
 0x259   :  { %2004 = vmatprep.mubr.msk.bf16.mxu0 %vm2227_vm0, %v2226_v2 }
 0x2b5   :  { %v543_v40 = vpop.xlane.xlu1 %542 }
 0x2b6   :  { %v551_v41 = vsub.f32 %v440_v14, %v543_v40  ;;  %v946_v14 = vsel %vm352_vm1, %v941_v46, 0 }
 0x2b8   :  { %v556_v42 = vmul.f32 1.442695, %v551_v41 }
 0x2b9   :  { %v2502_v51 = vpop.permute.xlu1 %344 }
 0x2ba   :  { %2187 = vpow2.f32 %v556_v42  ;;  %v725_v56 = vsel %vm585_vm2, %v2502_v51, 0 }
 0x2bd   :  { %v546_v44 = vpop.xlane.xlu0 %545 }
 0x2be   :  { %v552_v45 = vsub.f32 %v486_v20, %v546_v44 }
 0x2c0   :  { %v558_v47 = vmul.f32 1.442695, %v552_v45 }
 0x2c2   :  { %2189 = vpow2.f32 %v558_v47 }
 0x2c5   :  { %v549_v48 = vpop.xlane.xlu0 %548 }
 0x2c6   :  { %v553_v49 = vsub.f32 %v532_v27, %v549_v48 }
 0x2c7   :  { %v2500_v50 = vpop.eup %2187 }
 0x2c8   :  { %v560_v52 = vmul.f32 1.442695, %v553_v49  ;;  %v579_v53 = vpack.c.bf16 %v2500_v50, %v2500_v50  ;;  %v565_v7 = vsel %vm537_vm3, %v2500_v50, 0.0 }
 0x2c9   :  { %v2506_v54 = vpop.permute.xlu0 %342 }
 0x2ca   :  { %2191 = vpow2.f32 %v560_v52  ;;  %v679_v58 = vsel %vm585_vm2, %v2506_v54, 0  ;;  %1999 = vmatmul.mubr.msk.bf16.vlgmr.msra.gmra.mxu1 %vm537_vm3, %v579_v53 }
 0x2cb   :  { %2009 = vmatpush3.bf16.msra.mxu1 %v725_v56  ;;  %2003 = vmatpush3.bf16.msra.mxu0 %v679_v58 }
 0x2cc   :  { %2014 = vmatprep.subr.bf16.mxu0 %v2226_v2  ;;  %2010 = vmatprep.mubr.msk.bf16.mxu1 %vm2227_vm0, %v2226_v2 }
 0x2cd   :  { %2020 = vmatprep.subr.bf16.mxu1 %v2226_v2 }
 0x2cf   :  { %v2518_v0 = vpop.eup %2189 }
 0x2d0   :  { %v580_v4 = vpack.c.bf16 %v2518_v0, %v2518_v0 }
 0x2d2   :  { %2005 = vmatmul.mubr.msk.bf16.vlgmr.msra.gmra.mxu0 %vm537_vm3, %v580_v4 }
 0x2d3   :  { %2015 = vmatpush3.bf16.xpose.msra.mxu0 %v802_v5  ;;  %2016 = vmatprep.mubr.msk.bf16.mxu0 %vm2227_vm0, %v2226_v2 }
 0x2d4   :  { %2026 = vmatprep.subr.bf16.mxu0 %v2226_v2 }
 0x2d7   :  { %v2529_v43 = vpop.eup %2191 }
 0x2d8   :  { %v581_v8 = vpack.c.bf16 %v2529_v43, %v2529_v43  ;;  %v571_v46 = vsel %vm537_vm3, %v2529_v43, 0.0 }
 0x2da   :  { %2011 = vmatmul.mubr.msk.bf16.vlgmr.msra.gmra.mxu1 %vm537_vm3, %v581_v8  ;;  %2017 = vmatmul.mubr.msk.bf16.vlgmr.msra.gmra.mxu0 %vm352_vm1, %v796_v9 }
 0x2db   :  { %2021 = vmatpush3.bf16.xpose.msra.mxu1 %v850_v10  ;;  %2027 = vmatpush3.bf16.xpose.msra.mxu0 %v898_v12  ;;  %v568_v12 = vsel %vm537_vm3, %v2518_v0, 0.0 }
 0x2dc   :  { %2022 = vmatprep.mubr.msk.bf16.mxu1 %vm2227_vm0, %v2226_v2  ;;  %2028 = vmatprep.mubr.msk.bf16.mxu0 %vm2227_vm0, %v2226_v2 }
 0x2dd   :  { %2032 = vmatprep.subr.bf16.mxu1 %v2226_v2  ;;  %2038 = vmatprep.subr.bf16.mxu0 %v2226_v2 }
 0x2e2   :  { %2023 = vmatmul.mubr.msk.bf16.vlgmr.msra.gmra.mxu1 %vm352_vm1, %v844_v13  ;;  %2029 = vmatmul.mubr.msk.bf16.vlgmr.msra.gmra.mxu0 %vm352_vm1, %v892_v59 }
 0x2e3   :  { %2033 = vmatpush3.bf16.xpose.msra.mxu1 %v946_v14  ;;  %2039 = vmatpush3.bf16.msra.mxu0 %v1037_v15 }
 0x2e4   :  { %2034 = vmatprep.mubr.msk.bf16.mxu1 %vm2227_vm0, %v2226_v2  ;;  %2044 = vmatprep.subr.bf16.mxu1 %v2226_v2 }
 0x2e5   :  { %2040 = vmatprep.mubr.msk.bf16.mxu0 %vm2227_vm0, %v2226_v2  ;;  %2050 = vmatprep.subr.bf16.mxu0 %v2226_v2 }
 0x2ea   :  { %2035 = vmatmul.mubr.msk.bf16.vlgmr.msra.gmra.mxu1 %vm352_vm1, %v940_v60 }
 0x2eb   :  { %2045 = vmatpush3.bf16.msra.mxu1 %v1084_v62  ;;  %2046 = vmatprep.mubr.msk.bf16.mxu1 %vm2227_vm0, %v2226_v2 }
 0x2ec   :  { %2056 = vmatprep.subr.bf16.mxu1 %v2226_v2 }
 0x318   :  { %v2565_v63 = vpop.f32.mrf.mxu0 }
 0x31a   :  { %v1994_v16 = vpop.f32.mrf.mxu0 }
 0x31c   :  { %v626_v17 = vpop.f32.mrf.mxu0 }
 0x31d   :  { %v1126_v17 = vrot.slane %v2506_v54, 4 }
 0x31e   :  { %v1995_v18 = vpop.f32.mrf.mxu0 }
 0x38a   :  { %v2567_v19 = vpop.f32.mrf.mxu1 }
 0x38c   :  { %v2000_v11 = vpop.f32.mrf.mxu1 }
 0x38e   :  { %v672_v20 = vpop.f32.mrf.mxu1 }
 0x38f   :  { %v1131_v20 = vsel %vm585_vm2, %v1126_v17, 0 }
 0x390   :  { %v2001_v3 = vpop.f32.mrf.mxu1 }
 0x391   :  { %v1173_v3 = vrot.slane %v2502_v51, 4 }
 0x392   :  { %v2569_v21 = vpop.f32.mrf.mxu0 }
 0x394   :  { %v2006_v22 = vpop.f32.mrf.mxu0 }
 0x396   :  { %v718_v24 = vpop.f32.mrf.mxu0 }
 0x398   :  { %v2007_v25 = vpop.f32.mrf.mxu0 }
 0x399   :  { %v1178_v25 = vsel %vm585_vm2, %v1173_v3, 0 }
 0x39a   :  { %v2574_v27 = vpop.f32.mrf.mxu1  ;;  %v838_v31 = vpop.f32.mrf.mxu0 }
 0x39b   :  { %v839_v32 = vadd.f32 %v1814_v26, %v838_v31 }
 0x39c   :  { %v2012_v33 = vpop.f32.mrf.mxu1  ;;  %v2018_v34 = vpop.f32.mrf.mxu0 }
 0x39d   :  { %v988_v35 = vsel %vm537_vm3, %v839_v32, -inf }
 0x39e   :  { %989 = vmax.xlane.f32.xlu1 %v988_v35  ;;  %v764_v36 = vpop.f32.mrf.mxu1  ;;  %v841_v37 = vpop.f32.mrf.mxu0 }
 0x39f   :  { %v2136_v36 = vld [vmem:[%s2788_s4 + $0x38] sm:$0xff]   ;;  %v2137_v37 = vld [vmem:[%s2788_s4 + $0x30] sm:$0xff]  }
 0x3a0   :  { %v2013_v39 = vpop.f32.mrf.mxu1  ;;  %v2019_v40 = vpop.f32.mrf.mxu0 }
 0x3a1   :  { %v2138_v39 = vld [vmem:[%s2788_s4 + $0x28] sm:$0xff]   ;;  %v2140_v40 = vld [vmem:[%s2788_s4 + $0x18] sm:$0xff]  }
 0x3a2   :  { %v886_v41 = vpop.f32.mrf.mxu1  ;;  %v934_v42 = vpop.f32.mrf.mxu0 }
 0x3a3   :  { %v887_v44 = vadd.f32 %v1814_v26, %v886_v41  ;;  %v935_v48 = vadd.f32 %v1814_v26, %v934_v42 }
 0x3a4   :  { %v2024_v45 = vpop.f32.mrf.mxu1  ;;  %v2030_v47 = vpop.f32.mrf.mxu0 }
 0x3a5   :  { %v991_v49 = vsel %vm537_vm3, %v887_v44, -inf  ;;  %v994_v61 = vsel %vm537_vm3, %v935_v48, -inf }
 0x3a6   :  { %v937_v52 = vpop.f32.mrf.mxu0  ;;  %992 = vmax.xlane.f32.xlu0 %v991_v49  ;;  %v889_v53 = vpop.f32.mrf.mxu1 }
 0x3a7   :  { %v2141_v52 = vld [vmem:[%s2788_s4 + $0x10] sm:$0xff]  }
 0x3a8   :  { %v2025_v56 = vpop.f32.mrf.mxu1  ;;  %v2031_v58 = vpop.f32.mrf.mxu0 }
 0x3a9   :  { %v2142_v58 = vld [vmem:[%s2788_s4 + $0x8] sm:$0xff]  }
 0x3aa   :  { %995 = vmax.xlane.f32.xlu0 %v994_v61  ;;  %v982_v4 = vpop.f32.mrf.mxu1 }
 0x3ab   :  { %v983_v5 = vadd.f32 %v1814_v26, %v982_v4 }
 0x3ac   :  { %v2036_v6 = vpop.f32.mrf.mxu1 }
 0x3ad   :  { %v997_v8 = vsel %vm537_vm3, %v983_v5, -inf }
 0x3ae   :  { %566 = vadd.xlane.f32.xlu0 %v565_v7  ;;  %998 = vmax.xlane.f32.xlu1 %v997_v8  ;;  %v985_v9 = vpop.f32.mrf.mxu1 }
 0x3af   :  { %v2143_v9 = vld [vmem:[%s2788_s4] sm:$0xff]  }
 0x3b0   :  { %v2037_v10 = vpop.f32.mrf.mxu1 }
 0x3b2   :  { %569 = vadd.xlane.f32.xlu0 %v568_v12 }
 0x3b6   :  { %572 = vadd.xlane.f32.xlu0 %v571_v46 }
 0x3ba   :  { %563 = vadd.xlane.f32.xlu0 %v562_v57 }
 0x427   :  { %v990_v59 = vpop.xlane.xlu1 %989 }
 0x428   :  { %v1000_v50 = vsub.f32 %v839_v32, %v990_v59 }
 0x42a   :  { %v1004_v13 = vmul.f32 1.442695, %v1000_v50 }
 0x42c   :  { %2193 = vpow2.f32 %v1004_v13 }
 0x42f   :  { %v993_v14 = vpop.xlane.xlu0 %992 }
 0x430   :  { %v1001_v15 = vsub.f32 %v887_v44, %v993_v14 }
 0x432   :  { %v1006_v55 = vmul.f32 1.442695, %v1001_v15 }
 0x433   :  { %v996_v60 = vpop.xlane.xlu0 %995 }
 0x434   :  { %2195 = vpow2.f32 %v1006_v55  ;;  %v1002_v62 = vsub.f32 %v935_v48, %v996_v60 }
 0x436   :  { %v1008_v0 = vmul.f32 1.442695, %v1002_v62 }
 0x437   :  { %v999_v16 = vpop.xlane.xlu1 %998  ;;  %v567_v41 = vpop.xlane.xlu0 %566 }
 0x438   :  { %2197 = vpow2.f32 %v1008_v0  ;;  %v1003_v43 = vsub.f32 %v983_v5, %v999_v16 }
 0x439   :  { %v2194_v18 = vpop.eup %2193 }
 0x43a   :  { %v1010_v11 = vmul.f32 1.442695, %v1003_v43  ;;  %v1028_v38 = vpack.c.bf16 %v2194_v18, %v2194_v18  ;;  %v1012_v35 = vsel %vm537_vm3, %v2194_v18, 0.0 }
 0x43b   :  { %v570_v44 = vpop.xlane.xlu0 %569 }
 0x43c   :  { %2199 = vpow2.f32 %v1010_v11  ;;  %2041 = vmatmul.mubr.msk.bf16.vlgmr.msra.gmra.mxu0 %vm537_vm3, %v1028_v38 }
 0x43d   :  { %2051 = vmatpush3.bf16.msra.mxu0 %v1131_v20  ;;  %2052 = vmatprep.mubr.msk.bf16.mxu0 %vm2227_vm0, %v2226_v2  ;;  %2201 = vrcp.f32 %v567_v41 }
 0x43e   :  { %2062 = vmatprep.subr.bf16.mxu0 %v2226_v2 }
 0x43f   :  { %v573_v47 = vpop.xlane.xlu0 %572 }
 0x441   :  { %v2196_v22 = vpop.eup %2195 }
 0x442   :  { %v1015_v54 = vsel %vm537_vm3, %v2196_v22, 0.0  ;;  %v1029_v24 = vpack.c.bf16 %v2196_v22, %v2196_v22 }
 0x443   :  { %1016 = vadd.xlane.f32.xlu1 %v1015_v54  ;;  %v564_v20 = vpop.xlane.xlu0 %563 }
 0x444   :  { %2047 = vmatmul.mubr.msk.bf16.vlgmr.msra.gmra.mxu1 %vm537_vm3, %v1029_v24 }
 0x445   :  { %v2198_v26 = vpop.eup %2197  ;;  %2057 = vmatpush3.bf16.msra.mxu1 %v1178_v25  ;;  %2058 = vmatprep.mubr.msk.bf16.mxu1 %vm2227_vm0, %v2226_v2 }
 0x446   :  { %v1018_v31 = vsel %vm537_vm3, %v2198_v26, 0.0  ;;  %v1030_v32 = vpack.c.bf16 %v2198_v26, %v2198_v26 }
 0x447   :  { %1019 = vadd.xlane.f32.xlu1 %v1018_v31 }
 0x448   :  { %2053 = vmatmul.mubr.msk.bf16.vlgmr.msra.gmra.mxu0 %vm537_vm3, %v1030_v32 }
 0x449   :  { %v2200_v51 = vpop.eup %2199  ;;  %2078 = vmatprep.mubr.msk.bf16.mxu0 %vm2227_vm0, %v2226_v2  ;;  %2063 = vmatpush3.bf16.msra.mxu0 %v2136_v36 }
 0x44a   :  { %v1021_v33 = vsel %vm537_vm3, %v2200_v51, 0.0  ;;  %v1031_v34 = vpack.c.bf16 %v2200_v51, %v2200_v51  ;;  %2064 = vmatprep.subr.bf16.mxu0 %v2226_v2  ;;  %v2202_v61 = vpop.eup %2201 }
 0x44b   :  { %1022 = vadd.xlane.f32.xlu1 %v1021_v33  ;;  %v768_v7 = vmul.f32 %v2202_v61, %v2567_v19 }
 0x44c   :  { %2059 = vmatmul.mubr.msk.bf16.vlgmr.msra.gmra.mxu1 %vm537_vm3, %v1031_v34 }
 0x44d   :  { %1536 = vmatprep.mubr.bf16.mxu1 %v2225_v1  ;;  %2065 = vmatpush3.bf16.msra.mxu0 %v2137_v37  ;;  %v2139_v1 = vld [vmem:[%s2788_s4 + $0x20] sm:$0xff]  }
 0x44e   :  { %2066 = vmatprep.subr.bf16.mxu0 %v2226_v2 }
 0x44f   :  { %1013 = vadd.xlane.f32.xlu1 %v1012_v35 }
 0x451   :  { %2067 = vmatpush3.bf16.msra.mxu0 %v2138_v39 }
 0x452   :  { %2068 = vmatprep.subr.bf16.mxu0 %v2226_v2 }
 0x455   :  { %2069 = vmatpush3.bf16.msra.mxu0 %v2139_v1 }
 0x456   :  { %2070 = vmatprep.subr.bf16.mxu0 %v2226_v2 }
 0x459   :  { %2071 = vmatpush3.bf16.msra.mxu0 %v2140_v40 }
 0x45a   :  { %2072 = vmatprep.subr.bf16.mxu0 %v2226_v2 }
 0x45d   :  { %2073 = vmatpush3.bf16.msra.mxu0 %v2141_v52 }
 0x45e   :  { %2074 = vmatprep.subr.bf16.mxu0 %v2226_v2 }
 0x461   :  { %2075 = vmatpush3.bf16.msra.mxu0 %v2142_v58 }
 0x462   :  { %2076 = vmatprep.subr.bf16.mxu0 %v2226_v2 }
 0x465   :  { %2077 = vmatpush3.bf16.msra.mxu0 %v2143_v9 }
 0x4cc   :  { %v1017_v42 = vpop.xlane.xlu1 %1016 }
 0x4cd   :  { %2203 = vrcp.f32 %v1017_v42 }
 0x4ce   :  { %2205 = vrcp.f32 %v570_v44 }
 0x4d0   :  { %v1020_v45 = vpop.xlane.xlu1 %1019 }
 0x4d1   :  { %2207 = vrcp.f32 %v1020_v45  ;;  %v1823_v45 = vld [vmem:[%s2789_s5] ss:$0 sm:$0xff] }
 0x4d2   :  { %2209 = vrcp.f32 %v573_v47 }
 0x4d4   :  { %v1023_v48 = vpop.xlane.xlu1 %1022 }
 0x4d5   :  { %2211 = vrcp.f32 %v1023_v48 }
 0x4d6   :  { %2213 = vrcp.f32 %v564_v20  ;;  %v2172_v20 = vld [vmem:[%s2791_s8 + $0x68] sm:$0xff]  }
 0x4d8   :  { %v1014_v3 = vpop.xlane.xlu1 %1013 }
 0x4d9   :  { %2215 = vrcp.f32 %v1014_v3  ;;  %v2173_v3 = vld [vmem:[%s2791_s8 + $0x28] sm:$0xff]  }
 0x4da   :  { %v2204_v5 = vpop.eup %2203 }
 0x4db   :  { %v2206_v10 = vpop.eup %2205 }
 0x4dc   :  { %v769_v13 = vmul.f32 %v2206_v10, %v2569_v21 }
 0x4de   :  { %v2208_v57 = vpop.eup %2207 }
 0x4df   :  { %v2210_v2 = vpop.eup %2209 }
 0x4e0   :  { %v770_v16 = vmul.f32 %v2210_v2, %v2574_v27  ;;  %v2153_v2 = vld [vmem:[%s2790_s6 + $0x40] ss:$8 sps:$4 sm:$0xff]  }
 0x4e2   :  { %v2212_v60 = vpop.eup %2211 }
 0x4e3   :  { %v2214_v54 = vpop.eup %2213 }
 0x4e4   :  { %v767_v33 = vmul.f32 %v2214_v54, %v2565_v63  ;;  %v50_v63 = vunpack.c.l.bf16 %v2378_v23  ;;  %v2175_v54 = vld [vmem:[%s2791_s8 + $0x20] sm:$0xff]  }
 0x4e6   :  { %v2216_v27 = vpop.eup %2215 }
 0x4fc   :  { %v1073_v49 = vpop.f32.mrf.mxu0 }
 0x4fd   :  { %v1220_v51 = vmul.f32 %v2216_v27, %v1073_v49 }
 0x4fe   :  { %v2042_v53 = vpop.f32.mrf.mxu0 }
 0x4ff   :  { %v51_v53 = vunpack.c.h.bf16 %v2378_v23 }
 0x500   :  { %v1076_v56 = vpop.f32.mrf.mxu0 }
 0x502   :  { %v2043_v4 = vpop.f32.mrf.mxu0 }
 0x504   :  { %v1120_v6 = vpop.f32.mrf.mxu1 }
 0x505   :  { %v1221_v8 = vmul.f32 %v2204_v5, %v1120_v6  ;;  %v2144_v5 = vld [vmem:[%s2790_s6 + $0x70] ss:$8 sps:$4 sm:$0xff]   ;;  %v2146_v6 = vld [vmem:[%s2790_s6 + $0x74] ss:$8 sps:$4 sm:$0xff]  }
 0x506   :  { %v2048_v12 = vpop.f32.mrf.mxu1  ;;  %1504 = vmatprep.subr.bf16.mxu1 %v2146_v6 }
 0x507   :  { %v2088_v46 = vpack.i.bf16 %v1221_v8, %v768_v7  ;;  %1505 = vmatpush1.bf16.msra.mxu1 %v2144_v5 }
 0x508   :  { %v1123_v59 = vpop.f32.mrf.mxu1  ;;  %v1167_v50 = vpop.f32.mrf.mxu0 }
 0x509   :  { %v1222_v14 = vmul.f32 %v2208_v57, %v1167_v50  ;;  %2089 = vrot.lane.b32.xlu0 %v2088_v46, %s2230_s16  ;;  %v2149_v59 = vld [vmem:[%s2790_s6 + $0x64] ss:$8 sps:$4 sm:$0xff]   ;;  %v2147_v50 = vld [vmem:[%s2790_s6 + $0x60] ss:$8 sps:$4 sm:$0xff]  }
 0x50a   :  { %v2049_v15 = vpop.f32.mrf.mxu1  ;;  %v2054_v19 = vpop.f32.mrf.mxu0  ;;  %1506 = vmatprep.subr.bf16.mxu1 %v2149_v59 }
 0x50b   :  { %v2093_v55 = vpack.i.bf16 %v1222_v14, %v769_v13  ;;  %1507 = vmatpush1.bf16.msra.mxu1 %v2147_v50  ;;  %v2152_v13 = vld [vmem:[%s2790_s6 + $0x54] ss:$8 sps:$4 sm:$0xff]   ;;  %v2150_v14 = vld [vmem:[%s2790_s6 + $0x50] ss:$8 sps:$4 sm:$0xff]   ;;  %v2155_v15 = vld [vmem:[%s2790_s6 + $0x44] ss:$8 sps:$4 sm:$0xff]  }
 0x50c   :  { %v1170_v62 = vpop.f32.mrf.mxu0  ;;  %v1214_v0 = vpop.f32.mrf.mxu1  ;;  %1508 = vmatprep.subr.bf16.mxu1 %v2152_v13  ;;  %v2158_v19 = vld [vmem:[%s2790_s6 + $0x34] ss:$8 sps:$4 sm:$0xff]  }
 0x50d   :  { %v1223_v17 = vmul.f32 %v2212_v60, %v1214_v0  ;;  %2094 = vrot.lane.b32.xlu1 %v2093_v55, %s2228_s3  ;;  %v2156_v55 = vld [vmem:[%s2790_s6 + $0x30] ss:$8 sps:$4 sm:$0xff]   ;;  %v2161_v60 = vld [vmem:[%s2790_s6 + $0x24] ss:$8 sps:$4 sm:$0xff]   ;;  %v2159_v62 = vld [vmem:[%s2790_s6 + $0x20] ss:$8 sps:$4 sm:$0xff]  }
 0x50e   :  { %v2055_v43 = vpop.f32.mrf.mxu0  ;;  %v2060_v18 = vpop.f32.mrf.mxu1  ;;  %v2164_v0 = vld [vmem:[%s2790_s6 + $0x14] ss:$8 sps:$4 sm:$0xff]  }
 0x50f   :  { %v2098_v11 = vpack.i.bf16 %v1223_v17, %v770_v16  ;;  %1509 = vmatpush1.bf16.msra.mxu1 %v2150_v14  ;;  %v2162_v16 = vld [vmem:[%s2790_s6 + $0x10] ss:$8 sps:$4 sm:$0xff]   ;;  %v2167_v17 = vld [vmem:[%s2790_s6 + $0x4] ss:$8 sps:$4 sm:$0xff]   ;;  %v2165_v43 = vld [vmem:[%s2790_s6] ss:$8 sps:$4 sm:$0xff]  }
 0x510   :  { %v1217_v38 = vpop.f32.mrf.mxu1  ;;  %1510 = vmatprep.subr.bf16.mxu1 %v2155_v15  ;;  %v2168_v18 = vld [vmem:[%s2791_s8 + $0x78] sm:$0xff]  }
 0x511   :  { %2099 = vrot.lane.b32.xlu1 %v2098_v11, %s2229_s15  ;;  %v2169_v11 = vld [vmem:[%s2791_s8 + $0x38] sm:$0xff]   ;;  %1924 = vmatprep.subr.bf16.mxu0 %v2168_v18  ;;  %v2170_v38 = vld [vmem:[%s2791_s8 + $0x70] sm:$0xff]  }
 0x512   :  { %v2061_v21 = vpop.f32.mrf.mxu1 }
 0x513   :  { %1511 = vmatpush1.bf16.msra.mxu1 %v2153_v2  ;;  %v2171_v21 = vld [vmem:[%s2791_s8 + $0x30] sm:$0xff]  }
 0x514   :  { %1512 = vmatprep.subr.bf16.mxu1 %v2158_v19 }
 0x517   :  { %1513 = vmatpush1.bf16.msra.mxu1 %v2156_v55 }
 0x518   :  { %1514 = vmatprep.subr.bf16.mxu1 %v2161_v60 }
 0x51b   :  { %1515 = vmatpush1.bf16.msra.mxu1 %v2159_v62 }
 0x51c   :  { %1516 = vmatprep.subr.bf16.mxu1 %v2164_v0 }
 0x51f   :  { %1517 = vmatpush1.bf16.msra.mxu1 %v2162_v16 }
 0x520   :  { %1518 = vmatprep.subr.bf16.mxu1 %v2167_v17 }
 0x523   :  { %1519 = vmatpush1.bf16.msra.mxu1 %v2165_v43 }
 0x57b   :  { %v2090_v22 = vpop.permute.xlu0 %2089 }
 0x57c   :  { %v2092_v25 = vunpack.i.h.bf16 %v2090_v22  ;;  %v2091_v26 = vunpack.i.l.bf16 %v2090_v22  ;;  %v2174_v22 = vld [vmem:[%s2791_s8 + $0x60] sm:$0xff]  }
 0x57e   :  { %v1236_v35 = vsel %vm352_vm1, %v1220_v51, %v2092_v25  ;;  %v783_v36 = vsel %vm352_vm1, %v767_v33, %v2091_v26  ;;  %v2177_v25 = vld [vmem:[%s2791_s8 + $0x18] sm:$0xff]  }
 0x57f   :  { %v2095_v24 = vpop.permute.xlu1 %2094 }
 0x580   :  { %v2097_v31 = vunpack.i.h.bf16 %v2095_v24  ;;  %v2096_v32 = vunpack.i.l.bf16 %v2095_v24  ;;  %v2176_v24 = vld [vmem:[%s2791_s8 + $0x58] sm:$0xff]  }
 0x582   :  { %v785_v1 = vsel %vm784_vm4, %v783_v36, %v2096_v32  ;;  %v1237_v40 = vsel %vm784_vm4, %v1236_v35, %v2097_v31  ;;  %v1832_v36 = vld [vmem:[%s2792_s10] ss:$0 sm:$0xff] }
 0x583   :  { %v2100_v34 = vpop.permute.xlu1 %2099 }
 0x584   :  { %v2102_v37 = vunpack.i.h.bf16 %v2100_v34  ;;  %v2101_v39 = vunpack.i.l.bf16 %v2100_v34 }
 0x586   :  { %v1238_v41 = vsel %vm786_vm5, %v1237_v40, %v2102_v37  ;;  %v787_v42 = vsel %vm786_vm5, %v785_v1, %v2101_v39  ;;  %v1833_v40 = vld [vmem:[%s2793_s11] ss:$0 sm:$0xff] }
 0x587   :  { %v1239_v44 = vpack.c.bf16 %v1238_v41, %v787_v42 }
 0x589   :  { %2079 = vmatmul.mubr.bf16.vlgmr.msra.gmra.mxu0 %v1239_v44 }
 0x58a   :  { %1925 = vmatpush3.bf16.msra.mxu0 %v2169_v11 }
 0x58b   :  { %1926 = vmatprep.subr.bf16.mxu0 %v2170_v38 }
 0x58e   :  { %1927 = vmatpush3.bf16.msra.mxu0 %v2171_v21 }
 0x58f   :  { %1928 = vmatprep.subr.bf16.mxu0 %v2172_v20 }
 0x592   :  { %1929 = vmatpush3.bf16.msra.mxu0 %v2173_v3 }
 0x593   :  { %1930 = vmatprep.subr.bf16.mxu0 %v2174_v22 }
 0x596   :  { %1931 = vmatpush3.bf16.msra.mxu0 %v2175_v54 }
 0x597   :  { %1932 = vmatprep.subr.bf16.mxu0 %v2176_v24 }
 0x59a   :  { %1933 = vmatpush3.bf16.msra.mxu0 %v2177_v25 }
 0x649   :  { %v1345_v47 = vpop.f32.mrf.mxu0 }
 0x64a   :  { %v1346_v48 = vadd.f32 %v1823_v45, %v1345_v47  ;;  %v2179_v47 = vld [vmem:[%s2791_s8 + $0x10] sm:$0xff]  }
 0x64b   :  { %v2080_v49 = vpop.f32.mrf.mxu0 }
 0x64c   :  { %v1352_v52 = vadd.f32 %v1346_v48, %v50_v63  ;;  %v2178_v63 = vld [vmem:[%s2791_s8 + $0x50] sm:$0xff]   ;;  %v2180_v48 = vld [vmem:[%s2791_s8 + $0x48] sm:$0xff]  }
 0x64d   :  { %v1348_v56 = vpop.f32.mrf.mxu0  ;;  %1934 = vmatprep.subr.bf16.mxu0 %v2178_v63  ;;  %v2181_v49 = vld [vmem:[%s2791_s8 + $0x8] sm:$0xff]  }
 0x64e   :  { %v1349_v58 = vadd.f32 %v1823_v45, %v1348_v56  ;;  %1356 = vadd.xlane.f32.xlu0 %v1352_v52  ;;  %1935 = vmatpush3.bf16.msra.mxu0 %v2179_v47  ;;  %v1412_v56 = vld [vmem:[%s2794_s7] sm:$0x3] }
 0x64f   :  { %v2081_v61 = vpop.f32.mrf.mxu0  ;;  %1936 = vmatprep.subr.bf16.mxu0 %v2180_v48 }
 0x650   :  { %v1353_v4 = vadd.f32 %v1349_v58, %v51_v53  ;;  %v2183_v53 = vld [vmem:[%s2791_s8] sm:$0xff]   ;;  %v1421_v61 = vrot.slane %v1412_v56, %v92_v30 }
 0x652   :  { %1358 = vadd.xlane.f32.xlu1 %v1353_v4  ;;  %1937 = vmatpush3.bf16.msra.mxu0 %v2181_v49 }
 0x6d7   :  { %v1357_v7 = vpop.xlane.xlu0 %1356 }
 0x6d8   :  { %v1361_v8 = vmul.f32 0.0078125, %v1357_v7 }
 0x6da   :  { %v2659_v9 = vsub.f32 %v1352_v52, %v1361_v8  ;;  %v2182_v52 = vld [vmem:[%s2791_s8 + $0x40] sm:$0xff]  }
 0x6db   :  { %v1359_v23 = vpop.xlane.xlu1 %1358  ;;  %1938 = vmatprep.subr.bf16.mxu0 %v2182_v52 }
 0x6dc   :  { %v1362_v10 = vmul.f32 0.0078125, %v1359_v23  ;;  %v1365_v12 = vmul.f32 %v2659_v9, %v2659_v9  ;;  %1939 = vmatpush3.bf16.msra.mxu0 %v2183_v53 }
 0x6de   :  { %v2663_v46 = vsub.f32 %v1353_v4, %v1362_v10  ;;  %1367 = vadd.xlane.f32.xlu0 %v1365_v12  ;;  %v1417_v4 = vrot.slane %v1412_v56, %v88_v29 }
 0x6e0   :  { %v1366_v57 = vmul.f32 %v2663_v46, %v2663_v46 }
 0x6e2   :  { %1369 = vadd.xlane.f32.xlu0 %v1366_v57 }
 0x767   :  { %v1368_v26 = vpop.xlane.xlu0 %1367 }
 0x768   :  { %v1371_v27 = vmul.f32 0.0078125, %v1368_v26 }
 0x76a   :  { %v1373_v31 = vadd.f32 1e-05, %v1371_v27 }
 0x76b   :  { %v1370_v32 = vpop.xlane.xlu0 %1369 }
 0x76c   :  { %2217 = vrsqrt.f32 %v1373_v31  ;;  %v1372_v51 = vmul.f32 0.0078125, %v1370_v32  ;;  %v1867_v32 = vld [vmem:[%s2796_s12] ss:$0 sm:$0xff] }
 0x76e   :  { %v1374_v33 = vadd.f32 1e-05, %v1372_v51 }
 0x770   :  { %2219 = vrsqrt.f32 %v1374_v33 }
 0x779   :  { %v2218_v34 = vpop.eup %2217 }
 0x77a   :  { %v1377_v35 = vmul.f32 %v2218_v34, %v2659_v9 }
 0x77c   :  { %v1385_v1 = vmul.f32 %v1832_v36, %v1377_v35  ;;  %v1868_v35 = vld [vmem:[%s2797_s13] ss:$0 sm:$0xff] }
 0x77d   :  { %v2220_v37 = vpop.eup %2219 }
 0x77e   :  { %v1378_v39 = vmul.f32 %v2220_v37, %v2663_v46  ;;  %v1393_v42 = vadd.f32 %v1833_v40, %v1385_v1 }
 0x780   :  { %v1386_v41 = vmul.f32 %v1832_v36, %v1378_v39 }
 0x782   :  { %v1394_v44 = vadd.f32 %v1833_v40, %v1386_v41 }
 0x784   :  { %v1395_v45 = vpack.c.bf16 %v1394_v44, %v1393_v42 }
 0x786   :  { %1537 = vmatmul.mubr.bf16.vlgmr.msra.gmra.mxu1 %v1395_v45 }
 0x846   :  { %v1538_v58 = vpop.f32.mrf.mxu1 }
 0x847   :  { %v1539_v9 = vadd.f32 %v1538_v58, %v1417_v4 }
 0x848   :  { %v1540_v5 = vpop.f32.mrf.mxu1 }
 0x849   :  { %v1541_v7 = vadd.f32 %v1540_v5, %v1421_v61  ;;  %v1547_v59 = vmax.f32 %v1539_v9, 0.0 }
 0x84a   :  { %v1542_v6 = vpop.f32.mrf.mxu1 }
 0x84b   :  { %v1543_v8 = vadd.f32 %v1542_v6, %v1417_v4  ;;  %v1548_v46 = vmax.f32 %v1541_v7, 0.0 }
 0x84c   :  { %v1544_v23 = vpop.f32.mrf.mxu1 }
 0x84d   :  { %v1545_v10 = vadd.f32 %v1544_v23, %v1421_v61  ;;  %v1549_v12 = vmax.f32 %v1543_v8, 0.0 }
 0x84f   :  { %v1550_v57 = vmax.f32 %v1545_v10, 0.0  ;;  %v1551_v13 = vpack.c.bf16 %v1549_v12, %v1547_v59 }
 0x851   :  { %v1552_v50 = vpack.c.bf16 %v1550_v57, %v1548_v46 }
 0x853   :  { %1720 = vmatprep.mubr.bf16.mxu0 %v1552_v50 }
 0x854   :  { %1721 = vmatmul.mubr.bf16.vlgmr.msra.gmra.mxu0 %v1551_v13 }
 0x914   :  { %v1940_v14 = vpop.f32.mrf.mxu0 }
 0x916   :  { %v1941_v29 = vpop.f32.mrf.mxu0 }
 0x917   :  { %v1942_v30 = vadd.f32 %v1941_v29, %v1940_v14 }
 0x918   :  { %v1943_v2 = vpop.f32.mrf.mxu0 }
 0x919   :  { %v1723_v15 = vadd.f32 %v1942_v30, %v1850_v28 }
 0x91a   :  { %v1944_v19 = vpop.f32.mrf.mxu0 }
 0x91b   :  { %v1945_v55 = vadd.f32 %v1944_v19, %v1943_v2  ;;  %v1729_v60 = vadd.f32 %v1723_v15, %v1393_v42 }
 0x91d   :  { %v1726_v62 = vadd.f32 %v1945_v55, %v1850_v28  ;;  %1733 = vadd.xlane.f32.xlu1 %v1729_v60 }
 0x91f   :  { %v1730_v0 = vadd.f32 %v1726_v62, %v1394_v44 }
 0x921   :  { %1735 = vadd.xlane.f32.xlu0 %v1730_v0 }
 0x9a6   :  { %v1734_v16 = vpop.xlane.xlu1 %1733 }
 0x9a7   :  { %v1737_v17 = vmul.f32 0.0078125, %v1734_v16 }
 0x9a9   :  { %v1739_v43 = vsub.f32 %v1729_v60, %v1737_v17 }
 0x9aa   :  { %v1736_v18 = vpop.xlane.xlu0 %1735 }
 0x9ab   :  { %v1738_v11 = vmul.f32 0.0078125, %v1736_v18  ;;  %v1741_v38 = vmul.f32 %v1739_v43, %v1739_v43 }
 0x9ad   :  { %v1740_v21 = vsub.f32 %v1730_v0, %v1738_v11  ;;  %1743 = vadd.xlane.f32.xlu1 %v1741_v38 }
 0x9af   :  { %v1742_v20 = vmul.f32 %v1740_v21, %v1740_v21 }
 0x9b1   :  { %1745 = vadd.xlane.f32.xlu0 %v1742_v20 }
 0xa36   :  { %v1744_v3 = vpop.xlane.xlu1 %1743 }
 0xa37   :  { %v1747_v22 = vmul.f32 0.0078125, %v1744_v3 }
 0xa39   :  { %v1749_v54 = vadd.f32 1e-05, %v1747_v22 }
 0xa3a   :  { %v1746_v24 = vpop.xlane.xlu0 %1745 }
 0xa3b   :  { %2221 = vrsqrt.f32 %v1749_v54  ;;  %v1748_v25 = vmul.f32 0.0078125, %v1746_v24 }
 0xa3d   :  { %v1750_v26 = vadd.f32 1e-05, %v1748_v25 }
 0xa3f   :  { %2223 = vrsqrt.f32 %v1750_v26 }
 0xa48   :  { %v2222_v27 = vpop.eup %2221 }
 0xa49   :  { %v1753_v31 = vmul.f32 %v2222_v27, %v1739_v43 }
 0xa4b   :  { %v1761_v33 = vmul.f32 %v1867_v32, %v1753_v31 }
 0xa4c   :  { %v2224_v51 = vpop.eup %2223 }
 0xa4d   :  { %v1754_v34 = vmul.f32 %v2224_v51, %v1740_v21  ;;  %v1769_v37 = vadd.f32 %v1868_v35, %v1761_v33 }
 0xa4f   :  { %v1762_v36 = vmul.f32 %v1867_v32, %v1754_v34 }
 0xa51   :  { %v1770_v39 = vadd.f32 %v1868_v35, %v1762_v36 }
 0xa53   :  { %v1872_v1 = vpack.c.bf16 %v1770_v39, %v1769_v37 }
 0xa55   :  { %1873 = vst [vmem:[%s2798_s14] sm:$0xff] %v1872_v1  }

// kernel: transformer_forward.9
= control target key start
LH: loop header
LB: loop body
LE: loop exit
PB: predicated region body
PF: predicated region fallthrough
CT: control target
= control target key end

     0   :  { %s5079_s0 = inlined_call_operand.vmem [shape: bf16[2,8,128], index: 0, kind: input, shape index: {}]   ;;  %s5080_s1 = inlined_call_operand.vmem [shape: bf16[2,8,128], index: 1, kind: input, shape index: {}]   ;;  %s5081_s2 = inlined_call_operand.vmem [shape: f32[8,8], index: 2, kind: input, shape index: {}]   ;;  %s5082_s3 = inlined_call_operand.vmem [shape: f32[2,1,8], index: 3, kind: input, shape index: {}]   ;;  %s5083_s4 = inlined_call_operand.vmem [shape: f32[2,1,8], index: 4, kind: input, shape index: {}]   ;;  %s5084_s5 = inlined_call_operand.vmem [shape: bf16[128,384], index: 5, kind: input, shape index: {}]   ;;  %s5085_s6 = inlined_call_operand.vmem [shape: f32[1,384], index: 6, kind: input, shape index: {}]   ;;  %s5086_s7 = inlined_call_operand.hbm [shape: bf16[128,128], index: 7, kind: input, shape index: {}]   ;;  %s5087_s8 = inlined_call_operand.vmem [shape: f32[1,128], index: 8, kind: input, shape index: {}]   ;;  %s5088_s9 = inlined_call_operand.hbm [shape: bf16[128,128], index: 9, kind: input, shape index: {}]   ;;  %s5089_s10 = inlined_call_operand.vmem [shape: f32[1,128], index: 10, kind: input, shape index: {}]   ;;  %s5090_s11 = inlined_call_operand.vmem [shape: bf16[128,256], index: 11, kind: input, shape index: {}]   ;;  %s5091_s12 = inlined_call_operand.vmem [shape: f32[1,256], index: 12, kind: input, shape index: {}]   ;;  %s5092_s13 = inlined_call_operand.hbm [shape: bf16[128,128], index: 13, kind: input, shape index: {}]   ;;  %s5093_s14 = inlined_call_operand.vmem [shape: f32[1,128], index: 14, kind: input, shape index: {}]   ;;  %s5094_s15 = inlined_call_operand.vmem [shape: bf16[128,256], index: 15, kind: input, shape index: {}]   ;;  %s5095_s16 = inlined_call_operand.vmem [shape: f32[1,256], index: 16, kind: input, shape index: {}]   ;;  %s5096_s17 = inlined_call_operand.vmem [shape: bf16[256,128], index: 17, kind: input, shape index: {}]   ;;  %s5097_s18 = inlined_call_operand.vmem [shape: f32[1,128], index: 18, kind: input, shape index: {}]   ;;  %s5098_s19 = inlined_call_operand.vmem [shape: f32[1,128], index: 19, kind: input, shape index: {}]   ;;  %s5099_s20 = inlined_call_operand.vmem [shape: f32[1,128], index: 20, kind: input, shape index: {}]   ;;  %s5100_s21 = inlined_call_operand.vmem [shape: f32[1,128], index: 21, kind: input, shape index: {}]   ;;  %s5101_s22 = inlined_call_operand.hbm [shape: f32[1,128], index: 22, kind: input, shape index: {}]   ;;  %s5102_s23 = inlined_call_operand.hbm [shape: f32[1,128], index: 23, kind: input, shape index: {}]   ;;  %s5103_s24 = inlined_call_operand.hbm [shape: f32[1,128], index: 24, kind: input, shape index: {}]   ;;  %s5104_s25 = inlined_call_operand.vmem [shape: bf16[2,8,128], index: 25, kind: output, shape index: {}]  }
   0x1   :  { %5108 = sst [smem:[#allocation16_spill]] %s5079_s0 }
   0x2   :  { %5109 = sst [smem:[#allocation17_spill]] %s5080_s1 }
   0x3   :  { %5110 = sst [smem:[#allocation18_spill]] %s5081_s2 }
   0x4   :  { %5111 = sst [smem:[#allocation19_spill]] %s5082_s3 }
   0x5   :  { %5112 = sst [smem:[#allocation20_spill]] %s5083_s4 }
   0x6   :  { %5113 = sst [smem:[#allocation21_spill]] %s5084_s5 }
   0x7   :  { %5114 = sst [smem:[#allocation22_spill]] %s5085_s6 }
   0x8   :  { %5115 = sst [smem:[#allocation23_spill]] %s5086_s7 }
   0x9   :  { %5116 = sst [smem:[#allocation24_spill]] %s5087_s8 }
   0xa   :  { %5117 = sst [smem:[#allocation25_spill]] %s5088_s9 }
   0xb   :  { %30 = vsyncpa [#allocation3], 0 }
   0xc   :  { %31 = vsyncpa [#allocation5], 0 }
   0xd   :  { %32 = vsyncpa [#allocation8], 0 }
   0xe   :  { %33 = vsyncpa [#allocation11], 0  ;;  %s4152_s29 = smov [#allocation4]   ;;  %s4153_s6 = smov [#allocation7]  }
   0xf   :  { %s67_s2 = sshll.u32 %s4152_s29, 4  ;;  %s114_s30 = sshll.u32 %s4153_s6, 4  ;;  %s68_s2 = int_to_ptr.vmem [resolvable:$true] %s67_s2  ;;  %s115_s30 = int_to_ptr.vmem [resolvable:$true] %s114_s30 }
  0x10   :  { %s4032_s7 = scalar_lea.vmem %s68_s2, 1024  ;;  %p4037_p1 = scmp.lt.s32.totalorder %s68_s2, %s68_s2 }
  0x11   :  { %p4033_p0 = scmp.ne.s32.totalorder %s68_s2, %s4032_s7  ;;  %p4038_p2 = scmp.lt.s32.totalorder %s4032_s7, %s4032_s7 }
  0x13   :  { %p4039_p3 = por %p4038_p2, %p4037_p1 }
  0x15   :  { %p4040_p4 = pnand %p4039_p3, %p4033_p0 }
  0x17   :  { %4043 = shalt.err (!%p4040_p4)
}
  0x18   :  { %s4154_s3 = smov 64   ;;  %s4155_s26 = smov 4  }
  0x19   :  { %s5118_s27 = sld [smem:[#allocation25_spill]]  ;;  %s4052_s4 = scalar_lea.vmem %s115_s30, 16 }
  0x1a   :  { %p4053_p5 = scmp.ne.s32.totalorder %s115_s30, %s4052_s4  ;;  %s4056_s28 = scalar_lea.vmem %s115_s30, 32 }
  0x1b   :  { %p4057_p6 = scmp.lt.s32.totalorder %s115_s30, %s115_s30  ;;  %p4058_p7 = scmp.lt.s32.totalorder %s4056_s28, %s4052_s4 }
  0x1d   :  { %p4059_p8 = por %p4058_p7, %p4057_p6 }
  0x1f   :  { %73 = dma.hbm_to_vmem [thread:$0]  %s5118_s27, 1024, %s68_s2, [#allocation5], %s4154_s3, %s4154_s3, %s4155_s26  }
  0x20   :  { %p4060_p9 = pnand %p4059_p8, %p4053_p5 }
  0x22   :  { %4063 = shalt.err (!%p4060_p9)
}
  0x23   :  { %117 = dma.hbm_to_vmem [thread:$0]  %s5101_s22, 16, %s115_s30, [#allocation8]  }
  0x24   :  { %s4156_s0 = smov [#allocation2]   ;;  %s4157_s6 = smov [#allocation6]  }
  0x25   :  { %s53_s29 = sshll.u32 %s4156_s0, 4  ;;  %s85_s7 = sshll.u32 %s4157_s6, 4  ;;  %s54_s29 = int_to_ptr.vmem [resolvable:$true] %s53_s29  ;;  %s86_s7 = int_to_ptr.vmem [resolvable:$true] %s85_s7 }
  0x26   :  { %s4072_s1 = scalar_lea.vmem %s54_s29, 1024  ;;  %p4077_p11 = scmp.lt.s32.totalorder %s54_s29, %s54_s29 }
  0x27   :  { %p4073_p10 = scmp.ne.s32.totalorder %s54_s29, %s4072_s1  ;;  %p4078_p12 = scmp.lt.s32.totalorder %s4072_s1, %s4072_s1 }
  0x29   :  { %p4079_p13 = por %p4078_p12, %p4077_p11 }
  0x2b   :  { %p4080_p0 = pnand %p4079_p13, %p4073_p10 }
  0x2d   :  { %4083 = shalt.err (!%p4080_p0)
}
  0x2e   :  { %s5119_s27 = sld [smem:[#allocation23_spill]]  ;;  %s4092_s22 = scalar_lea.vmem %s86_s7, 1024 }
  0x2f   :  { %p4093_p1 = scmp.ne.s32.totalorder %s86_s7, %s4092_s22  ;;  %p4097_p2 = scmp.lt.s32.totalorder %s86_s7, %s86_s7 }
  0x30   :  { %p4098_p3 = scmp.lt.s32.totalorder %s4092_s22, %s4092_s22 }
  0x32   :  { %p4099_p4 = por %p4098_p3, %p4097_p2 }
  0x34   :  { %59 = dma.hbm_to_vmem [thread:$0]  %s5119_s27, 1024, %s54_s29, [#allocation3], %s4154_s3, %s4154_s3, %s4155_s26  }
  0x35   :  { %p4100_p5 = pnand %p4099_p4, %p4093_p1 }
  0x37   :  { %4103 = shalt.err (!%p4100_p5)
}
  0x38   :  { %91 = dma.hbm_to_vmem [thread:$0]  %s5092_s13, 1024, %s86_s7, [#allocation5], %s4154_s3, %s4154_s3, %s4155_s26  }
  0x39   :  { %s4158_s28 = smov [#allocation9]   ;;  %s4159_s5 = smov [#allocation10]  }
  0x3a   :  { %s124_s9 = sshll.u32 %s4158_s28, 4  ;;  %s134_s0 = sshll.u32 %s4159_s5, 4  ;;  %s125_s9 = int_to_ptr.vmem [resolvable:$true] %s124_s9  ;;  %s135_s0 = int_to_ptr.vmem [resolvable:$true] %s134_s0 }
  0x3b   :  { %s4112_s29 = scalar_lea.vmem %s125_s9, 16  ;;  %s4116_s6 = scalar_lea.vmem %s125_s9, 32 }
  0x3c   :  { %p4113_p6 = scmp.ne.s32.totalorder %s125_s9, %s4112_s29  ;;  %p4117_p7 = scmp.lt.s32.totalorder %s125_s9, %s125_s9 }
  0x3d   :  { %p4118_p8 = scmp.lt.s32.totalorder %s4116_s6, %s4112_s29 }
  0x3f   :  { %p4119_p9 = por %p4118_p8, %p4117_p7 }
  0x41   :  { %p4120_p10 = pnand %p4119_p9, %p4113_p6 }
  0x43   :  { %4123 = shalt.err (!%p4120_p10)
}
  0x44   :  { %127 = dma.hbm_to_vmem [thread:$0]  %s5102_s23, 16, %s125_s9, [#allocation8]  }
  0x45   :  { %s4132_s8 = scalar_lea.vmem %s135_s0, 16  ;;  %s4136_s13 = scalar_lea.vmem %s135_s0, 32 }
  0x46   :  { %p4133_p11 = scmp.ne.s32.totalorder %s135_s0, %s4132_s8  ;;  %p4137_p12 = scmp.lt.s32.totalorder %s135_s0, %s135_s0 }
  0x47   :  { %p4138_p13 = scmp.lt.s32.totalorder %s4136_s13, %s4132_s8 }
  0x49   :  { %p4139_p0 = por %p4138_p13, %p4137_p12 }
  0x4b   :  { %p4140_p1 = pnand %p4139_p0, %p4133_p11 }
  0x4d   :  { %4143 = shalt.err (!%p4140_p1)
}
  0x4e   :  { %137 = dma.hbm_to_vmem [thread:$0]  %s5103_s24, 16, %s135_s0, [#allocation11]  }
  0x4f   :  { %4144 = dma.done.wait [#allocation3], 1024  }
  0x50   :  { %4145 = vsyncadd [#allocation3], 4294966272 }
  0x51   :  { %4146 = dma.done.wait [#allocation5], 2048  }
  0x52   :  { %4147 = vsyncadd [#allocation5], 4294965248 }
  0x53   :  { %4148 = dma.done.wait [#allocation8], 32  }
  0x54   :  { %4149 = vsyncadd [#allocation8], 4294967264 }
  0x55   :  { %4150 = dma.done.wait [#allocation11], 16  }
  0x56   :  { %4151 = vsyncadd [#allocation11], 4294967280  ;;  %v4160_v0 = vmov 0   ;;  %v4161_v1 = vmov 0.0   ;;  %s5120_s22 = sld [smem:[#allocation21_spill]]  ;;  %vm4162_vm0 = vmmov 0   ;;  %v198_v27 = vlaneseq }
  0x57   :  { %379 = vmatprep.mubr.bf16.mxu0 %v4160_v0  ;;  %3510 = vmatprep.subr.bf16.mxu1 %v4161_v1  ;;  %s5121_s6 = sld [smem:[#allocation16_spill]]  ;;  %vm465_vm1 = vcmask 261120   ;;  %s4163_s30 = smov 96   ;;  %vm698_vm2 = vcmask 1043456   ;;  %vm650_vm3 = vcmask 64512   ;;  %vm897_vm4 = vcmask 523264  }
  0x58   :  { %3526 = vmatprep.mubr.msk.bf16.mxu1 %vm4162_vm0, %v4161_v1  ;;  %v199_v28 = vshrl.u32 %v198_v27, 7  ;;  %s5122_s27 = sld [smem:[#allocation22_spill]]  ;;  %s4164_s24 = smov 32   ;;  %vm899_vm5 = vcmask 785408  }
  0x59   :  { %s5123_s9 = sld [smem:[#allocation18_spill]] }
  0x5a   :  { %v4418_v29 = vsub.s32 0, %v199_v28  ;;  %v4420_v30 = vsub.s32 1, %v199_v28  ;;  %v208_v47 = vsub.s32 2, %v199_v28  ;;  %s5124_s29 = sld [smem:[#allocation19_spill]] }
  0x5b   :  { %s5125_s13 = sld [smem:[#allocation24_spill]] }
  0x5c   :  { %v3825_v2 = vld [vmem:[%s5120_s22 + $0xac] ss:$12 sps:$4 sm:$0xff]   ;;  %v3827_v3 = vld [vmem:[%s5120_s22 + $0xa8] ss:$12 sps:$4 sm:$0xff]   ;;  %v3830_v5 = vld [vmem:[%s5120_s22 + $0x90] ss:$12 sps:$4 sm:$0xff]  }
  0x5d   :  { %347 = vmatprep.subr.bf16.mxu0 %v3825_v2  ;;  %v3828_v4 = vld [vmem:[%s5120_s22 + $0x94] ss:$12 sps:$4 sm:$0xff]   ;;  %v3831_v6 = vld [vmem:[%s5120_s22 + $0x7c] ss:$12 sps:$4 sm:$0xff]   ;;  %v3833_v7 = vld [vmem:[%s5120_s22 + $0x78] ss:$12 sps:$4 sm:$0xff]  }
  0x5e   :  { %348 = vmatpush1.bf16.msra.mxu0 %v3827_v3  ;;  %v3834_v8 = vld [vmem:[%s5120_s22 + $0x64] ss:$12 sps:$4 sm:$0xff]   ;;  %v3836_v9 = vld [vmem:[%s5120_s22 + $0x60] ss:$12 sps:$4 sm:$0xff]   ;;  %v3839_v13 = vld [vmem:[%s5120_s22 + $0x48] ss:$12 sps:$4 sm:$0xff]  }
  0x5f   :  { %349 = vmatprep.subr.bf16.mxu0 %v3828_v4  ;;  %v3850_v10 = vld [vmem:[%s5120_s22 + $0xb0] ss:$12 sps:$4 sm:$0xff]   ;;  %v3837_v11 = vld [vmem:[%s5120_s22 + $0x4c] ss:$12 sps:$4 sm:$0xff]   ;;  %v3840_v14 = vld [vmem:[%s5120_s22 + $0x34] ss:$12 sps:$4 sm:$0xff]  }
  0x60   :  { %3511 = vmatpush3.bf16.msra.mxu1 %v3850_v10  ;;  %v3851_v12 = vld [vmem:[%s5120_s22 + $0x98] ss:$12 sps:$4 sm:$0xff]   ;;  %v3852_v15 = vld [vmem:[%s5120_s22 + $0x80] ss:$12 sps:$4 sm:$0xff]   ;;  %v3842_v16 = vld [vmem:[%s5120_s22 + $0x30] ss:$12 sps:$4 sm:$0xff]  }
  0x61   :  { %3512 = vmatprep.subr.bf16.mxu1 %v4161_v1  ;;  %v3843_v17 = vld [vmem:[%s5120_s22 + $0x1c] ss:$12 sps:$4 sm:$0xff]   ;;  %v3845_v19 = vld [vmem:[%s5120_s22 + $0x18] ss:$12 sps:$4 sm:$0xff]   ;;  %v3848_v22 = vld [vmem:[%s5120_s22] ss:$12 sps:$4 sm:$0xff]  }
  0x62   :  { %350 = vmatpush1.bf16.msra.mxu0 %v3830_v5  ;;  %v3853_v18 = vld [vmem:[%s5120_s22 + $0x68] ss:$12 sps:$4 sm:$0xff]   ;;  %v3846_v20 = vld [vmem:[%s5120_s22 + $0x4] ss:$12 sps:$4 sm:$0xff]   ;;  %v3856_v25 = vld [vmem:[%s5120_s22 + $0x20] ss:$12 sps:$4 sm:$0xff]  }
  0x63   :  { %351 = vmatprep.subr.bf16.mxu0 %v3831_v6  ;;  %v3854_v21 = vld [vmem:[%s5120_s22 + $0x50] ss:$12 sps:$4 sm:$0xff]   ;;  %v4393_v23 = vld [vmem:[%s5121_s6] sm:$0xff]   ;;  %v3857_v26 = vld [vmem:[%s5120_s22 + $0x8] ss:$12 sps:$4 sm:$0xff]   ;;  %s5127_s5 = sld [smem:[#allocation20_spill]] }
  0x64   :  { %3513 = vmatpush3.bf16.msra.mxu1 %v3851_v12  ;;  %v3855_v24 = vld [vmem:[%s5120_s22 + $0x38] ss:$12 sps:$4 sm:$0xff]   ;;  %v196_v31 = vld [vmem:[%s5122_s27] sm:$0x7]  ;;  %s5126_s22 = sld [smem:[#allocation17_spill]] }
  0x65   :  { %3514 = vmatprep.subr.bf16.mxu1 %v4161_v1  ;;  %v201_v34 = vrot.slane %v196_v31, %v4418_v29  ;;  %v205_v35 = vrot.slane %v196_v31, %v4420_v30  ;;  %v209_v48 = vrot.slane %v196_v31, %v208_v47  ;;  %v4493_v4 = vld [vmem:[%s5123_s9] sm:$0xff] }
  0x66   :  { %352 = vmatpush1.bf16.msra.mxu0 %v3833_v7  ;;  %v3262_v5 = vld [vmem:[%s5124_s29] ss:$0 sm:$0xff] }
  0x67   :  { %353 = vmatprep.subr.bf16.mxu0 %v3834_v8  ;;  %v443_v6 = vadd.f32 %v3262_v5, %v4493_v4 }
  0x68   :  { %3515 = vmatpush3.bf16.msra.mxu1 %v3852_v15 }
  0x69   :  { %3516 = vmatprep.subr.bf16.mxu1 %v4161_v1 }
  0x6a   :  { %354 = vmatpush1.bf16.msra.mxu0 %v3836_v9 }
  0x6b   :  { %355 = vmatprep.subr.bf16.mxu0 %v3837_v11 }
  0x6c   :  { %3517 = vmatpush3.bf16.msra.mxu1 %v3853_v18 }
  0x6d   :  { %3518 = vmatprep.subr.bf16.mxu1 %v4161_v1 }
  0x6e   :  { %356 = vmatpush1.bf16.msra.mxu0 %v3839_v13 }
  0x6f   :  { %357 = vmatprep.subr.bf16.mxu0 %v3840_v14 }
  0x70   :  { %3519 = vmatpush3.bf16.msra.mxu1 %v3854_v21 }
  0x71   :  { %3520 = vmatprep.subr.bf16.mxu1 %v4161_v1 }
  0x72   :  { %358 = vmatpush1.bf16.msra.mxu0 %v3842_v16 }
  0x73   :  { %359 = vmatprep.subr.bf16.mxu0 %v3843_v17 }
  0x74   :  { %3521 = vmatpush3.bf16.msra.mxu1 %v3855_v24 }
  0x75   :  { %3522 = vmatprep.subr.bf16.mxu1 %v4161_v1 }
  0x76   :  { %360 = vmatpush1.bf16.msra.mxu0 %v3845_v19 }
  0x77   :  { %361 = vmatprep.subr.bf16.mxu0 %v3846_v20 }
  0x78   :  { %3523 = vmatpush3.bf16.msra.mxu1 %v3856_v25 }
  0x79   :  { %3524 = vmatprep.subr.bf16.mxu1 %v4161_v1 }
  0x7a   :  { %362 = vmatpush1.bf16.msra.mxu0 %v3848_v22 }
  0x7b   :  { %3554 = vmatprep.subr.bf16.mxu0 %v4161_v1 }
  0x7c   :  { %3525 = vmatpush3.bf16.msra.mxu1 %v3857_v26 }
  0x7d   :  { %380 = vmatmul.mubr.bf16.vlgmr.msra.gmra.mxu0 %v4393_v23  ;;  %3530 = vmatprep.subr.bf16.mxu1 %v4161_v1 }
  0x7e   :  { %3556 = vmatprep.mubr.msk.bf16.mxu0 %vm4162_vm0, %v4161_v1 }
  0x7f   :  { %3527 = vmatmul.mubr.bf16.vlgmr.msra.gmra.mxu1 %v4393_v23 }
  0x80   :  { %3532 = vmatprep.mubr.msk.bf16.mxu1 %vm4162_vm0, %v4161_v1 }
 0x13d   :  { %v381_v32 = vpop.f32.mrf.mxu0 }
 0x13e   :  { %v382_v39 = vadd.f32 %v381_v32, %v201_v34 }
 0x13f   :  { %v383_v33 = vpop.f32.mrf.mxu0  ;;  %v424_v49 = vpop.f32.mrf.mxu1 }
 0x140   :  { %v384_v40 = vadd.f32 %v383_v33, %v205_v35  ;;  %v431_v44 = vmul.f32 0.17677669, %v382_v39  ;;  %v425_v51 = vadd.f32 %v424_v49, %v209_v48 }
 0x141   :  { %v385_v36 = vpop.f32.mrf.mxu0  ;;  %v3528_v50 = vpop.f32.mrf.mxu1 }
 0x142   :  { %v386_v37 = vadd.f32 %v385_v36, %v201_v34 }
 0x143   :  { %v387_v38 = vpop.f32.mrf.mxu0  ;;  %v427_v52 = vpop.f32.mrf.mxu1 }
 0x144   :  { %v388_v41 = vadd.f32 %v387_v38, %v205_v35  ;;  %v432_v42 = vmul.f32 0.17677669, %v386_v37  ;;  %v428_v53 = vadd.f32 %v427_v52, %v209_v48 }
 0x145   :  { %v3529_v54 = vpop.f32.mrf.mxu1 }
 0x146   :  { %v4427_v43 = vpack.c.bf16 %v388_v41, %v384_v40  ;;  %v4435_v46 = vpack.c.bf16 %v432_v42, %v431_v44  ;;  %v4450_v55 = vpack.c.bf16 %v428_v53, %v425_v51 }
 0x148   :  { %454 = vrot.lane.b32.xlu1 %v4427_v43, %s4154_s3  ;;  %452 = vrot.lane.b32.xlu0 %v4427_v43, %s4163_s30  ;;  %v470_v45 = vsel %vm465_vm1, %v4427_v43, 0  ;;  %v700_v56 = vsel %vm698_vm2, %v4450_v55, 0 }
 0x149   :  { %3531 = vmatpush3.bf16.xpose.msra.mxu1 %v470_v45  ;;  %3555 = vmatpush3.bf16.msra.mxu0 %v700_v56 }
 0x14a   :  { %3536 = vmatprep.subr.bf16.mxu1 %v4161_v1  ;;  %3566 = vmatprep.subr.bf16.mxu0 %v4161_v1 }
 0x14c   :  { %447 = vrot.lane.b32.xlu1 %v4435_v46, %s4154_s3  ;;  %445 = vrot.lane.b32.xlu0 %v4435_v46, %s4163_s30 }
 0x150   :  { %449 = vrot.lane.b32.xlu1 %v4435_v46, %s4164_s24  ;;  %456 = vrot.lane.b32.xlu0 %v4427_v43, %s4164_s24 }
 0x151   :  { %3533 = vmatmul.mubr.msk.bf16.vlgmr.msra.gmra.mxu1 %vm465_vm1, %v4435_v46 }
 0x152   :  { %3538 = vmatprep.mubr.msk.bf16.mxu1 %vm4162_vm0, %v4161_v1 }
 0x154   :  { %459 = vrot.lane.b32.xlu1 %v4450_v55, %s4163_s30 }
 0x1ba   :  { %v4457_v57 = vpop.permute.xlu0 %452  ;;  %v4462_v59 = vpop.permute.xlu1 %454 }
 0x1bb   :  { %v516_v58 = vsel %vm465_vm1, %v4457_v57, 0  ;;  %v562_v61 = vsel %vm465_vm1, %v4462_v59, 0 }
 0x1bc   :  { %3537 = vmatpush3.bf16.xpose.msra.mxu1 %v516_v58 }
 0x1bd   :  { %3542 = vmatprep.subr.bf16.mxu1 %v4161_v1 }
 0x1be   :  { %v4464_v60 = vpop.permute.xlu0 %445  ;;  %v4475_v63 = vpop.permute.xlu1 %447 }
 0x1c2   :  { %v4473_v62 = vpop.permute.xlu0 %456  ;;  %v4484_v3 = vpop.permute.xlu1 %449 }
 0x1c3   :  { %3539 = vmatmul.mubr.msk.bf16.vlgmr.msra.gmra.mxu1 %vm465_vm1, %v4464_v60  ;;  %v608_v2 = vsel %vm465_vm1, %v4473_v62, 0 }
 0x1c4   :  { %3543 = vmatpush3.bf16.xpose.msra.mxu1 %v562_v61  ;;  %3544 = vmatprep.mubr.msk.bf16.mxu1 %vm4162_vm0, %v4161_v1 }
 0x1c5   :  { %3548 = vmatprep.subr.bf16.mxu1 %v4161_v1 }
 0x1c6   :  { %v4500_v13 = vpop.permute.xlu1 %459 }
 0x1c7   :  { %v746_v14 = vsel %vm698_vm2, %v4500_v13, 0 }
 0x1cb   :  { %3545 = vmatmul.mubr.msk.bf16.vlgmr.msra.gmra.mxu1 %vm465_vm1, %v4475_v63 }
 0x1cc   :  { %3549 = vmatpush3.bf16.xpose.msra.mxu1 %v608_v2  ;;  %3550 = vmatprep.mubr.msk.bf16.mxu1 %vm4162_vm0, %v4161_v1  ;;  %v911_v2 = vrot.slane %v4427_v43, 4 }
 0x1cd   :  { %3560 = vmatprep.subr.bf16.mxu1 %v4161_v1 }
 0x1d3   :  { %3551 = vmatmul.mubr.msk.bf16.vlgmr.msra.gmra.mxu1 %vm465_vm1, %v4484_v3 }
 0x1d4   :  { %3562 = vmatprep.mubr.msk.bf16.mxu1 %vm4162_vm0, %v4161_v1  ;;  %3561 = vmatpush3.bf16.msra.mxu1 %v746_v14 }
 0x1d5   :  { %3572 = vmatprep.subr.bf16.mxu1 %v4161_v1 }
 0x211   :  { %v506_v7 = vpop.f32.mrf.mxu1 }
 0x212   :  { %v507_v8 = vadd.f32 %v506_v7, %v443_v6  ;;  %v916_v7 = vsel %vm465_vm1, %v911_v2, 0 }
 0x213   :  { %v3534_v9 = vpop.f32.mrf.mxu1 }
 0x214   :  { %v651_v10 = vsel %vm650_vm3, %v507_v8, -inf  ;;  %v959_v9 = vrot.slane %v4457_v57, 4  ;;  %v1146_v57 = vrot.slane %v4450_v55, 4 }
 0x215   :  { %652 = vmax.xlane.f32.xlu0 %v651_v10  ;;  %v509_v11 = vpop.f32.mrf.mxu1 }
 0x216   :  { %v910_v11 = vrot.slane %v4435_v46, 4  ;;  %v1055_v46 = vrot.slane %v4473_v62, 4 }
 0x217   :  { %v3535_v12 = vpop.f32.mrf.mxu1 }
 0x218   :  { %v964_v12 = vsel %vm465_vm1, %v959_v9, 0 }
 0x283   :  { %v552_v15 = vpop.f32.mrf.mxu1 }
 0x284   :  { %v553_v16 = vadd.f32 %v552_v15, %v443_v6  ;;  %v958_v15 = vrot.slane %v4464_v60, 4  ;;  %v1054_v60 = vrot.slane %v4484_v3, 4 }
 0x285   :  { %v3540_v17 = vpop.f32.mrf.mxu1 }
 0x286   :  { %v654_v18 = vsel %vm650_vm3, %v553_v16, -inf  ;;  %v1151_v17 = vsel %vm698_vm2, %v1146_v57, 0 }
 0x287   :  { %655 = vmax.xlane.f32.xlu1 %v654_v18  ;;  %v555_v19 = vpop.f32.mrf.mxu1 }
 0x289   :  { %v3541_v20 = vpop.f32.mrf.mxu1 }
 0x28b   :  { %v598_v21 = vpop.f32.mrf.mxu1 }
 0x28c   :  { %v599_v22 = vadd.f32 %v598_v21, %v443_v6 }
 0x28d   :  { %v3546_v24 = vpop.f32.mrf.mxu1 }
 0x28e   :  { %v657_v25 = vsel %vm650_vm3, %v599_v22, -inf }
 0x28f   :  { %658 = vmax.xlane.f32.xlu0 %v657_v25  ;;  %v601_v26 = vpop.f32.mrf.mxu1 }
 0x290   :  { %v3272_v26 = vld [vmem:[%s5124_s29 + $0x1] ss:$0 sm:$0xff] }
 0x291   :  { %v3547_v27 = vpop.f32.mrf.mxu1 }
 0x293   :  { %v644_v28 = vpop.f32.mrf.mxu1 }
 0x294   :  { %v645_v31 = vadd.f32 %v644_v28, %v443_v6  ;;  %v909_v28 = vadd.f32 %v3272_v26, %v4493_v4 }
 0x295   :  { %v3552_v32 = vpop.f32.mrf.mxu1 }
 0x296   :  { %v660_v33 = vsel %vm650_vm3, %v645_v31, -inf }
 0x297   :  { %661 = vmax.xlane.f32.xlu0 %v660_v33  ;;  %v647_v34 = vpop.f32.mrf.mxu1 }
 0x298   :  { %463 = vrot.lane.b32.xlu1 %v4450_v55, %s4164_s24 }
 0x299   :  { %v3553_v35 = vpop.f32.mrf.mxu1 }
 0x29e   :  { %v653_v36 = vpop.xlane.xlu0 %652 }
 0x29f   :  { %v663_v37 = vsub.f32 %v507_v8, %v653_v36  ;;  %v1007_v8 = vrot.slane %v4462_v59, 4  ;;  %v1006_v59 = vrot.slane %v4475_v63, 4 }
 0x2a1   :  { %v667_v38 = vmul.f32 1.442695, %v663_v37  ;;  %v1012_v14 = vsel %vm465_vm1, %v1007_v8, 0 }
 0x2a3   :  { %3948 = vpow2.f32 %v667_v38 }
 0x2ad   :  { %461 = vrot.lane.b32.xlu0 %v4450_v55, %s4154_s3  ;;  %v1193_v55 = vrot.slane %v4500_v13, 4 }
 0x2af   :  { %v1198_v62 = vsel %vm698_vm2, %v1193_v55, 0 }
 0x2b0   :  { %v4512_v39 = vpop.eup %3948 }
 0x2b1   :  { %v691_v40 = vpack.c.bf16 %v4512_v39, %v4512_v39  ;;  %v675_v57 = vsel %vm650_vm3, %v4512_v39, 0.0 }
 0x2b3   :  { %3557 = vmatmul.mubr.msk.bf16.vlgmr.msra.gmra.mxu0 %vm650_vm3, %v691_v40 }
 0x2b4   :  { %3568 = vmatprep.mubr.msk.bf16.mxu0 %vm4162_vm0, %v4161_v1 }
 0x310   :  { %v656_v41 = vpop.xlane.xlu1 %655 }
 0x311   :  { %v664_v42 = vsub.f32 %v553_v16, %v656_v41  ;;  %v1060_v16 = vsel %vm465_vm1, %v1055_v46, 0 }
 0x313   :  { %v669_v44 = vmul.f32 1.442695, %v664_v42 }
 0x314   :  { %v4521_v52 = vpop.permute.xlu1 %463 }
 0x315   :  { %3950 = vpow2.f32 %v669_v44  ;;  %v838_v58 = vsel %vm698_vm2, %v4521_v52, 0 }
 0x318   :  { %v659_v45 = vpop.xlane.xlu0 %658 }
 0x319   :  { %v665_v47 = vsub.f32 %v599_v22, %v659_v45 }
 0x31b   :  { %v671_v48 = vmul.f32 1.442695, %v665_v47 }
 0x31d   :  { %3952 = vpow2.f32 %v671_v48 }
 0x320   :  { %v662_v49 = vpop.xlane.xlu0 %661 }
 0x321   :  { %v666_v50 = vsub.f32 %v645_v31, %v662_v49 }
 0x322   :  { %v4519_v51 = vpop.eup %3950 }
 0x323   :  { %v673_v53 = vmul.f32 1.442695, %v666_v50  ;;  %v692_v54 = vpack.c.bf16 %v4519_v51, %v4519_v51  ;;  %v678_v9 = vsel %vm650_vm3, %v4519_v51, 0.0 }
 0x324   :  { %v4525_v56 = vpop.permute.xlu0 %461 }
 0x325   :  { %3954 = vpow2.f32 %v673_v53  ;;  %v792_v61 = vsel %vm698_vm2, %v4525_v56, 0  ;;  %3563 = vmatmul.mubr.msk.bf16.vlgmr.msra.gmra.mxu1 %vm650_vm3, %v692_v54 }
 0x326   :  { %3573 = vmatpush3.bf16.msra.mxu1 %v838_v58  ;;  %3567 = vmatpush3.bf16.msra.mxu0 %v792_v61 }
 0x327   :  { %3578 = vmatprep.subr.bf16.mxu0 %v4161_v1  ;;  %3574 = vmatprep.mubr.msk.bf16.mxu1 %vm4162_vm0, %v4161_v1 }
 0x328   :  { %3584 = vmatprep.subr.bf16.mxu1 %v4161_v1 }
 0x32a   :  { %v4537_v5 = vpop.eup %3952 }
 0x32b   :  { %v693_v6 = vpack.c.bf16 %v4537_v5, %v4537_v5 }
 0x32d   :  { %3569 = vmatmul.mubr.msk.bf16.vlgmr.msra.gmra.mxu0 %vm650_vm3, %v693_v6 }
 0x32e   :  { %3579 = vmatpush3.bf16.xpose.msra.mxu0 %v916_v7  ;;  %3580 = vmatprep.mubr.msk.bf16.mxu0 %vm4162_vm0, %v4161_v1 }
 0x32f   :  { %3590 = vmatprep.subr.bf16.mxu0 %v4161_v1 }
 0x332   :  { %v4548_v43 = vpop.eup %3954 }
 0x333   :  { %v694_v10 = vpack.c.bf16 %v4548_v43, %v4548_v43  ;;  %v684_v46 = vsel %vm650_vm3, %v4548_v43, 0.0 }
 0x335   :  { %3575 = vmatmul.mubr.msk.bf16.vlgmr.msra.gmra.mxu1 %vm650_vm3, %v694_v10  ;;  %3581 = vmatmul.mubr.msk.bf16.vlgmr.msra.gmra.mxu0 %vm465_vm1, %v910_v11 }
 0x336   :  { %3585 = vmatpush3.bf16.xpose.msra.mxu1 %v964_v12  ;;  %3591 = vmatpush3.bf16.xpose.msra.mxu0 %v1012_v14  ;;  %v681_v14 = vsel %vm650_vm3, %v4537_v5, 0.0 }
 0x337   :  { %3586 = vmatprep.mubr.msk.bf16.mxu1 %vm4162_vm0, %v4161_v1  ;;  %3592 = vmatprep.mubr.msk.bf16.mxu0 %vm4162_vm0, %v4161_v1 }
 0x338   :  { %3596 = vmatprep.subr.bf16.mxu1 %v4161_v1  ;;  %3602 = vmatprep.subr.bf16.mxu0 %v4161_v1 }
 0x33d   :  { %3587 = vmatmul.mubr.msk.bf16.vlgmr.msra.gmra.mxu1 %vm465_vm1, %v958_v15  ;;  %3593 = vmatmul.mubr.msk.bf16.vlgmr.msra.gmra.mxu0 %vm465_vm1, %v1006_v59 }
 0x33e   :  { %3597 = vmatpush3.bf16.xpose.msra.mxu1 %v1060_v16  ;;  %3603 = vmatpush3.bf16.msra.mxu0 %v1151_v17 }
 0x33f   :  { %3598 = vmatprep.mubr.msk.bf16.mxu1 %vm4162_vm0, %v4161_v1  ;;  %3608 = vmatprep.subr.bf16.mxu1 %v4161_v1 }
 0x340   :  { %3604 = vmatprep.mubr.msk.bf16.mxu0 %vm4162_vm0, %v4161_v1  ;;  %3614 = vmatprep.subr.bf16.mxu0 %v4161_v1 }
 0x345   :  { %3599 = vmatmul.mubr.msk.bf16.vlgmr.msra.gmra.mxu1 %vm465_vm1, %v1054_v60 }
 0x346   :  { %3609 = vmatpush3.bf16.msra.mxu1 %v1198_v62  ;;  %3610 = vmatprep.mubr.msk.bf16.mxu1 %vm4162_vm0, %v4161_v1 }
 0x347   :  { %3620 = vmatprep.subr.bf16.mxu1 %v4161_v1 }
 0x373   :  { %v4584_v63 = vpop.f32.mrf.mxu0 }
 0x375   :  { %v3558_v18 = vpop.f32.mrf.mxu0 }
 0x377   :  { %v739_v19 = vpop.f32.mrf.mxu0 }
 0x378   :  { %v1240_v19 = vrot.slane %v4525_v56, 4 }
 0x379   :  { %v3559_v20 = vpop.f32.mrf.mxu0 }
 0x3e5   :  { %v4586_v21 = vpop.f32.mrf.mxu1 }
 0x3e7   :  { %v3564_v13 = vpop.f32.mrf.mxu1 }
 0x3e9   :  { %v785_v22 = vpop.f32.mrf.mxu1 }
 0x3ea   :  { %v1245_v22 = vsel %vm698_vm2, %v1240_v19, 0 }
 0x3eb   :  { %v3565_v3 = vpop.f32.mrf.mxu1 }
 0x3ec   :  { %v1287_v3 = vrot.slane %v4521_v52, 4 }
 0x3ed   :  { %v4588_v24 = vpop.f32.mrf.mxu0 }
 0x3ef   :  { %v3570_v25 = vpop.f32.mrf.mxu0 }
 0x3f1   :  { %v831_v27 = vpop.f32.mrf.mxu0 }
 0x3f2   :  { %v1292_v27 = vsel %vm698_vm2, %v1287_v3, 0 }
 0x3f3   :  { %v3571_v31 = vpop.f32.mrf.mxu0 }
 0x3f5   :  { %v4594_v32 = vpop.f32.mrf.mxu1  ;;  %v952_v33 = vpop.f32.mrf.mxu0 }
 0x3f6   :  { %v953_v34 = vadd.f32 %v952_v33, %v909_v28 }
 0x3f7   :  { %v3576_v35 = vpop.f32.mrf.mxu1  ;;  %v3582_v36 = vpop.f32.mrf.mxu0 }
 0x3f8   :  { %v1102_v37 = vsel %vm650_vm3, %v953_v34, -inf }
 0x3f9   :  { %1103 = vmax.xlane.f32.xlu1 %v1102_v37  ;;  %v877_v38 = vpop.f32.mrf.mxu1  ;;  %v955_v40 = vpop.f32.mrf.mxu0  ;;  %v3858_v37 = vld [vmem:[#allocation2 + $0x38] sm:$0xff]  }
 0x3fa   :  { %v3859_v38 = vld [vmem:[#allocation2 + $0x30] sm:$0xff]   ;;  %v3860_v40 = vld [vmem:[#allocation2 + $0x28] sm:$0xff]  }
 0x3fb   :  { %v3577_v41 = vpop.f32.mrf.mxu1  ;;  %v3583_v42 = vpop.f32.mrf.mxu0 }
 0x3fc   :  { %v3861_v41 = vld [vmem:[#allocation2 + $0x20] sm:$0xff]   ;;  %v3862_v42 = vld [vmem:[#allocation2 + $0x18] sm:$0xff]  }
 0x3fd   :  { %v1000_v44 = vpop.f32.mrf.mxu1  ;;  %v1048_v45 = vpop.f32.mrf.mxu0 }
 0x3fe   :  { %v1001_v47 = vadd.f32 %v1000_v44, %v909_v28  ;;  %v1049_v4 = vadd.f32 %v1048_v45, %v909_v28 }
 0x3ff   :  { %v3588_v48 = vpop.f32.mrf.mxu1  ;;  %v3594_v49 = vpop.f32.mrf.mxu0 }
 0x400   :  { %v1105_v50 = vsel %vm650_vm3, %v1001_v47, -inf  ;;  %v1108_v2 = vsel %vm650_vm3, %v1049_v4, -inf }
 0x401   :  { %v1051_v53 = vpop.f32.mrf.mxu0  ;;  %1106 = vmax.xlane.f32.xlu0 %v1105_v50  ;;  %v1003_v54 = vpop.f32.mrf.mxu1 }
 0x402   :  { %v3863_v53 = vld [vmem:[#allocation2 + $0x10] sm:$0xff]  }
 0x403   :  { %v3589_v58 = vpop.f32.mrf.mxu1  ;;  %v3595_v61 = vpop.f32.mrf.mxu0 }
 0x404   :  { %v3864_v61 = vld [vmem:[#allocation2 + $0x8] sm:$0xff]  }
 0x405   :  { %1109 = vmax.xlane.f32.xlu0 %v1108_v2  ;;  %v1096_v6 = vpop.f32.mrf.mxu1 }
 0x406   :  { %v1097_v7 = vadd.f32 %v1096_v6, %v909_v28 }
 0x407   :  { %v3600_v8 = vpop.f32.mrf.mxu1 }
 0x408   :  { %v1111_v10 = vsel %vm650_vm3, %v1097_v7, -inf }
 0x409   :  { %679 = vadd.xlane.f32.xlu0 %v678_v9  ;;  %1112 = vmax.xlane.f32.xlu1 %v1111_v10  ;;  %v1099_v11 = vpop.f32.mrf.mxu1 }
 0x40a   :  { %v3865_v11 = vld [vmem:[#allocation2] sm:$0xff]  }
 0x40b   :  { %v3601_v12 = vpop.f32.mrf.mxu1 }
 0x40d   :  { %682 = vadd.xlane.f32.xlu0 %v681_v14 }
 0x411   :  { %685 = vadd.xlane.f32.xlu0 %v684_v46 }
 0x415   :  { %676 = vadd.xlane.f32.xlu0 %v675_v57 }
 0x482   :  { %v1104_v59 = vpop.xlane.xlu1 %1103 }
 0x483   :  { %v1114_v51 = vsub.f32 %v953_v34, %v1104_v59 }
 0x485   :  { %v1118_v15 = vmul.f32 1.442695, %v1114_v51 }
 0x487   :  { %3956 = vpow2.f32 %v1118_v15 }
 0x48a   :  { %v1107_v16 = vpop.xlane.xlu0 %1106 }
 0x48b   :  { %v1115_v17 = vsub.f32 %v1001_v47, %v1107_v16 }
 0x48d   :  { %v1120_v55 = vmul.f32 1.442695, %v1115_v17 }
 0x48e   :  { %v1110_v60 = vpop.xlane.xlu0 %1109 }
 0x48f   :  { %3958 = vpow2.f32 %v1120_v55  ;;  %v1116_v62 = vsub.f32 %v1049_v4, %v1110_v60 }
 0x491   :  { %v1122_v5 = vmul.f32 1.442695, %v1116_v62 }
 0x492   :  { %v1113_v18 = vpop.xlane.xlu1 %1112  ;;  %v680_v44 = vpop.xlane.xlu0 %679 }
 0x493   :  { %3960 = vpow2.f32 %v1122_v5  ;;  %v1117_v43 = vsub.f32 %v1097_v7, %v1113_v18 }
 0x494   :  { %v3957_v20 = vpop.eup %3956 }
 0x495   :  { %v1124_v13 = vmul.f32 1.442695, %v1117_v43  ;;  %v1142_v39 = vpack.c.bf16 %v3957_v20, %v3957_v20  ;;  %v1126_v36 = vsel %vm650_vm3, %v3957_v20, 0.0 }
 0x496   :  { %v683_v47 = vpop.xlane.xlu0 %682 }
 0x497   :  { %3962 = vpow2.f32 %v1124_v13  ;;  %3605 = vmatmul.mubr.msk.bf16.vlgmr.msra.gmra.mxu0 %vm650_vm3, %v1142_v39 }
 0x498   :  { %3615 = vmatpush3.bf16.msra.mxu0 %v1245_v22  ;;  %3616 = vmatprep.mubr.msk.bf16.mxu0 %vm4162_vm0, %v4161_v1  ;;  %3964 = vrcp.f32 %v680_v44 }
 0x499   :  { %3626 = vmatprep.subr.bf16.mxu0 %v4161_v1 }
 0x49a   :  { %v686_v49 = vpop.xlane.xlu0 %685 }
 0x49c   :  { %v3959_v25 = vpop.eup %3958 }
 0x49d   :  { %v1129_v56 = vsel %vm650_vm3, %v3959_v25, 0.0  ;;  %v1143_v26 = vpack.c.bf16 %v3959_v25, %v3959_v25 }
 0x49e   :  { %1130 = vadd.xlane.f32.xlu1 %v1129_v56 }
 0x49f   :  { %3611 = vmatmul.mubr.msk.bf16.vlgmr.msra.gmra.mxu1 %vm650_vm3, %v1143_v26 }
 0x4a0   :  { %v3961_v28 = vpop.eup %3960  ;;  %3621 = vmatpush3.bf16.msra.mxu1 %v1292_v27  ;;  %3622 = vmatprep.mubr.msk.bf16.mxu1 %vm4162_vm0, %v4161_v1 }
 0x4a1   :  { %v1132_v31 = vsel %vm650_vm3, %v3961_v28, 0.0  ;;  %v1144_v33 = vpack.c.bf16 %v3961_v28, %v3961_v28  ;;  %3646 = vmatprep.subr.bf16.mxu1 %v4161_v1 }
 0x4a2   :  { %1133 = vadd.xlane.f32.xlu1 %v1132_v31 }
 0x4a3   :  { %3617 = vmatmul.mubr.msk.bf16.vlgmr.msra.gmra.mxu0 %vm650_vm3, %v1144_v33 }
 0x4a4   :  { %v3963_v52 = vpop.eup %3962  ;;  %3642 = vmatprep.mubr.msk.bf16.mxu0 %vm4162_vm0, %v4161_v1  ;;  %3627 = vmatpush3.bf16.msra.mxu0 %v3858_v37 }
 0x4a5   :  { %v1135_v34 = vsel %vm650_vm3, %v3963_v52, 0.0  ;;  %v1145_v35 = vpack.c.bf16 %v3963_v52, %v3963_v52  ;;  %3628 = vmatprep.subr.bf16.mxu0 %v4161_v1  ;;  %v3965_v2 = vpop.eup %3964 }
 0x4a6   :  { %1136 = vadd.xlane.f32.xlu1 %v1135_v34  ;;  %v881_v9 = vmul.f32 %v3965_v2, %v4586_v21 }
 0x4a7   :  { %3623 = vmatmul.mubr.msk.bf16.vlgmr.msra.gmra.mxu1 %vm650_vm3, %v1145_v35 }
 0x4a8   :  { %3662 = vmatprep.mubr.msk.bf16.mxu1 %vm4162_vm0, %v4161_v1  ;;  %3629 = vmatpush3.bf16.msra.mxu0 %v3859_v38 }
 0x4a9   :  { %3630 = vmatprep.subr.bf16.mxu0 %v4161_v1 }
 0x4aa   :  { %1127 = vadd.xlane.f32.xlu1 %v1126_v36 }
 0x4ac   :  { %3631 = vmatpush3.bf16.msra.mxu0 %v3860_v40 }
 0x4ad   :  { %3632 = vmatprep.subr.bf16.mxu0 %v4161_v1 }
 0x4b0   :  { %3633 = vmatpush3.bf16.msra.mxu0 %v3861_v41 }
 0x4b1   :  { %3634 = vmatprep.subr.bf16.mxu0 %v4161_v1 }
 0x4b4   :  { %3635 = vmatpush3.bf16.msra.mxu0 %v3862_v42 }
 0x4b5   :  { %3636 = vmatprep.subr.bf16.mxu0 %v4161_v1 }
 0x4b8   :  { %3637 = vmatpush3.bf16.msra.mxu0 %v3863_v53 }
 0x4b9   :  { %3638 = vmatprep.subr.bf16.mxu0 %v4161_v1 }
 0x4bc   :  { %3639 = vmatpush3.bf16.msra.mxu0 %v3864_v61 }
 0x4bd   :  { %3640 = vmatprep.subr.bf16.mxu0 %v4161_v1 }
 0x4c0   :  { %3641 = vmatpush3.bf16.msra.mxu0 %v3865_v11  ;;  %v3869_v11 = vld [vmem:[%s5090_s11 + $0x60] ss:$8 sps:$4 sm:$0xff]  }
 0x527   :  { %v1131_v45 = vpop.xlane.xlu1 %1130 }
 0x528   :  { %3966 = vrcp.f32 %v1131_v45 }
 0x529   :  { %3968 = vrcp.f32 %v683_v47 }
 0x52b   :  { %v1134_v48 = vpop.xlane.xlu1 %1133 }
 0x52c   :  { %3970 = vrcp.f32 %v1134_v48 }
 0x52d   :  { %3972 = vrcp.f32 %v686_v49  ;;  %v161_v49 = vunpack.c.l.bf16 %v4393_v23 }
 0x52f   :  { %v1137_v4 = vpop.xlane.xlu1 %1136 }
 0x530   :  { %3974 = vrcp.f32 %v1137_v4 }
 0x533   :  { %v1128_v25 = vpop.xlane.xlu1 %1127 }
 0x535   :  { %v3967_v7 = vpop.eup %3966 }
 0x536   :  { %v3969_v12 = vpop.eup %3968 }
 0x537   :  { %v882_v16 = vmul.f32 %v3969_v12, %v4588_v24  ;;  %v677_v24 = vpop.xlane.xlu0 %676  ;;  %v3874_v12 = vld [vmem:[%s5090_s11 + $0x54] ss:$8 sps:$4 sm:$0xff]  }
 0x538   :  { %3976 = vrcp.f32 %v677_v24  ;;  %v3891_v24 = vld [vmem:[%s5090_s11] ss:$8 sps:$4 sm:$0xff]  }
 0x539   :  { %v3971_v57 = vpop.eup %3970  ;;  %3978 = vrcp.f32 %v1128_v25  ;;  %v3894_v25 = vld [vmem:[#allocation4 + $0x18] sm:$0xff]  }
 0x53a   :  { %v3973_v17 = vpop.eup %3972 }
 0x53b   :  { %v883_v19 = vmul.f32 %v3973_v17, %v4594_v32 }
 0x53d   :  { %v3975_v5 = vpop.eup %3974 }
 0x545   :  { %v3977_v26 = vpop.eup %3976 }
 0x546   :  { %v3979_v32 = vpop.eup %3978  ;;  %v880_v35 = vmul.f32 %v3977_v26, %v4584_v63  ;;  %v3281_v63 = vld [vmem:[%s5125_s13] ss:$0 sm:$0xff]  ;;  %v3896_v26 = vld [vmem:[#allocation4 + $0x10] sm:$0xff]  }
 0x557   :  { %v1187_v50 = vpop.f32.mrf.mxu0 }
 0x558   :  { %v1334_v34 = vmul.f32 %v3979_v32, %v1187_v50 }
 0x559   :  { %v3606_v54 = vpop.f32.mrf.mxu0 }
 0x55b   :  { %v1190_v58 = vpop.f32.mrf.mxu0 }
 0x55c   :  { %v162_v58 = vunpack.c.h.bf16 %v4393_v23  ;;  %v3878_v23 = vld [vmem:[#allocation4 + $0x38] sm:$0xff]  }
 0x55d   :  { %v3607_v6 = vpop.f32.mrf.mxu0  ;;  %3647 = vmatpush3.bf16.msra.mxu1 %v3878_v23 }
 0x55e   :  { %3648 = vmatprep.subr.bf16.mxu1 %v4161_v1 }
 0x55f   :  { %v1234_v8 = vpop.f32.mrf.mxu1 }
 0x560   :  { %v1335_v10 = vmul.f32 %v3967_v7, %v1234_v8  ;;  %v3866_v8 = vld [vmem:[%s5090_s11 + $0x70] ss:$8 sps:$4 sm:$0xff]  }
 0x561   :  { %v3612_v14 = vpop.f32.mrf.mxu1 }
 0x562   :  { %v3795_v46 = vpack.i.bf16 %v1335_v10, %v881_v9  ;;  %v3868_v9 = vld [vmem:[%s5090_s11 + $0x74] ss:$8 sps:$4 sm:$0xff]   ;;  %v3871_v10 = vld [vmem:[%s5090_s11 + $0x64] ss:$8 sps:$4 sm:$0xff]   ;;  %v3872_v14 = vld [vmem:[%s5090_s11 + $0x50] ss:$8 sps:$4 sm:$0xff]  }
 0x563   :  { %v1237_v59 = vpop.f32.mrf.mxu1  ;;  %v1281_v51 = vpop.f32.mrf.mxu0  ;;  %1739 = vmatprep.subr.bf16.mxu0 %v3868_v9 }
 0x564   :  { %v1336_v15 = vmul.f32 %v3971_v57, %v1281_v51  ;;  %3796 = vrot.lane.b32.xlu0 %v3795_v46, %s4164_s24  ;;  %v3877_v46 = vld [vmem:[%s5090_s11 + $0x44] ss:$8 sps:$4 sm:$0xff]   ;;  %v3875_v57 = vld [vmem:[%s5090_s11 + $0x40] ss:$8 sps:$4 sm:$0xff]  }
 0x565   :  { %v3613_v55 = vpop.f32.mrf.mxu1  ;;  %v3618_v60 = vpop.f32.mrf.mxu0 }
 0x566   :  { %v3800_v62 = vpack.i.bf16 %v1336_v15, %v882_v16 }
 0x567   :  { %v1284_v21 = vpop.f32.mrf.mxu0  ;;  %v1328_v18 = vpop.f32.mrf.mxu1 }
 0x568   :  { %v1337_v43 = vmul.f32 %v3975_v5, %v1328_v18  ;;  %3801 = vrot.lane.b32.xlu1 %v3800_v62, %s4154_s3  ;;  %v3881_v5 = vld [vmem:[%s5090_s11 + $0x34] ss:$8 sps:$4 sm:$0xff]   ;;  %v3879_v21 = vld [vmem:[%s5090_s11 + $0x30] ss:$8 sps:$4 sm:$0xff]  }
 0x569   :  { %v3619_v20 = vpop.f32.mrf.mxu0  ;;  %v3624_v13 = vpop.f32.mrf.mxu1  ;;  %v3882_v18 = vld [vmem:[#allocation4 + $0x30] sm:$0xff]  }
 0x56a   :  { %v3805_v39 = vpack.i.bf16 %v1337_v43, %v883_v19  ;;  %v3885_v19 = vld [vmem:[%s5090_s11 + $0x24] ss:$8 sps:$4 sm:$0xff]   ;;  %3649 = vmatpush3.bf16.msra.mxu1 %v3882_v18  ;;  %v3883_v43 = vld [vmem:[%s5090_s11 + $0x20] ss:$8 sps:$4 sm:$0xff]   ;;  %v3889_v13 = vld [vmem:[%s5090_s11 + $0x14] ss:$8 sps:$4 sm:$0xff]  }
 0x56b   :  { %v1331_v22 = vpop.f32.mrf.mxu1  ;;  %3650 = vmatprep.subr.bf16.mxu1 %v4161_v1  ;;  %v3886_v20 = vld [vmem:[#allocation4 + $0x28] sm:$0xff]  }
 0x56c   :  { %3806 = vrot.lane.b32.xlu1 %v3805_v39, %s4163_s30  ;;  %v3887_v39 = vld [vmem:[%s5090_s11 + $0x10] ss:$8 sps:$4 sm:$0xff]   ;;  %v3890_v22 = vld [vmem:[#allocation4 + $0x20] sm:$0xff]  }
 0x56d   :  { %v3625_v3 = vpop.f32.mrf.mxu1 }
 0x56e   :  { %3651 = vmatpush3.bf16.msra.mxu1 %v3886_v20  ;;  %v3893_v3 = vld [vmem:[%s5090_s11 + $0x4] ss:$8 sps:$4 sm:$0xff]  }
 0x56f   :  { %3652 = vmatprep.subr.bf16.mxu1 %v4161_v1 }
 0x572   :  { %3653 = vmatpush3.bf16.msra.mxu1 %v3890_v22 }
 0x573   :  { %3654 = vmatprep.subr.bf16.mxu1 %v4161_v1 }
 0x576   :  { %3655 = vmatpush3.bf16.msra.mxu1 %v3894_v25 }
 0x577   :  { %3656 = vmatprep.subr.bf16.mxu1 %v4161_v1 }
 0x57a   :  { %3657 = vmatpush3.bf16.msra.mxu1 %v3896_v26 }
 0x57b   :  { %3658 = vmatprep.subr.bf16.mxu1 %v4161_v1 }
 0x5d6   :  { %v3797_v56 = vpop.permute.xlu0 %3796 }
 0x5d7   :  { %v3799_v28 = vunpack.i.h.bf16 %v3797_v56  ;;  %v3798_v31 = vunpack.i.l.bf16 %v3797_v56  ;;  %v3895_v56 = vld [vmem:[%s5126_s22] sm:$0xff]  }
 0x5d9   :  { %v1350_v37 = vsel %vm465_vm1, %v1334_v34, %v3799_v28  ;;  %v896_v38 = vsel %vm465_vm1, %v880_v35, %v3798_v31  ;;  %v3898_v28 = vld [vmem:[#allocation4] sm:$0xff]  }
 0x5da   :  { %v3802_v27 = vpop.permute.xlu1 %3801 }
 0x5db   :  { %v3804_v33 = vunpack.i.h.bf16 %v3802_v27  ;;  %v3803_v52 = vunpack.i.l.bf16 %v3802_v27  ;;  %v3897_v27 = vld [vmem:[#allocation4 + $0x8] sm:$0xff]  }
 0x5dc   :  { %3659 = vmatpush3.bf16.msra.mxu1 %v3897_v27 }
 0x5dd   :  { %v898_v42 = vsel %vm897_vm4, %v896_v38, %v3803_v52  ;;  %v1351_v44 = vsel %vm897_vm4, %v1350_v37, %v3804_v33  ;;  %3660 = vmatprep.subr.bf16.mxu1 %v4161_v1  ;;  %v3290_v38 = vld [vmem:[%s5098_s19] ss:$0 sm:$0xff] }
 0x5de   :  { %v3807_v36 = vpop.permute.xlu1 %3806 }
 0x5df   :  { %v3809_v40 = vunpack.i.h.bf16 %v3807_v36  ;;  %v3808_v41 = vunpack.i.l.bf16 %v3807_v36 }
 0x5e0   :  { %3661 = vmatpush3.bf16.msra.mxu1 %v3898_v28 }
 0x5e1   :  { %v1352_v45 = vsel %vm899_vm5, %v1351_v44, %v3809_v40  ;;  %v900_v47 = vsel %vm899_vm5, %v898_v42, %v3808_v41  ;;  %3666 = vmatprep.subr.bf16.mxu1 %v4161_v1  ;;  %v3291_v44 = vld [vmem:[%s5099_s20] ss:$0 sm:$0xff] }
 0x5e2   :  { %v1353_v48 = vpack.c.bf16 %v1352_v45, %v900_v47 }
 0x5e4   :  { %3643 = vmatmul.mubr.bf16.vlgmr.msra.gmra.mxu0 %v1353_v48 }
 0x5e5   :  { %1771 = vmatprep.mubr.bf16.mxu0 %v4160_v0  ;;  %1740 = vmatpush1.bf16.msra.mxu0 %v3866_v8 }
 0x5e6   :  { %1741 = vmatprep.subr.bf16.mxu0 %v3871_v10 }
 0x5e9   :  { %1742 = vmatpush1.bf16.msra.mxu0 %v3869_v11 }
 0x5ea   :  { %1743 = vmatprep.subr.bf16.mxu0 %v3874_v12  ;;  %v3292_v12 = vld [vmem:[%s5089_s10] ss:$0 sm:$0xff] }
 0x5ed   :  { %1744 = vmatpush1.bf16.msra.mxu0 %v3872_v14 }
 0x5ee   :  { %1745 = vmatprep.subr.bf16.mxu0 %v3877_v46 }
 0x5f1   :  { %1746 = vmatpush1.bf16.msra.mxu0 %v3875_v57 }
 0x5f2   :  { %1747 = vmatprep.subr.bf16.mxu0 %v3881_v5 }
 0x5f5   :  { %1748 = vmatpush1.bf16.msra.mxu0 %v3879_v21 }
 0x5f6   :  { %1749 = vmatprep.subr.bf16.mxu0 %v3885_v19 }
 0x5f9   :  { %1750 = vmatpush1.bf16.msra.mxu0 %v3883_v43 }
 0x5fa   :  { %1751 = vmatprep.subr.bf16.mxu0 %v3889_v13 }
 0x5fd   :  { %1752 = vmatpush1.bf16.msra.mxu0 %v3887_v39 }
 0x5fe   :  { %1753 = vmatprep.subr.bf16.mxu0 %v3893_v3  ;;  %v3318_v3 = vld [vmem:[%s5127_s5] ss:$0 sm:$0xff] }
 0x601   :  { %1754 = vmatpush1.bf16.msra.mxu0 %v3891_v24 }
 0x602   :  { %3690 = vmatprep.subr.bf16.mxu0 %v4161_v1 }
 0x604   :  { %1772 = vmatmul.mubr.bf16.vlgmr.msra.gmra.mxu0 %v3895_v56 }
 0x605   :  { %3692 = vmatprep.mubr.msk.bf16.mxu0 %vm4162_vm0, %v4161_v1 }
 0x6a4   :  { %v1459_v4 = vpop.f32.mrf.mxu0 }
 0x6a5   :  { %v1460_v50 = vadd.f32 %v3281_v63, %v1459_v4 }
 0x6a6   :  { %v3644_v53 = vpop.f32.mrf.mxu0 }
 0x6a7   :  { %v1466_v54 = vadd.f32 %v1460_v50, %v161_v49  ;;  %v1641_v49 = vld [vmem:[%s5091_s12] sm:$0x3] }
 0x6a8   :  { %v1462_v61 = vpop.f32.mrf.mxu0  ;;  %v1646_v4 = vrot.slane %v1641_v49, %v4418_v29  ;;  %v1650_v53 = vrot.slane %v1641_v49, %v4420_v30 }
 0x6a9   :  { %v1463_v2 = vadd.f32 %v3281_v63, %v1462_v61  ;;  %1470 = vadd.xlane.f32.xlu0 %v1466_v54 }
 0x6aa   :  { %v3645_v6 = vpop.f32.mrf.mxu0 }
 0x6ab   :  { %v1467_v7 = vadd.f32 %v1463_v2, %v162_v58 }
 0x6ad   :  { %1472 = vadd.xlane.f32.xlu1 %v1467_v7 }
 0x6c4   :  { %v1773_v50 = vpop.f32.mrf.mxu0 }
 0x6c5   :  { %v1774_v58 = vadd.f32 %v1773_v50, %v1646_v4 }
 0x732   :  { %v1471_v59 = vpop.xlane.xlu0 %1470 }
 0x733   :  { %v1475_v51 = vmul.f32 0.0078125, %v1471_v59 }
 0x735   :  { %v1477_v15 = vsub.f32 %v1466_v54, %v1475_v51  ;;  %v1775_v54 = vpop.f32.mrf.mxu0 }
 0x736   :  { %v1473_v16 = vpop.xlane.xlu1 %1472  ;;  %v1776_v2 = vadd.f32 %v1775_v54, %v1650_v53 }
 0x737   :  { %v1476_v17 = vmul.f32 0.0078125, %v1473_v16  ;;  %v1479_v55 = vmul.f32 %v1477_v15, %v1477_v15  ;;  %v1777_v61 = vpop.f32.mrf.mxu0 }
 0x738   :  { %v1778_v6 = vadd.f32 %v1777_v61, %v1646_v4 }
 0x739   :  { %v1478_v60 = vsub.f32 %v1467_v7, %v1476_v17  ;;  %1481 = vadd.xlane.f32.xlu0 %v1479_v55  ;;  %v1779_v7 = vpop.f32.mrf.mxu0 }
 0x73a   :  { %v4737_v8 = vpack.c.bf16 %v1778_v6, %v1774_v58  ;;  %v1780_v9 = vadd.f32 %v1779_v7, %v1650_v53 }
 0x73b   :  { %v1480_v62 = vmul.f32 %v1478_v60, %v1478_v60 }
 0x73c   :  { %v4739_v10 = vpack.c.bf16 %v1780_v9, %v1776_v2  ;;  %1793 = vrot.lane.b32.xlu1 %v4737_v8, %s4163_s30  ;;  %v1816_v23 = vsel %vm465_vm1, %v4737_v8, 0 }
 0x73d   :  { %1483 = vadd.xlane.f32.xlu0 %v1480_v62 }
 0x73e   :  { %v2044_v11 = vsel %vm698_vm2, %v4739_v10, 0 }
 0x73f   :  { %3691 = vmatpush3.bf16.msra.mxu0 %v2044_v11 }
 0x740   :  { %1795 = vrot.lane.b32.xlu1 %v4737_v8, %s4154_s3  ;;  %3702 = vmatprep.subr.bf16.mxu0 %v4161_v1 }
 0x7c2   :  { %v1482_v31 = vpop.xlane.xlu0 %1481 }
 0x7c3   :  { %v1485_v32 = vmul.f32 0.0078125, %v1482_v31 }
 0x7c5   :  { %v1487_v33 = vadd.f32 1e-05, %v1485_v32 }
 0x7c6   :  { %v1484_v52 = vpop.xlane.xlu0 %1483 }
 0x7c7   :  { %3980 = vrsqrt.f32 %v1487_v33  ;;  %v1486_v34 = vmul.f32 0.0078125, %v1484_v52 }
 0x7c9   :  { %v1488_v35 = vadd.f32 1e-05, %v1486_v34 }
 0x7cb   :  { %3982 = vrsqrt.f32 %v1488_v35 }
 0x7d4   :  { %v3981_v36 = vpop.eup %3980 }
 0x7d5   :  { %v1491_v37 = vmul.f32 %v3981_v36, %v1477_v15 }
 0x7d7   :  { %v1499_v42 = vmul.f32 %v3290_v38, %v1491_v37 }
 0x7d8   :  { %v3983_v40 = vpop.eup %3982 }
 0x7d9   :  { %v1492_v41 = vmul.f32 %v3983_v40, %v1478_v60  ;;  %v4724_v47 = vadd.f32 %v3291_v44, %v1499_v42  ;;  %v4756_v60 = vpop.permute.xlu1 %1793 }
 0x7da   :  { %v1862_v62 = vsel %vm465_vm1, %v4756_v60, 0 }
 0x7db   :  { %v1500_v45 = vmul.f32 %v3290_v38, %v1492_v41 }
 0x7dd   :  { %v4726_v48 = vadd.f32 %v3291_v44, %v1500_v45  ;;  %v4775_v5 = vpop.permute.xlu1 %1795 }
 0x7de   :  { %v1908_v18 = vsel %vm465_vm1, %v4775_v5, 0 }
 0x7df   :  { %v1509_v63 = vpack.c.bf16 %v4726_v48, %v4724_v47 }
 0x7e1   :  { %3663 = vmatmul.mubr.bf16.vlgmr.msra.gmra.mxu1 %v1509_v63 }
 0x7e2   :  { %3668 = vmatprep.mubr.msk.bf16.mxu1 %vm4162_vm0, %v4161_v1  ;;  %3667 = vmatpush3.bf16.xpose.msra.mxu1 %v1816_v23 }
 0x7e3   :  { %3672 = vmatprep.subr.bf16.mxu1 %v4161_v1 }
 0x8a1   :  { %v1615_v14 = vpop.f32.mrf.mxu1 }
 0x8a2   :  { %v1616_v57 = vadd.f32 %v3292_v12, %v1615_v14 }
 0x8a3   :  { %v3664_v46 = vpop.f32.mrf.mxu1 }
 0x8a4   :  { %v1622_v16 = vmul.f32 0.17677669, %v1616_v57 }
 0x8a5   :  { %v1618_v59 = vpop.f32.mrf.mxu1 }
 0x8a6   :  { %v1619_v51 = vadd.f32 %v3292_v12, %v1618_v59 }
 0x8a7   :  { %v3665_v15 = vpop.f32.mrf.mxu1 }
 0x8a8   :  { %v1623_v17 = vmul.f32 0.17677669, %v1619_v51 }
 0x8aa   :  { %v4754_v55 = vpack.c.bf16 %v1623_v17, %v1622_v16 }
 0x8ac   :  { %1788 = vrot.lane.b32.xlu1 %v4754_v55, %s4154_s3  ;;  %1786 = vrot.lane.b32.xlu0 %v4754_v55, %s4163_s30 }
 0x8ad   :  { %3669 = vmatmul.mubr.msk.bf16.vlgmr.msra.gmra.mxu1 %vm465_vm1, %v4754_v55 }
 0x8ae   :  { %3673 = vmatpush3.bf16.xpose.msra.mxu1 %v1862_v62  ;;  %3674 = vmatprep.mubr.msk.bf16.mxu1 %vm4162_vm0, %v4161_v1 }
 0x8af   :  { %3678 = vmatprep.subr.bf16.mxu1 %v4161_v1 }
 0x8b0   :  { %1790 = vrot.lane.b32.xlu1 %v4754_v55, %s4164_s24  ;;  %1797 = vrot.lane.b32.xlu0 %v4737_v8, %s4164_s24 }
 0x8b4   :  { %1800 = vrot.lane.b32.xlu1 %v4739_v10, %s4163_s30 }
 0x91e   :  { %v4777_v21 = vpop.permute.xlu0 %1786  ;;  %v4783_v19 = vpop.permute.xlu1 %1788 }
 0x91f   :  { %3675 = vmatmul.mubr.msk.bf16.vlgmr.msra.gmra.mxu1 %vm465_vm1, %v4777_v21 }
 0x920   :  { %3679 = vmatpush3.bf16.xpose.msra.mxu1 %v1908_v18  ;;  %3680 = vmatprep.mubr.msk.bf16.mxu1 %vm4162_vm0, %v4161_v1  ;;  %v2252_v18 = vrot.slane %v4737_v8, 4 }
 0x921   :  { %3684 = vmatprep.subr.bf16.mxu1 %v4161_v1 }
 0x922   :  { %v4788_v43 = vpop.permute.xlu0 %1797  ;;  %v4790_v20 = vpop.permute.xlu1 %1790 }
 0x923   :  { %v1954_v13 = vsel %vm465_vm1, %v4788_v43, 0 }
 0x926   :  { %v4799_v39 = vpop.permute.xlu1 %1800 }
 0x927   :  { %3681 = vmatmul.mubr.msk.bf16.vlgmr.msra.gmra.mxu1 %vm465_vm1, %v4783_v19  ;;  %v2090_v22 = vsel %vm698_vm2, %v4799_v39, 0 }
 0x928   :  { %3685 = vmatpush3.bf16.xpose.msra.mxu1 %v1954_v13  ;;  %3686 = vmatprep.mubr.msk.bf16.mxu1 %vm4162_vm0, %v4161_v1 }
 0x929   :  { %3696 = vmatprep.subr.bf16.mxu1 %v4161_v1 }
 0x92f   :  { %3687 = vmatmul.mubr.msk.bf16.vlgmr.msra.gmra.mxu1 %vm465_vm1, %v4790_v20 }
 0x930   :  { %3697 = vmatpush3.bf16.msra.mxu1 %v2090_v22  ;;  %3698 = vmatprep.mubr.msk.bf16.mxu1 %vm4162_vm0, %v4161_v1 }
 0x931   :  { %3708 = vmatprep.subr.bf16.mxu1 %v4161_v1 }
 0x96d   :  { %v1852_v24 = vpop.f32.mrf.mxu1 }
 0x96e   :  { %v1853_v25 = vadd.f32 %v3318_v3, %v1852_v24  ;;  %v2300_v24 = vrot.slane %v4756_v60, 4  ;;  %v2487_v60 = vrot.slane %v4739_v10, 4 }
 0x96f   :  { %v3670_v56 = vpop.f32.mrf.mxu1 }
 0x970   :  { %v1996_v26 = vsel %vm650_vm3, %v1853_v25, -inf }
 0x971   :  { %1997 = vmax.xlane.f32.xlu0 %v1996_v26  ;;  %v1855_v27 = vpop.f32.mrf.mxu1  ;;  %v2251_v26 = vrot.slane %v4754_v55, 4  ;;  %v2396_v55 = vrot.slane %v4788_v43, 4 }
 0x972   :  { %v2305_v27 = vsel %vm465_vm1, %v2300_v24, 0 }
 0x973   :  { %v3671_v28 = vpop.f32.mrf.mxu1 }
 0x9df   :  { %v1898_v31 = vpop.f32.mrf.mxu1 }
 0x9e0   :  { %v1899_v32 = vadd.f32 %v3318_v3, %v1898_v31  ;;  %v2299_v31 = vrot.slane %v4777_v21, 4  ;;  %v2395_v21 = vrot.slane %v4790_v20, 4 }
 0x9e1   :  { %v3676_v33 = vpop.f32.mrf.mxu1 }
 0x9e2   :  { %v1999_v52 = vsel %vm650_vm3, %v1899_v32, -inf  ;;  %v2492_v33 = vsel %vm698_vm2, %v2487_v60, 0 }
 0x9e3   :  { %2000 = vmax.xlane.f32.xlu1 %v1999_v52  ;;  %v1901_v34 = vpop.f32.mrf.mxu1 }
 0x9e5   :  { %v3677_v35 = vpop.f32.mrf.mxu1 }
 0x9e7   :  { %v1944_v36 = vpop.f32.mrf.mxu1 }
 0x9e8   :  { %v1945_v37 = vadd.f32 %v3318_v3, %v1944_v36 }
 0x9e9   :  { %v3682_v38 = vpop.f32.mrf.mxu1 }
 0x9ea   :  { %v2002_v40 = vsel %vm650_vm3, %v1945_v37, -inf }
 0x9eb   :  { %2003 = vmax.xlane.f32.xlu0 %v2002_v40  ;;  %v1947_v41 = vpop.f32.mrf.mxu1 }
 0x9ed   :  { %v3683_v42 = vpop.f32.mrf.mxu1 }
 0x9ef   :  { %v1990_v44 = vpop.f32.mrf.mxu1 }
 0x9f0   :  { %v1991_v45 = vadd.f32 %v3318_v3, %v1990_v44  ;;  %v2257_v3 = vsel %vm465_vm1, %v2252_v18, 0  ;;  %v3328_v44 = vld [vmem:[%s5127_s5 + $0x1] ss:$0 sm:$0xff] }
 0x9f1   :  { %v3688_v63 = vpop.f32.mrf.mxu1 }
 0x9f2   :  { %v2005_v49 = vsel %vm650_vm3, %v1991_v45, -inf }
 0x9f3   :  { %2006 = vmax.xlane.f32.xlu0 %v2005_v49  ;;  %v1993_v4 = vpop.f32.mrf.mxu1 }
 0x9f4   :  { %1804 = vrot.lane.b32.xlu1 %v4739_v10, %s4164_s24 }
 0x9f5   :  { %v3689_v50 = vpop.f32.mrf.mxu1 }
 0x9fa   :  { %v1998_v53 = vpop.xlane.xlu0 %1997 }
 0x9fb   :  { %v2008_v54 = vsub.f32 %v1853_v25, %v1998_v53  ;;  %v2348_v25 = vrot.slane %v4775_v5, 4  ;;  %v2347_v5 = vrot.slane %v4783_v19, 4 }
 0x9fd   :  { %v2012_v58 = vmul.f32 1.442695, %v2008_v54  ;;  %v2353_v28 = vsel %vm465_vm1, %v2348_v25, 0 }
 0x9ff   :  { %3984 = vpow2.f32 %v2012_v58 }
 0xa09   :  { %1802 = vrot.lane.b32.xlu0 %v4739_v10, %s4154_s3  ;;  %v2534_v10 = vrot.slane %v4799_v39, 4 }
 0xa0b   :  { %v2539_v19 = vsel %vm698_vm2, %v2534_v10, 0 }
 0xa0c   :  { %v4819_v61 = vpop.eup %3984 }
 0xa0d   :  { %v2036_v2 = vpack.c.bf16 %v4819_v61, %v4819_v61  ;;  %v2020_v60 = vsel %vm650_vm3, %v4819_v61, 0.0 }
 0xa0f   :  { %3693 = vmatmul.mubr.msk.bf16.vlgmr.msra.gmra.mxu0 %vm650_vm3, %v2036_v2 }
 0xa10   :  { %3704 = vmatprep.mubr.msk.bf16.mxu0 %vm4162_vm0, %v4161_v1 }
 0xa6c   :  { %v2001_v6 = vpop.xlane.xlu1 %2000 }
 0xa6d   :  { %v2009_v7 = vsub.f32 %v1899_v32, %v2001_v6  ;;  %v2401_v32 = vsel %vm465_vm1, %v2396_v55, 0 }
 0xa6f   :  { %v2014_v9 = vmul.f32 1.442695, %v2009_v7 }
 0xa70   :  { %v4828_v59 = vpop.permute.xlu1 %1804 }
 0xa71   :  { %3986 = vpow2.f32 %v2014_v9  ;;  %v2182_v17 = vsel %vm698_vm2, %v4828_v59, 0 }
 0xa74   :  { %v2004_v23 = vpop.xlane.xlu0 %2003 }
 0xa75   :  { %v2010_v11 = vsub.f32 %v1945_v37, %v2004_v23 }
 0xa77   :  { %v2016_v12 = vmul.f32 1.442695, %v2010_v11 }
 0xa79   :  { %3988 = vpow2.f32 %v2016_v12 }
 0xa7c   :  { %v2007_v14 = vpop.xlane.xlu0 %2006 }
 0xa7d   :  { %v2011_v46 = vsub.f32 %v1991_v45, %v2007_v14 }
 0xa7e   :  { %v4826_v57 = vpop.eup %3986 }
 0xa7f   :  { %v2018_v51 = vmul.f32 1.442695, %v2011_v46  ;;  %v2037_v15 = vpack.c.bf16 %v4826_v57, %v4826_v57  ;;  %v2023_v25 = vsel %vm650_vm3, %v4826_v57, 0.0 }
 0xa80   :  { %v4832_v16 = vpop.permute.xlu0 %1802 }
 0xa81   :  { %3990 = vpow2.f32 %v2018_v51  ;;  %v2136_v62 = vsel %vm698_vm2, %v4832_v16, 0  ;;  %3699 = vmatmul.mubr.msk.bf16.vlgmr.msra.gmra.mxu1 %vm650_vm3, %v2037_v15 }
 0xa82   :  { %3709 = vmatpush3.bf16.msra.mxu1 %v2182_v17  ;;  %3703 = vmatpush3.bf16.msra.mxu0 %v2136_v62 }
 0xa83   :  { %3714 = vmatprep.subr.bf16.mxu0 %v4161_v1  ;;  %3710 = vmatprep.mubr.msk.bf16.mxu1 %vm4162_vm0, %v4161_v1 }
 0xa84   :  { %3720 = vmatprep.subr.bf16.mxu1 %v4161_v1 }
 0xa86   :  { %v4844_v13 = vpop.eup %3988 }
 0xa87   :  { %v2038_v22 = vpack.c.bf16 %v4844_v13, %v4844_v13 }
 0xa89   :  { %3705 = vmatmul.mubr.msk.bf16.vlgmr.msra.gmra.mxu0 %vm650_vm3, %v2038_v22 }
 0xa8a   :  { %3715 = vmatpush3.bf16.xpose.msra.mxu0 %v2257_v3  ;;  %3716 = vmatprep.mubr.msk.bf16.mxu0 %vm4162_vm0, %v4161_v1 }
 0xa8b   :  { %3726 = vmatprep.subr.bf16.mxu0 %v4161_v1 }
 0xa8e   :  { %v4855_v8 = vpop.eup %3990 }
 0xa8f   :  { %v2039_v56 = vpack.c.bf16 %v4855_v8, %v4855_v8  ;;  %v2029_v55 = vsel %vm650_vm3, %v4855_v8, 0.0 }
 0xa91   :  { %3711 = vmatmul.mubr.msk.bf16.vlgmr.msra.gmra.mxu1 %vm650_vm3, %v2039_v56  ;;  %3717 = vmatmul.mubr.msk.bf16.vlgmr.msra.gmra.mxu0 %vm465_vm1, %v2251_v26 }
 0xa92   :  { %3721 = vmatpush3.bf16.xpose.msra.mxu1 %v2305_v27  ;;  %3727 = vmatpush3.bf16.xpose.msra.mxu0 %v2353_v28  ;;  %v2026_v28 = vsel %vm650_vm3, %v4844_v13, 0.0 }
 0xa93   :  { %3722 = vmatprep.mubr.msk.bf16.mxu1 %vm4162_vm0, %v4161_v1  ;;  %3728 = vmatprep.mubr.msk.bf16.mxu0 %vm4162_vm0, %v4161_v1 }
 0xa94   :  { %3732 = vmatprep.subr.bf16.mxu1 %v4161_v1  ;;  %3738 = vmatprep.subr.bf16.mxu0 %v4161_v1 }
 0xa99   :  { %3723 = vmatmul.mubr.msk.bf16.vlgmr.msra.gmra.mxu1 %vm465_vm1, %v2299_v31  ;;  %3729 = vmatmul.mubr.msk.bf16.vlgmr.msra.gmra.mxu0 %vm465_vm1, %v2347_v5 }
 0xa9a   :  { %3733 = vmatpush3.bf16.xpose.msra.mxu1 %v2401_v32  ;;  %3739 = vmatpush3.bf16.msra.mxu0 %v2492_v33 }
 0xa9b   :  { %3734 = vmatprep.mubr.msk.bf16.mxu1 %vm4162_vm0, %v4161_v1  ;;  %3744 = vmatprep.subr.bf16.mxu1 %v4161_v1 }
 0xa9c   :  { %3740 = vmatprep.mubr.msk.bf16.mxu0 %vm4162_vm0, %v4161_v1  ;;  %3750 = vmatprep.subr.bf16.mxu0 %v4161_v1 }
 0xaa1   :  { %3735 = vmatmul.mubr.msk.bf16.vlgmr.msra.gmra.mxu1 %vm465_vm1, %v2395_v21 }
 0xaa2   :  { %3745 = vmatpush3.bf16.msra.mxu1 %v2539_v19  ;;  %3746 = vmatprep.mubr.msk.bf16.mxu1 %vm4162_vm0, %v4161_v1 }
 0xaa3   :  { %3756 = vmatprep.subr.bf16.mxu1 %v4161_v1 }
 0xacf   :  { %v4891_v43 = vpop.f32.mrf.mxu0 }
 0xad1   :  { %v3694_v52 = vpop.f32.mrf.mxu0 }
 0xad3   :  { %v2083_v34 = vpop.f32.mrf.mxu0 }
 0xad4   :  { %v2581_v34 = vrot.slane %v4832_v16, 4 }
 0xad5   :  { %v3695_v35 = vpop.f32.mrf.mxu0 }
 0xb41   :  { %v4893_v36 = vpop.f32.mrf.mxu1 }
 0xb43   :  { %v3700_v39 = vpop.f32.mrf.mxu1 }
 0xb45   :  { %v2129_v37 = vpop.f32.mrf.mxu1 }
 0xb46   :  { %v2586_v37 = vsel %vm698_vm2, %v2581_v34, 0 }
 0xb47   :  { %v3701_v20 = vpop.f32.mrf.mxu1 }
 0xb48   :  { %v2628_v20 = vrot.slane %v4828_v59, 4 }
 0xb49   :  { %v4895_v38 = vpop.f32.mrf.mxu0 }
 0xb4b   :  { %v3706_v40 = vpop.f32.mrf.mxu0 }
 0xb4d   :  { %v2175_v41 = vpop.f32.mrf.mxu0 }
 0xb4f   :  { %v3707_v42 = vpop.f32.mrf.mxu0 }
 0xb50   :  { %v2633_v42 = vsel %vm698_vm2, %v2628_v20, 0 }
 0xb51   :  { %v4900_v45 = vpop.f32.mrf.mxu1  ;;  %v2293_v63 = vpop.f32.mrf.mxu0 }
 0xb52   :  { %v2294_v49 = vadd.f32 %v3328_v44, %v2293_v63 }
 0xb53   :  { %v3712_v4 = vpop.f32.mrf.mxu1  ;;  %v3718_v50 = vpop.f32.mrf.mxu0 }
 0xb54   :  { %v2443_v53 = vsel %vm650_vm3, %v2294_v49, -inf }
 0xb55   :  { %2444 = vmax.xlane.f32.xlu1 %v2443_v53  ;;  %v2221_v54 = vpop.f32.mrf.mxu1  ;;  %v2296_v58 = vpop.f32.mrf.mxu0 }
 0xb56   :  { %v3899_v54 = vld [vmem:[#allocation6 + $0x38] sm:$0xff]   ;;  %v3900_v58 = vld [vmem:[#allocation6 + $0x30] sm:$0xff]  }
 0xb57   :  { %v3713_v2 = vpop.f32.mrf.mxu1  ;;  %v3719_v6 = vpop.f32.mrf.mxu0 }
 0xb58   :  { %v3901_v2 = vld [vmem:[#allocation6 + $0x28] sm:$0xff]   ;;  %v3902_v6 = vld [vmem:[#allocation6 + $0x20] sm:$0xff]  }
 0xb59   :  { %v2341_v7 = vpop.f32.mrf.mxu1  ;;  %v2389_v9 = vpop.f32.mrf.mxu0 }
 0xb5a   :  { %v2342_v23 = vadd.f32 %v3328_v44, %v2341_v7  ;;  %v2390_v14 = vadd.f32 %v3328_v44, %v2389_v9  ;;  %v3903_v7 = vld [vmem:[#allocation6 + $0x18] sm:$0xff]  }
 0xb5b   :  { %v3724_v11 = vpop.f32.mrf.mxu1  ;;  %v3730_v12 = vpop.f32.mrf.mxu0 }
 0xb5c   :  { %v2446_v46 = vsel %vm650_vm3, %v2342_v23, -inf  ;;  %v2449_v18 = vsel %vm650_vm3, %v2390_v14, -inf }
 0xb5d   :  { %v2392_v51 = vpop.f32.mrf.mxu0  ;;  %2447 = vmax.xlane.f32.xlu0 %v2446_v46  ;;  %v2344_v15 = vpop.f32.mrf.mxu1 }
 0xb5e   :  { %v3904_v51 = vld [vmem:[#allocation6 + $0x10] sm:$0xff]  }
 0xb5f   :  { %v3725_v17 = vpop.f32.mrf.mxu1  ;;  %v3731_v62 = vpop.f32.mrf.mxu0 }
 0xb60   :  { %v3905_v62 = vld [vmem:[#allocation6 + $0x8] sm:$0xff]  }
 0xb61   :  { %2450 = vmax.xlane.f32.xlu0 %v2449_v18  ;;  %v2437_v22 = vpop.f32.mrf.mxu1 }
 0xb62   :  { %v2438_v3 = vadd.f32 %v3328_v44, %v2437_v22 }
 0xb63   :  { %v3736_v24 = vpop.f32.mrf.mxu1 }
 0xb64   :  { %v2452_v56 = vsel %vm650_vm3, %v2438_v3, -inf }
 0xb65   :  { %2024 = vadd.xlane.f32.xlu0 %v2023_v25  ;;  %2453 = vmax.xlane.f32.xlu1 %v2452_v56  ;;  %v2440_v26 = vpop.f32.mrf.mxu1 }
 0xb66   :  { %v3906_v26 = vld [vmem:[#allocation6] sm:$0xff]  }
 0xb67   :  { %v3737_v27 = vpop.f32.mrf.mxu1 }
 0xb69   :  { %2027 = vadd.xlane.f32.xlu0 %v2026_v28 }
 0xb6d   :  { %2030 = vadd.xlane.f32.xlu0 %v2029_v55 }
 0xb71   :  { %2021 = vadd.xlane.f32.xlu0 %v2020_v60 }
 0xbde   :  { %v2445_v5 = vpop.xlane.xlu1 %2444 }
 0xbdf   :  { %v2455_v57 = vsub.f32 %v2294_v49, %v2445_v5 }
 0xbe1   :  { %v2459_v31 = vmul.f32 1.442695, %v2455_v57 }
 0xbe3   :  { %3992 = vpow2.f32 %v2459_v31 }
 0xbe6   :  { %v2448_v32 = vpop.xlane.xlu0 %2447 }
 0xbe7   :  { %v2456_v33 = vsub.f32 %v2342_v23, %v2448_v32 }
 0xbe9   :  { %v2461_v10 = vmul.f32 1.442695, %v2456_v33 }
 0xbea   :  { %v2451_v21 = vpop.xlane.xlu0 %2450 }
 0xbeb   :  { %3994 = vpow2.f32 %v2461_v10  ;;  %v2457_v19 = vsub.f32 %v2390_v14, %v2451_v21 }
 0xbed   :  { %v2463_v13 = vmul.f32 1.442695, %v2457_v19 }
 0xbee   :  { %v2454_v52 = vpop.xlane.xlu1 %2453 }
 0xbef   :  { %3996 = vpow2.f32 %v2463_v13  ;;  %v2458_v8 = vsub.f32 %v2438_v3, %v2454_v52 }
 0xbf0   :  { %v3993_v35 = vpop.eup %3992 }
 0xbf1   :  { %v2465_v39 = vmul.f32 1.442695, %v2458_v8  ;;  %v2483_v61 = vpack.c.bf16 %v3993_v35, %v3993_v35  ;;  %v2467_v53 = vsel %vm650_vm3, %v3993_v35, 0.0 }
 0xbf3   :  { %3998 = vpow2.f32 %v2465_v39  ;;  %3741 = vmatmul.mubr.msk.bf16.vlgmr.msra.gmra.mxu0 %vm650_vm3, %v2483_v61 }
 0xbf4   :  { %3751 = vmatpush3.bf16.msra.mxu0 %v2586_v37  ;;  %3752 = vmatprep.mubr.msk.bf16.mxu0 %vm4162_vm0, %v4161_v1 }
 0xbf5   :  { %3762 = vmatprep.subr.bf16.mxu0 %v4161_v1 }
 0xbf8   :  { %v3995_v40 = vpop.eup %3994 }
 0xbf9   :  { %v2470_v16 = vsel %vm650_vm3, %v3995_v40, 0.0  ;;  %v2484_v41 = vpack.c.bf16 %v3995_v40, %v3995_v40 }
 0xbfa   :  { %2471 = vadd.xlane.f32.xlu1 %v2470_v16 }
 0xbfb   :  { %3747 = vmatmul.mubr.msk.bf16.vlgmr.msra.gmra.mxu1 %vm650_vm3, %v2484_v41 }
 0xbfc   :  { %v3997_v44 = vpop.eup %3996  ;;  %3757 = vmatpush3.bf16.msra.mxu1 %v2633_v42  ;;  %3758 = vmatprep.mubr.msk.bf16.mxu1 %vm4162_vm0, %v4161_v1 }
 0xbfd   :  { %v2473_v63 = vsel %vm650_vm3, %v3997_v44, 0.0  ;;  %v2485_v49 = vpack.c.bf16 %v3997_v44, %v3997_v44 }
 0xbfe   :  { %2474 = vadd.xlane.f32.xlu1 %v2473_v63 }
 0xbff   :  { %3753 = vmatmul.mubr.msk.bf16.vlgmr.msra.gmra.mxu0 %vm650_vm3, %v2485_v49 }
 0xc00   :  { %v3999_v59 = vpop.eup %3998  ;;  %3778 = vmatprep.mubr.msk.bf16.mxu0 %vm4162_vm0, %v4161_v1  ;;  %3763 = vmatpush3.bf16.msra.mxu0 %v3899_v54 }
 0xc01   :  { %v2476_v4 = vsel %vm650_vm3, %v3999_v59, 0.0  ;;  %v2486_v50 = vpack.c.bf16 %v3999_v59, %v3999_v59  ;;  %3764 = vmatprep.subr.bf16.mxu0 %v4161_v1 }
 0xc02   :  { %2477 = vadd.xlane.f32.xlu1 %v2476_v4 }
 0xc03   :  { %3759 = vmatmul.mubr.msk.bf16.vlgmr.msra.gmra.mxu1 %vm650_vm3, %v2486_v50 }
 0xc04   :  { %2990 = vmatprep.mubr.bf16.mxu1 %v4160_v0  ;;  %3765 = vmatpush3.bf16.msra.mxu0 %v3900_v58  ;;  %v2025_v0 = vpop.xlane.xlu0 %2024 }
 0xc05   :  { %3766 = vmatprep.subr.bf16.mxu0 %v4161_v1  ;;  %4000 = vrcp.f32 %v2025_v0 }
 0xc06   :  { %2468 = vadd.xlane.f32.xlu1 %v2467_v53 }
 0xc08   :  { %3767 = vmatpush3.bf16.msra.mxu0 %v3901_v2  ;;  %v2028_v23 = vpop.xlane.xlu0 %2027 }
 0xc09   :  { %3768 = vmatprep.subr.bf16.mxu0 %v4161_v1 }
 0xc0c   :  { %3769 = vmatpush3.bf16.msra.mxu0 %v3902_v6  ;;  %v2031_v12 = vpop.xlane.xlu0 %2030 }
 0xc0d   :  { %3770 = vmatprep.subr.bf16.mxu0 %v4161_v1 }
 0xc10   :  { %3771 = vmatpush3.bf16.msra.mxu0 %v3903_v7 }
 0xc11   :  { %3772 = vmatprep.subr.bf16.mxu0 %v4161_v1 }
 0xc12   :  { %v4001_v18 = vpop.eup %4000 }
 0xc13   :  { %v2225_v25 = vmul.f32 %v4001_v18, %v4893_v36  ;;  %v3907_v18 = vld [vmem:[%s5094_s15 + $0x70] ss:$8 sps:$4 sm:$0xff]  }
 0xc14   :  { %3773 = vmatpush3.bf16.msra.mxu0 %v3904_v51 }
 0xc15   :  { %3774 = vmatprep.subr.bf16.mxu0 %v4161_v1 }
 0xc18   :  { %3775 = vmatpush3.bf16.msra.mxu0 %v3905_v62 }
 0xc19   :  { %3776 = vmatprep.subr.bf16.mxu0 %v4161_v1 }
 0xc1c   :  { %3777 = vmatpush3.bf16.msra.mxu0 %v3906_v26 }
 0xc83   :  { %v2472_v9 = vpop.xlane.xlu1 %2471 }
 0xc84   :  { %4002 = vrcp.f32 %v2472_v9 }
 0xc85   :  { %4004 = vrcp.f32 %v2028_v23 }
 0xc87   :  { %v2475_v11 = vpop.xlane.xlu1 %2474 }
 0xc88   :  { %4006 = vrcp.f32 %v2475_v11 }
 0xc89   :  { %4008 = vrcp.f32 %v2031_v12 }
 0xc8b   :  { %v2478_v14 = vpop.xlane.xlu1 %2477 }
 0xc8c   :  { %4010 = vrcp.f32 %v2478_v14 }
 0xc8f   :  { %v2469_v20 = vpop.xlane.xlu1 %2468 }
 0xc91   :  { %v4003_v3 = vpop.eup %4002 }
 0xc92   :  { %v4005_v27 = vpop.eup %4004 }
 0xc93   :  { %v2226_v32 = vmul.f32 %v4005_v27, %v4895_v38  ;;  %v2022_v38 = vpop.xlane.xlu0 %2021 }
 0xc94   :  { %4012 = vrcp.f32 %v2022_v38  ;;  %v3938_v38 = vld [vmem:[%s5096_s17 + $0x20] sm:$0xff]  }
 0xc95   :  { %v4007_v60 = vpop.eup %4006  ;;  %4014 = vrcp.f32 %v2469_v20  ;;  %v3939_v20 = vld [vmem:[%s5096_s17 + $0x58] sm:$0xff]  }
 0xc96   :  { %v4009_v33 = vpop.eup %4008 }
 0xc97   :  { %v2227_v52 = vmul.f32 %v4009_v33, %v4900_v45  ;;  %v3919_v33 = vld [vmem:[%s5094_s15 + $0x30] ss:$8 sps:$4 sm:$0xff]  }
 0xc99   :  { %v4011_v19 = vpop.eup %4010 }
 0xca1   :  { %v4013_v16 = vpop.eup %4012 }
 0xca2   :  { %v4015_v45 = vpop.eup %4014  ;;  %v2224_v4 = vmul.f32 %v4013_v16, %v4891_v43  ;;  %v3337_v43 = vld [vmem:[%s5093_s14] ss:$0 sm:$0xff] }
 0xcb3   :  { %v2528_v46 = vpop.f32.mrf.mxu0 }
 0xcb4   :  { %v2675_v59 = vmul.f32 %v4015_v45, %v2528_v46 }
 0xcb5   :  { %v3742_v15 = vpop.f32.mrf.mxu0 }
 0xcb7   :  { %v2531_v17 = vpop.f32.mrf.mxu0 }
 0xcb9   :  { %v3743_v22 = vpop.f32.mrf.mxu0 }
 0xcba   :  { %v3909_v22 = vld [vmem:[%s5094_s15 + $0x74] ss:$8 sps:$4 sm:$0xff]  }
 0xcbb   :  { %v2575_v24 = vpop.f32.mrf.mxu1  ;;  %2958 = vmatprep.subr.bf16.mxu1 %v3909_v22 }
 0xcbc   :  { %v2676_v56 = vmul.f32 %v4003_v3, %v2575_v24  ;;  %2959 = vmatpush1.bf16.msra.mxu1 %v3907_v18 }
 0xcbd   :  { %v3748_v28 = vpop.f32.mrf.mxu1 }
 0xcbe   :  { %v3810_v55 = vpack.i.bf16 %v2676_v56, %v2225_v25  ;;  %v3912_v28 = vld [vmem:[%s5094_s15 + $0x64] ss:$8 sps:$4 sm:$0xff]  }
 0xcbf   :  { %v2578_v5 = vpop.f32.mrf.mxu1  ;;  %v2622_v57 = vpop.f32.mrf.mxu0  ;;  %2960 = vmatprep.subr.bf16.mxu1 %v3912_v28 }
 0xcc0   :  { %v2677_v31 = vmul.f32 %v4007_v60, %v2622_v57  ;;  %3811 = vrot.lane.b32.xlu0 %v3810_v55, %s4164_s24  ;;  %v3910_v55 = vld [vmem:[%s5094_s15 + $0x60] ss:$8 sps:$4 sm:$0xff]   ;;  %v3915_v60 = vld [vmem:[%s5094_s15 + $0x54] ss:$8 sps:$4 sm:$0xff]   ;;  %v3913_v5 = vld [vmem:[%s5094_s15 + $0x50] ss:$8 sps:$4 sm:$0xff]  }
 0xcc1   :  { %v3749_v10 = vpop.f32.mrf.mxu1  ;;  %v3754_v21 = vpop.f32.mrf.mxu0  ;;  %2961 = vmatpush1.bf16.msra.mxu1 %v3910_v55  ;;  %v3916_v57 = vld [vmem:[%s5094_s15 + $0x40] ss:$8 sps:$4 sm:$0xff]  }
 0xcc2   :  { %v3815_v1 = vpack.i.bf16 %v2677_v31, %v2226_v32  ;;  %2962 = vmatprep.subr.bf16.mxu1 %v3915_v60  ;;  %v3918_v31 = vld [vmem:[%s5094_s15 + $0x44] ss:$8 sps:$4 sm:$0xff]   ;;  %v3921_v32 = vld [vmem:[%s5094_s15 + $0x34] ss:$8 sps:$4 sm:$0xff]   ;;  %v3922_v21 = vld [vmem:[%s5094_s15 + $0x20] ss:$8 sps:$4 sm:$0xff]  }
 0xcc3   :  { %v2625_v36 = vpop.f32.mrf.mxu0  ;;  %v2669_v13 = vpop.f32.mrf.mxu1  ;;  %v3924_v10 = vld [vmem:[%s5094_s15 + $0x24] ss:$8 sps:$4 sm:$0xff]  }
 0xcc4   :  { %v2678_v34 = vmul.f32 %v4011_v19, %v2669_v13  ;;  %3816 = vrot.lane.b32.xlu1 %v3815_v1, %s4154_s3  ;;  %v3927_v1 = vld [vmem:[%s5094_s15 + $0x14] ss:$8 sps:$4 sm:$0xff]   ;;  %v3925_v19 = vld [vmem:[%s5094_s15 + $0x10] ss:$8 sps:$4 sm:$0xff]   ;;  %v3930_v36 = vld [vmem:[%s5094_s15 + $0x4] ss:$8 sps:$4 sm:$0xff]  }
 0xcc5   :  { %v3755_v8 = vpop.f32.mrf.mxu0  ;;  %v3760_v35 = vpop.f32.mrf.mxu1  ;;  %2963 = vmatpush1.bf16.msra.mxu1 %v3913_v5  ;;  %v3928_v13 = vld [vmem:[%s5094_s15] ss:$8 sps:$4 sm:$0xff]  }
 0xcc6   :  { %v3820_v39 = vpack.i.bf16 %v2678_v34, %v2227_v52  ;;  %2964 = vmatprep.subr.bf16.mxu1 %v3918_v31  ;;  %v3931_v52 = vld [vmem:[%s5096_s17 + $0x78] sm:$0xff]   ;;  %v3933_v8 = vld [vmem:[%s5096_s17 + $0x70] sm:$0xff]  }
 0xcc7   :  { %v2672_v61 = vpop.f32.mrf.mxu1  ;;  %v3932_v34 = vld [vmem:[%s5096_s17 + $0x38] sm:$0xff]   ;;  %3488 = vmatprep.subr.bf16.mxu0 %v3931_v52  ;;  %v3934_v35 = vld [vmem:[%s5096_s17 + $0x30] sm:$0xff]  }
 0xcc8   :  { %3821 = vrot.lane.b32.xlu1 %v3820_v39, %s4163_s30  ;;  %v3935_v39 = vld [vmem:[%s5096_s17 + $0x68] sm:$0xff]  }
 0xcc9   :  { %v3761_v37 = vpop.f32.mrf.mxu1  ;;  %2965 = vmatpush1.bf16.msra.mxu1 %v3916_v57  ;;  %v3936_v61 = vld [vmem:[%s5096_s17 + $0x28] sm:$0xff]  }
 0xcca   :  { %2966 = vmatprep.subr.bf16.mxu1 %v3921_v32  ;;  %v3937_v37 = vld [vmem:[%s5096_s17 + $0x60] sm:$0xff]  }
 0xccd   :  { %2967 = vmatpush1.bf16.msra.mxu1 %v3919_v33 }
 0xcce   :  { %2968 = vmatprep.subr.bf16.mxu1 %v3924_v10 }
 0xcd1   :  { %2969 = vmatpush1.bf16.msra.mxu1 %v3922_v21 }
 0xcd2   :  { %2970 = vmatprep.subr.bf16.mxu1 %v3927_v1 }
 0xcd5   :  { %2971 = vmatpush1.bf16.msra.mxu1 %v3925_v19 }
 0xcd6   :  { %2972 = vmatprep.subr.bf16.mxu1 %v3930_v36 }
 0xcd9   :  { %2973 = vmatpush1.bf16.msra.mxu1 %v3928_v13 }
 0xd32   :  { %v3812_v40 = vpop.permute.xlu0 %3811 }
 0xd33   :  { %v3814_v42 = vunpack.i.h.bf16 %v3812_v40  ;;  %v3813_v44 = vunpack.i.l.bf16 %v3812_v40  ;;  %v3940_v40 = vld [vmem:[%s5096_s17 + $0x18] sm:$0xff]  }
 0xd35   :  { %v2691_v53 = vsel %vm465_vm1, %v2675_v59, %v3814_v42  ;;  %v2240_v54 = vsel %vm465_vm1, %v2224_v4, %v3813_v44  ;;  %v3346_v4 = vld [vmem:[%s5100_s21] ss:$0 sm:$0xff] }
 0xd36   :  { %v3817_v41 = vpop.permute.xlu1 %3816 }
 0xd37   :  { %v3819_v63 = vunpack.i.h.bf16 %v3817_v41  ;;  %v3818_v49 = vunpack.i.l.bf16 %v3817_v41 }
 0xd39   :  { %v2241_v6 = vsel %vm897_vm4, %v2240_v54, %v3818_v49  ;;  %v2692_v7 = vsel %vm897_vm4, %v2691_v53, %v3819_v63 }
 0xd3a   :  { %v3822_v50 = vpop.permute.xlu1 %3821 }
 0xd3b   :  { %v3824_v58 = vunpack.i.h.bf16 %v3822_v50  ;;  %v3823_v2 = vunpack.i.l.bf16 %v3822_v50 }
 0xd3d   :  { %v2693_v0 = vsel %vm899_vm5, %v2692_v7, %v3824_v58  ;;  %v2242_v9 = vsel %vm899_vm5, %v2241_v6, %v3823_v2  ;;  %v3347_v58 = vld [vmem:[#allocation7] ss:$0 sm:$0xff] }
 0xd3e   :  { %v2694_v23 = vpack.c.bf16 %v2693_v0, %v2242_v9  ;;  %v3941_v9 = vld [vmem:[%s5096_s17 + $0x50] sm:$0xff]  }
 0xd40   :  { %3779 = vmatmul.mubr.bf16.vlgmr.msra.gmra.mxu0 %v2694_v23  ;;  %v3942_v23 = vld [vmem:[%s5096_s17 + $0x10] sm:$0xff]  }
 0xd41   :  { %3489 = vmatpush3.bf16.msra.mxu0 %v3932_v34 }
 0xd42   :  { %3490 = vmatprep.subr.bf16.mxu0 %v3933_v8 }
 0xd45   :  { %3491 = vmatpush3.bf16.msra.mxu0 %v3934_v35 }
 0xd46   :  { %3492 = vmatprep.subr.bf16.mxu0 %v3935_v39 }
 0xd49   :  { %3493 = vmatpush3.bf16.msra.mxu0 %v3936_v61 }
 0xd4a   :  { %3494 = vmatprep.subr.bf16.mxu0 %v3937_v37 }
 0xd4d   :  { %3495 = vmatpush3.bf16.msra.mxu0 %v3938_v38 }
 0xd4e   :  { %3496 = vmatprep.subr.bf16.mxu0 %v3939_v20 }
 0xd51   :  { %3497 = vmatpush3.bf16.msra.mxu0 %v3940_v40 }
 0xd52   :  { %3498 = vmatprep.subr.bf16.mxu0 %v3941_v9 }
 0xd55   :  { %3499 = vmatpush3.bf16.msra.mxu0 %v3942_v23 }
 0xe00   :  { %v2800_v11 = vpop.f32.mrf.mxu0 }
 0xe01   :  { %v2801_v12 = vadd.f32 %v3337_v43, %v2800_v11  ;;  %v3944_v11 = vld [vmem:[%s5096_s17 + $0x8] sm:$0xff]  }
 0xe02   :  { %v3780_v14 = vpop.f32.mrf.mxu0 }
 0xe03   :  { %v2807_v46 = vadd.f32 %v2801_v12, %v4724_v47  ;;  %v3945_v12 = vld [vmem:[%s5096_s17 + $0x40] sm:$0xff]  }
 0xe04   :  { %v2803_v51 = vpop.f32.mrf.mxu0  ;;  %v3946_v14 = vld [vmem:[%s5096_s17] sm:$0xff]  }
 0xe05   :  { %v2804_v15 = vadd.f32 %v3337_v43, %v2803_v51  ;;  %2811 = vadd.xlane.f32.xlu0 %v2807_v46  ;;  %v3943_v43 = vld [vmem:[%s5096_s17 + $0x48] sm:$0xff]  }
 0xe06   :  { %v3781_v17 = vpop.f32.mrf.mxu0  ;;  %3500 = vmatprep.subr.bf16.mxu0 %v3943_v43 }
 0xe07   :  { %v2808_v62 = vadd.f32 %v2804_v15, %v4726_v48  ;;  %3501 = vmatpush3.bf16.msra.mxu0 %v3944_v11 }
 0xe08   :  { %3502 = vmatprep.subr.bf16.mxu0 %v3945_v12 }
 0xe09   :  { %2813 = vadd.xlane.f32.xlu1 %v2808_v62 }
 0xe0b   :  { %3503 = vmatpush3.bf16.msra.mxu0 %v3946_v14 }
 0xe8e   :  { %v2812_v3 = vpop.xlane.xlu0 %2811 }
 0xe8f   :  { %v2815_v24 = vmul.f32 0.0078125, %v2812_v3 }
 0xe91   :  { %v4965_v47 = vsub.f32 %v2807_v46, %v2815_v24  ;;  %v2866_v46 = vld [vmem:[%s5095_s16] sm:$0x3] }
 0xe92   :  { %v2814_v25 = vpop.xlane.xlu1 %2813  ;;  %v2875_v15 = vrot.slane %v2866_v46, %v4420_v30  ;;  %v2871_v17 = vrot.slane %v2866_v46, %v4418_v29  ;;  %v3364_v29 = vld [vmem:[%s5097_s18] ss:$0 sm:$0xff] }
 0xe93   :  { %v2816_v56 = vmul.f32 0.0078125, %v2814_v25  ;;  %v2819_v48 = vmul.f32 %v4965_v47, %v4965_v47 }
 0xe95   :  { %v4969_v26 = vsub.f32 %v2808_v62, %v2816_v56  ;;  %2821 = vadd.xlane.f32.xlu0 %v2819_v48 }
 0xe97   :  { %v2820_v27 = vmul.f32 %v4969_v26, %v4969_v26 }
 0xe99   :  { %2823 = vadd.xlane.f32.xlu0 %v2820_v27 }
 0xf1e   :  { %v2822_v16 = vpop.xlane.xlu0 %2821 }
 0xf1f   :  { %v2825_v41 = vmul.f32 0.0078125, %v2822_v16 }
 0xf21   :  { %v2827_v42 = vadd.f32 1e-05, %v2825_v41 }
 0xf22   :  { %v2824_v44 = vpop.xlane.xlu0 %2823 }
 0xf23   :  { %4016 = vrsqrt.f32 %v2827_v42  ;;  %v2826_v45 = vmul.f32 0.0078125, %v2824_v44  ;;  %v3381_v44 = vld [vmem:[#allocation9] ss:$0 sm:$0xff] }
 0xf25   :  { %v2828_v63 = vadd.f32 1e-05, %v2826_v45 }
 0xf27   :  { %4018 = vrsqrt.f32 %v2828_v63 }
 0xf30   :  { %v4017_v49 = vpop.eup %4016 }
 0xf31   :  { %v2831_v59 = vmul.f32 %v4017_v49, %v4965_v47 }
 0xf33   :  { %v2839_v54 = vmul.f32 %v3346_v4, %v2831_v59  ;;  %v3382_v59 = vld [vmem:[#allocation10] ss:$0 sm:$0xff] }
 0xf34   :  { %v4019_v50 = vpop.eup %4018 }
 0xf35   :  { %v2832_v53 = vmul.f32 %v4019_v50, %v4969_v26  ;;  %v2847_v6 = vadd.f32 %v3347_v58, %v2839_v54 }
 0xf37   :  { %v2840_v2 = vmul.f32 %v3346_v4, %v2832_v53 }
 0xf39   :  { %v2848_v7 = vadd.f32 %v3347_v58, %v2840_v2 }
 0xf3b   :  { %v2849_v0 = vpack.c.bf16 %v2848_v7, %v2847_v6 }
 0xf3d   :  { %2991 = vmatmul.mubr.bf16.vlgmr.msra.gmra.mxu1 %v2849_v0 }
 0xffd   :  { %v2992_v51 = vpop.f32.mrf.mxu1 }
 0xffe   :  { %v2993_v24 = vadd.f32 %v2992_v51, %v2871_v17 }
 0xfff   :  { %v2994_v62 = vpop.f32.mrf.mxu1 }
0x1000   :  { %v2995_v22 = vadd.f32 %v2994_v62, %v2875_v15  ;;  %v3001_v27 = vmax.f32 %v2993_v24, 0.0 }
0x1001   :  { %v2996_v18 = vpop.f32.mrf.mxu1 }
0x1002   :  { %v2997_v3 = vadd.f32 %v2996_v18, %v2871_v17  ;;  %v3002_v48 = vmax.f32 %v2995_v22, 0.0 }
0x1003   :  { %v2998_v47 = vpop.f32.mrf.mxu1 }
0x1004   :  { %v2999_v25 = vadd.f32 %v2998_v47, %v2875_v15  ;;  %v3003_v56 = vmax.f32 %v2997_v3, 0.0 }
0x1006   :  { %v3004_v26 = vmax.f32 %v2999_v25, 0.0  ;;  %v3005_v55 = vpack.c.bf16 %v3003_v56, %v3001_v27 }
0x1008   :  { %v3006_v28 = vpack.c.bf16 %v3004_v26, %v3002_v48 }
0x100a   :  { %3174 = vmatprep.mubr.bf16.mxu0 %v3006_v28 }
0x100b   :  { %3175 = vmatmul.mubr.bf16.vlgmr.msra.gmra.mxu0 %v3005_v55 }
0x10cb   :  { %v3504_v60 = vpop.f32.mrf.mxu0 }
0x10cd   :  { %v3505_v30 = vpop.f32.mrf.mxu0 }
0x10ce   :  { %v3506_v5 = vadd.f32 %v3505_v30, %v3504_v60 }
0x10cf   :  { %v3507_v57 = vpop.f32.mrf.mxu0 }
0x10d0   :  { %v3177_v31 = vadd.f32 %v3506_v5, %v3364_v29 }
0x10d1   :  { %v3508_v32 = vpop.f32.mrf.mxu0 }
0x10d2   :  { %v3509_v33 = vadd.f32 %v3508_v32, %v3507_v57  ;;  %v3183_v10 = vadd.f32 %v3177_v31, %v2847_v6 }
0x10d4   :  { %v3180_v21 = vadd.f32 %v3509_v33, %v3364_v29  ;;  %3187 = vadd.xlane.f32.xlu1 %v3183_v10 }
0x10d6   :  { %v3184_v1 = vadd.f32 %v3180_v21, %v2848_v7 }
0x10d8   :  { %3189 = vadd.xlane.f32.xlu0 %v3184_v1 }
0x115d   :  { %v3188_v19 = vpop.xlane.xlu1 %3187 }
0x115e   :  { %v3191_v36 = vmul.f32 0.0078125, %v3188_v19 }
0x1160   :  { %v3193_v13 = vsub.f32 %v3183_v10, %v3191_v36 }
0x1161   :  { %v3190_v52 = vpop.xlane.xlu0 %3189 }
0x1162   :  { %v3192_v34 = vmul.f32 0.0078125, %v3190_v52  ;;  %v3195_v8 = vmul.f32 %v3193_v13, %v3193_v13 }
0x1164   :  { %v3194_v35 = vsub.f32 %v3184_v1, %v3192_v34  ;;  %3197 = vadd.xlane.f32.xlu1 %v3195_v8 }
0x1166   :  { %v3196_v39 = vmul.f32 %v3194_v35, %v3194_v35 }
0x1168   :  { %3199 = vadd.xlane.f32.xlu0 %v3196_v39 }
0x11ed   :  { %v3198_v61 = vpop.xlane.xlu1 %3197 }
0x11ee   :  { %v3201_v37 = vmul.f32 0.0078125, %v3198_v61 }
0x11f0   :  { %v3203_v38 = vadd.f32 1e-05, %v3201_v37 }
0x11f1   :  { %v3200_v20 = vpop.xlane.xlu0 %3199 }
0x11f2   :  { %4020 = vrsqrt.f32 %v3203_v38  ;;  %v3202_v40 = vmul.f32 0.0078125, %v3200_v20 }
0x11f4   :  { %v3204_v16 = vadd.f32 1e-05, %v3202_v40 }
0x11f6   :  { %4022 = vrsqrt.f32 %v3204_v16 }
0x11ff   :  { %v4021_v41 = vpop.eup %4020 }
0x1200   :  { %v3207_v42 = vmul.f32 %v4021_v41, %v3193_v13 }
0x1202   :  { %v3215_v63 = vmul.f32 %v3381_v44, %v3207_v42 }
0x1203   :  { %v4023_v45 = vpop.eup %4022 }
0x1204   :  { %v3208_v49 = vmul.f32 %v4023_v45, %v3194_v35  ;;  %v3223_v50 = vadd.f32 %v3382_v59, %v3215_v63 }
0x1206   :  { %v3216_v4 = vmul.f32 %v3381_v44, %v3208_v49 }
0x1208   :  { %v3224_v53 = vadd.f32 %v3382_v59, %v3216_v4 }
0x120a   :  { %v3386_v54 = vpack.c.bf16 %v3224_v53, %v3223_v50 }
0x120c   :  { %3387 = vst [vmem:[%s5104_s25] sm:$0xff] %v3386_v54  }
0x120d   :  { %3233 = vsyncpa [#allocation3], 1 }
0x120e   :  { %3234 = vsyncpa [#allocation5], 1 }
0x120f   :  { %3235 = vsyncpa [#allocation8], 1 }
0x1210   :  { %3236 = vsyncpa [#allocation11], 1 }

// kernel: transformer_forward.11
= control target key start
LH: loop header
LB: loop body
LE: loop exit
PB: predicated region body
PF: predicated region fallthrough
CT: control target
= control target key end

     0   :  { %v243_v3 = vmov 0.0   ;;  %vm244_vm0 = vmmov 0   ;;  %s317_s0 = inlined_call_operand.vmem [shape: bf16[16,128], index: 0, kind: input, shape index: {}]   ;;  %s318_s3 = inlined_call_operand.vmem [shape: bf16[128,128], index: 3, kind: input, shape index: {}]   ;;  %s319_s1 = inlined_call_operand.vmem [shape: f32[1,128], index: 1, kind: input, shape index: {}]   ;;  %s320_s2 = inlined_call_operand.vmem [shape: f32[1,128], index: 2, kind: input, shape index: {}]   ;;  %s321_s4 = inlined_call_operand.vmem [shape: f32[1,128], index: 4, kind: input, shape index: {}]   ;;  %s322_s5 = inlined_call_operand.vmem [shape: f32[16,128], index: 5, kind: output, shape index: {}]  }
   0x1   :  { %v197_v0 = vld [vmem:[%s317_s0] sm:$0xff]   ;;  %209 = vmatprep.subr.bf16.mxu0 %v243_v3  ;;  %v231_v4 = vld [vmem:[%s318_s3 + $0x38] sm:$0xff]   ;;  %v232_v13 = vld [vmem:[%s318_s3 + $0x30] sm:$0xff]   ;;  %225 = vmatprep.mubr.msk.bf16.mxu0 %vm244_vm0, %v243_v3 }
   0x2   :  { %v198_v1 = vunpack.c.l.bf16 %v197_v0  ;;  %v199_v2 = vunpack.c.h.bf16 %v197_v0  ;;  %210 = vmatpush3.bf16.msra.mxu0 %v231_v4  ;;  %v233_v14 = vld [vmem:[%s318_s3 + $0x28] sm:$0xff]   ;;  %v234_v15 = vld [vmem:[%s318_s3 + $0x20] sm:$0xff]   ;;  %v235_v16 = vld [vmem:[%s318_s3 + $0x18] sm:$0xff]  }
   0x3   :  { %211 = vmatprep.subr.bf16.mxu0 %v243_v3  ;;  %v236_v17 = vld [vmem:[%s318_s3 + $0x10] sm:$0xff]   ;;  %v237_v18 = vld [vmem:[%s318_s3 + $0x8] sm:$0xff]   ;;  %v238_v19 = vld [vmem:[%s318_s3] sm:$0xff]  }
   0x4   :  { %27 = vadd.xlane.f32.xlu0 %v198_v1  ;;  %v185_v28 = vld [vmem:[%s319_s1] ss:$0 sm:$0xff] }
   0x5   :  { %v186_v32 = vld [vmem:[%s320_s2] ss:$0 sm:$0xff] }
   0x6   :  { %212 = vmatpush3.bf16.msra.mxu0 %v232_v13  ;;  %v187_v37 = vld [vmem:[%s321_s4] ss:$0 sm:$0xff] }
   0x7   :  { %213 = vmatprep.subr.bf16.mxu0 %v243_v3 }
   0x8   :  { %29 = vadd.xlane.f32.xlu0 %v199_v2 }
   0xa   :  { %214 = vmatpush3.bf16.msra.mxu0 %v233_v14 }
   0xb   :  { %215 = vmatprep.subr.bf16.mxu0 %v243_v3 }
   0xe   :  { %216 = vmatpush3.bf16.msra.mxu0 %v234_v15 }
   0xf   :  { %217 = vmatprep.subr.bf16.mxu0 %v243_v3 }
  0x12   :  { %218 = vmatpush3.bf16.msra.mxu0 %v235_v16 }
  0x13   :  { %219 = vmatprep.subr.bf16.mxu0 %v243_v3 }
  0x16   :  { %220 = vmatpush3.bf16.msra.mxu0 %v236_v17 }
  0x17   :  { %221 = vmatprep.subr.bf16.mxu0 %v243_v3 }
  0x1a   :  { %222 = vmatpush3.bf16.msra.mxu0 %v237_v18 }
  0x1b   :  { %223 = vmatprep.subr.bf16.mxu0 %v243_v3 }
  0x1e   :  { %224 = vmatpush3.bf16.msra.mxu0 %v238_v19 }
  0x8d   :  { %v28_v5 = vpop.xlane.xlu0 %27 }
  0x8e   :  { %v32_v6 = vmul.f32 0.0078125, %v28_v5 }
  0x90   :  { %v34_v7 = vsub.f32 %v198_v1, %v32_v6 }
  0x91   :  { %v30_v8 = vpop.xlane.xlu0 %29 }
  0x92   :  { %v33_v9 = vmul.f32 0.0078125, %v30_v8  ;;  %v36_v10 = vmul.f32 %v34_v7, %v34_v7 }
  0x94   :  { %v35_v11 = vsub.f32 %v199_v2, %v33_v9  ;;  %38 = vadd.xlane.f32.xlu1 %v36_v10 }
  0x96   :  { %v37_v12 = vmul.f32 %v35_v11, %v35_v11 }
  0x98   :  { %40 = vadd.xlane.f32.xlu1 %v37_v12 }
 0x11d   :  { %v39_v20 = vpop.xlane.xlu1 %38 }
 0x11e   :  { %v42_v21 = vmul.f32 0.0078125, %v39_v20 }
 0x120   :  { %v44_v22 = vadd.f32 1e-05, %v42_v21 }
 0x121   :  { %v41_v23 = vpop.xlane.xlu1 %40 }
 0x122   :  { %239 = vrsqrt.f32 %v44_v22  ;;  %v43_v24 = vmul.f32 0.0078125, %v41_v23 }
 0x124   :  { %v45_v25 = vadd.f32 1e-05, %v43_v24 }
 0x126   :  { %241 = vrsqrt.f32 %v45_v25 }
 0x12f   :  { %v240_v26 = vpop.eup %239 }
 0x130   :  { %v48_v27 = vmul.f32 %v240_v26, %v34_v7 }
 0x132   :  { %v56_v31 = vmul.f32 %v185_v28, %v48_v27 }
 0x133   :  { %v242_v29 = vpop.eup %241 }
 0x134   :  { %v49_v30 = vmul.f32 %v242_v29, %v35_v11  ;;  %v64_v34 = vadd.f32 %v186_v32, %v56_v31 }
 0x136   :  { %v57_v33 = vmul.f32 %v185_v28, %v49_v30 }
 0x138   :  { %v65_v35 = vadd.f32 %v186_v32, %v57_v33 }
 0x13a   :  { %v66_v36 = vpack.c.bf16 %v65_v35, %v64_v34 }
 0x13c   :  { %226 = vmatmul.mubr.bf16.vlgmr.msra.gmra.mxu0 %v66_v36 }
 0x1fc   :  { %v172_v38 = vpop.f32.mrf.mxu0 }
 0x1fd   :  { %v173_v39 = vadd.f32 %v187_v37, %v172_v38 }
 0x1fe   :  { %v227_v40 = vpop.f32.mrf.mxu0 }
 0x1ff   :  { %179 = vst [vmem:[%s322_s5] sm:$0xff] %v173_v39 }
 0x200   :  { %v175_v41 = vpop.f32.mrf.mxu0 }
 0x201   :  { %v176_v42 = vadd.f32 %v187_v37, %v175_v41 }
 0x202   :  { %v228_v43 = vpop.f32.mrf.mxu0 }
 0x203   :  { %180 = vst [vmem:[%s322_s5 + $0x8] sm:$0xff] %v176_v42 }

// kernel: transformer_forward.10
= control target key start
LH: loop header
LB: loop body
LE: loop exit
PB: predicated region body
PF: predicated region fallthrough
CT: control target
= control target key end

     0   :  { %v3937_v1 = vmov 0   ;;  %v3938_v2 = vmov 0.0   ;;  %vm3939_vm0 = vmmov 0   ;;  %v122_v27 = vlaneseq  ;;  %s3940_s28 = smov 64   ;;  %s4911_s5 = inlined_call_operand.vmem [shape: bf16[128,384], index: 5, kind: input, shape index: {}]   ;;  %s4912_s0 = inlined_call_operand.vmem [shape: bf16[2,8,128], index: 0, kind: input, shape index: {}]   ;;  %s4913_s6 = inlined_call_operand.vmem [shape: f32[1,384], index: 6, kind: input, shape index: {}]   ;;  %s4914_s2 = inlined_call_operand.vmem [shape: f32[8,8], index: 2, kind: input, shape index: {}]   ;;  %s4915_s3 = inlined_call_operand.vmem [shape: f32[2,1,8], index: 3, kind: input, shape index: {}]   ;;  %s4916_s7 = inlined_call_operand.vmem [shape: bf16[128,128], index: 7, kind: input, shape index: {}]   ;;  %s4917_s8 = inlined_call_operand.vmem [shape: f32[1,128], index: 8, kind: input, shape index: {}]   ;;  %s4918_s11 = inlined_call_operand.vmem [shape: bf16[128,256], index: 11, kind: input, shape index: {}]   ;;  %s4919_s9 = inlined_call_operand.vmem [shape: bf16[128,128], index: 9, kind: input, shape index: {}]   ;;  %s4920_s1 = inlined_call_operand.vmem [shape: bf16[2,8,128], index: 1, kind: input, shape index: {}]   ;;  %s4921_s19 = inlined_call_operand.vmem [shape: f32[1,128], index: 19, kind: input, shape index: {}]   ;;  %s4922_s20 = inlined_call_operand.vmem [shape: f32[1,128], index: 20, kind: input, shape index: {}]   ;;  %s4923_s12 = inlined_call_operand.vmem [shape: f32[1,256], index: 12, kind: input, shape index: {}]   ;;  %s4924_s10 = inlined_call_operand.vmem [shape: f32[1,128], index: 10, kind: input, shape index: {}]   ;;  %s4925_s4 = inlined_call_operand.vmem [shape: f32[2,1,8], index: 4, kind: input, shape index: {}]   ;;  %s4926_s13 = inlined_call_operand.vmem [shape: bf16[128,128], index: 13, kind: input, shape index: {}]   ;;  %s4927_s14 = inlined_call_operand.vmem [shape: f32[1,128], index: 14, kind: input, shape index: {}]   ;;  %s4928_s15 = inlined_call_operand.vmem [shape: bf16[128,256], index: 15, kind: input, shape index: {}]   ;;  %s4929_s17 = inlined_call_operand.vmem [shape: bf16[256,128], index: 17, kind: input, shape index: {}]   ;;  %s4930_s21 = inlined_call_operand.vmem [shape: f32[1,128], index: 21, kind: input, shape index: {}]   ;;  %s4931_s22 = inlined_call_operand.vmem [shape: f32[1,128], index: 22, kind: input, shape index: {}]   ;;  %s4932_s16 = inlined_call_operand.vmem [shape: f32[1,256], index: 16, kind: input, shape index: {}]   ;;  %s4933_s18 = inlined_call_operand.vmem [shape: f32[1,128], index: 18, kind: input, shape index: {}]   ;;  %s4934_s23 = inlined_call_operand.vmem [shape: f32[1,128], index: 23, kind: input, shape index: {}]   ;;  %s4935_s24 = inlined_call_operand.vmem [shape: f32[1,128], index: 24, kind: input, shape index: {}]   ;;  %s4936_s25 = inlined_call_operand.vmem [shape: bf16[2,8,128], index: 25, kind: output, shape index: {}]  }
   0x1   :  { %4942 = sst [smem:[#allocation2_spill]] %s4911_s5  ;;  %303 = vmatprep.mubr.bf16.mxu0 %v3937_v1  ;;  %3430 = vmatprep.subr.bf16.mxu1 %v3938_v2  ;;  %vm389_vm1 = vcmask 261120   ;;  %s3942_s5 = smov 32   ;;  %vm622_vm2 = vcmask 1043456   ;;  %vm574_vm3 = vcmask 64512   ;;  %vm821_vm4 = vcmask 523264  }
   0x2   :  { %4943 = sst [smem:[#allocation3_spill]] %s4912_s0  ;;  %3446 = vmatprep.mubr.msk.bf16.mxu1 %vm3939_vm0, %v3938_v2  ;;  %v123_v28 = vshrl.u32 %v122_v27, 7  ;;  %vm823_vm5 = vcmask 785408  }
   0x3   :  { %4944 = sst [smem:[#allocation4_spill]] %s4913_s6 }
   0x4   :  { %4945 = sst [smem:[#allocation5_spill]] %s4914_s2  ;;  %v4169_v29 = vsub.s32 0, %v123_v28  ;;  %v4171_v30 = vsub.s32 1, %v123_v28  ;;  %v132_v47 = vsub.s32 2, %v123_v28 }
   0x5   :  { %4946 = sst [smem:[#allocation6_spill]] %s4915_s3 }
   0x6   :  { %4947 = sst [smem:[#allocation7_spill]] %s4916_s7  ;;  %s3941_s7 = smov 96  }
   0x7   :  { %4948 = sst [smem:[#allocation8_spill]] %s4917_s8 }
   0x8   :  { %4949 = sst [smem:[#allocation9_spill]] %s4918_s11 }
   0x9   :  { %4950 = sst [smem:[#allocation10_spill]] %s4919_s9 }
   0xa   :  { %4951 = sst [smem:[#allocation11_spill]] %s4920_s1 }
   0xb   :  { %s4952_s8 = sld [smem:[#allocation2_spill]] }
   0xc   :  { %s4953_s30 = sld [smem:[#allocation3_spill]] }
   0xd   :  { %s4954_s3 = sld [smem:[#allocation4_spill]] }
   0xe   :  { %s4956_s26 = sld [smem:[#allocation6_spill]] }
   0xf   :  { %s4957_s1 = sld [smem:[#allocation7_spill]] }
  0x10   :  { %s4958_s11 = sld [smem:[#allocation8_spill]] }
  0x11   :  { %v3738_v0 = vld [vmem:[%s4952_s8 + $0xac] ss:$12 sps:$4 sm:$0xff]   ;;  %v3740_v3 = vld [vmem:[%s4952_s8 + $0xa8] ss:$12 sps:$4 sm:$0xff]   ;;  %v3743_v5 = vld [vmem:[%s4952_s8 + $0x90] ss:$12 sps:$4 sm:$0xff]  }
  0x12   :  { %271 = vmatprep.subr.bf16.mxu0 %v3738_v0  ;;  %v3741_v4 = vld [vmem:[%s4952_s8 + $0x94] ss:$12 sps:$4 sm:$0xff]   ;;  %v3744_v6 = vld [vmem:[%s4952_s8 + $0x7c] ss:$12 sps:$4 sm:$0xff]   ;;  %v3746_v7 = vld [vmem:[%s4952_s8 + $0x78] ss:$12 sps:$4 sm:$0xff]  }
  0x13   :  { %272 = vmatpush1.bf16.msra.mxu0 %v3740_v3  ;;  %v3747_v8 = vld [vmem:[%s4952_s8 + $0x64] ss:$12 sps:$4 sm:$0xff]   ;;  %v3749_v9 = vld [vmem:[%s4952_s8 + $0x60] ss:$12 sps:$4 sm:$0xff]   ;;  %v3752_v13 = vld [vmem:[%s4952_s8 + $0x48] ss:$12 sps:$4 sm:$0xff]  }
  0x14   :  { %273 = vmatprep.subr.bf16.mxu0 %v3741_v4  ;;  %v3763_v10 = vld [vmem:[%s4952_s8 + $0xb0] ss:$12 sps:$4 sm:$0xff]   ;;  %v3750_v11 = vld [vmem:[%s4952_s8 + $0x4c] ss:$12 sps:$4 sm:$0xff]   ;;  %v3753_v14 = vld [vmem:[%s4952_s8 + $0x34] ss:$12 sps:$4 sm:$0xff]  }
  0x15   :  { %3431 = vmatpush3.bf16.msra.mxu1 %v3763_v10  ;;  %v3764_v12 = vld [vmem:[%s4952_s8 + $0x98] ss:$12 sps:$4 sm:$0xff]   ;;  %v3765_v15 = vld [vmem:[%s4952_s8 + $0x80] ss:$12 sps:$4 sm:$0xff]   ;;  %v3755_v16 = vld [vmem:[%s4952_s8 + $0x30] ss:$12 sps:$4 sm:$0xff]  }
  0x16   :  { %3432 = vmatprep.subr.bf16.mxu1 %v3938_v2  ;;  %v3756_v17 = vld [vmem:[%s4952_s8 + $0x1c] ss:$12 sps:$4 sm:$0xff]   ;;  %v3758_v19 = vld [vmem:[%s4952_s8 + $0x18] ss:$12 sps:$4 sm:$0xff]   ;;  %v3761_v22 = vld [vmem:[%s4952_s8] ss:$12 sps:$4 sm:$0xff]  }
  0x17   :  { %274 = vmatpush1.bf16.msra.mxu0 %v3743_v5  ;;  %v3766_v18 = vld [vmem:[%s4952_s8 + $0x68] ss:$12 sps:$4 sm:$0xff]   ;;  %v3759_v20 = vld [vmem:[%s4952_s8 + $0x4] ss:$12 sps:$4 sm:$0xff]   ;;  %v3769_v25 = vld [vmem:[%s4952_s8 + $0x20] ss:$12 sps:$4 sm:$0xff]  }
  0x18   :  { %275 = vmatprep.subr.bf16.mxu0 %v3744_v6  ;;  %v3767_v21 = vld [vmem:[%s4952_s8 + $0x50] ss:$12 sps:$4 sm:$0xff]   ;;  %v4145_v23 = vld [vmem:[%s4953_s30] sm:$0xff]   ;;  %v3770_v26 = vld [vmem:[%s4952_s8 + $0x8] ss:$12 sps:$4 sm:$0xff]   ;;  %s4955_s30 = sld [smem:[#allocation5_spill]] }
  0x19   :  { %3433 = vmatpush3.bf16.msra.mxu1 %v3764_v12  ;;  %v3768_v24 = vld [vmem:[%s4952_s8 + $0x38] ss:$12 sps:$4 sm:$0xff]   ;;  %v120_v31 = vld [vmem:[%s4954_s3] sm:$0x7]  ;;  %s4959_s0 = sld [smem:[#allocation9_spill]] }
  0x1a   :  { %3434 = vmatprep.subr.bf16.mxu1 %v3938_v2  ;;  %v125_v34 = vrot.slane %v120_v31, %v4169_v29  ;;  %v129_v35 = vrot.slane %v120_v31, %v4171_v30  ;;  %v133_v48 = vrot.slane %v120_v31, %v132_v47  ;;  %v3182_v5 = vld [vmem:[%s4956_s26] ss:$0 sm:$0xff]  ;;  %s4960_s27 = sld [smem:[#allocation10_spill]] }
  0x1b   :  { %276 = vmatpush1.bf16.msra.mxu0 %v3746_v7  ;;  %s4961_s8 = sld [smem:[#allocation11_spill]] }
  0x1c   :  { %277 = vmatprep.subr.bf16.mxu0 %v3747_v8 }
  0x1d   :  { %3435 = vmatpush3.bf16.msra.mxu1 %v3765_v15 }
  0x1e   :  { %3436 = vmatprep.subr.bf16.mxu1 %v3938_v2  ;;  %v4244_v4 = vld [vmem:[%s4955_s30] sm:$0xff] }
  0x1f   :  { %278 = vmatpush1.bf16.msra.mxu0 %v3749_v9  ;;  %v367_v6 = vadd.f32 %v3182_v5, %v4244_v4 }
  0x20   :  { %279 = vmatprep.subr.bf16.mxu0 %v3750_v11 }
  0x21   :  { %3437 = vmatpush3.bf16.msra.mxu1 %v3766_v18 }
  0x22   :  { %3438 = vmatprep.subr.bf16.mxu1 %v3938_v2 }
  0x23   :  { %280 = vmatpush1.bf16.msra.mxu0 %v3752_v13 }
  0x24   :  { %281 = vmatprep.subr.bf16.mxu0 %v3753_v14 }
  0x25   :  { %3439 = vmatpush3.bf16.msra.mxu1 %v3767_v21 }
  0x26   :  { %3440 = vmatprep.subr.bf16.mxu1 %v3938_v2 }
  0x27   :  { %282 = vmatpush1.bf16.msra.mxu0 %v3755_v16 }
  0x28   :  { %283 = vmatprep.subr.bf16.mxu0 %v3756_v17 }
  0x29   :  { %3441 = vmatpush3.bf16.msra.mxu1 %v3768_v24 }
  0x2a   :  { %3442 = vmatprep.subr.bf16.mxu1 %v3938_v2 }
  0x2b   :  { %284 = vmatpush1.bf16.msra.mxu0 %v3758_v19 }
  0x2c   :  { %285 = vmatprep.subr.bf16.mxu0 %v3759_v20 }
  0x2d   :  { %3443 = vmatpush3.bf16.msra.mxu1 %v3769_v25 }
  0x2e   :  { %3444 = vmatprep.subr.bf16.mxu1 %v3938_v2 }
  0x2f   :  { %286 = vmatpush1.bf16.msra.mxu0 %v3761_v22 }
  0x30   :  { %3474 = vmatprep.subr.bf16.mxu0 %v3938_v2 }
  0x31   :  { %3445 = vmatpush3.bf16.msra.mxu1 %v3770_v26 }
  0x32   :  { %304 = vmatmul.mubr.bf16.vlgmr.msra.gmra.mxu0 %v4145_v23  ;;  %3450 = vmatprep.subr.bf16.mxu1 %v3938_v2 }
  0x33   :  { %3476 = vmatprep.mubr.msk.bf16.mxu0 %vm3939_vm0, %v3938_v2 }
  0x34   :  { %3447 = vmatmul.mubr.bf16.vlgmr.msra.gmra.mxu1 %v4145_v23 }
  0x35   :  { %3452 = vmatprep.mubr.msk.bf16.mxu1 %vm3939_vm0, %v3938_v2 }
  0xf2   :  { %v305_v32 = vpop.f32.mrf.mxu0 }
  0xf3   :  { %v306_v39 = vadd.f32 %v305_v32, %v125_v34 }
  0xf4   :  { %v307_v33 = vpop.f32.mrf.mxu0  ;;  %v348_v49 = vpop.f32.mrf.mxu1 }
  0xf5   :  { %v308_v40 = vadd.f32 %v307_v33, %v129_v35  ;;  %v355_v44 = vmul.f32 0.17677669, %v306_v39  ;;  %v349_v51 = vadd.f32 %v348_v49, %v133_v48 }
  0xf6   :  { %v309_v36 = vpop.f32.mrf.mxu0  ;;  %v3448_v50 = vpop.f32.mrf.mxu1 }
  0xf7   :  { %v310_v37 = vadd.f32 %v309_v36, %v125_v34 }
  0xf8   :  { %v311_v38 = vpop.f32.mrf.mxu0  ;;  %v351_v52 = vpop.f32.mrf.mxu1 }
  0xf9   :  { %v312_v41 = vadd.f32 %v311_v38, %v129_v35  ;;  %v356_v42 = vmul.f32 0.17677669, %v310_v37  ;;  %v352_v53 = vadd.f32 %v351_v52, %v133_v48 }
  0xfa   :  { %v3449_v54 = vpop.f32.mrf.mxu1 }
  0xfb   :  { %v4178_v43 = vpack.c.bf16 %v312_v41, %v308_v40  ;;  %v4186_v46 = vpack.c.bf16 %v356_v42, %v355_v44  ;;  %v4201_v55 = vpack.c.bf16 %v352_v53, %v349_v51 }
  0xfd   :  { %378 = vrot.lane.b32.xlu1 %v4178_v43, %s3940_s28  ;;  %376 = vrot.lane.b32.xlu0 %v4178_v43, %s3941_s7  ;;  %v394_v45 = vsel %vm389_vm1, %v4178_v43, 0  ;;  %v624_v56 = vsel %vm622_vm2, %v4201_v55, 0 }
  0xfe   :  { %3451 = vmatpush3.bf16.xpose.msra.mxu1 %v394_v45  ;;  %3475 = vmatpush3.bf16.msra.mxu0 %v624_v56 }
  0xff   :  { %3456 = vmatprep.subr.bf16.mxu1 %v3938_v2  ;;  %3486 = vmatprep.subr.bf16.mxu0 %v3938_v2 }
 0x101   :  { %371 = vrot.lane.b32.xlu1 %v4186_v46, %s3940_s28  ;;  %369 = vrot.lane.b32.xlu0 %v4186_v46, %s3941_s7 }
 0x105   :  { %373 = vrot.lane.b32.xlu1 %v4186_v46, %s3942_s5  ;;  %380 = vrot.lane.b32.xlu0 %v4178_v43, %s3942_s5 }
 0x106   :  { %3453 = vmatmul.mubr.msk.bf16.vlgmr.msra.gmra.mxu1 %vm389_vm1, %v4186_v46 }
 0x107   :  { %3458 = vmatprep.mubr.msk.bf16.mxu1 %vm3939_vm0, %v3938_v2 }
 0x109   :  { %383 = vrot.lane.b32.xlu1 %v4201_v55, %s3941_s7 }
 0x16f   :  { %v4208_v57 = vpop.permute.xlu0 %376  ;;  %v4213_v59 = vpop.permute.xlu1 %378 }
 0x170   :  { %v440_v58 = vsel %vm389_vm1, %v4208_v57, 0  ;;  %v486_v61 = vsel %vm389_vm1, %v4213_v59, 0 }
 0x171   :  { %3457 = vmatpush3.bf16.xpose.msra.mxu1 %v440_v58 }
 0x172   :  { %3462 = vmatprep.subr.bf16.mxu1 %v3938_v2 }
 0x173   :  { %v4215_v60 = vpop.permute.xlu0 %369  ;;  %v4226_v63 = vpop.permute.xlu1 %371 }
 0x177   :  { %v4224_v62 = vpop.permute.xlu0 %380  ;;  %v4235_v3 = vpop.permute.xlu1 %373 }
 0x178   :  { %3459 = vmatmul.mubr.msk.bf16.vlgmr.msra.gmra.mxu1 %vm389_vm1, %v4215_v60  ;;  %v532_v0 = vsel %vm389_vm1, %v4224_v62, 0 }
 0x179   :  { %3463 = vmatpush3.bf16.xpose.msra.mxu1 %v486_v61  ;;  %3464 = vmatprep.mubr.msk.bf16.mxu1 %vm3939_vm0, %v3938_v2 }
 0x17a   :  { %3468 = vmatprep.subr.bf16.mxu1 %v3938_v2 }
 0x17b   :  { %v4251_v13 = vpop.permute.xlu1 %383 }
 0x17c   :  { %v670_v14 = vsel %vm622_vm2, %v4251_v13, 0 }
 0x180   :  { %3465 = vmatmul.mubr.msk.bf16.vlgmr.msra.gmra.mxu1 %vm389_vm1, %v4226_v63 }
 0x181   :  { %3469 = vmatpush3.bf16.xpose.msra.mxu1 %v532_v0  ;;  %3470 = vmatprep.mubr.msk.bf16.mxu1 %vm3939_vm0, %v3938_v2  ;;  %v835_v0 = vrot.slane %v4178_v43, 4 }
 0x182   :  { %3480 = vmatprep.subr.bf16.mxu1 %v3938_v2 }
 0x188   :  { %3471 = vmatmul.mubr.msk.bf16.vlgmr.msra.gmra.mxu1 %vm389_vm1, %v4235_v3 }
 0x189   :  { %3482 = vmatprep.mubr.msk.bf16.mxu1 %vm3939_vm0, %v3938_v2  ;;  %3481 = vmatpush3.bf16.msra.mxu1 %v670_v14 }
 0x18a   :  { %3492 = vmatprep.subr.bf16.mxu1 %v3938_v2 }
 0x1c6   :  { %v430_v7 = vpop.f32.mrf.mxu1 }
 0x1c7   :  { %v431_v8 = vadd.f32 %v430_v7, %v367_v6  ;;  %v840_v7 = vsel %vm389_vm1, %v835_v0, 0 }
 0x1c8   :  { %v3454_v9 = vpop.f32.mrf.mxu1 }
 0x1c9   :  { %v575_v10 = vsel %vm574_vm3, %v431_v8, -inf  ;;  %v883_v9 = vrot.slane %v4208_v57, 4  ;;  %v1070_v57 = vrot.slane %v4201_v55, 4 }
 0x1ca   :  { %576 = vmax.xlane.f32.xlu0 %v575_v10  ;;  %v433_v11 = vpop.f32.mrf.mxu1 }
 0x1cb   :  { %v834_v11 = vrot.slane %v4186_v46, 4  ;;  %v979_v46 = vrot.slane %v4224_v62, 4 }
 0x1cc   :  { %v3455_v12 = vpop.f32.mrf.mxu1 }
 0x1cd   :  { %v888_v12 = vsel %vm389_vm1, %v883_v9, 0 }
 0x238   :  { %v476_v15 = vpop.f32.mrf.mxu1 }
 0x239   :  { %v477_v16 = vadd.f32 %v476_v15, %v367_v6  ;;  %v882_v15 = vrot.slane %v4215_v60, 4  ;;  %v978_v60 = vrot.slane %v4235_v3, 4 }
 0x23a   :  { %v3460_v17 = vpop.f32.mrf.mxu1 }
 0x23b   :  { %v578_v18 = vsel %vm574_vm3, %v477_v16, -inf  ;;  %v1075_v17 = vsel %vm622_vm2, %v1070_v57, 0 }
 0x23c   :  { %579 = vmax.xlane.f32.xlu1 %v578_v18  ;;  %v479_v19 = vpop.f32.mrf.mxu1 }
 0x23e   :  { %v3461_v20 = vpop.f32.mrf.mxu1 }
 0x240   :  { %v522_v21 = vpop.f32.mrf.mxu1 }
 0x241   :  { %v523_v22 = vadd.f32 %v522_v21, %v367_v6 }
 0x242   :  { %v3466_v24 = vpop.f32.mrf.mxu1 }
 0x243   :  { %v581_v25 = vsel %vm574_vm3, %v523_v22, -inf }
 0x244   :  { %582 = vmax.xlane.f32.xlu0 %v581_v25  ;;  %v525_v26 = vpop.f32.mrf.mxu1 }
 0x245   :  { %v3192_v26 = vld [vmem:[%s4956_s26 + $0x1] ss:$0 sm:$0xff] }
 0x246   :  { %v3467_v27 = vpop.f32.mrf.mxu1 }
 0x248   :  { %v568_v28 = vpop.f32.mrf.mxu1 }
 0x249   :  { %v569_v31 = vadd.f32 %v568_v28, %v367_v6  ;;  %v833_v28 = vadd.f32 %v3192_v26, %v4244_v4 }
 0x24a   :  { %v3472_v32 = vpop.f32.mrf.mxu1 }
 0x24b   :  { %v584_v33 = vsel %vm574_vm3, %v569_v31, -inf }
 0x24c   :  { %585 = vmax.xlane.f32.xlu0 %v584_v33  ;;  %v571_v34 = vpop.f32.mrf.mxu1 }
 0x24d   :  { %387 = vrot.lane.b32.xlu1 %v4201_v55, %s3942_s5 }
 0x24e   :  { %v3473_v35 = vpop.f32.mrf.mxu1 }
 0x253   :  { %v577_v36 = vpop.xlane.xlu0 %576 }
 0x254   :  { %v587_v37 = vsub.f32 %v431_v8, %v577_v36  ;;  %v931_v8 = vrot.slane %v4213_v59, 4  ;;  %v930_v59 = vrot.slane %v4226_v63, 4 }
 0x256   :  { %v591_v38 = vmul.f32 1.442695, %v587_v37  ;;  %v936_v14 = vsel %vm389_vm1, %v931_v8, 0 }
 0x258   :  { %3861 = vpow2.f32 %v591_v38 }
 0x262   :  { %385 = vrot.lane.b32.xlu0 %v4201_v55, %s3940_s28  ;;  %v1117_v55 = vrot.slane %v4251_v13, 4 }
 0x264   :  { %v1122_v62 = vsel %vm622_vm2, %v1117_v55, 0 }
 0x265   :  { %v4263_v39 = vpop.eup %3861 }
 0x266   :  { %v615_v40 = vpack.c.bf16 %v4263_v39, %v4263_v39  ;;  %v599_v57 = vsel %vm574_vm3, %v4263_v39, 0.0 }
 0x268   :  { %3477 = vmatmul.mubr.msk.bf16.vlgmr.msra.gmra.mxu0 %vm574_vm3, %v615_v40 }
 0x269   :  { %3488 = vmatprep.mubr.msk.bf16.mxu0 %vm3939_vm0, %v3938_v2 }
 0x2c5   :  { %v580_v41 = vpop.xlane.xlu1 %579 }
 0x2c6   :  { %v588_v42 = vsub.f32 %v477_v16, %v580_v41  ;;  %v984_v16 = vsel %vm389_vm1, %v979_v46, 0 }
 0x2c8   :  { %v593_v44 = vmul.f32 1.442695, %v588_v42 }
 0x2c9   :  { %v4272_v52 = vpop.permute.xlu1 %387 }
 0x2ca   :  { %3863 = vpow2.f32 %v593_v44  ;;  %v762_v58 = vsel %vm622_vm2, %v4272_v52, 0 }
 0x2cd   :  { %v583_v45 = vpop.xlane.xlu0 %582 }
 0x2ce   :  { %v589_v47 = vsub.f32 %v523_v22, %v583_v45 }
 0x2d0   :  { %v595_v48 = vmul.f32 1.442695, %v589_v47 }
 0x2d2   :  { %3865 = vpow2.f32 %v595_v48 }
 0x2d5   :  { %v586_v49 = vpop.xlane.xlu0 %585 }
 0x2d6   :  { %v590_v50 = vsub.f32 %v569_v31, %v586_v49 }
 0x2d7   :  { %v4270_v51 = vpop.eup %3863 }
 0x2d8   :  { %v597_v53 = vmul.f32 1.442695, %v590_v50  ;;  %v616_v54 = vpack.c.bf16 %v4270_v51, %v4270_v51  ;;  %v602_v9 = vsel %vm574_vm3, %v4270_v51, 0.0 }
 0x2d9   :  { %v4276_v56 = vpop.permute.xlu0 %385 }
 0x2da   :  { %3867 = vpow2.f32 %v597_v53  ;;  %v716_v61 = vsel %vm622_vm2, %v4276_v56, 0  ;;  %3483 = vmatmul.mubr.msk.bf16.vlgmr.msra.gmra.mxu1 %vm574_vm3, %v616_v54 }
 0x2db   :  { %3493 = vmatpush3.bf16.msra.mxu1 %v762_v58  ;;  %3487 = vmatpush3.bf16.msra.mxu0 %v716_v61 }
 0x2dc   :  { %3498 = vmatprep.subr.bf16.mxu0 %v3938_v2  ;;  %3494 = vmatprep.mubr.msk.bf16.mxu1 %vm3939_vm0, %v3938_v2 }
 0x2dd   :  { %3504 = vmatprep.subr.bf16.mxu1 %v3938_v2 }
 0x2df   :  { %v4288_v5 = vpop.eup %3865 }
 0x2e0   :  { %v617_v6 = vpack.c.bf16 %v4288_v5, %v4288_v5 }
 0x2e2   :  { %3489 = vmatmul.mubr.msk.bf16.vlgmr.msra.gmra.mxu0 %vm574_vm3, %v617_v6 }
 0x2e3   :  { %3499 = vmatpush3.bf16.xpose.msra.mxu0 %v840_v7  ;;  %3500 = vmatprep.mubr.msk.bf16.mxu0 %vm3939_vm0, %v3938_v2 }
 0x2e4   :  { %3510 = vmatprep.subr.bf16.mxu0 %v3938_v2 }
 0x2e7   :  { %v4299_v43 = vpop.eup %3867 }
 0x2e8   :  { %v618_v10 = vpack.c.bf16 %v4299_v43, %v4299_v43  ;;  %v608_v46 = vsel %vm574_vm3, %v4299_v43, 0.0 }
 0x2ea   :  { %3495 = vmatmul.mubr.msk.bf16.vlgmr.msra.gmra.mxu1 %vm574_vm3, %v618_v10  ;;  %3501 = vmatmul.mubr.msk.bf16.vlgmr.msra.gmra.mxu0 %vm389_vm1, %v834_v11 }
 0x2eb   :  { %3505 = vmatpush3.bf16.xpose.msra.mxu1 %v888_v12  ;;  %3511 = vmatpush3.bf16.xpose.msra.mxu0 %v936_v14  ;;  %v605_v14 = vsel %vm574_vm3, %v4288_v5, 0.0 }
 0x2ec   :  { %3506 = vmatprep.mubr.msk.bf16.mxu1 %vm3939_vm0, %v3938_v2  ;;  %3512 = vmatprep.mubr.msk.bf16.mxu0 %vm3939_vm0, %v3938_v2 }
 0x2ed   :  { %3516 = vmatprep.subr.bf16.mxu1 %v3938_v2  ;;  %3522 = vmatprep.subr.bf16.mxu0 %v3938_v2 }
 0x2f2   :  { %3507 = vmatmul.mubr.msk.bf16.vlgmr.msra.gmra.mxu1 %vm389_vm1, %v882_v15  ;;  %3513 = vmatmul.mubr.msk.bf16.vlgmr.msra.gmra.mxu0 %vm389_vm1, %v930_v59 }
 0x2f3   :  { %3517 = vmatpush3.bf16.xpose.msra.mxu1 %v984_v16  ;;  %3523 = vmatpush3.bf16.msra.mxu0 %v1075_v17 }
 0x2f4   :  { %3518 = vmatprep.mubr.msk.bf16.mxu1 %vm3939_vm0, %v3938_v2  ;;  %3528 = vmatprep.subr.bf16.mxu1 %v3938_v2 }
 0x2f5   :  { %3524 = vmatprep.mubr.msk.bf16.mxu0 %vm3939_vm0, %v3938_v2  ;;  %3534 = vmatprep.subr.bf16.mxu0 %v3938_v2 }
 0x2fa   :  { %3519 = vmatmul.mubr.msk.bf16.vlgmr.msra.gmra.mxu1 %vm389_vm1, %v978_v60 }
 0x2fb   :  { %3529 = vmatpush3.bf16.msra.mxu1 %v1122_v62  ;;  %3530 = vmatprep.mubr.msk.bf16.mxu1 %vm3939_vm0, %v3938_v2 }
 0x2fc   :  { %3540 = vmatprep.subr.bf16.mxu1 %v3938_v2 }
 0x328   :  { %v4335_v63 = vpop.f32.mrf.mxu0 }
 0x32a   :  { %v3478_v18 = vpop.f32.mrf.mxu0 }
 0x32c   :  { %v663_v19 = vpop.f32.mrf.mxu0 }
 0x32d   :  { %v1164_v19 = vrot.slane %v4276_v56, 4 }
 0x32e   :  { %v3479_v20 = vpop.f32.mrf.mxu0 }
 0x39a   :  { %v4337_v21 = vpop.f32.mrf.mxu1 }
 0x39c   :  { %v3484_v13 = vpop.f32.mrf.mxu1 }
 0x39e   :  { %v709_v22 = vpop.f32.mrf.mxu1 }
 0x39f   :  { %v1169_v22 = vsel %vm622_vm2, %v1164_v19, 0 }
 0x3a0   :  { %v3485_v3 = vpop.f32.mrf.mxu1 }
 0x3a1   :  { %v1211_v3 = vrot.slane %v4272_v52, 4 }
 0x3a2   :  { %v4339_v24 = vpop.f32.mrf.mxu0 }
 0x3a4   :  { %v3490_v25 = vpop.f32.mrf.mxu0 }
 0x3a6   :  { %v755_v27 = vpop.f32.mrf.mxu0 }
 0x3a7   :  { %v1216_v27 = vsel %vm622_vm2, %v1211_v3, 0 }
 0x3a8   :  { %v3491_v31 = vpop.f32.mrf.mxu0 }
 0x3aa   :  { %v4345_v32 = vpop.f32.mrf.mxu1  ;;  %v876_v33 = vpop.f32.mrf.mxu0 }
 0x3ab   :  { %v877_v34 = vadd.f32 %v876_v33, %v833_v28 }
 0x3ac   :  { %v3496_v35 = vpop.f32.mrf.mxu1  ;;  %v3502_v36 = vpop.f32.mrf.mxu0 }
 0x3ad   :  { %v1026_v37 = vsel %vm574_vm3, %v877_v34, -inf }
 0x3ae   :  { %1027 = vmax.xlane.f32.xlu1 %v1026_v37  ;;  %v801_v38 = vpop.f32.mrf.mxu1  ;;  %v879_v40 = vpop.f32.mrf.mxu0  ;;  %v3771_v37 = vld [vmem:[%s4957_s1 + $0x38] sm:$0xff]  }
 0x3af   :  { %v3772_v38 = vld [vmem:[%s4957_s1 + $0x30] sm:$0xff]   ;;  %v3773_v40 = vld [vmem:[%s4957_s1 + $0x28] sm:$0xff]  }
 0x3b0   :  { %v3497_v41 = vpop.f32.mrf.mxu1  ;;  %v3503_v42 = vpop.f32.mrf.mxu0 }
 0x3b1   :  { %v3774_v41 = vld [vmem:[%s4957_s1 + $0x20] sm:$0xff]   ;;  %v3775_v42 = vld [vmem:[%s4957_s1 + $0x18] sm:$0xff]  }
 0x3b2   :  { %v924_v44 = vpop.f32.mrf.mxu1  ;;  %v972_v45 = vpop.f32.mrf.mxu0 }
 0x3b3   :  { %v925_v47 = vadd.f32 %v924_v44, %v833_v28  ;;  %v973_v4 = vadd.f32 %v972_v45, %v833_v28 }
 0x3b4   :  { %v3508_v48 = vpop.f32.mrf.mxu1  ;;  %v3514_v49 = vpop.f32.mrf.mxu0 }
 0x3b5   :  { %v1029_v50 = vsel %vm574_vm3, %v925_v47, -inf  ;;  %v1032_v0 = vsel %vm574_vm3, %v973_v4, -inf }
 0x3b6   :  { %v975_v53 = vpop.f32.mrf.mxu0  ;;  %1030 = vmax.xlane.f32.xlu0 %v1029_v50  ;;  %v927_v54 = vpop.f32.mrf.mxu1 }
 0x3b7   :  { %v3776_v53 = vld [vmem:[%s4957_s1 + $0x10] sm:$0xff]  }
 0x3b8   :  { %v3509_v58 = vpop.f32.mrf.mxu1  ;;  %v3515_v61 = vpop.f32.mrf.mxu0 }
 0x3b9   :  { %v3777_v61 = vld [vmem:[%s4957_s1 + $0x8] sm:$0xff]  }
 0x3ba   :  { %1033 = vmax.xlane.f32.xlu0 %v1032_v0  ;;  %v1020_v6 = vpop.f32.mrf.mxu1 }
 0x3bb   :  { %v1021_v7 = vadd.f32 %v1020_v6, %v833_v28 }
 0x3bc   :  { %v3520_v8 = vpop.f32.mrf.mxu1 }
 0x3bd   :  { %v1035_v10 = vsel %vm574_vm3, %v1021_v7, -inf }
 0x3be   :  { %603 = vadd.xlane.f32.xlu0 %v602_v9  ;;  %1036 = vmax.xlane.f32.xlu1 %v1035_v10  ;;  %v1023_v11 = vpop.f32.mrf.mxu1 }
 0x3bf   :  { %v3778_v11 = vld [vmem:[%s4957_s1] sm:$0xff]  }
 0x3c0   :  { %v3521_v12 = vpop.f32.mrf.mxu1 }
 0x3c2   :  { %606 = vadd.xlane.f32.xlu0 %v605_v14 }
 0x3c6   :  { %609 = vadd.xlane.f32.xlu0 %v608_v46 }
 0x3ca   :  { %600 = vadd.xlane.f32.xlu0 %v599_v57 }
 0x437   :  { %v1028_v59 = vpop.xlane.xlu1 %1027 }
 0x438   :  { %v1038_v51 = vsub.f32 %v877_v34, %v1028_v59 }
 0x43a   :  { %v1042_v15 = vmul.f32 1.442695, %v1038_v51 }
 0x43c   :  { %3869 = vpow2.f32 %v1042_v15 }
 0x43f   :  { %v1031_v16 = vpop.xlane.xlu0 %1030 }
 0x440   :  { %v1039_v17 = vsub.f32 %v925_v47, %v1031_v16 }
 0x442   :  { %v1044_v55 = vmul.f32 1.442695, %v1039_v17 }
 0x443   :  { %v1034_v60 = vpop.xlane.xlu0 %1033 }
 0x444   :  { %3871 = vpow2.f32 %v1044_v55  ;;  %v1040_v62 = vsub.f32 %v973_v4, %v1034_v60 }
 0x446   :  { %v1046_v5 = vmul.f32 1.442695, %v1040_v62 }
 0x447   :  { %v1037_v18 = vpop.xlane.xlu1 %1036  ;;  %v604_v44 = vpop.xlane.xlu0 %603 }
 0x448   :  { %3873 = vpow2.f32 %v1046_v5  ;;  %v1041_v43 = vsub.f32 %v1021_v7, %v1037_v18 }
 0x449   :  { %v3870_v20 = vpop.eup %3869 }
 0x44a   :  { %v1048_v13 = vmul.f32 1.442695, %v1041_v43  ;;  %v1066_v39 = vpack.c.bf16 %v3870_v20, %v3870_v20  ;;  %v1050_v36 = vsel %vm574_vm3, %v3870_v20, 0.0 }
 0x44b   :  { %v607_v47 = vpop.xlane.xlu0 %606 }
 0x44c   :  { %3875 = vpow2.f32 %v1048_v13  ;;  %3525 = vmatmul.mubr.msk.bf16.vlgmr.msra.gmra.mxu0 %vm574_vm3, %v1066_v39 }
 0x44d   :  { %3535 = vmatpush3.bf16.msra.mxu0 %v1169_v22  ;;  %3536 = vmatprep.mubr.msk.bf16.mxu0 %vm3939_vm0, %v3938_v2  ;;  %3877 = vrcp.f32 %v604_v44 }
 0x44e   :  { %3546 = vmatprep.subr.bf16.mxu0 %v3938_v2 }
 0x44f   :  { %v610_v49 = vpop.xlane.xlu0 %609 }
 0x451   :  { %v3872_v25 = vpop.eup %3871 }
 0x452   :  { %v1053_v56 = vsel %vm574_vm3, %v3872_v25, 0.0  ;;  %v1067_v26 = vpack.c.bf16 %v3872_v25, %v3872_v25 }
 0x453   :  { %1054 = vadd.xlane.f32.xlu1 %v1053_v56  ;;  %v601_v3 = vpop.xlane.xlu0 %600 }
 0x454   :  { %3531 = vmatmul.mubr.msk.bf16.vlgmr.msra.gmra.mxu1 %vm574_vm3, %v1067_v26 }
 0x455   :  { %v3874_v28 = vpop.eup %3873  ;;  %3541 = vmatpush3.bf16.msra.mxu1 %v1216_v27  ;;  %3542 = vmatprep.mubr.msk.bf16.mxu1 %vm3939_vm0, %v3938_v2 }
 0x456   :  { %v1056_v31 = vsel %vm574_vm3, %v3874_v28, 0.0  ;;  %v1068_v33 = vpack.c.bf16 %v3874_v28, %v3874_v28  ;;  %3566 = vmatprep.subr.bf16.mxu1 %v3938_v2 }
 0x457   :  { %1057 = vadd.xlane.f32.xlu1 %v1056_v31 }
 0x458   :  { %3537 = vmatmul.mubr.msk.bf16.vlgmr.msra.gmra.mxu0 %vm574_vm3, %v1068_v33 }
 0x459   :  { %v3876_v52 = vpop.eup %3875  ;;  %3562 = vmatprep.mubr.msk.bf16.mxu0 %vm3939_vm0, %v3938_v2  ;;  %3547 = vmatpush3.bf16.msra.mxu0 %v3771_v37 }
 0x45a   :  { %v1059_v34 = vsel %vm574_vm3, %v3876_v52, 0.0  ;;  %v1069_v35 = vpack.c.bf16 %v3876_v52, %v3876_v52  ;;  %3548 = vmatprep.subr.bf16.mxu0 %v3938_v2  ;;  %v3878_v0 = vpop.eup %3877 }
 0x45b   :  { %1060 = vadd.xlane.f32.xlu1 %v1059_v34  ;;  %v805_v9 = vmul.f32 %v3878_v0, %v4337_v21 }
 0x45c   :  { %3543 = vmatmul.mubr.msk.bf16.vlgmr.msra.gmra.mxu1 %vm574_vm3, %v1069_v35 }
 0x45d   :  { %3582 = vmatprep.mubr.msk.bf16.mxu1 %vm3939_vm0, %v3938_v2  ;;  %3549 = vmatpush3.bf16.msra.mxu0 %v3772_v38 }
 0x45e   :  { %3550 = vmatprep.subr.bf16.mxu0 %v3938_v2 }
 0x45f   :  { %1051 = vadd.xlane.f32.xlu1 %v1050_v36 }
 0x461   :  { %3551 = vmatpush3.bf16.msra.mxu0 %v3773_v40 }
 0x462   :  { %3552 = vmatprep.subr.bf16.mxu0 %v3938_v2 }
 0x465   :  { %3553 = vmatpush3.bf16.msra.mxu0 %v3774_v41 }
 0x466   :  { %3554 = vmatprep.subr.bf16.mxu0 %v3938_v2 }
 0x469   :  { %3555 = vmatpush3.bf16.msra.mxu0 %v3775_v42 }
 0x46a   :  { %3556 = vmatprep.subr.bf16.mxu0 %v3938_v2 }
 0x46d   :  { %3557 = vmatpush3.bf16.msra.mxu0 %v3776_v53 }
 0x46e   :  { %3558 = vmatprep.subr.bf16.mxu0 %v3938_v2 }
 0x471   :  { %3559 = vmatpush3.bf16.msra.mxu0 %v3777_v61 }
 0x472   :  { %3560 = vmatprep.subr.bf16.mxu0 %v3938_v2 }
 0x475   :  { %3561 = vmatpush3.bf16.msra.mxu0 %v3778_v11  ;;  %v3787_v11 = vld [vmem:[%s4959_s0 + $0x54] ss:$8 sps:$4 sm:$0xff]  }
 0x4dc   :  { %v1055_v45 = vpop.xlane.xlu1 %1054 }
 0x4dd   :  { %3879 = vrcp.f32 %v1055_v45 }
 0x4de   :  { %3881 = vrcp.f32 %v607_v47 }
 0x4e0   :  { %v1058_v48 = vpop.xlane.xlu1 %1057 }
 0x4e1   :  { %3883 = vrcp.f32 %v1058_v48 }
 0x4e2   :  { %3885 = vrcp.f32 %v610_v49  ;;  %v85_v49 = vunpack.c.l.bf16 %v4145_v23 }
 0x4e4   :  { %v1061_v4 = vpop.xlane.xlu1 %1060 }
 0x4e5   :  { %3887 = vrcp.f32 %v1061_v4 }
 0x4e6   :  { %3889 = vrcp.f32 %v601_v3  ;;  %v3804_v3 = vld [vmem:[%s4959_s0] ss:$8 sps:$4 sm:$0xff]  }
 0x4e8   :  { %v1052_v25 = vpop.xlane.xlu1 %1051 }
 0x4e9   :  { %3891 = vrcp.f32 %v1052_v25  ;;  %v3807_v25 = vld [vmem:[%s4960_s27 + $0x18] sm:$0xff]  }
 0x4ea   :  { %v3880_v7 = vpop.eup %3879 }
 0x4eb   :  { %v3882_v12 = vpop.eup %3881 }
 0x4ec   :  { %v806_v15 = vmul.f32 %v3882_v12, %v4339_v24  ;;  %v3785_v12 = vld [vmem:[%s4959_s0 + $0x50] ss:$8 sps:$4 sm:$0xff]  }
 0x4ee   :  { %v3884_v57 = vpop.eup %3883 }
 0x4ef   :  { %v3886_v17 = vpop.eup %3885 }
 0x4f0   :  { %v807_v19 = vmul.f32 %v3886_v17, %v4345_v32 }
 0x4f2   :  { %v3888_v62 = vpop.eup %3887 }
 0x4f3   :  { %v3890_v26 = vpop.eup %3889 }
 0x4f4   :  { %v804_v35 = vmul.f32 %v3890_v26, %v4335_v63  ;;  %v3201_v63 = vld [vmem:[%s4958_s11] ss:$0 sm:$0xff]  ;;  %v3809_v26 = vld [vmem:[%s4960_s27 + $0x10] sm:$0xff]  }
 0x4f6   :  { %v3892_v32 = vpop.eup %3891 }
 0x50c   :  { %v1111_v50 = vpop.f32.mrf.mxu0 }
 0x50d   :  { %v1258_v34 = vmul.f32 %v3892_v32, %v1111_v50 }
 0x50e   :  { %v3526_v54 = vpop.f32.mrf.mxu0 }
 0x510   :  { %v1114_v58 = vpop.f32.mrf.mxu0 }
 0x511   :  { %v86_v58 = vunpack.c.h.bf16 %v4145_v23  ;;  %v3782_v23 = vld [vmem:[%s4959_s0 + $0x60] ss:$8 sps:$4 sm:$0xff]  }
 0x512   :  { %v3527_v6 = vpop.f32.mrf.mxu0 }
 0x514   :  { %v1158_v8 = vpop.f32.mrf.mxu1 }
 0x515   :  { %v1259_v10 = vmul.f32 %v3880_v7, %v1158_v8  ;;  %v3779_v8 = vld [vmem:[%s4959_s0 + $0x70] ss:$8 sps:$4 sm:$0xff]  }
 0x516   :  { %v3532_v14 = vpop.f32.mrf.mxu1 }
 0x517   :  { %v3708_v46 = vpack.i.bf16 %v1259_v10, %v805_v9  ;;  %v3781_v9 = vld [vmem:[%s4959_s0 + $0x74] ss:$8 sps:$4 sm:$0xff]   ;;  %v3784_v10 = vld [vmem:[%s4959_s0 + $0x64] ss:$8 sps:$4 sm:$0xff]  }
 0x518   :  { %v1161_v59 = vpop.f32.mrf.mxu1  ;;  %v1205_v51 = vpop.f32.mrf.mxu0  ;;  %1663 = vmatprep.subr.bf16.mxu0 %v3781_v9  ;;  %v3791_v14 = vld [vmem:[%s4960_s27 + $0x38] sm:$0xff]  }
 0x519   :  { %v1260_v16 = vmul.f32 %v3884_v57, %v1205_v51  ;;  %3709 = vrot.lane.b32.xlu0 %v3708_v46, %s3942_s5  ;;  %v3790_v46 = vld [vmem:[%s4959_s0 + $0x44] ss:$8 sps:$4 sm:$0xff]   ;;  %3567 = vmatpush3.bf16.msra.mxu1 %v3791_v14  ;;  %v3788_v57 = vld [vmem:[%s4959_s0 + $0x40] ss:$8 sps:$4 sm:$0xff]  }
 0x51a   :  { %v3533_v55 = vpop.f32.mrf.mxu1  ;;  %v3538_v21 = vpop.f32.mrf.mxu0  ;;  %3568 = vmatprep.subr.bf16.mxu1 %v3938_v2 }
 0x51b   :  { %v3713_v60 = vpack.i.bf16 %v1260_v16, %v806_v15 }
 0x51c   :  { %v1208_v5 = vpop.f32.mrf.mxu0  ;;  %v1252_v18 = vpop.f32.mrf.mxu1 }
 0x51d   :  { %v1261_v43 = vmul.f32 %v3888_v62, %v1252_v18  ;;  %3714 = vrot.lane.b32.xlu1 %v3713_v60, %s3940_s28  ;;  %v3794_v62 = vld [vmem:[%s4959_s0 + $0x34] ss:$8 sps:$4 sm:$0xff]   ;;  %v3792_v5 = vld [vmem:[%s4959_s0 + $0x30] ss:$8 sps:$4 sm:$0xff]  }
 0x51e   :  { %v3539_v20 = vpop.f32.mrf.mxu0  ;;  %v3544_v13 = vpop.f32.mrf.mxu1  ;;  %v3795_v18 = vld [vmem:[%s4960_s27 + $0x30] sm:$0xff]  }
 0x51f   :  { %v3718_v39 = vpack.i.bf16 %v1261_v43, %v807_v19  ;;  %v3798_v19 = vld [vmem:[%s4959_s0 + $0x24] ss:$8 sps:$4 sm:$0xff]   ;;  %3569 = vmatpush3.bf16.msra.mxu1 %v3795_v18  ;;  %v3796_v43 = vld [vmem:[%s4959_s0 + $0x20] ss:$8 sps:$4 sm:$0xff]   ;;  %v3802_v13 = vld [vmem:[%s4959_s0 + $0x14] ss:$8 sps:$4 sm:$0xff]  }
 0x520   :  { %v1255_v22 = vpop.f32.mrf.mxu1  ;;  %3570 = vmatprep.subr.bf16.mxu1 %v3938_v2  ;;  %v3799_v20 = vld [vmem:[%s4960_s27 + $0x28] sm:$0xff]  }
 0x521   :  { %3719 = vrot.lane.b32.xlu1 %v3718_v39, %s3941_s7  ;;  %v3800_v39 = vld [vmem:[%s4959_s0 + $0x10] ss:$8 sps:$4 sm:$0xff]   ;;  %v3803_v22 = vld [vmem:[%s4960_s27 + $0x20] sm:$0xff]  }
 0x522   :  { %v3545_v24 = vpop.f32.mrf.mxu1 }
 0x523   :  { %3571 = vmatpush3.bf16.msra.mxu1 %v3799_v20  ;;  %v3806_v24 = vld [vmem:[%s4959_s0 + $0x4] ss:$8 sps:$4 sm:$0xff]  }
 0x524   :  { %3572 = vmatprep.subr.bf16.mxu1 %v3938_v2 }
 0x527   :  { %3573 = vmatpush3.bf16.msra.mxu1 %v3803_v22 }
 0x528   :  { %3574 = vmatprep.subr.bf16.mxu1 %v3938_v2 }
 0x52b   :  { %3575 = vmatpush3.bf16.msra.mxu1 %v3807_v25 }
 0x52c   :  { %3576 = vmatprep.subr.bf16.mxu1 %v3938_v2 }
 0x52f   :  { %3577 = vmatpush3.bf16.msra.mxu1 %v3809_v26 }
 0x530   :  { %3578 = vmatprep.subr.bf16.mxu1 %v3938_v2 }
 0x58b   :  { %v3710_v56 = vpop.permute.xlu0 %3709 }
 0x58c   :  { %v3712_v28 = vunpack.i.h.bf16 %v3710_v56  ;;  %v3711_v31 = vunpack.i.l.bf16 %v3710_v56  ;;  %v3808_v56 = vld [vmem:[%s4961_s8] sm:$0xff]  }
 0x58e   :  { %v1274_v37 = vsel %vm389_vm1, %v1258_v34, %v3712_v28  ;;  %v820_v38 = vsel %vm389_vm1, %v804_v35, %v3711_v31  ;;  %v3811_v28 = vld [vmem:[%s4960_s27] sm:$0xff]  }
 0x58f   :  { %v3715_v27 = vpop.permute.xlu1 %3714 }
 0x590   :  { %v3717_v33 = vunpack.i.h.bf16 %v3715_v27  ;;  %v3716_v52 = vunpack.i.l.bf16 %v3715_v27  ;;  %v3810_v27 = vld [vmem:[%s4960_s27 + $0x8] sm:$0xff]  }
 0x591   :  { %3579 = vmatpush3.bf16.msra.mxu1 %v3810_v27 }
 0x592   :  { %v822_v42 = vsel %vm821_vm4, %v820_v38, %v3716_v52  ;;  %v1275_v44 = vsel %vm821_vm4, %v1274_v37, %v3717_v33  ;;  %3580 = vmatprep.subr.bf16.mxu1 %v3938_v2  ;;  %v3210_v38 = vld [vmem:[%s4921_s19] ss:$0 sm:$0xff] }
 0x593   :  { %v3720_v36 = vpop.permute.xlu1 %3719 }
 0x594   :  { %v3722_v40 = vunpack.i.h.bf16 %v3720_v36  ;;  %v3721_v41 = vunpack.i.l.bf16 %v3720_v36 }
 0x595   :  { %3581 = vmatpush3.bf16.msra.mxu1 %v3811_v28 }
 0x596   :  { %v1276_v45 = vsel %vm823_vm5, %v1275_v44, %v3722_v40  ;;  %v824_v47 = vsel %vm823_vm5, %v822_v42, %v3721_v41  ;;  %3586 = vmatprep.subr.bf16.mxu1 %v3938_v2  ;;  %v3211_v44 = vld [vmem:[%s4922_s20] ss:$0 sm:$0xff] }
 0x597   :  { %v1277_v48 = vpack.c.bf16 %v1276_v45, %v824_v47 }
 0x599   :  { %3563 = vmatmul.mubr.bf16.vlgmr.msra.gmra.mxu0 %v1277_v48 }
 0x59a   :  { %1695 = vmatprep.mubr.bf16.mxu0 %v3937_v1  ;;  %1664 = vmatpush1.bf16.msra.mxu0 %v3779_v8 }
 0x59b   :  { %1665 = vmatprep.subr.bf16.mxu0 %v3784_v10 }
 0x59e   :  { %1666 = vmatpush1.bf16.msra.mxu0 %v3782_v23 }
 0x59f   :  { %1667 = vmatprep.subr.bf16.mxu0 %v3787_v11 }
 0x5a2   :  { %1668 = vmatpush1.bf16.msra.mxu0 %v3785_v12  ;;  %v3212_v12 = vld [vmem:[%s4924_s10] ss:$0 sm:$0xff] }
 0x5a3   :  { %1669 = vmatprep.subr.bf16.mxu0 %v3790_v46 }
 0x5a6   :  { %1670 = vmatpush1.bf16.msra.mxu0 %v3788_v57 }
 0x5a7   :  { %1671 = vmatprep.subr.bf16.mxu0 %v3794_v62 }
 0x5aa   :  { %1672 = vmatpush1.bf16.msra.mxu0 %v3792_v5 }
 0x5ab   :  { %1673 = vmatprep.subr.bf16.mxu0 %v3798_v19 }
 0x5ae   :  { %1674 = vmatpush1.bf16.msra.mxu0 %v3796_v43 }
 0x5af   :  { %1675 = vmatprep.subr.bf16.mxu0 %v3802_v13 }
 0x5b2   :  { %1676 = vmatpush1.bf16.msra.mxu0 %v3800_v39 }
 0x5b3   :  { %1677 = vmatprep.subr.bf16.mxu0 %v3806_v24  ;;  %v3238_v24 = vld [vmem:[%s4925_s4] ss:$0 sm:$0xff] }
 0x5b6   :  { %1678 = vmatpush1.bf16.msra.mxu0 %v3804_v3 }
 0x5b7   :  { %3610 = vmatprep.subr.bf16.mxu0 %v3938_v2 }
 0x5b9   :  { %1696 = vmatmul.mubr.bf16.vlgmr.msra.gmra.mxu0 %v3808_v56 }
 0x5ba   :  { %3612 = vmatprep.mubr.msk.bf16.mxu0 %vm3939_vm0, %v3938_v2 }
 0x659   :  { %v1383_v4 = vpop.f32.mrf.mxu0 }
 0x65a   :  { %v1384_v50 = vadd.f32 %v3201_v63, %v1383_v4 }
 0x65b   :  { %v3564_v53 = vpop.f32.mrf.mxu0 }
 0x65c   :  { %v1390_v54 = vadd.f32 %v1384_v50, %v85_v49  ;;  %v1565_v49 = vld [vmem:[%s4923_s12] sm:$0x3] }
 0x65d   :  { %v1386_v61 = vpop.f32.mrf.mxu0  ;;  %v1570_v4 = vrot.slane %v1565_v49, %v4169_v29  ;;  %v1574_v53 = vrot.slane %v1565_v49, %v4171_v30 }
 0x65e   :  { %v1387_v0 = vadd.f32 %v3201_v63, %v1386_v61  ;;  %1394 = vadd.xlane.f32.xlu0 %v1390_v54 }
 0x65f   :  { %v3565_v6 = vpop.f32.mrf.mxu0 }
 0x660   :  { %v1391_v7 = vadd.f32 %v1387_v0, %v86_v58 }
 0x662   :  { %1396 = vadd.xlane.f32.xlu1 %v1391_v7 }
 0x679   :  { %v1697_v50 = vpop.f32.mrf.mxu0 }
 0x67a   :  { %v1698_v58 = vadd.f32 %v1697_v50, %v1570_v4 }
 0x6e7   :  { %v1395_v59 = vpop.xlane.xlu0 %1394 }
 0x6e8   :  { %v1399_v51 = vmul.f32 0.0078125, %v1395_v59 }
 0x6ea   :  { %v1401_v15 = vsub.f32 %v1390_v54, %v1399_v51  ;;  %v1699_v54 = vpop.f32.mrf.mxu0 }
 0x6eb   :  { %v1397_v16 = vpop.xlane.xlu1 %1396  ;;  %v1700_v0 = vadd.f32 %v1699_v54, %v1574_v53 }
 0x6ec   :  { %v1400_v17 = vmul.f32 0.0078125, %v1397_v16  ;;  %v1403_v55 = vmul.f32 %v1401_v15, %v1401_v15  ;;  %v1701_v61 = vpop.f32.mrf.mxu0 }
 0x6ed   :  { %v1702_v6 = vadd.f32 %v1701_v61, %v1570_v4 }
 0x6ee   :  { %v1402_v21 = vsub.f32 %v1391_v7, %v1400_v17  ;;  %1405 = vadd.xlane.f32.xlu0 %v1403_v55  ;;  %v1703_v7 = vpop.f32.mrf.mxu0 }
 0x6ef   :  { %v4536_v8 = vpack.c.bf16 %v1702_v6, %v1698_v58  ;;  %v1704_v9 = vadd.f32 %v1703_v7, %v1574_v53 }
 0x6f0   :  { %v1404_v60 = vmul.f32 %v1402_v21, %v1402_v21 }
 0x6f1   :  { %v4538_v10 = vpack.c.bf16 %v1704_v9, %v1700_v0  ;;  %1717 = vrot.lane.b32.xlu1 %v4536_v8, %s3941_s7  ;;  %v1740_v23 = vsel %vm389_vm1, %v4536_v8, 0 }
 0x6f2   :  { %1407 = vadd.xlane.f32.xlu0 %v1404_v60 }
 0x6f3   :  { %v1968_v11 = vsel %vm622_vm2, %v4538_v10, 0 }
 0x6f4   :  { %3611 = vmatpush3.bf16.msra.mxu0 %v1968_v11 }
 0x6f5   :  { %1719 = vrot.lane.b32.xlu1 %v4536_v8, %s3940_s28  ;;  %3622 = vmatprep.subr.bf16.mxu0 %v3938_v2 }
 0x777   :  { %v1406_v31 = vpop.xlane.xlu0 %1405 }
 0x778   :  { %v1409_v32 = vmul.f32 0.0078125, %v1406_v31 }
 0x77a   :  { %v1411_v33 = vadd.f32 1e-05, %v1409_v32 }
 0x77b   :  { %v1408_v52 = vpop.xlane.xlu0 %1407 }
 0x77c   :  { %3893 = vrsqrt.f32 %v1411_v33  ;;  %v1410_v34 = vmul.f32 0.0078125, %v1408_v52 }
 0x77e   :  { %v1412_v35 = vadd.f32 1e-05, %v1410_v34 }
 0x780   :  { %3895 = vrsqrt.f32 %v1412_v35 }
 0x789   :  { %v3894_v36 = vpop.eup %3893 }
 0x78a   :  { %v1415_v37 = vmul.f32 %v3894_v36, %v1401_v15 }
 0x78c   :  { %v1423_v42 = vmul.f32 %v3210_v38, %v1415_v37 }
 0x78d   :  { %v3896_v40 = vpop.eup %3895 }
 0x78e   :  { %v1416_v41 = vmul.f32 %v3896_v40, %v1402_v21  ;;  %v4523_v47 = vadd.f32 %v3211_v44, %v1423_v42  ;;  %v4555_v21 = vpop.permute.xlu1 %1717 }
 0x78f   :  { %v1786_v60 = vsel %vm389_vm1, %v4555_v21, 0 }
 0x790   :  { %v1424_v45 = vmul.f32 %v3210_v38, %v1416_v41 }
 0x792   :  { %v4525_v48 = vadd.f32 %v3211_v44, %v1424_v45  ;;  %v4574_v62 = vpop.permute.xlu1 %1719 }
 0x793   :  { %v1832_v18 = vsel %vm389_vm1, %v4574_v62, 0 }
 0x794   :  { %v1433_v63 = vpack.c.bf16 %v4525_v48, %v4523_v47 }
 0x796   :  { %3583 = vmatmul.mubr.bf16.vlgmr.msra.gmra.mxu1 %v1433_v63 }
 0x797   :  { %3588 = vmatprep.mubr.msk.bf16.mxu1 %vm3939_vm0, %v3938_v2  ;;  %3587 = vmatpush3.bf16.xpose.msra.mxu1 %v1740_v23 }
 0x798   :  { %3592 = vmatprep.subr.bf16.mxu1 %v3938_v2 }
 0x856   :  { %v1539_v14 = vpop.f32.mrf.mxu1 }
 0x857   :  { %v1540_v57 = vadd.f32 %v3212_v12, %v1539_v14 }
 0x858   :  { %v3584_v46 = vpop.f32.mrf.mxu1 }
 0x859   :  { %v1546_v16 = vmul.f32 0.17677669, %v1540_v57 }
 0x85a   :  { %v1542_v59 = vpop.f32.mrf.mxu1 }
 0x85b   :  { %v1543_v51 = vadd.f32 %v3212_v12, %v1542_v59 }
 0x85c   :  { %v3585_v15 = vpop.f32.mrf.mxu1 }
 0x85d   :  { %v1547_v17 = vmul.f32 0.17677669, %v1543_v51 }
 0x85f   :  { %v4553_v55 = vpack.c.bf16 %v1547_v17, %v1546_v16 }
 0x861   :  { %1712 = vrot.lane.b32.xlu1 %v4553_v55, %s3940_s28  ;;  %1710 = vrot.lane.b32.xlu0 %v4553_v55, %s3941_s7 }
 0x862   :  { %3589 = vmatmul.mubr.msk.bf16.vlgmr.msra.gmra.mxu1 %vm389_vm1, %v4553_v55 }
 0x863   :  { %3593 = vmatpush3.bf16.xpose.msra.mxu1 %v1786_v60  ;;  %3594 = vmatprep.mubr.msk.bf16.mxu1 %vm3939_vm0, %v3938_v2 }
 0x864   :  { %3598 = vmatprep.subr.bf16.mxu1 %v3938_v2 }
 0x865   :  { %1714 = vrot.lane.b32.xlu1 %v4553_v55, %s3942_s5  ;;  %1721 = vrot.lane.b32.xlu0 %v4536_v8, %s3942_s5 }
 0x869   :  { %1724 = vrot.lane.b32.xlu1 %v4538_v10, %s3941_s7 }
 0x8d3   :  { %v4576_v5 = vpop.permute.xlu0 %1710  ;;  %v4582_v19 = vpop.permute.xlu1 %1712 }
 0x8d4   :  { %3595 = vmatmul.mubr.msk.bf16.vlgmr.msra.gmra.mxu1 %vm389_vm1, %v4576_v5 }
 0x8d5   :  { %3599 = vmatpush3.bf16.xpose.msra.mxu1 %v1832_v18  ;;  %3600 = vmatprep.mubr.msk.bf16.mxu1 %vm3939_vm0, %v3938_v2  ;;  %v2176_v18 = vrot.slane %v4536_v8, 4 }
 0x8d6   :  { %3604 = vmatprep.subr.bf16.mxu1 %v3938_v2 }
 0x8d7   :  { %v4587_v43 = vpop.permute.xlu0 %1721  ;;  %v4589_v20 = vpop.permute.xlu1 %1714 }
 0x8d8   :  { %v1878_v13 = vsel %vm389_vm1, %v4587_v43, 0 }
 0x8db   :  { %v4598_v39 = vpop.permute.xlu1 %1724 }
 0x8dc   :  { %3601 = vmatmul.mubr.msk.bf16.vlgmr.msra.gmra.mxu1 %vm389_vm1, %v4582_v19  ;;  %v2014_v22 = vsel %vm622_vm2, %v4598_v39, 0 }
 0x8dd   :  { %3605 = vmatpush3.bf16.xpose.msra.mxu1 %v1878_v13  ;;  %3606 = vmatprep.mubr.msk.bf16.mxu1 %vm3939_vm0, %v3938_v2 }
 0x8de   :  { %3616 = vmatprep.subr.bf16.mxu1 %v3938_v2 }
 0x8e4   :  { %3607 = vmatmul.mubr.msk.bf16.vlgmr.msra.gmra.mxu1 %vm389_vm1, %v4589_v20 }
 0x8e5   :  { %3617 = vmatpush3.bf16.msra.mxu1 %v2014_v22  ;;  %3618 = vmatprep.mubr.msk.bf16.mxu1 %vm3939_vm0, %v3938_v2 }
 0x8e6   :  { %3628 = vmatprep.subr.bf16.mxu1 %v3938_v2 }
 0x922   :  { %v1776_v3 = vpop.f32.mrf.mxu1 }
 0x923   :  { %v1777_v25 = vadd.f32 %v3238_v24, %v1776_v3  ;;  %v2224_v3 = vrot.slane %v4555_v21, 4  ;;  %v2411_v21 = vrot.slane %v4538_v10, 4 }
 0x924   :  { %v3590_v56 = vpop.f32.mrf.mxu1 }
 0x925   :  { %v1920_v26 = vsel %vm574_vm3, %v1777_v25, -inf }
 0x926   :  { %1921 = vmax.xlane.f32.xlu0 %v1920_v26  ;;  %v1779_v27 = vpop.f32.mrf.mxu1  ;;  %v2175_v26 = vrot.slane %v4553_v55, 4  ;;  %v2320_v55 = vrot.slane %v4587_v43, 4 }
 0x927   :  { %v2229_v27 = vsel %vm389_vm1, %v2224_v3, 0 }
 0x928   :  { %v3591_v28 = vpop.f32.mrf.mxu1 }
 0x994   :  { %v1822_v31 = vpop.f32.mrf.mxu1 }
 0x995   :  { %v1823_v32 = vadd.f32 %v3238_v24, %v1822_v31  ;;  %v2223_v31 = vrot.slane %v4576_v5, 4  ;;  %v2319_v5 = vrot.slane %v4589_v20, 4 }
 0x996   :  { %v3596_v33 = vpop.f32.mrf.mxu1 }
 0x997   :  { %v1923_v52 = vsel %vm574_vm3, %v1823_v32, -inf  ;;  %v2416_v33 = vsel %vm622_vm2, %v2411_v21, 0 }
 0x998   :  { %1924 = vmax.xlane.f32.xlu1 %v1923_v52  ;;  %v1825_v34 = vpop.f32.mrf.mxu1 }
 0x99a   :  { %v3597_v35 = vpop.f32.mrf.mxu1 }
 0x99c   :  { %v1868_v36 = vpop.f32.mrf.mxu1 }
 0x99d   :  { %v1869_v37 = vadd.f32 %v3238_v24, %v1868_v36 }
 0x99e   :  { %v3602_v38 = vpop.f32.mrf.mxu1 }
 0x99f   :  { %v1926_v40 = vsel %vm574_vm3, %v1869_v37, -inf }
 0x9a0   :  { %1927 = vmax.xlane.f32.xlu0 %v1926_v40  ;;  %v1871_v41 = vpop.f32.mrf.mxu1 }
 0x9a2   :  { %v3603_v42 = vpop.f32.mrf.mxu1 }
 0x9a4   :  { %v1914_v44 = vpop.f32.mrf.mxu1 }
 0x9a5   :  { %v1915_v45 = vadd.f32 %v3238_v24, %v1914_v44  ;;  %v2181_v24 = vsel %vm389_vm1, %v2176_v18, 0  ;;  %v3248_v44 = vld [vmem:[%s4925_s4 + $0x1] ss:$0 sm:$0xff] }
 0x9a6   :  { %v3608_v63 = vpop.f32.mrf.mxu1 }
 0x9a7   :  { %v1929_v49 = vsel %vm574_vm3, %v1915_v45, -inf }
 0x9a8   :  { %1930 = vmax.xlane.f32.xlu0 %v1929_v49  ;;  %v1917_v4 = vpop.f32.mrf.mxu1 }
 0x9a9   :  { %1728 = vrot.lane.b32.xlu1 %v4538_v10, %s3942_s5 }
 0x9aa   :  { %v3609_v50 = vpop.f32.mrf.mxu1 }
 0x9af   :  { %v1922_v53 = vpop.xlane.xlu0 %1921 }
 0x9b0   :  { %v1932_v54 = vsub.f32 %v1777_v25, %v1922_v53  ;;  %v2272_v25 = vrot.slane %v4574_v62, 4  ;;  %v2271_v62 = vrot.slane %v4582_v19, 4 }
 0x9b2   :  { %v1936_v58 = vmul.f32 1.442695, %v1932_v54  ;;  %v2277_v28 = vsel %vm389_vm1, %v2272_v25, 0 }
 0x9b4   :  { %3897 = vpow2.f32 %v1936_v58 }
 0x9be   :  { %1726 = vrot.lane.b32.xlu0 %v4538_v10, %s3940_s28  ;;  %v2458_v10 = vrot.slane %v4598_v39, 4 }
 0x9c0   :  { %v2463_v19 = vsel %vm622_vm2, %v2458_v10, 0 }
 0x9c1   :  { %v4618_v61 = vpop.eup %3897 }
 0x9c2   :  { %v1960_v0 = vpack.c.bf16 %v4618_v61, %v4618_v61  ;;  %v1944_v21 = vsel %vm574_vm3, %v4618_v61, 0.0 }
 0x9c4   :  { %3613 = vmatmul.mubr.msk.bf16.vlgmr.msra.gmra.mxu0 %vm574_vm3, %v1960_v0 }
 0x9c5   :  { %3624 = vmatprep.mubr.msk.bf16.mxu0 %vm3939_vm0, %v3938_v2 }
 0xa21   :  { %v1925_v6 = vpop.xlane.xlu1 %1924 }
 0xa22   :  { %v1933_v7 = vsub.f32 %v1823_v32, %v1925_v6  ;;  %v2325_v32 = vsel %vm389_vm1, %v2320_v55, 0 }
 0xa24   :  { %v1938_v9 = vmul.f32 1.442695, %v1933_v7 }
 0xa25   :  { %v4627_v59 = vpop.permute.xlu1 %1728 }
 0xa26   :  { %3899 = vpow2.f32 %v1938_v9  ;;  %v2106_v17 = vsel %vm622_vm2, %v4627_v59, 0 }
 0xa29   :  { %v1928_v23 = vpop.xlane.xlu0 %1927 }
 0xa2a   :  { %v1934_v11 = vsub.f32 %v1869_v37, %v1928_v23 }
 0xa2c   :  { %v1940_v12 = vmul.f32 1.442695, %v1934_v11 }
 0xa2e   :  { %3901 = vpow2.f32 %v1940_v12 }
 0xa31   :  { %v1931_v14 = vpop.xlane.xlu0 %1930 }
 0xa32   :  { %v1935_v46 = vsub.f32 %v1915_v45, %v1931_v14 }
 0xa33   :  { %v4625_v57 = vpop.eup %3899 }
 0xa34   :  { %v1942_v51 = vmul.f32 1.442695, %v1935_v46  ;;  %v1961_v15 = vpack.c.bf16 %v4625_v57, %v4625_v57  ;;  %v1947_v25 = vsel %vm574_vm3, %v4625_v57, 0.0 }
 0xa35   :  { %v4631_v16 = vpop.permute.xlu0 %1726 }
 0xa36   :  { %3903 = vpow2.f32 %v1942_v51  ;;  %v2060_v60 = vsel %vm622_vm2, %v4631_v16, 0  ;;  %3619 = vmatmul.mubr.msk.bf16.vlgmr.msra.gmra.mxu1 %vm574_vm3, %v1961_v15 }
 0xa37   :  { %3629 = vmatpush3.bf16.msra.mxu1 %v2106_v17  ;;  %3623 = vmatpush3.bf16.msra.mxu0 %v2060_v60 }
 0xa38   :  { %3634 = vmatprep.subr.bf16.mxu0 %v3938_v2  ;;  %3630 = vmatprep.mubr.msk.bf16.mxu1 %vm3939_vm0, %v3938_v2 }
 0xa39   :  { %3640 = vmatprep.subr.bf16.mxu1 %v3938_v2 }
 0xa3b   :  { %v4643_v13 = vpop.eup %3901 }
 0xa3c   :  { %v1962_v22 = vpack.c.bf16 %v4643_v13, %v4643_v13 }
 0xa3e   :  { %3625 = vmatmul.mubr.msk.bf16.vlgmr.msra.gmra.mxu0 %vm574_vm3, %v1962_v22 }
 0xa3f   :  { %3635 = vmatpush3.bf16.xpose.msra.mxu0 %v2181_v24  ;;  %3636 = vmatprep.mubr.msk.bf16.mxu0 %vm3939_vm0, %v3938_v2 }
 0xa40   :  { %3646 = vmatprep.subr.bf16.mxu0 %v3938_v2 }
 0xa43   :  { %v4654_v8 = vpop.eup %3903 }
 0xa44   :  { %v1963_v56 = vpack.c.bf16 %v4654_v8, %v4654_v8  ;;  %v1953_v55 = vsel %vm574_vm3, %v4654_v8, 0.0 }
 0xa46   :  { %3631 = vmatmul.mubr.msk.bf16.vlgmr.msra.gmra.mxu1 %vm574_vm3, %v1963_v56  ;;  %3637 = vmatmul.mubr.msk.bf16.vlgmr.msra.gmra.mxu0 %vm389_vm1, %v2175_v26 }
 0xa47   :  { %3641 = vmatpush3.bf16.xpose.msra.mxu1 %v2229_v27  ;;  %3647 = vmatpush3.bf16.xpose.msra.mxu0 %v2277_v28  ;;  %v1950_v28 = vsel %vm574_vm3, %v4643_v13, 0.0 }
 0xa48   :  { %3642 = vmatprep.mubr.msk.bf16.mxu1 %vm3939_vm0, %v3938_v2  ;;  %3648 = vmatprep.mubr.msk.bf16.mxu0 %vm3939_vm0, %v3938_v2 }
 0xa49   :  { %3652 = vmatprep.subr.bf16.mxu1 %v3938_v2  ;;  %3658 = vmatprep.subr.bf16.mxu0 %v3938_v2 }
 0xa4e   :  { %3643 = vmatmul.mubr.msk.bf16.vlgmr.msra.gmra.mxu1 %vm389_vm1, %v2223_v31  ;;  %3649 = vmatmul.mubr.msk.bf16.vlgmr.msra.gmra.mxu0 %vm389_vm1, %v2271_v62 }
 0xa4f   :  { %3653 = vmatpush3.bf16.xpose.msra.mxu1 %v2325_v32  ;;  %3659 = vmatpush3.bf16.msra.mxu0 %v2416_v33 }
 0xa50   :  { %3654 = vmatprep.mubr.msk.bf16.mxu1 %vm3939_vm0, %v3938_v2  ;;  %3664 = vmatprep.subr.bf16.mxu1 %v3938_v2 }
 0xa51   :  { %3660 = vmatprep.mubr.msk.bf16.mxu0 %vm3939_vm0, %v3938_v2  ;;  %3670 = vmatprep.subr.bf16.mxu0 %v3938_v2 }
 0xa56   :  { %3655 = vmatmul.mubr.msk.bf16.vlgmr.msra.gmra.mxu1 %vm389_vm1, %v2319_v5 }
 0xa57   :  { %3665 = vmatpush3.bf16.msra.mxu1 %v2463_v19  ;;  %3666 = vmatprep.mubr.msk.bf16.mxu1 %vm3939_vm0, %v3938_v2 }
 0xa58   :  { %3676 = vmatprep.subr.bf16.mxu1 %v3938_v2 }
 0xa84   :  { %v4690_v43 = vpop.f32.mrf.mxu0 }
 0xa86   :  { %v3614_v52 = vpop.f32.mrf.mxu0 }
 0xa88   :  { %v2007_v34 = vpop.f32.mrf.mxu0 }
 0xa89   :  { %v2505_v34 = vrot.slane %v4631_v16, 4 }
 0xa8a   :  { %v3615_v35 = vpop.f32.mrf.mxu0 }
 0xaf6   :  { %v4692_v36 = vpop.f32.mrf.mxu1 }
 0xaf8   :  { %v3620_v39 = vpop.f32.mrf.mxu1 }
 0xafa   :  { %v2053_v37 = vpop.f32.mrf.mxu1 }
 0xafb   :  { %v2510_v37 = vsel %vm622_vm2, %v2505_v34, 0 }
 0xafc   :  { %v3621_v20 = vpop.f32.mrf.mxu1 }
 0xafd   :  { %v2552_v20 = vrot.slane %v4627_v59, 4 }
 0xafe   :  { %v4694_v38 = vpop.f32.mrf.mxu0 }
 0xb00   :  { %v3626_v40 = vpop.f32.mrf.mxu0 }
 0xb02   :  { %v2099_v41 = vpop.f32.mrf.mxu0 }
 0xb04   :  { %v3627_v42 = vpop.f32.mrf.mxu0 }
 0xb05   :  { %v2557_v42 = vsel %vm622_vm2, %v2552_v20, 0 }
 0xb06   :  { %v4699_v45 = vpop.f32.mrf.mxu1  ;;  %v2217_v63 = vpop.f32.mrf.mxu0 }
 0xb07   :  { %v2218_v49 = vadd.f32 %v3248_v44, %v2217_v63 }
 0xb08   :  { %v3632_v4 = vpop.f32.mrf.mxu1  ;;  %v3638_v50 = vpop.f32.mrf.mxu0 }
 0xb09   :  { %v2367_v53 = vsel %vm574_vm3, %v2218_v49, -inf }
 0xb0a   :  { %2368 = vmax.xlane.f32.xlu1 %v2367_v53  ;;  %v2145_v54 = vpop.f32.mrf.mxu1  ;;  %v2220_v58 = vpop.f32.mrf.mxu0 }
 0xb0b   :  { %v3812_v54 = vld [vmem:[%s4926_s13 + $0x38] sm:$0xff]   ;;  %v3813_v58 = vld [vmem:[%s4926_s13 + $0x30] sm:$0xff]  }
 0xb0c   :  { %v3633_v0 = vpop.f32.mrf.mxu1  ;;  %v3639_v6 = vpop.f32.mrf.mxu0 }
 0xb0d   :  { %v3814_v0 = vld [vmem:[%s4926_s13 + $0x28] sm:$0xff]   ;;  %v3816_v6 = vld [vmem:[%s4926_s13 + $0x18] sm:$0xff]  }
 0xb0e   :  { %v2265_v7 = vpop.f32.mrf.mxu1  ;;  %v2313_v9 = vpop.f32.mrf.mxu0 }
 0xb0f   :  { %v2266_v23 = vadd.f32 %v3248_v44, %v2265_v7  ;;  %v2314_v14 = vadd.f32 %v3248_v44, %v2313_v9 }
 0xb10   :  { %v3644_v11 = vpop.f32.mrf.mxu1  ;;  %v3650_v12 = vpop.f32.mrf.mxu0 }
 0xb11   :  { %v2370_v46 = vsel %vm574_vm3, %v2266_v23, -inf  ;;  %v2373_v18 = vsel %vm574_vm3, %v2314_v14, -inf }
 0xb12   :  { %v2316_v51 = vpop.f32.mrf.mxu0  ;;  %2371 = vmax.xlane.f32.xlu0 %v2370_v46  ;;  %v2268_v15 = vpop.f32.mrf.mxu1 }
 0xb13   :  { %v3817_v51 = vld [vmem:[%s4926_s13 + $0x10] sm:$0xff]  }
 0xb14   :  { %v3645_v17 = vpop.f32.mrf.mxu1  ;;  %v3651_v60 = vpop.f32.mrf.mxu0 }
 0xb15   :  { %v3818_v60 = vld [vmem:[%s4926_s13 + $0x8] sm:$0xff]  }
 0xb16   :  { %2374 = vmax.xlane.f32.xlu0 %v2373_v18  ;;  %v2361_v22 = vpop.f32.mrf.mxu1 }
 0xb17   :  { %v2362_v24 = vadd.f32 %v3248_v44, %v2361_v22 }
 0xb18   :  { %v3656_v3 = vpop.f32.mrf.mxu1 }
 0xb19   :  { %v2376_v56 = vsel %vm574_vm3, %v2362_v24, -inf }
 0xb1a   :  { %1948 = vadd.xlane.f32.xlu0 %v1947_v25  ;;  %2377 = vmax.xlane.f32.xlu1 %v2376_v56  ;;  %v2364_v26 = vpop.f32.mrf.mxu1 }
 0xb1b   :  { %v3819_v26 = vld [vmem:[%s4926_s13] sm:$0xff]  }
 0xb1c   :  { %v3657_v27 = vpop.f32.mrf.mxu1 }
 0xb1e   :  { %1951 = vadd.xlane.f32.xlu0 %v1950_v28 }
 0xb22   :  { %1954 = vadd.xlane.f32.xlu0 %v1953_v55 }
 0xb26   :  { %1945 = vadd.xlane.f32.xlu0 %v1944_v21 }
 0xb93   :  { %v2369_v62 = vpop.xlane.xlu1 %2368 }
 0xb94   :  { %v2379_v57 = vsub.f32 %v2218_v49, %v2369_v62 }
 0xb96   :  { %v2383_v31 = vmul.f32 1.442695, %v2379_v57 }
 0xb98   :  { %3905 = vpow2.f32 %v2383_v31 }
 0xb9b   :  { %v2372_v32 = vpop.xlane.xlu0 %2371 }
 0xb9c   :  { %v2380_v33 = vsub.f32 %v2266_v23, %v2372_v32 }
 0xb9e   :  { %v2385_v10 = vmul.f32 1.442695, %v2380_v33 }
 0xb9f   :  { %v2375_v5 = vpop.xlane.xlu0 %2374 }
 0xba0   :  { %3907 = vpow2.f32 %v2385_v10  ;;  %v2381_v19 = vsub.f32 %v2314_v14, %v2375_v5 }
 0xba2   :  { %v2387_v13 = vmul.f32 1.442695, %v2381_v19 }
 0xba3   :  { %v2378_v52 = vpop.xlane.xlu1 %2377  ;;  %v1949_v7 = vpop.xlane.xlu0 %1948 }
 0xba4   :  { %3909 = vpow2.f32 %v2387_v13  ;;  %v2382_v8 = vsub.f32 %v2362_v24, %v2378_v52 }
 0xba5   :  { %v3906_v35 = vpop.eup %3905 }
 0xba6   :  { %v2389_v39 = vmul.f32 1.442695, %v2382_v8  ;;  %v2407_v61 = vpack.c.bf16 %v3906_v35, %v3906_v35  ;;  %v2391_v53 = vsel %vm574_vm3, %v3906_v35, 0.0 }
 0xba7   :  { %v1952_v23 = vpop.xlane.xlu0 %1951 }
 0xba8   :  { %3911 = vpow2.f32 %v2389_v39  ;;  %3661 = vmatmul.mubr.msk.bf16.vlgmr.msra.gmra.mxu0 %vm574_vm3, %v2407_v61 }
 0xba9   :  { %3671 = vmatpush3.bf16.msra.mxu0 %v2510_v37  ;;  %3672 = vmatprep.mubr.msk.bf16.mxu0 %vm3939_vm0, %v3938_v2  ;;  %3913 = vrcp.f32 %v1949_v7 }
 0xbaa   :  { %3682 = vmatprep.subr.bf16.mxu0 %v3938_v2 }
 0xbab   :  { %v1955_v12 = vpop.xlane.xlu0 %1954 }
 0xbad   :  { %v3908_v40 = vpop.eup %3907 }
 0xbae   :  { %v2394_v16 = vsel %vm574_vm3, %v3908_v40, 0.0  ;;  %v2408_v41 = vpack.c.bf16 %v3908_v40, %v3908_v40 }
 0xbaf   :  { %2395 = vadd.xlane.f32.xlu1 %v2394_v16  ;;  %v1946_v37 = vpop.xlane.xlu0 %1945 }
 0xbb0   :  { %3667 = vmatmul.mubr.msk.bf16.vlgmr.msra.gmra.mxu1 %vm574_vm3, %v2408_v41 }
 0xbb1   :  { %v3910_v44 = vpop.eup %3909  ;;  %3677 = vmatpush3.bf16.msra.mxu1 %v2557_v42  ;;  %3678 = vmatprep.mubr.msk.bf16.mxu1 %vm3939_vm0, %v3938_v2 }
 0xbb2   :  { %v2397_v63 = vsel %vm574_vm3, %v3910_v44, 0.0  ;;  %v2409_v49 = vpack.c.bf16 %v3910_v44, %v3910_v44 }
 0xbb3   :  { %2398 = vadd.xlane.f32.xlu1 %v2397_v63 }
 0xbb4   :  { %3673 = vmatmul.mubr.msk.bf16.vlgmr.msra.gmra.mxu0 %vm574_vm3, %v2409_v49 }
 0xbb5   :  { %v3912_v59 = vpop.eup %3911  ;;  %3698 = vmatprep.mubr.msk.bf16.mxu0 %vm3939_vm0, %v3938_v2  ;;  %3683 = vmatpush3.bf16.msra.mxu0 %v3812_v54 }
 0xbb6   :  { %v2400_v4 = vsel %vm574_vm3, %v3912_v59, 0.0  ;;  %v2410_v50 = vpack.c.bf16 %v3912_v59, %v3912_v59  ;;  %3684 = vmatprep.subr.bf16.mxu0 %v3938_v2  ;;  %v3914_v18 = vpop.eup %3913 }
 0xbb7   :  { %2401 = vadd.xlane.f32.xlu1 %v2400_v4  ;;  %v2149_v25 = vmul.f32 %v3914_v18, %v4692_v36  ;;  %v3820_v18 = vld [vmem:[%s4928_s15 + $0x70] ss:$8 sps:$4 sm:$0xff]  }
 0xbb8   :  { %3679 = vmatmul.mubr.msk.bf16.vlgmr.msra.gmra.mxu1 %vm574_vm3, %v2410_v50 }
 0xbb9   :  { %2914 = vmatprep.mubr.bf16.mxu1 %v3937_v1  ;;  %3685 = vmatpush3.bf16.msra.mxu0 %v3813_v58  ;;  %v3815_v1 = vld [vmem:[%s4926_s13 + $0x20] sm:$0xff]  }
 0xbba   :  { %3686 = vmatprep.subr.bf16.mxu0 %v3938_v2 }
 0xbbb   :  { %2392 = vadd.xlane.f32.xlu1 %v2391_v53 }
 0xbbd   :  { %3687 = vmatpush3.bf16.msra.mxu0 %v3814_v0 }
 0xbbe   :  { %3688 = vmatprep.subr.bf16.mxu0 %v3938_v2 }
 0xbc1   :  { %3689 = vmatpush3.bf16.msra.mxu0 %v3815_v1 }
 0xbc2   :  { %3690 = vmatprep.subr.bf16.mxu0 %v3938_v2 }
 0xbc5   :  { %3691 = vmatpush3.bf16.msra.mxu0 %v3816_v6 }
 0xbc6   :  { %3692 = vmatprep.subr.bf16.mxu0 %v3938_v2 }
 0xbc9   :  { %3693 = vmatpush3.bf16.msra.mxu0 %v3817_v51 }
 0xbca   :  { %3694 = vmatprep.subr.bf16.mxu0 %v3938_v2 }
 0xbcd   :  { %3695 = vmatpush3.bf16.msra.mxu0 %v3818_v60 }
 0xbce   :  { %3696 = vmatprep.subr.bf16.mxu0 %v3938_v2 }
 0xbd1   :  { %3697 = vmatpush3.bf16.msra.mxu0 %v3819_v26 }
 0xc38   :  { %v2396_v9 = vpop.xlane.xlu1 %2395 }
 0xc39   :  { %3915 = vrcp.f32 %v2396_v9 }
 0xc3a   :  { %3917 = vrcp.f32 %v1952_v23 }
 0xc3c   :  { %v2399_v11 = vpop.xlane.xlu1 %2398 }
 0xc3d   :  { %3919 = vrcp.f32 %v2399_v11 }
 0xc3e   :  { %3921 = vrcp.f32 %v1955_v12 }
 0xc40   :  { %v2402_v14 = vpop.xlane.xlu1 %2401 }
 0xc41   :  { %3923 = vrcp.f32 %v2402_v14 }
 0xc42   :  { %3925 = vrcp.f32 %v1946_v37  ;;  %v3851_v37 = vld [vmem:[%s4929_s17 + $0x20] sm:$0xff]  }
 0xc44   :  { %v2393_v20 = vpop.xlane.xlu1 %2392 }
 0xc45   :  { %3927 = vrcp.f32 %v2393_v20  ;;  %v3852_v20 = vld [vmem:[%s4929_s17 + $0x58] sm:$0xff]  }
 0xc46   :  { %v3916_v24 = vpop.eup %3915 }
 0xc47   :  { %v3918_v27 = vpop.eup %3917 }
 0xc48   :  { %v2150_v31 = vmul.f32 %v3918_v27, %v4694_v38 }
 0xc4a   :  { %v3920_v21 = vpop.eup %3919 }
 0xc4b   :  { %v3922_v2 = vpop.eup %3921 }
 0xc4c   :  { %v2151_v52 = vmul.f32 %v3922_v2, %v4699_v45  ;;  %v3832_v2 = vld [vmem:[%s4928_s15 + $0x30] ss:$8 sps:$4 sm:$0xff]  }
 0xc4e   :  { %v3924_v5 = vpop.eup %3923 }
 0xc4f   :  { %v3926_v16 = vpop.eup %3925 }
 0xc50   :  { %v2148_v4 = vmul.f32 %v3926_v16, %v4690_v43  ;;  %v3257_v43 = vld [vmem:[%s4927_s14] ss:$0 sm:$0xff] }
 0xc52   :  { %v3928_v45 = vpop.eup %3927 }
 0xc68   :  { %v2452_v46 = vpop.f32.mrf.mxu0 }
 0xc69   :  { %v2599_v59 = vmul.f32 %v3928_v45, %v2452_v46 }
 0xc6a   :  { %v3662_v15 = vpop.f32.mrf.mxu0 }
 0xc6c   :  { %v2455_v17 = vpop.f32.mrf.mxu0 }
 0xc6e   :  { %v3663_v22 = vpop.f32.mrf.mxu0 }
 0xc6f   :  { %v3822_v22 = vld [vmem:[%s4928_s15 + $0x74] ss:$8 sps:$4 sm:$0xff]  }
 0xc70   :  { %v2499_v3 = vpop.f32.mrf.mxu1  ;;  %2882 = vmatprep.subr.bf16.mxu1 %v3822_v22 }
 0xc71   :  { %v2600_v56 = vmul.f32 %v3916_v24, %v2499_v3  ;;  %2883 = vmatpush1.bf16.msra.mxu1 %v3820_v18 }
 0xc72   :  { %v3668_v28 = vpop.f32.mrf.mxu1 }
 0xc73   :  { %v3723_v55 = vpack.i.bf16 %v2600_v56, %v2149_v25  ;;  %v3825_v28 = vld [vmem:[%s4928_s15 + $0x64] ss:$8 sps:$4 sm:$0xff]  }
 0xc74   :  { %v2502_v62 = vpop.f32.mrf.mxu1  ;;  %v2546_v57 = vpop.f32.mrf.mxu0  ;;  %2884 = vmatprep.subr.bf16.mxu1 %v3825_v28 }
 0xc75   :  { %v2601_v32 = vmul.f32 %v3920_v21, %v2546_v57  ;;  %3724 = vrot.lane.b32.xlu0 %v3723_v55, %s3942_s5  ;;  %v3823_v55 = vld [vmem:[%s4928_s15 + $0x60] ss:$8 sps:$4 sm:$0xff]   ;;  %v3828_v21 = vld [vmem:[%s4928_s15 + $0x54] ss:$8 sps:$4 sm:$0xff]   ;;  %v3826_v62 = vld [vmem:[%s4928_s15 + $0x50] ss:$8 sps:$4 sm:$0xff]  }
 0xc76   :  { %v3669_v33 = vpop.f32.mrf.mxu1  ;;  %v3674_v36 = vpop.f32.mrf.mxu0  ;;  %2885 = vmatpush1.bf16.msra.mxu1 %v3823_v55  ;;  %v3829_v57 = vld [vmem:[%s4928_s15 + $0x40] ss:$8 sps:$4 sm:$0xff]  }
 0xc77   :  { %v3728_v10 = vpack.i.bf16 %v2601_v32, %v2150_v31  ;;  %2886 = vmatprep.subr.bf16.mxu1 %v3828_v21  ;;  %v3831_v31 = vld [vmem:[%s4928_s15 + $0x44] ss:$8 sps:$4 sm:$0xff]   ;;  %v3834_v32 = vld [vmem:[%s4928_s15 + $0x34] ss:$8 sps:$4 sm:$0xff]   ;;  %v3835_v36 = vld [vmem:[%s4928_s15 + $0x20] ss:$8 sps:$4 sm:$0xff]  }
 0xc78   :  { %v2549_v19 = vpop.f32.mrf.mxu0  ;;  %v2593_v13 = vpop.f32.mrf.mxu1  ;;  %v3837_v33 = vld [vmem:[%s4928_s15 + $0x24] ss:$8 sps:$4 sm:$0xff]  }
 0xc79   :  { %v2602_v34 = vmul.f32 %v3924_v5, %v2593_v13  ;;  %3729 = vrot.lane.b32.xlu1 %v3728_v10, %s3940_s28  ;;  %v3840_v10 = vld [vmem:[%s4928_s15 + $0x14] ss:$8 sps:$4 sm:$0xff]   ;;  %v3838_v5 = vld [vmem:[%s4928_s15 + $0x10] ss:$8 sps:$4 sm:$0xff]   ;;  %v3843_v19 = vld [vmem:[%s4928_s15 + $0x4] ss:$8 sps:$4 sm:$0xff]  }
 0xc7a   :  { %v3675_v8 = vpop.f32.mrf.mxu0  ;;  %v3680_v35 = vpop.f32.mrf.mxu1  ;;  %2887 = vmatpush1.bf16.msra.mxu1 %v3826_v62  ;;  %v3841_v13 = vld [vmem:[%s4928_s15] ss:$8 sps:$4 sm:$0xff]  }
 0xc7b   :  { %v3733_v39 = vpack.i.bf16 %v2602_v34, %v2151_v52  ;;  %2888 = vmatprep.subr.bf16.mxu1 %v3831_v31  ;;  %v3844_v52 = vld [vmem:[%s4929_s17 + $0x78] sm:$0xff]   ;;  %v3846_v8 = vld [vmem:[%s4929_s17 + $0x70] sm:$0xff]  }
 0xc7c   :  { %v2596_v61 = vpop.f32.mrf.mxu1  ;;  %v3845_v34 = vld [vmem:[%s4929_s17 + $0x38] sm:$0xff]   ;;  %3408 = vmatprep.subr.bf16.mxu0 %v3844_v52  ;;  %v3847_v35 = vld [vmem:[%s4929_s17 + $0x30] sm:$0xff]  }
 0xc7d   :  { %3734 = vrot.lane.b32.xlu1 %v3733_v39, %s3941_s7  ;;  %v3848_v39 = vld [vmem:[%s4929_s17 + $0x68] sm:$0xff]  }
 0xc7e   :  { %v3681_v38 = vpop.f32.mrf.mxu1  ;;  %2889 = vmatpush1.bf16.msra.mxu1 %v3829_v57  ;;  %v3849_v61 = vld [vmem:[%s4929_s17 + $0x28] sm:$0xff]  }
 0xc7f   :  { %2890 = vmatprep.subr.bf16.mxu1 %v3834_v32  ;;  %v3850_v38 = vld [vmem:[%s4929_s17 + $0x60] sm:$0xff]  }
 0xc82   :  { %2891 = vmatpush1.bf16.msra.mxu1 %v3832_v2 }
 0xc83   :  { %2892 = vmatprep.subr.bf16.mxu1 %v3837_v33 }
 0xc86   :  { %2893 = vmatpush1.bf16.msra.mxu1 %v3835_v36 }
 0xc87   :  { %2894 = vmatprep.subr.bf16.mxu1 %v3840_v10 }
 0xc8a   :  { %2895 = vmatpush1.bf16.msra.mxu1 %v3838_v5 }
 0xc8b   :  { %2896 = vmatprep.subr.bf16.mxu1 %v3843_v19 }
 0xc8e   :  { %2897 = vmatpush1.bf16.msra.mxu1 %v3841_v13 }
 0xce7   :  { %v3725_v40 = vpop.permute.xlu0 %3724 }
 0xce8   :  { %v3727_v42 = vunpack.i.h.bf16 %v3725_v40  ;;  %v3726_v44 = vunpack.i.l.bf16 %v3725_v40  ;;  %v3853_v40 = vld [vmem:[%s4929_s17 + $0x18] sm:$0xff]  }
 0xcea   :  { %v2615_v53 = vsel %vm389_vm1, %v2599_v59, %v3727_v42  ;;  %v2164_v54 = vsel %vm389_vm1, %v2148_v4, %v3726_v44  ;;  %v3266_v4 = vld [vmem:[%s4930_s21] ss:$0 sm:$0xff] }
 0xceb   :  { %v3730_v41 = vpop.permute.xlu1 %3729 }
 0xcec   :  { %v3732_v63 = vunpack.i.h.bf16 %v3730_v41  ;;  %v3731_v49 = vunpack.i.l.bf16 %v3730_v41 }
 0xcee   :  { %v2165_v1 = vsel %vm821_vm4, %v2164_v54, %v3731_v49  ;;  %v2616_v6 = vsel %vm821_vm4, %v2615_v53, %v3732_v63 }
 0xcef   :  { %v3735_v50 = vpop.permute.xlu1 %3734 }
 0xcf0   :  { %v3737_v58 = vunpack.i.h.bf16 %v3735_v50  ;;  %v3736_v0 = vunpack.i.l.bf16 %v3735_v50 }
 0xcf2   :  { %v2617_v7 = vsel %vm823_vm5, %v2616_v6, %v3737_v58  ;;  %v2166_v9 = vsel %vm823_vm5, %v2165_v1, %v3736_v0  ;;  %v3267_v58 = vld [vmem:[%s4931_s22] ss:$0 sm:$0xff] }
 0xcf3   :  { %v2618_v23 = vpack.c.bf16 %v2617_v7, %v2166_v9  ;;  %v3854_v9 = vld [vmem:[%s4929_s17 + $0x50] sm:$0xff]  }
 0xcf5   :  { %3699 = vmatmul.mubr.bf16.vlgmr.msra.gmra.mxu0 %v2618_v23  ;;  %v3855_v23 = vld [vmem:[%s4929_s17 + $0x10] sm:$0xff]  }
 0xcf6   :  { %3409 = vmatpush3.bf16.msra.mxu0 %v3845_v34 }
 0xcf7   :  { %3410 = vmatprep.subr.bf16.mxu0 %v3846_v8 }
 0xcfa   :  { %3411 = vmatpush3.bf16.msra.mxu0 %v3847_v35 }
 0xcfb   :  { %3412 = vmatprep.subr.bf16.mxu0 %v3848_v39 }
 0xcfe   :  { %3413 = vmatpush3.bf16.msra.mxu0 %v3849_v61 }
 0xcff   :  { %3414 = vmatprep.subr.bf16.mxu0 %v3850_v38 }
 0xd02   :  { %3415 = vmatpush3.bf16.msra.mxu0 %v3851_v37 }
 0xd03   :  { %3416 = vmatprep.subr.bf16.mxu0 %v3852_v20 }
 0xd06   :  { %3417 = vmatpush3.bf16.msra.mxu0 %v3853_v40 }
 0xd07   :  { %3418 = vmatprep.subr.bf16.mxu0 %v3854_v9 }
 0xd0a   :  { %3419 = vmatpush3.bf16.msra.mxu0 %v3855_v23 }
 0xdb5   :  { %v2724_v11 = vpop.f32.mrf.mxu0 }
 0xdb6   :  { %v2725_v12 = vadd.f32 %v3257_v43, %v2724_v11  ;;  %v3857_v11 = vld [vmem:[%s4929_s17 + $0x8] sm:$0xff]  }
 0xdb7   :  { %v3700_v14 = vpop.f32.mrf.mxu0 }
 0xdb8   :  { %v2731_v46 = vadd.f32 %v2725_v12, %v4523_v47  ;;  %v3858_v12 = vld [vmem:[%s4929_s17 + $0x40] sm:$0xff]  }
 0xdb9   :  { %v2727_v51 = vpop.f32.mrf.mxu0  ;;  %v3859_v14 = vld [vmem:[%s4929_s17] sm:$0xff]  }
 0xdba   :  { %v2728_v15 = vadd.f32 %v3257_v43, %v2727_v51  ;;  %2735 = vadd.xlane.f32.xlu0 %v2731_v46  ;;  %v3856_v43 = vld [vmem:[%s4929_s17 + $0x48] sm:$0xff]  }
 0xdbb   :  { %v3701_v17 = vpop.f32.mrf.mxu0  ;;  %3420 = vmatprep.subr.bf16.mxu0 %v3856_v43 }
 0xdbc   :  { %v2732_v60 = vadd.f32 %v2728_v15, %v4525_v48  ;;  %3421 = vmatpush3.bf16.msra.mxu0 %v3857_v11 }
 0xdbd   :  { %3422 = vmatprep.subr.bf16.mxu0 %v3858_v12 }
 0xdbe   :  { %2737 = vadd.xlane.f32.xlu1 %v2732_v60 }
 0xdc0   :  { %3423 = vmatpush3.bf16.msra.mxu0 %v3859_v14 }
 0xe43   :  { %v2736_v24 = vpop.xlane.xlu0 %2735 }
 0xe44   :  { %v2739_v3 = vmul.f32 0.0078125, %v2736_v24 }
 0xe46   :  { %v4788_v47 = vsub.f32 %v2731_v46, %v2739_v3  ;;  %v2790_v46 = vld [vmem:[%s4932_s16] sm:$0x3] }
 0xe47   :  { %v2738_v25 = vpop.xlane.xlu1 %2737  ;;  %v2799_v15 = vrot.slane %v2790_v46, %v4171_v30  ;;  %v2795_v17 = vrot.slane %v2790_v46, %v4169_v29  ;;  %v3284_v29 = vld [vmem:[%s4933_s18] ss:$0 sm:$0xff] }
 0xe48   :  { %v2740_v56 = vmul.f32 0.0078125, %v2738_v25  ;;  %v2743_v48 = vmul.f32 %v4788_v47, %v4788_v47 }
 0xe4a   :  { %v4792_v26 = vsub.f32 %v2732_v60, %v2740_v56  ;;  %2745 = vadd.xlane.f32.xlu0 %v2743_v48 }
 0xe4c   :  { %v2744_v27 = vmul.f32 %v4792_v26, %v4792_v26 }
 0xe4e   :  { %2747 = vadd.xlane.f32.xlu0 %v2744_v27 }
 0xed3   :  { %v2746_v16 = vpop.xlane.xlu0 %2745 }
 0xed4   :  { %v2749_v41 = vmul.f32 0.0078125, %v2746_v16 }
 0xed6   :  { %v2751_v42 = vadd.f32 1e-05, %v2749_v41 }
 0xed7   :  { %v2748_v44 = vpop.xlane.xlu0 %2747 }
 0xed8   :  { %3929 = vrsqrt.f32 %v2751_v42  ;;  %v2750_v45 = vmul.f32 0.0078125, %v2748_v44  ;;  %v3301_v44 = vld [vmem:[%s4934_s23] ss:$0 sm:$0xff] }
 0xeda   :  { %v2752_v63 = vadd.f32 1e-05, %v2750_v45 }
 0xedc   :  { %3931 = vrsqrt.f32 %v2752_v63 }
 0xee5   :  { %v3930_v49 = vpop.eup %3929 }
 0xee6   :  { %v2755_v59 = vmul.f32 %v3930_v49, %v4788_v47 }
 0xee8   :  { %v2763_v54 = vmul.f32 %v3266_v4, %v2755_v59  ;;  %v3302_v59 = vld [vmem:[%s4935_s24] ss:$0 sm:$0xff] }
 0xee9   :  { %v3932_v50 = vpop.eup %3931 }
 0xeea   :  { %v2756_v53 = vmul.f32 %v3932_v50, %v4792_v26  ;;  %v2771_v1 = vadd.f32 %v3267_v58, %v2763_v54 }
 0xeec   :  { %v2764_v0 = vmul.f32 %v3266_v4, %v2756_v53 }
 0xeee   :  { %v2772_v6 = vadd.f32 %v3267_v58, %v2764_v0 }
 0xef0   :  { %v2773_v7 = vpack.c.bf16 %v2772_v6, %v2771_v1 }
 0xef2   :  { %2915 = vmatmul.mubr.bf16.vlgmr.msra.gmra.mxu1 %v2773_v7 }
 0xfb2   :  { %v2916_v51 = vpop.f32.mrf.mxu1 }
 0xfb3   :  { %v2917_v3 = vadd.f32 %v2916_v51, %v2795_v17 }
 0xfb4   :  { %v2918_v60 = vpop.f32.mrf.mxu1 }
 0xfb5   :  { %v2919_v22 = vadd.f32 %v2918_v60, %v2799_v15  ;;  %v2925_v27 = vmax.f32 %v2917_v3, 0.0 }
 0xfb6   :  { %v2920_v18 = vpop.f32.mrf.mxu1 }
 0xfb7   :  { %v2921_v24 = vadd.f32 %v2920_v18, %v2795_v17  ;;  %v2926_v48 = vmax.f32 %v2919_v22, 0.0 }
 0xfb8   :  { %v2922_v47 = vpop.f32.mrf.mxu1 }
 0xfb9   :  { %v2923_v25 = vadd.f32 %v2922_v47, %v2799_v15  ;;  %v2927_v56 = vmax.f32 %v2921_v24, 0.0 }
 0xfbb   :  { %v2928_v26 = vmax.f32 %v2923_v25, 0.0  ;;  %v2929_v55 = vpack.c.bf16 %v2927_v56, %v2925_v27 }
 0xfbd   :  { %v2930_v28 = vpack.c.bf16 %v2928_v26, %v2926_v48 }
 0xfbf   :  { %3098 = vmatprep.mubr.bf16.mxu0 %v2930_v28 }
 0xfc0   :  { %3099 = vmatmul.mubr.bf16.vlgmr.msra.gmra.mxu0 %v2929_v55 }
0x1080   :  { %v3424_v21 = vpop.f32.mrf.mxu0 }
0x1082   :  { %v3425_v30 = vpop.f32.mrf.mxu0 }
0x1083   :  { %v3426_v62 = vadd.f32 %v3425_v30, %v3424_v21 }
0x1084   :  { %v3427_v57 = vpop.f32.mrf.mxu0 }
0x1085   :  { %v3101_v31 = vadd.f32 %v3426_v62, %v3284_v29 }
0x1086   :  { %v3428_v32 = vpop.f32.mrf.mxu0 }
0x1087   :  { %v3429_v2 = vadd.f32 %v3428_v32, %v3427_v57  ;;  %v3107_v33 = vadd.f32 %v3101_v31, %v2771_v1 }
0x1089   :  { %v3104_v36 = vadd.f32 %v3429_v2, %v3284_v29  ;;  %3111 = vadd.xlane.f32.xlu1 %v3107_v33 }
0x108b   :  { %v3108_v10 = vadd.f32 %v3104_v36, %v2772_v6 }
0x108d   :  { %3113 = vadd.xlane.f32.xlu0 %v3108_v10 }
0x1112   :  { %v3112_v5 = vpop.xlane.xlu1 %3111 }
0x1113   :  { %v3115_v19 = vmul.f32 0.0078125, %v3112_v5 }
0x1115   :  { %v3117_v13 = vsub.f32 %v3107_v33, %v3115_v19 }
0x1116   :  { %v3114_v52 = vpop.xlane.xlu0 %3113 }
0x1117   :  { %v3116_v34 = vmul.f32 0.0078125, %v3114_v52  ;;  %v3119_v8 = vmul.f32 %v3117_v13, %v3117_v13 }
0x1119   :  { %v3118_v35 = vsub.f32 %v3108_v10, %v3116_v34  ;;  %3121 = vadd.xlane.f32.xlu1 %v3119_v8 }
0x111b   :  { %v3120_v39 = vmul.f32 %v3118_v35, %v3118_v35 }
0x111d   :  { %3123 = vadd.xlane.f32.xlu0 %v3120_v39 }
0x11a2   :  { %v3122_v61 = vpop.xlane.xlu1 %3121 }
0x11a3   :  { %v3125_v38 = vmul.f32 0.0078125, %v3122_v61 }
0x11a5   :  { %v3127_v37 = vadd.f32 1e-05, %v3125_v38 }
0x11a6   :  { %v3124_v20 = vpop.xlane.xlu0 %3123 }
0x11a7   :  { %3933 = vrsqrt.f32 %v3127_v37  ;;  %v3126_v40 = vmul.f32 0.0078125, %v3124_v20 }
0x11a9   :  { %v3128_v16 = vadd.f32 1e-05, %v3126_v40 }
0x11ab   :  { %3935 = vrsqrt.f32 %v3128_v16 }
0x11b4   :  { %v3934_v41 = vpop.eup %3933 }
0x11b5   :  { %v3131_v42 = vmul.f32 %v3934_v41, %v3117_v13 }
0x11b7   :  { %v3139_v63 = vmul.f32 %v3301_v44, %v3131_v42 }
0x11b8   :  { %v3936_v45 = vpop.eup %3935 }
0x11b9   :  { %v3132_v49 = vmul.f32 %v3936_v45, %v3118_v35  ;;  %v3147_v50 = vadd.f32 %v3302_v59, %v3139_v63 }
0x11bb   :  { %v3140_v4 = vmul.f32 %v3301_v44, %v3132_v49 }
0x11bd   :  { %v3148_v53 = vadd.f32 %v3302_v59, %v3140_v4 }
0x11bf   :  { %v3306_v54 = vpack.c.bf16 %v3148_v53, %v3147_v50 }
0x11c1   :  { %3307 = vst [vmem:[%s4936_s25] sm:$0xff] %v3306_v54  }

</bundles_post_ra>
